<compile_context>
chip_gen: v7x
topology: tpu7x:2x2x1
jax: 0.10.0
libtpu: 0.0.40
codegen_flags: <defaults>
</compile_context>

<pallas_src>
import numpy as np
import jax
import jax.numpy as jnp
from jax.experimental import pallas as pl
from jax.experimental.pallas import tpu as pltpu


# ----------------------------------------------------------------------------
# numpy-side operator-matrix builders (run once at init)
# ----------------------------------------------------------------------------
def _grouped_to_dense(w, groups):
    """(Cout, Cin_pg, ...) grouped conv weight -> dense (Cout, Cin_pg*groups, ...)."""
    cout, cin_pg = w.shape[0], w.shape[1]
    cout_pg = cout // groups
    dense = np.zeros((cout, cin_pg * groups) + w.shape[2:], np.float32)
    for o in range(cout):
        g = o // cout_pg
        dense[o, g * cin_pg:(g + 1) * cin_pg] = w[o]
    return dense


def _conv3x3_mats(w_dense, H, Wd):
    """3x3 'same' conv as  out = sum_{a,b} L[a*3+b] @ x @ R[b]  on x:(Cin*H, W).

    L[k] has shape (Cout*H, Cin*H) (row shift + channel mixing + zero padding on
    rows), R[b] has shape (W, W) (column shift + zero padding on columns)."""
    Cout, Cin = w_dense.shape[:2]
    L = np.zeros((9, Cout * H, Cin * H), np.float32)
    R = np.zeros((3, Wd, Wd), np.float32)
    co = np.arange(Cout)[:, None]
    ci = np.arange(Cin)[None, :]
    for a in range(3):
        for b in range(3):
            k = a * 3 + b
            for i in range(H):
                u = i + a - 1
                if 0 <= u < H:
                    L[k, co * H + i, ci * H + u] = w_dense[:, :, a, b]
    for b in range(3):
        for j in range(Wd):
            v = j + b - 1
            if 0 <= v < Wd:
                R[b, v, j] = 1.0
    return L, R


def _pool_mats(C, H, Wd):
    """AvgPool2d(2) as  out = Lp @ x @ Rp."""
    Ho, Wo = H // 2, Wd // 2
    Lp = np.zeros((C * Ho, C * H), np.float32)
    Rp = np.zeros((Wd, Wo), np.float32)
    for c in range(C):
        for ho in range(Ho):
            Lp[c * Ho + ho, c * H + 2 * ho] = 0.5
            Lp[c * Ho + ho, c * H + 2 * ho + 1] = 0.5
    for wo in range(Wo):
        Rp[2 * wo, wo] = 0.5
        Rp[2 * wo + 1, wo] = 0.5
    return Lp, Rp


def _pw_mat(w_dense2d, H):
    """1x1 conv as a single left-matrix: kron(W, I_H) acting on (Cin*H, W)."""
    return np.kron(w_dense2d.astype(np.float32),
                   np.eye(H, dtype=np.float32)).astype(np.float32)


def _bias_col(b, H):
    return np.repeat(b.astype(np.float32), H).reshape(-1, 1)


def _tconv_mats(wt, Hin, Win, stride=2, pad=1, out_pad=1):
    """Depthwise ConvTranspose2d(k=3) as  out = sum_{a,b} L[a*3+b] @ x @ R[b].

    wt: (C, 1, 3, 3) torch layout, groups == C."""
    C = wt.shape[0]
    Hout = (Hin - 1) * stride - 2 * pad + 3 + out_pad
    Wout = (Win - 1) * stride - 2 * pad + 3 + out_pad
    L = np.zeros((9, C * Hout, C * Hin), np.float32)
    R = np.zeros((3, Win, Wout), np.float32)
    for a in range(3):
        for b in range(3):
            k = a * 3 + b
            for m in range(Hin):
                i = stride * m + a - pad
                if 0 <= i < Hout:
                    for c in range(C):
                        L[k, c * Hout + i, c * Hin + m] = wt[c, 0, a, b]
    for b in range(3):
        for n in range(Win):
            j = stride * n + b - pad
            if 0 <= j < Wout:
                R[b, n, j] = 1.0
    return L, R


def _fc_stack(wfc, C, H, Wd):
    """Linear on a torch NCHW-flattened tensor, refactored so it consumes the
    kernel's (C*H, W) activation directly:  out = b + sum_w Wstack[w] @ x[:, w]."""
    nout = wfc.shape[0]
    wr = wfc.reshape(nout, C, H, Wd)
    return np.stack([wr[:, :, :, w].reshape(nout, C * H) for w in range(Wd)],
                    axis=0).astype(np.float32)


# ----------------------------------------------------------------------------
# in-kernel layer helpers (traced inline; only dot / add / mul / maximum)
# ----------------------------------------------------------------------------
def _k3_apply(x, l_ref, r_ref, b_ref):
    """sum_{a,b} L[a*3+b] @ x @ R[b] + bias, ReLU."""
    out = None
    for bb in range(3):
        t = None
        for aa in range(3):
            term = jnp.dot(l_ref[aa * 3 + bb], x,
                           preferred_element_type=jnp.float32)
            t = term if t is None else t + term
        tb = jnp.dot(t, r_ref[bb], preferred_element_type=jnp.float32)
        out = tb if out is None else out + tb
    return jnp.maximum(out + b_ref[...], 0.0)


def _pool_apply(x, lp_ref, rp_ref):
    t = jnp.dot(lp_ref[...], x, preferred_element_type=jnp.float32)
    return jnp.dot(t, rp_ref[...], preferred_element_type=jnp.float32)


def _pw_apply(x, l_ref, b_ref):
    out = jnp.dot(l_ref[...], x, preferred_element_type=jnp.float32) + b_ref[...]
    return jnp.maximum(out, 0.0)


def _fc_apply(x, w_ref, b_ref):
    """x: (R, Wd); w_ref: (Wd, 10, R); returns (10, 1)."""
    out = b_ref[...]
    for w in range(x.shape[1]):
        out = out + jnp.dot(w_ref[w], x[:, w:w + 1],
                            preferred_element_type=jnp.float32)
    return out


# ----------------------------------------------------------------------------
# the single fused kernel: whole TestNet2 forward for one image
# ----------------------------------------------------------------------------
def _testnet2_kernel(
        x_ref,
        c1l, c1r, c1b, p1l, p1r,
        c2l, c2r, c2b, p2l, p2r,
        c3l, c3r, c3b, p3l, p3r,
        c4l, c4b, c5l, c5b, f1w, f1b,
        c6l, c6b, t7l, t7r, t7b,
        c8la, c8lb, c8b, f2w, f2b,
        y1_ref, y2_ref):
    x = x_ref[...]                               # (3*32, 32)

    a = _k3_apply(x, c1l, c1r, c1b)              # conv1 + relu   (4*32, 32)
    a = _pool_apply(a, p1l, p1r)                 # avgpool1       (4*16, 16)
    a = _k3_apply(a, c2l, c2r, c2b)              # conv2 + relu   (8*16, 16)
    xmid = _pool_apply(a, p2l, p2r)              # avgpool2       (8*8, 8)

    t = _k3_apply(xmid, c3l, c3r, c3b)           # conv3 + relu   (32*8, 8)
    t = _pool_apply(t, p3l, p3r)                 # avgpool3       (32*4, 4)
    t = _pw_apply(t, c4l, c4b)                   # conv4 + relu   (8*4, 4)

    y1a = _pw_apply(t, c5l, c5b)                 # conv5 + relu   (16*4, 4)
    y1_ref[...] = _fc_apply(y1a, f1w, f1b)       # fc1            (10, 1)

    u = _pw_apply(t, c6l, c6b)                   # conv6 + relu   (4*4, 4)
    u = _k3_apply(u, t7l, t7r, t7b)              # tconv7 + relu  (4*8, 8)

    # conv8 (1x1, groups=2) on cat([xmid, u]) -- concat folded away by splitting
    # the weight matrix by input channel at init.
    y2a = jnp.maximum(
        jnp.dot(c8la[...], xmid, preferred_element_type=jnp.float32) +
        jnp.dot(c8lb[...], u, preferred_element_type=jnp.float32) +
        c8b[...], 0.0)                           # conv8 + relu   (16*8, 8)
    y2_ref[...] = _fc_apply(y2a, f2w, f2b)       # fc2            (10, 1)


def _const_index(nd):
    return lambda n: (0,) * nd


@jax.jit
def _forward(x_nchw, params):
    n, c, h, w = x_nchw.shape
    x = x_nchw.reshape(n, c * h, w).astype(jnp.float32)

    in_specs = [pl.BlockSpec((None, c * h, w), lambda i: (i, 0, 0))]
    for p in params:
        in_specs.append(pl.BlockSpec(p.shape, _const_index(len(p.shape))))
    out_specs = [pl.BlockSpec((None, 10, 1), lambda i: (i, 0, 0)),
                 pl.BlockSpec((None, 10, 1), lambda i: (i, 0, 0))]
    out_shape = (jax.ShapeDtypeStruct((n, 10, 1), jnp.float32),
                 jax.ShapeDtypeStruct((n, 10, 1), jnp.float32))

    y1, y2 = pl.pallas_call(
        _testnet2_kernel,
        grid=(n,),
        in_specs=in_specs,
        out_specs=out_specs,
        out_shape=out_shape,
        compiler_params=pltpu.CompilerParams(
            dimension_semantics=("parallel",)),
    )(x, *params)
    return y1.reshape(n, 10), y2.reshape(n, 10)


# ----------------------------------------------------------------------------
# TestNet2
# ----------------------------------------------------------------------------
class TestNet2Pallas:
    IN_C, IN_H, IN_W = 3, 32, 32

    def __init__(self, seed=0):
        rng = np.random.default_rng(seed)

        def u(shape, fan_in):
            bound = 1.0 / np.sqrt(fan_in)
            return rng.uniform(-bound, bound, size=shape).astype(np.float32)

        # Raw PyTorch-layout parameters (also used by the pure-JAX reference).
        self.w1, self.b1 = u((4, 3, 3, 3), 27), u((4,), 27)
        self.w2, self.b2 = u((8, 1, 3, 3), 9), u((8,), 9)         # groups=4
        self.w3, self.b3 = u((32, 1, 3, 3), 9), u((32,), 9)       # groups=8
        self.w4, self.b4 = u((8, 8, 1, 1), 8), u((8,), 8)         # groups=4
        self.w5, self.b5 = u((16, 8, 1, 1), 8), u((16,), 8)
        self.wf1, self.bf1 = u((10, 256), 256), u((10,), 256)
        self.w6, self.b6 = u((4, 8, 1, 1), 8), u((4,), 8)
        self.w7, self.b7 = u((4, 1, 3, 3), 9), u((4,), 9)         # tconv, groups=4
        self.w8, self.b8 = u((16, 6, 1, 1), 6), u((16,), 6)       # groups=2
        self.wf2, self.bf2 = u((10, 1024), 1024), u((10,), 1024)

        # Precomputed operator matrices for the fused kernel.
        c1L, c1R = _conv3x3_mats(self.w1, 32, 32)
        c2L, c2R = _conv3x3_mats(_grouped_to_dense(self.w2, 4), 16, 16)
        c3L, c3R = _conv3x3_mats(_grouped_to_dense(self.w3, 8), 8, 8)
        p1L, p1R = _pool_mats(4, 32, 32)
        p2L, p2R = _pool_mats(8, 16, 16)
        p3L, p3R = _pool_mats(32, 8, 8)
        c4L = _pw_mat(_grouped_to_dense(self.w4, 4)[:, :, 0, 0], 4)
        c5L = _pw_mat(self.w5[:, :, 0, 0], 4)
        c6L = _pw_mat(self.w6[:, :, 0, 0], 4)
        t7L, t7R = _tconv_mats(self.w7, 4, 4)
        l8 = _pw_mat(_grouped_to_dense(self.w8, 2)[:, :, 0, 0], 8)  # (128, 96)
        c8La, c8Lb = l8[:, :64].copy(), l8[:, 64:].copy()
        f1W = _fc_stack(self.wf1, 16, 4, 4)
        f2W = _fc_stack(self.wf2, 16, 8, 8)

        np_params = [
            c1L, c1R, _bias_col(self.b1, 32),
            p1L, p1R,
            c2L, c2R, _bias_col(self.b2, 16),
            p2L, p2R,
            c3L, c3R, _bias_col(self.b3, 8),
            p3L, p3R,
            c4L, _bias_col(self.b4, 4),
            c5L, _bias_col(self.b5, 4),
            f1W, self.bf1.reshape(10, 1),
            c6L, _bias_col(self.b6, 4),
            t7L, t7R, _bias_col(self.b7, 8),
            c8La, c8Lb, _bias_col(self.b8, 8),
            f2W, self.bf2.reshape(10, 1),
        ]
        self.params = tuple(jnp.asarray(p) for p in np_params)

    def __call__(self, x_nchw):
        n, c, h, w = x_nchw.shape
        assert (c, h, w) == (self.IN_C, self.IN_H, self.IN_W)
        return _forward(x_nchw, self.params)

    # Pure-JAX reference (XLA ops, no Pallas) for a numerical sanity check.
    def reference(self, x_nchw):
        P = jax.lax.Precision.HIGHEST
        relu = lambda v: jnp.maximum(v, 0.0)

        def conv(x, w, b, groups=1, padding=0):
            y = jax.lax.conv_general_dilated(
                x, jnp.asarray(w), (1, 1),
                ((padding, padding), (padding, padding)),
                dimension_numbers=('NCHW', 'OIHW', 'NCHW'),
                feature_group_count=groups, precision=P)
            return y + jnp.asarray(b).reshape(1, -1, 1, 1)

        def pool(x):
            n, c, h, w = x.shape
            return x.reshape(n, c, h // 2, 2, w // 2, 2).mean(axis=(3, 5))

        def tconv(x, w, b):     # k=3, stride=2, pad=1, out_pad=1, groups=C
            w_eq = jnp.asarray(w)[:, :, ::-1, ::-1]
            y = jax.lax.conv_general_dilated(
                x, w_eq, (1, 1), ((1, 2), (1, 2)), lhs_dilation=(2, 2),
                dimension_numbers=('NCHW', 'OIHW', 'NCHW'),
                feature_group_count=w.shape[0], precision=P)
            return y + jnp.asarray(b).reshape(1, -1, 1, 1)

        x = x_nchw.astype(jnp.float32)
        n = x.shape[0]
        a = pool(relu(conv(x, self.w1, self.b1, padding=1)))
        a = pool(relu(conv(a, self.w2, self.b2, groups=4, padding=1)))
        y1 = pool(relu(conv(a, self.w3, self.b3, groups=8, padding=1)))
        y1 = relu(conv(y1, self.w4, self.b4, groups=4))
        y1_1 = y1
        y1 = relu(conv(y1, self.w5, self.b5))
        y1 = jnp.dot(y1.reshape(n, 256), jnp.asarray(self.wf1).T,
                     precision=P) + jnp.asarray(self.bf1)
        y1_1 = relu(conv(y1_1, self.w6, self.b6))
        y1_1 = relu(tconv(y1_1, self.w7, self.b7))
        y2 = jnp.concatenate([a, y1_1], axis=1)
        y2 = relu(conv(y2, self.w8, self.b8, groups=2))
        y2 = jnp.dot(y2.reshape(n, 1024), jnp.asarray(self.wf2).T,
                     precision=P) + jnp.asarray(self.bf2)
        return y1, y2


if __name__ == "__main__":
    # fc1 expects 4*4*16 and fc2 expects 8*8*16 -> input must be (N, 3, 32, 32).
    key = jax.random.PRNGKey(0)
    x = jax.random.normal(key, (2, 3, 32, 32), dtype=jnp.float32)

    model = TestNet2Pallas()
    y1, y2 = model(x)
    y1 = jax.block_until_ready(y1)
    y2 = jax.block_until_ready(y2)

    assert y1.shape == (2, 10) and y2.shape == (2, 10)
    assert bool(jnp.all(jnp.isfinite(y1))) and bool(jnp.all(jnp.isfinite(y2)))

    # Numerical check against a plain-XLA reference of the same module.
    r1, r2 = model.reference(x)
    err1 = float(jnp.max(jnp.abs(y1 - r1)))
    err2 = float(jnp.max(jnp.abs(y2 - r2)))
    assert err1 < 3e-2 and err2 < 3e-2, (err1, err2)

    print("KERNEL_OK")
</pallas_src>

<mosaic_0001>
module attributes {stable_mosaic.version = 11 : i64} {
  func.func @_testnet2_kernel(%arg0: i32, %arg1: memref<1x96x32xf32, #tpu.memory_space<vmem>>, %arg2: memref<9x128x96xf32, #tpu.memory_space<vmem>>, %arg3: memref<3x32x32xf32, #tpu.memory_space<vmem>>, %arg4: memref<128x1xf32, #tpu.memory_space<vmem>>, %arg5: memref<64x128xf32, #tpu.memory_space<vmem>>, %arg6: memref<32x16xf32, #tpu.memory_space<vmem>>, %arg7: memref<9x128x64xf32, #tpu.memory_space<vmem>>, %arg8: memref<3x16x16xf32, #tpu.memory_space<vmem>>, %arg9: memref<128x1xf32, #tpu.memory_space<vmem>>, %arg10: memref<64x128xf32, #tpu.memory_space<vmem>>, %arg11: memref<16x8xf32, #tpu.memory_space<vmem>>, %arg12: memref<9x256x64xf32, #tpu.memory_space<vmem>>, %arg13: memref<3x8x8xf32, #tpu.memory_space<vmem>>, %arg14: memref<256x1xf32, #tpu.memory_space<vmem>>, %arg15: memref<128x256xf32, #tpu.memory_space<vmem>>, %arg16: memref<8x4xf32, #tpu.memory_space<vmem>>, %arg17: memref<32x128xf32, #tpu.memory_space<vmem>>, %arg18: memref<32x1xf32, #tpu.memory_space<vmem>>, %arg19: memref<64x32xf32, #tpu.memory_space<vmem>>, %arg20: memref<64x1xf32, #tpu.memory_space<vmem>>, %arg21: memref<4x10x64xf32, #tpu.memory_space<vmem>>, %arg22: memref<10x1xf32, #tpu.memory_space<vmem>>, %arg23: memref<16x32xf32, #tpu.memory_space<vmem>>, %arg24: memref<16x1xf32, #tpu.memory_space<vmem>>, %arg25: memref<9x32x16xf32, #tpu.memory_space<vmem>>, %arg26: memref<3x4x8xf32, #tpu.memory_space<vmem>>, %arg27: memref<32x1xf32, #tpu.memory_space<vmem>>, %arg28: memref<128x64xf32, #tpu.memory_space<vmem>>, %arg29: memref<128x32xf32, #tpu.memory_space<vmem>>, %arg30: memref<128x1xf32, #tpu.memory_space<vmem>>, %arg31: memref<8x10x128xf32, #tpu.memory_space<vmem>>, %arg32: memref<10x1xf32, #tpu.memory_space<vmem>>, %arg33: memref<1x10x1xf32, #tpu.memory_space<vmem>>, %arg34: memref<1x10x1xf32, #tpu.memory_space<vmem>>) attributes {dimension_semantics = [#tpu.dimension_semantics<parallel>], iteration_bounds = array<i64: 2>, scalar_prefetch = 0 : i64, scratch_operands = 0 : i64, tpu.core_type = #tpu.core_type<tc>, window_params = [{transform_indices = @transform_0, window_bounds = array<i64: 1, 96, 32>}, {pipeline_mode = #tpu.pipeline_mode<synchronous>, transform_indices = @transform_1, window_bounds = array<i64: 9, 128, 96>}, {pipeline_mode = #tpu.pipeline_mode<synchronous>, transform_indices = @transform_2, window_bounds = array<i64: 3, 32, 32>}, {pipeline_mode = #tpu.pipeline_mode<synchronous>, transform_indices = @transform_3, window_bounds = array<i64: 128, 1>}, {pipeline_mode = #tpu.pipeline_mode<synchronous>, transform_indices = @transform_4, window_bounds = array<i64: 64, 128>}, {pipeline_mode = #tpu.pipeline_mode<synchronous>, transform_indices = @transform_5, window_bounds = array<i64: 32, 16>}, {pipeline_mode = #tpu.pipeline_mode<synchronous>, transform_indices = @transform_6, window_bounds = array<i64: 9, 128, 64>}, {pipeline_mode = #tpu.pipeline_mode<synchronous>, transform_indices = @transform_7, window_bounds = array<i64: 3, 16, 16>}, {pipeline_mode = #tpu.pipeline_mode<synchronous>, transform_indices = @transform_8, window_bounds = array<i64: 128, 1>}, {pipeline_mode = #tpu.pipeline_mode<synchronous>, transform_indices = @transform_9, window_bounds = array<i64: 64, 128>}, {pipeline_mode = #tpu.pipeline_mode<synchronous>, transform_indices = @transform_10, window_bounds = array<i64: 16, 8>}, {pipeline_mode = #tpu.pipeline_mode<synchronous>, transform_indices = @transform_11, window_bounds = array<i64: 9, 256, 64>}, {pipeline_mode = #tpu.pipeline_mode<synchronous>, transform_indices = @transform_12, window_bounds = array<i64: 3, 8, 8>}, {pipeline_mode = #tpu.pipeline_mode<synchronous>, transform_indices = @transform_13, window_bounds = array<i64: 256, 1>}, {pipeline_mode = #tpu.pipeline_mode<synchronous>, transform_indices = @transform_14, window_bounds = array<i64: 128, 256>}, {pipeline_mode = #tpu.pipeline_mode<synchronous>, transform_indices = @transform_15, window_bounds = array<i64: 8, 4>}, {pipeline_mode = #tpu.pipeline_mode<synchronous>, transform_indices = @transform_16, window_bounds = array<i64: 32, 128>}, {pipeline_mode = #tpu.pipeline_mode<synchronous>, transform_indices = @transform_17, window_bounds = array<i64: 32, 1>}, {pipeline_mode = #tpu.pipeline_mode<synchronous>, transform_indices = @transform_18, window_bounds = array<i64: 64, 32>}, {pipeline_mode = #tpu.pipeline_mode<synchronous>, transform_indices = @transform_19, window_bounds = array<i64: 64, 1>}, {pipeline_mode = #tpu.pipeline_mode<synchronous>, transform_indices = @transform_20, window_bounds = array<i64: 4, 10, 64>}, {pipeline_mode = #tpu.pipeline_mode<synchronous>, transform_indices = @transform_21, window_bounds = array<i64: 10, 1>}, {pipeline_mode = #tpu.pipeline_mode<synchronous>, transform_indices = @transform_22, window_bounds = array<i64: 16, 32>}, {pipeline_mode = #tpu.pipeline_mode<synchronous>, transform_indices = @transform_23, window_bounds = array<i64: 16, 1>}, {pipeline_mode = #tpu.pipeline_mode<synchronous>, transform_indices = @transform_24, window_bounds = array<i64: 9, 32, 16>}, {pipeline_mode = #tpu.pipeline_mode<synchronous>, transform_indices = @transform_25, window_bounds = array<i64: 3, 4, 8>}, {pipeline_mode = #tpu.pipeline_mode<synchronous>, transform_indices = @transform_26, window_bounds = array<i64: 32, 1>}, {pipeline_mode = #tpu.pipeline_mode<synchronous>, transform_indices = @transform_27, window_bounds = array<i64: 128, 64>}, {pipeline_mode = #tpu.pipeline_mode<synchronous>, transform_indices = @transform_28, window_bounds = array<i64: 128, 32>}, {pipeline_mode = #tpu.pipeline_mode<synchronous>, transform_indices = @transform_29, window_bounds = array<i64: 128, 1>}, {pipeline_mode = #tpu.pipeline_mode<synchronous>, transform_indices = @transform_30, window_bounds = array<i64: 8, 10, 128>}, {pipeline_mode = #tpu.pipeline_mode<synchronous>, transform_indices = @transform_31, window_bounds = array<i64: 10, 1>}, {transform_indices = @transform_32, window_bounds = array<i64: 1, 10, 1>}, {transform_indices = @transform_33, window_bounds = array<i64: 1, 10, 1>}]} {
    %c0 = arith.constant 0 : index
    %c0_0 = arith.constant 0 : index
    %c0_1 = arith.constant 0 : index
    %0 = vector.load %arg1[%c0, %c0_0, %c0_1] : memref<1x96x32xf32, #tpu.memory_space<vmem>>, vector<1x96x32xf32>
    %1 = vector.shape_cast %0 : vector<1x96x32xf32> to vector<96x32xf32>
    %c0_2 = arith.constant 0 : index
    %c0_3 = arith.constant 0 : index
    %c0_4 = arith.constant 0 : index
    %2 = vector.load %arg2[%c0_2, %c0_3, %c0_4] : memref<9x128x96xf32, #tpu.memory_space<vmem>>, vector<1x128x96xf32>
    %3 = vector.shape_cast %2 : vector<1x128x96xf32> to vector<128x96xf32>
    %cst = arith.constant dense<0.000000e+00> : vector<128x32xf32>
    %4 = tpu.matmul %3, %1, %cst {dimension_numbers = #tpu.dot_dimension_numbers<[1], [0], [0], [1], [0, 0, 1, 1], [], []>} : vector<128x96xf32>, vector<96x32xf32>, vector<128x32xf32> -> vector<128x32xf32>
    %c3 = arith.constant 3 : index
    %c0_5 = arith.constant 0 : index
    %c0_6 = arith.constant 0 : index
    %5 = vector.load %arg2[%c3, %c0_5, %c0_6] : memref<9x128x96xf32, #tpu.memory_space<vmem>>, vector<1x128x96xf32>
    %6 = vector.shape_cast %5 : vector<1x128x96xf32> to vector<128x96xf32>
    %cst_7 = arith.constant dense<0.000000e+00> : vector<128x32xf32>
    %7 = tpu.matmul %6, %1, %cst_7 {dimension_numbers = #tpu.dot_dimension_numbers<[1], [0], [0], [1], [0, 0, 1, 1], [], []>} : vector<128x96xf32>, vector<96x32xf32>, vector<128x32xf32> -> vector<128x32xf32>
    %8 = arith.addf %4, %7 : vector<128x32xf32>
    %c6 = arith.constant 6 : index
    %c0_8 = arith.constant 0 : index
    %c0_9 = arith.constant 0 : index
    %9 = vector.load %arg2[%c6, %c0_8, %c0_9] : memref<9x128x96xf32, #tpu.memory_space<vmem>>, vector<1x128x96xf32>
    %10 = vector.shape_cast %9 : vector<1x128x96xf32> to vector<128x96xf32>
    %cst_10 = arith.constant dense<0.000000e+00> : vector<128x32xf32>
    %11 = tpu.matmul %10, %1, %cst_10 {dimension_numbers = #tpu.dot_dimension_numbers<[1], [0], [0], [1], [0, 0, 1, 1], [], []>} : vector<128x96xf32>, vector<96x32xf32>, vector<128x32xf32> -> vector<128x32xf32>
    %12 = arith.addf %8, %11 : vector<128x32xf32>
    %c0_11 = arith.constant 0 : index
    %c0_12 = arith.constant 0 : index
    %c0_13 = arith.constant 0 : index
    %13 = vector.load %arg3[%c0_11, %c0_12, %c0_13] : memref<3x32x32xf32, #tpu.memory_space<vmem>>, vector<1x32x32xf32>
    %14 = vector.shape_cast %13 : vector<1x32x32xf32> to vector<32x32xf32>
    %cst_14 = arith.constant dense<0.000000e+00> : vector<128x32xf32>
    %15 = tpu.matmul %12, %14, %cst_14 {dimension_numbers = #tpu.dot_dimension_numbers<[1], [0], [0], [1], [0, 0, 1, 1], [], []>} : vector<128x32xf32>, vector<32x32xf32>, vector<128x32xf32> -> vector<128x32xf32>
    %c1 = arith.constant 1 : index
    %c0_15 = arith.constant 0 : index
    %c0_16 = arith.constant 0 : index
    %16 = vector.load %arg2[%c1, %c0_15, %c0_16] : memref<9x128x96xf32, #tpu.memory_space<vmem>>, vector<1x128x96xf32>
    %17 = vector.shape_cast %16 : vector<1x128x96xf32> to vector<128x96xf32>
    %cst_17 = arith.constant dense<0.000000e+00> : vector<128x32xf32>
    %18 = tpu.matmul %17, %1, %cst_17 {dimension_numbers = #tpu.dot_dimension_numbers<[1], [0], [0], [1], [0, 0, 1, 1], [], []>} : vector<128x96xf32>, vector<96x32xf32>, vector<128x32xf32> -> vector<128x32xf32>
    %c4 = arith.constant 4 : index
    %c0_18 = arith.constant 0 : index
    %c0_19 = arith.constant 0 : index
    %19 = vector.load %arg2[%c4, %c0_18, %c0_19] : memref<9x128x96xf32, #tpu.memory_space<vmem>>, vector<1x128x96xf32>
    %20 = vector.shape_cast %19 : vector<1x128x96xf32> to vector<128x96xf32>
    %cst_20 = arith.constant dense<0.000000e+00> : vector<128x32xf32>
    %21 = tpu.matmul %20, %1, %cst_20 {dimension_numbers = #tpu.dot_dimension_numbers<[1], [0], [0], [1], [0, 0, 1, 1], [], []>} : vector<128x96xf32>, vector<96x32xf32>, vector<128x32xf32> -> vector<128x32xf32>
    %22 = arith.addf %18, %21 : vector<128x32xf32>
    %c7 = arith.constant 7 : index
    %c0_21 = arith.constant 0 : index
    %c0_22 = arith.constant 0 : index
    %23 = vector.load %arg2[%c7, %c0_21, %c0_22] : memref<9x128x96xf32, #tpu.memory_space<vmem>>, vector<1x128x96xf32>
    %24 = vector.shape_cast %23 : vector<1x128x96xf32> to vector<128x96xf32>
    %cst_23 = arith.constant dense<0.000000e+00> : vector<128x32xf32>
    %25 = tpu.matmul %24, %1, %cst_23 {dimension_numbers = #tpu.dot_dimension_numbers<[1], [0], [0], [1], [0, 0, 1, 1], [], []>} : vector<128x96xf32>, vector<96x32xf32>, vector<128x32xf32> -> vector<128x32xf32>
    %26 = arith.addf %22, %25 : vector<128x32xf32>
    %c1_24 = arith.constant 1 : index
    %c0_25 = arith.constant 0 : index
    %c0_26 = arith.constant 0 : index
    %27 = vector.load %arg3[%c1_24, %c0_25, %c0_26] : memref<3x32x32xf32, #tpu.memory_space<vmem>>, vector<1x32x32xf32>
    %28 = vector.shape_cast %27 : vector<1x32x32xf32> to vector<32x32xf32>
    %cst_27 = arith.constant dense<0.000000e+00> : vector<128x32xf32>
    %29 = tpu.matmul %26, %28, %cst_27 {dimension_numbers = #tpu.dot_dimension_numbers<[1], [0], [0], [1], [0, 0, 1, 1], [], []>} : vector<128x32xf32>, vector<32x32xf32>, vector<128x32xf32> -> vector<128x32xf32>
    %30 = arith.addf %15, %29 : vector<128x32xf32>
    %c2 = arith.constant 2 : index
    %c0_28 = arith.constant 0 : index
    %c0_29 = arith.constant 0 : index
    %31 = vector.load %arg2[%c2, %c0_28, %c0_29] : memref<9x128x96xf32, #tpu.memory_space<vmem>>, vector<1x128x96xf32>
    %32 = vector.shape_cast %31 : vector<1x128x96xf32> to vector<128x96xf32>
    %cst_30 = arith.constant dense<0.000000e+00> : vector<128x32xf32>
    %33 = tpu.matmul %32, %1, %cst_30 {dimension_numbers = #tpu.dot_dimension_numbers<[1], [0], [0], [1], [0, 0, 1, 1], [], []>} : vector<128x96xf32>, vector<96x32xf32>, vector<128x32xf32> -> vector<128x32xf32>
    %c5 = arith.constant 5 : index
    %c0_31 = arith.constant 0 : index
    %c0_32 = arith.constant 0 : index
    %34 = vector.load %arg2[%c5, %c0_31, %c0_32] : memref<9x128x96xf32, #tpu.memory_space<vmem>>, vector<1x128x96xf32>
    %35 = vector.shape_cast %34 : vector<1x128x96xf32> to vector<128x96xf32>
    %cst_33 = arith.constant dense<0.000000e+00> : vector<128x32xf32>
    %36 = tpu.matmul %35, %1, %cst_33 {dimension_numbers = #tpu.dot_dimension_numbers<[1], [0], [0], [1], [0, 0, 1, 1], [], []>} : vector<128x96xf32>, vector<96x32xf32>, vector<128x32xf32> -> vector<128x32xf32>
    %37 = arith.addf %33, %36 : vector<128x32xf32>
    %c8 = arith.constant 8 : index
    %c0_34 = arith.constant 0 : index
    %c0_35 = arith.constant 0 : index
    %38 = vector.load %arg2[%c8, %c0_34, %c0_35] : memref<9x128x96xf32, #tpu.memory_space<vmem>>, vector<1x128x96xf32>
    %39 = vector.shape_cast %38 : vector<1x128x96xf32> to vector<128x96xf32>
    %cst_36 = arith.constant dense<0.000000e+00> : vector<128x32xf32>
    %40 = tpu.matmul %39, %1, %cst_36 {dimension_numbers = #tpu.dot_dimension_numbers<[1], [0], [0], [1], [0, 0, 1, 1], [], []>} : vector<128x96xf32>, vector<96x32xf32>, vector<128x32xf32> -> vector<128x32xf32>
    %41 = arith.addf %37, %40 : vector<128x32xf32>
    %c2_37 = arith.constant 2 : index
    %c0_38 = arith.constant 0 : index
    %c0_39 = arith.constant 0 : index
    %42 = vector.load %arg3[%c2_37, %c0_38, %c0_39] : memref<3x32x32xf32, #tpu.memory_space<vmem>>, vector<1x32x32xf32>
    %43 = vector.shape_cast %42 : vector<1x32x32xf32> to vector<32x32xf32>
    %cst_40 = arith.constant dense<0.000000e+00> : vector<128x32xf32>
    %44 = tpu.matmul %41, %43, %cst_40 {dimension_numbers = #tpu.dot_dimension_numbers<[1], [0], [0], [1], [0, 0, 1, 1], [], []>} : vector<128x32xf32>, vector<32x32xf32>, vector<128x32xf32> -> vector<128x32xf32>
    %45 = arith.addf %30, %44 : vector<128x32xf32>
    %c0_41 = arith.constant 0 : index
    %c0_42 = arith.constant 0 : index
    %46 = vector.load %arg4[%c0_41, %c0_42] : memref<128x1xf32, #tpu.memory_space<vmem>>, vector<128x1xf32>
    %47 = vector.broadcast %46 : vector<128x1xf32> to vector<128x32xf32>
    %48 = arith.addf %45, %47 : vector<128x32xf32>
    %cst_43 = arith.constant 0.000000e+00 : f32
    %49 = vector.broadcast %cst_43 : f32 to vector<128x32xf32>
    %50 = arith.maximumf %48, %49 : vector<128x32xf32>
    %c0_44 = arith.constant 0 : index
    %c0_45 = arith.constant 0 : index
    %51 = vector.load %arg5[%c0_44, %c0_45] : memref<64x128xf32, #tpu.memory_space<vmem>>, vector<64x128xf32>
    %cst_46 = arith.constant dense<0.000000e+00> : vector<64x32xf32>
    %52 = tpu.matmul %51, %50, %cst_46 {dimension_numbers = #tpu.dot_dimension_numbers<[1], [0], [0], [1], [0, 0, 1, 1], [], []>} : vector<64x128xf32>, vector<128x32xf32>, vector<64x32xf32> -> vector<64x32xf32>
    %c0_47 = arith.constant 0 : index
    %c0_48 = arith.constant 0 : index
    %53 = vector.load %arg6[%c0_47, %c0_48] : memref<32x16xf32, #tpu.memory_space<vmem>>, vector<32x16xf32>
    %cst_49 = arith.constant dense<0.000000e+00> : vector<64x16xf32>
    %54 = tpu.matmul %52, %53, %cst_49 {dimension_numbers = #tpu.dot_dimension_numbers<[1], [0], [0], [1], [0, 0, 1, 1], [], []>} : vector<64x32xf32>, vector<32x16xf32>, vector<64x16xf32> -> vector<64x16xf32>
    %c0_50 = arith.constant 0 : index
    %c0_51 = arith.constant 0 : index
    %c0_52 = arith.constant 0 : index
    %55 = vector.load %arg7[%c0_50, %c0_51, %c0_52] : memref<9x128x64xf32, #tpu.memory_space<vmem>>, vector<1x128x64xf32>
    %56 = vector.shape_cast %55 : vector<1x128x64xf32> to vector<128x64xf32>
    %cst_53 = arith.constant dense<0.000000e+00> : vector<128x16xf32>
    %57 = tpu.matmul %56, %54, %cst_53 {dimension_numbers = #tpu.dot_dimension_numbers<[1], [0], [0], [1], [0, 0, 1, 1], [], []>} : vector<128x64xf32>, vector<64x16xf32>, vector<128x16xf32> -> vector<128x16xf32>
    %c3_54 = arith.constant 3 : index
    %c0_55 = arith.constant 0 : index
    %c0_56 = arith.constant 0 : index
    %58 = vector.load %arg7[%c3_54, %c0_55, %c0_56] : memref<9x128x64xf32, #tpu.memory_space<vmem>>, vector<1x128x64xf32>
    %59 = vector.shape_cast %58 : vector<1x128x64xf32> to vector<128x64xf32>
    %cst_57 = arith.constant dense<0.000000e+00> : vector<128x16xf32>
    %60 = tpu.matmul %59, %54, %cst_57 {dimension_numbers = #tpu.dot_dimension_numbers<[1], [0], [0], [1], [0, 0, 1, 1], [], []>} : vector<128x64xf32>, vector<64x16xf32>, vector<128x16xf32> -> vector<128x16xf32>
    %61 = arith.addf %57, %60 : vector<128x16xf32>
    %c6_58 = arith.constant 6 : index
    %c0_59 = arith.constant 0 : index
    %c0_60 = arith.constant 0 : index
    %62 = vector.load %arg7[%c6_58, %c0_59, %c0_60] : memref<9x128x64xf32, #tpu.memory_space<vmem>>, vector<1x128x64xf32>
    %63 = vector.shape_cast %62 : vector<1x128x64xf32> to vector<128x64xf32>
    %cst_61 = arith.constant dense<0.000000e+00> : vector<128x16xf32>
    %64 = tpu.matmul %63, %54, %cst_61 {dimension_numbers = #tpu.dot_dimension_numbers<[1], [0], [0], [1], [0, 0, 1, 1], [], []>} : vector<128x64xf32>, vector<64x16xf32>, vector<128x16xf32> -> vector<128x16xf32>
    %65 = arith.addf %61, %64 : vector<128x16xf32>
    %c0_62 = arith.constant 0 : index
    %c0_63 = arith.constant 0 : index
    %c0_64 = arith.constant 0 : index
    %66 = vector.load %arg8[%c0_62, %c0_63, %c0_64] : memref<3x16x16xf32, #tpu.memory_space<vmem>>, vector<1x16x16xf32>
    %67 = vector.shape_cast %66 : vector<1x16x16xf32> to vector<16x16xf32>
    %cst_65 = arith.constant dense<0.000000e+00> : vector<128x16xf32>
    %68 = tpu.matmul %65, %67, %cst_65 {dimension_numbers = #tpu.dot_dimension_numbers<[1], [0], [0], [1], [0, 0, 1, 1], [], []>} : vector<128x16xf32>, vector<16x16xf32>, vector<128x16xf32> -> vector<128x16xf32>
    %c1_66 = arith.constant 1 : index
    %c0_67 = arith.constant 0 : index
    %c0_68 = arith.constant 0 : index
    %69 = vector.load %arg7[%c1_66, %c0_67, %c0_68] : memref<9x128x64xf32, #tpu.memory_space<vmem>>, vector<1x128x64xf32>
    %70 = vector.shape_cast %69 : vector<1x128x64xf32> to vector<128x64xf32>
    %cst_69 = arith.constant dense<0.000000e+00> : vector<128x16xf32>
    %71 = tpu.matmul %70, %54, %cst_69 {dimension_numbers = #tpu.dot_dimension_numbers<[1], [0], [0], [1], [0, 0, 1, 1], [], []>} : vector<128x64xf32>, vector<64x16xf32>, vector<128x16xf32> -> vector<128x16xf32>
    %c4_70 = arith.constant 4 : index
    %c0_71 = arith.constant 0 : index
    %c0_72 = arith.constant 0 : index
    %72 = vector.load %arg7[%c4_70, %c0_71, %c0_72] : memref<9x128x64xf32, #tpu.memory_space<vmem>>, vector<1x128x64xf32>
    %73 = vector.shape_cast %72 : vector<1x128x64xf32> to vector<128x64xf32>
    %cst_73 = arith.constant dense<0.000000e+00> : vector<128x16xf32>
    %74 = tpu.matmul %73, %54, %cst_73 {dimension_numbers = #tpu.dot_dimension_numbers<[1], [0], [0], [1], [0, 0, 1, 1], [], []>} : vector<128x64xf32>, vector<64x16xf32>, vector<128x16xf32> -> vector<128x16xf32>
    %75 = arith.addf %71, %74 : vector<128x16xf32>
    %c7_74 = arith.constant 7 : index
    %c0_75 = arith.constant 0 : index
    %c0_76 = arith.constant 0 : index
    %76 = vector.load %arg7[%c7_74, %c0_75, %c0_76] : memref<9x128x64xf32, #tpu.memory_space<vmem>>, vector<1x128x64xf32>
    %77 = vector.shape_cast %76 : vector<1x128x64xf32> to vector<128x64xf32>
    %cst_77 = arith.constant dense<0.000000e+00> : vector<128x16xf32>
    %78 = tpu.matmul %77, %54, %cst_77 {dimension_numbers = #tpu.dot_dimension_numbers<[1], [0], [0], [1], [0, 0, 1, 1], [], []>} : vector<128x64xf32>, vector<64x16xf32>, vector<128x16xf32> -> vector<128x16xf32>
    %79 = arith.addf %75, %78 : vector<128x16xf32>
    %c1_78 = arith.constant 1 : index
    %c0_79 = arith.constant 0 : index
    %c0_80 = arith.constant 0 : index
    %80 = vector.load %arg8[%c1_78, %c0_79, %c0_80] : memref<3x16x16xf32, #tpu.memory_space<vmem>>, vector<1x16x16xf32>
    %81 = vector.shape_cast %80 : vector<1x16x16xf32> to vector<16x16xf32>
    %cst_81 = arith.constant dense<0.000000e+00> : vector<128x16xf32>
    %82 = tpu.matmul %79, %81, %cst_81 {dimension_numbers = #tpu.dot_dimension_numbers<[1], [0], [0], [1], [0, 0, 1, 1], [], []>} : vector<128x16xf32>, vector<16x16xf32>, vector<128x16xf32> -> vector<128x16xf32>
    %83 = arith.addf %68, %82 : vector<128x16xf32>
    %c2_82 = arith.constant 2 : index
    %c0_83 = arith.constant 0 : index
    %c0_84 = arith.constant 0 : index
    %84 = vector.load %arg7[%c2_82, %c0_83, %c0_84] : memref<9x128x64xf32, #tpu.memory_space<vmem>>, vector<1x128x64xf32>
    %85 = vector.shape_cast %84 : vector<1x128x64xf32> to vector<128x64xf32>
    %cst_85 = arith.constant dense<0.000000e+00> : vector<128x16xf32>
    %86 = tpu.matmul %85, %54, %cst_85 {dimension_numbers = #tpu.dot_dimension_numbers<[1], [0], [0], [1], [0, 0, 1, 1], [], []>} : vector<128x64xf32>, vector<64x16xf32>, vector<128x16xf32> -> vector<128x16xf32>
    %c5_86 = arith.constant 5 : index
    %c0_87 = arith.constant 0 : index
    %c0_88 = arith.constant 0 : index
    %87 = vector.load %arg7[%c5_86, %c0_87, %c0_88] : memref<9x128x64xf32, #tpu.memory_space<vmem>>, vector<1x128x64xf32>
    %88 = vector.shape_cast %87 : vector<1x128x64xf32> to vector<128x64xf32>
    %cst_89 = arith.constant dense<0.000000e+00> : vector<128x16xf32>
    %89 = tpu.matmul %88, %54, %cst_89 {dimension_numbers = #tpu.dot_dimension_numbers<[1], [0], [0], [1], [0, 0, 1, 1], [], []>} : vector<128x64xf32>, vector<64x16xf32>, vector<128x16xf32> -> vector<128x16xf32>
    %90 = arith.addf %86, %89 : vector<128x16xf32>
    %c8_90 = arith.constant 8 : index
    %c0_91 = arith.constant 0 : index
    %c0_92 = arith.constant 0 : index
    %91 = vector.load %arg7[%c8_90, %c0_91, %c0_92] : memref<9x128x64xf32, #tpu.memory_space<vmem>>, vector<1x128x64xf32>
    %92 = vector.shape_cast %91 : vector<1x128x64xf32> to vector<128x64xf32>
    %cst_93 = arith.constant dense<0.000000e+00> : vector<128x16xf32>
    %93 = tpu.matmul %92, %54, %cst_93 {dimension_numbers = #tpu.dot_dimension_numbers<[1], [0], [0], [1], [0, 0, 1, 1], [], []>} : vector<128x64xf32>, vector<64x16xf32>, vector<128x16xf32> -> vector<128x16xf32>
    %94 = arith.addf %90, %93 : vector<128x16xf32>
    %c2_94 = arith.constant 2 : index
    %c0_95 = arith.constant 0 : index
    %c0_96 = arith.constant 0 : index
    %95 = vector.load %arg8[%c2_94, %c0_95, %c0_96] : memref<3x16x16xf32, #tpu.memory_space<vmem>>, vector<1x16x16xf32>
    %96 = vector.shape_cast %95 : vector<1x16x16xf32> to vector<16x16xf32>
    %cst_97 = arith.constant dense<0.000000e+00> : vector<128x16xf32>
    %97 = tpu.matmul %94, %96, %cst_97 {dimension_numbers = #tpu.dot_dimension_numbers<[1], [0], [0], [1], [0, 0, 1, 1], [], []>} : vector<128x16xf32>, vector<16x16xf32>, vector<128x16xf32> -> vector<128x16xf32>
    %98 = arith.addf %83, %97 : vector<128x16xf32>
    %c0_98 = arith.constant 0 : index
    %c0_99 = arith.constant 0 : index
    %99 = vector.load %arg9[%c0_98, %c0_99] : memref<128x1xf32, #tpu.memory_space<vmem>>, vector<128x1xf32>
    %100 = vector.broadcast %99 : vector<128x1xf32> to vector<128x16xf32>
    %101 = arith.addf %98, %100 : vector<128x16xf32>
    %cst_100 = arith.constant 0.000000e+00 : f32
    %102 = vector.broadcast %cst_100 : f32 to vector<128x16xf32>
    %103 = arith.maximumf %101, %102 : vector<128x16xf32>
    %c0_101 = arith.constant 0 : index
    %c0_102 = arith.constant 0 : index
    %104 = vector.load %arg10[%c0_101, %c0_102] : memref<64x128xf32, #tpu.memory_space<vmem>>, vector<64x128xf32>
    %cst_103 = arith.constant dense<0.000000e+00> : vector<64x16xf32>
    %105 = tpu.matmul %104, %103, %cst_103 {dimension_numbers = #tpu.dot_dimension_numbers<[1], [0], [0], [1], [0, 0, 1, 1], [], []>} : vector<64x128xf32>, vector<128x16xf32>, vector<64x16xf32> -> vector<64x16xf32>
    %c0_104 = arith.constant 0 : index
    %c0_105 = arith.constant 0 : index
    %106 = vector.load %arg11[%c0_104, %c0_105] : memref<16x8xf32, #tpu.memory_space<vmem>>, vector<16x8xf32>
    %cst_106 = arith.constant dense<0.000000e+00> : vector<64x8xf32>
    %107 = tpu.matmul %105, %106, %cst_106 {dimension_numbers = #tpu.dot_dimension_numbers<[1], [0], [0], [1], [0, 0, 1, 1], [], []>} : vector<64x16xf32>, vector<16x8xf32>, vector<64x8xf32> -> vector<64x8xf32>
    %c0_107 = arith.constant 0 : index
    %c0_108 = arith.constant 0 : index
    %c0_109 = arith.constant 0 : index
    %108 = vector.load %arg12[%c0_107, %c0_108, %c0_109] : memref<9x256x64xf32, #tpu.memory_space<vmem>>, vector<1x256x64xf32>
    %109 = vector.shape_cast %108 : vector<1x256x64xf32> to vector<256x64xf32>
    %cst_110 = arith.constant dense<0.000000e+00> : vector<256x8xf32>
    %110 = tpu.matmul %109, %107, %cst_110 {dimension_numbers = #tpu.dot_dimension_numbers<[1], [0], [0], [1], [0, 0, 1, 1], [], []>} : vector<256x64xf32>, vector<64x8xf32>, vector<256x8xf32> -> vector<256x8xf32>
    %c3_111 = arith.constant 3 : index
    %c0_112 = arith.constant 0 : index
    %c0_113 = arith.constant 0 : index
    %111 = vector.load %arg12[%c3_111, %c0_112, %c0_113] : memref<9x256x64xf32, #tpu.memory_space<vmem>>, vector<1x256x64xf32>
    %112 = vector.shape_cast %111 : vector<1x256x64xf32> to vector<256x64xf32>
    %cst_114 = arith.constant dense<0.000000e+00> : vector<256x8xf32>
    %113 = tpu.matmul %112, %107, %cst_114 {dimension_numbers = #tpu.dot_dimension_numbers<[1], [0], [0], [1], [0, 0, 1, 1], [], []>} : vector<256x64xf32>, vector<64x8xf32>, vector<256x8xf32> -> vector<256x8xf32>
    %114 = arith.addf %110, %113 : vector<256x8xf32>
    %c6_115 = arith.constant 6 : index
    %c0_116 = arith.constant 0 : index
    %c0_117 = arith.constant 0 : index
    %115 = vector.load %arg12[%c6_115, %c0_116, %c0_117] : memref<9x256x64xf32, #tpu.memory_space<vmem>>, vector<1x256x64xf32>
    %116 = vector.shape_cast %115 : vector<1x256x64xf32> to vector<256x64xf32>
    %cst_118 = arith.constant dense<0.000000e+00> : vector<256x8xf32>
    %117 = tpu.matmul %116, %107, %cst_118 {dimension_numbers = #tpu.dot_dimension_numbers<[1], [0], [0], [1], [0, 0, 1, 1], [], []>} : vector<256x64xf32>, vector<64x8xf32>, vector<256x8xf32> -> vector<256x8xf32>
    %118 = arith.addf %114, %117 : vector<256x8xf32>
    %c0_119 = arith.constant 0 : index
    %c0_120 = arith.constant 0 : index
    %c0_121 = arith.constant 0 : index
    %119 = vector.load %arg13[%c0_119, %c0_120, %c0_121] : memref<3x8x8xf32, #tpu.memory_space<vmem>>, vector<1x8x8xf32>
    %120 = vector.shape_cast %119 : vector<1x8x8xf32> to vector<8x8xf32>
    %cst_122 = arith.constant dense<0.000000e+00> : vector<256x8xf32>
    %121 = tpu.matmul %118, %120, %cst_122 {dimension_numbers = #tpu.dot_dimension_numbers<[1], [0], [0], [1], [0, 0, 1, 1], [], []>} : vector<256x8xf32>, vector<8x8xf32>, vector<256x8xf32> -> vector<256x8xf32>
    %c1_123 = arith.constant 1 : index
    %c0_124 = arith.constant 0 : index
    %c0_125 = arith.constant 0 : index
    %122 = vector.load %arg12[%c1_123, %c0_124, %c0_125] : memref<9x256x64xf32, #tpu.memory_space<vmem>>, vector<1x256x64xf32>
    %123 = vector.shape_cast %122 : vector<1x256x64xf32> to vector<256x64xf32>
    %cst_126 = arith.constant dense<0.000000e+00> : vector<256x8xf32>
    %124 = tpu.matmul %123, %107, %cst_126 {dimension_numbers = #tpu.dot_dimension_numbers<[1], [0], [0], [1], [0, 0, 1, 1], [], []>} : vector<256x64xf32>, vector<64x8xf32>, vector<256x8xf32> -> vector<256x8xf32>
    %c4_127 = arith.constant 4 : index
    %c0_128 = arith.constant 0 : index
    %c0_129 = arith.constant 0 : index
    %125 = vector.load %arg12[%c4_127, %c0_128, %c0_129] : memref<9x256x64xf32, #tpu.memory_space<vmem>>, vector<1x256x64xf32>
    %126 = vector.shape_cast %125 : vector<1x256x64xf32> to vector<256x64xf32>
    %cst_130 = arith.constant dense<0.000000e+00> : vector<256x8xf32>
    %127 = tpu.matmul %126, %107, %cst_130 {dimension_numbers = #tpu.dot_dimension_numbers<[1], [0], [0], [1], [0, 0, 1, 1], [], []>} : vector<256x64xf32>, vector<64x8xf32>, vector<256x8xf32> -> vector<256x8xf32>
    %128 = arith.addf %124, %127 : vector<256x8xf32>
    %c7_131 = arith.constant 7 : index
    %c0_132 = arith.constant 0 : index
    %c0_133 = arith.constant 0 : index
    %129 = vector.load %arg12[%c7_131, %c0_132, %c0_133] : memref<9x256x64xf32, #tpu.memory_space<vmem>>, vector<1x256x64xf32>
    %130 = vector.shape_cast %129 : vector<1x256x64xf32> to vector<256x64xf32>
    %cst_134 = arith.constant dense<0.000000e+00> : vector<256x8xf32>
    %131 = tpu.matmul %130, %107, %cst_134 {dimension_numbers = #tpu.dot_dimension_numbers<[1], [0], [0], [1], [0, 0, 1, 1], [], []>} : vector<256x64xf32>, vector<64x8xf32>, vector<256x8xf32> -> vector<256x8xf32>
    %132 = arith.addf %128, %131 : vector<256x8xf32>
    %c1_135 = arith.constant 1 : index
    %c0_136 = arith.constant 0 : index
    %c0_137 = arith.constant 0 : index
    %133 = vector.load %arg13[%c1_135, %c0_136, %c0_137] : memref<3x8x8xf32, #tpu.memory_space<vmem>>, vector<1x8x8xf32>
    %134 = vector.shape_cast %133 : vector<1x8x8xf32> to vector<8x8xf32>
    %cst_138 = arith.constant dense<0.000000e+00> : vector<256x8xf32>
    %135 = tpu.matmul %132, %134, %cst_138 {dimension_numbers = #tpu.dot_dimension_numbers<[1], [0], [0], [1], [0, 0, 1, 1], [], []>} : vector<256x8xf32>, vector<8x8xf32>, vector<256x8xf32> -> vector<256x8xf32>
    %136 = arith.addf %121, %135 : vector<256x8xf32>
    %c2_139 = arith.constant 2 : index
    %c0_140 = arith.constant 0 : index
    %c0_141 = arith.constant 0 : index
    %137 = vector.load %arg12[%c2_139, %c0_140, %c0_141] : memref<9x256x64xf32, #tpu.memory_space<vmem>>, vector<1x256x64xf32>
    %138 = vector.shape_cast %137 : vector<1x256x64xf32> to vector<256x64xf32>
    %cst_142 = arith.constant dense<0.000000e+00> : vector<256x8xf32>
    %139 = tpu.matmul %138, %107, %cst_142 {dimension_numbers = #tpu.dot_dimension_numbers<[1], [0], [0], [1], [0, 0, 1, 1], [], []>} : vector<256x64xf32>, vector<64x8xf32>, vector<256x8xf32> -> vector<256x8xf32>
    %c5_143 = arith.constant 5 : index
    %c0_144 = arith.constant 0 : index
    %c0_145 = arith.constant 0 : index
    %140 = vector.load %arg12[%c5_143, %c0_144, %c0_145] : memref<9x256x64xf32, #tpu.memory_space<vmem>>, vector<1x256x64xf32>
    %141 = vector.shape_cast %140 : vector<1x256x64xf32> to vector<256x64xf32>
    %cst_146 = arith.constant dense<0.000000e+00> : vector<256x8xf32>
    %142 = tpu.matmul %141, %107, %cst_146 {dimension_numbers = #tpu.dot_dimension_numbers<[1], [0], [0], [1], [0, 0, 1, 1], [], []>} : vector<256x64xf32>, vector<64x8xf32>, vector<256x8xf32> -> vector<256x8xf32>
    %143 = arith.addf %139, %142 : vector<256x8xf32>
    %c8_147 = arith.constant 8 : index
    %c0_148 = arith.constant 0 : index
    %c0_149 = arith.constant 0 : index
    %144 = vector.load %arg12[%c8_147, %c0_148, %c0_149] : memref<9x256x64xf32, #tpu.memory_space<vmem>>, vector<1x256x64xf32>
    %145 = vector.shape_cast %144 : vector<1x256x64xf32> to vector<256x64xf32>
    %cst_150 = arith.constant dense<0.000000e+00> : vector<256x8xf32>
    %146 = tpu.matmul %145, %107, %cst_150 {dimension_numbers = #tpu.dot_dimension_numbers<[1], [0], [0], [1], [0, 0, 1, 1], [], []>} : vector<256x64xf32>, vector<64x8xf32>, vector<256x8xf32> -> vector<256x8xf32>
    %147 = arith.addf %143, %146 : vector<256x8xf32>
    %c2_151 = arith.constant 2 : index
    %c0_152 = arith.constant 0 : index
    %c0_153 = arith.constant 0 : index
    %148 = vector.load %arg13[%c2_151, %c0_152, %c0_153] : memref<3x8x8xf32, #tpu.memory_space<vmem>>, vector<1x8x8xf32>
    %149 = vector.shape_cast %148 : vector<1x8x8xf32> to vector<8x8xf32>
    %cst_154 = arith.constant dense<0.000000e+00> : vector<256x8xf32>
    %150 = tpu.matmul %147, %149, %cst_154 {dimension_numbers = #tpu.dot_dimension_numbers<[1], [0], [0], [1], [0, 0, 1, 1], [], []>} : vector<256x8xf32>, vector<8x8xf32>, vector<256x8xf32> -> vector<256x8xf32>
    %151 = arith.addf %136, %150 : vector<256x8xf32>
    %c0_155 = arith.constant 0 : index
    %c0_156 = arith.constant 0 : index
    %152 = vector.load %arg14[%c0_155, %c0_156] : memref<256x1xf32, #tpu.memory_space<vmem>>, vector<256x1xf32>
    %153 = vector.broadcast %152 : vector<256x1xf32> to vector<256x8xf32>
    %154 = arith.addf %151, %153 : vector<256x8xf32>
    %cst_157 = arith.constant 0.000000e+00 : f32
    %155 = vector.broadcast %cst_157 : f32 to vector<256x8xf32>
    %156 = arith.maximumf %154, %155 : vector<256x8xf32>
    %c0_158 = arith.constant 0 : index
    %c0_159 = arith.constant 0 : index
    %157 = vector.load %arg15[%c0_158, %c0_159] : memref<128x256xf32, #tpu.memory_space<vmem>>, vector<128x256xf32>
    %cst_160 = arith.constant dense<0.000000e+00> : vector<128x8xf32>
    %158 = tpu.matmul %157, %156, %cst_160 {dimension_numbers = #tpu.dot_dimension_numbers<[1], [0], [0], [1], [0, 0, 1, 1], [], []>} : vector<128x256xf32>, vector<256x8xf32>, vector<128x8xf32> -> vector<128x8xf32>
    %c0_161 = arith.constant 0 : index
    %c0_162 = arith.constant 0 : index
    %159 = vector.load %arg16[%c0_161, %c0_162] : memref<8x4xf32, #tpu.memory_space<vmem>>, vector<8x4xf32>
    %cst_163 = arith.constant dense<0.000000e+00> : vector<128x4xf32>
    %160 = tpu.matmul %158, %159, %cst_163 {dimension_numbers = #tpu.dot_dimension_numbers<[1], [0], [0], [1], [0, 0, 1, 1], [], []>} : vector<128x8xf32>, vector<8x4xf32>, vector<128x4xf32> -> vector<128x4xf32>
    %c0_164 = arith.constant 0 : index
    %c0_165 = arith.constant 0 : index
    %161 = vector.load %arg17[%c0_164, %c0_165] : memref<32x128xf32, #tpu.memory_space<vmem>>, vector<32x128xf32>
    %cst_166 = arith.constant dense<0.000000e+00> : vector<32x4xf32>
    %162 = tpu.matmul %161, %160, %cst_166 {dimension_numbers = #tpu.dot_dimension_numbers<[1], [0], [0], [1], [0, 0, 1, 1], [], []>} : vector<32x128xf32>, vector<128x4xf32>, vector<32x4xf32> -> vector<32x4xf32>
    %c0_167 = arith.constant 0 : index
    %c0_168 = arith.constant 0 : index
    %163 = vector.load %arg18[%c0_167, %c0_168] : memref<32x1xf32, #tpu.memory_space<vmem>>, vector<32x1xf32>
    %164 = vector.broadcast %163 : vector<32x1xf32> to vector<32x4xf32>
    %165 = arith.addf %162, %164 : vector<32x4xf32>
    %cst_169 = arith.constant 0.000000e+00 : f32
    %166 = vector.broadcast %cst_169 : f32 to vector<32x4xf32>
    %167 = arith.maximumf %165, %166 : vector<32x4xf32>
    %c0_170 = arith.constant 0 : index
    %c0_171 = arith.constant 0 : index
    %168 = vector.load %arg19[%c0_170, %c0_171] : memref<64x32xf32, #tpu.memory_space<vmem>>, vector<64x32xf32>
    %cst_172 = arith.constant dense<0.000000e+00> : vector<64x4xf32>
    %169 = tpu.matmul %168, %167, %cst_172 {dimension_numbers = #tpu.dot_dimension_numbers<[1], [0], [0], [1], [0, 0, 1, 1], [], []>} : vector<64x32xf32>, vector<32x4xf32>, vector<64x4xf32> -> vector<64x4xf32>
    %c0_173 = arith.constant 0 : index
    %c0_174 = arith.constant 0 : index
    %170 = vector.load %arg20[%c0_173, %c0_174] : memref<64x1xf32, #tpu.memory_space<vmem>>, vector<64x1xf32>
    %171 = vector.broadcast %170 : vector<64x1xf32> to vector<64x4xf32>
    %172 = arith.addf %169, %171 : vector<64x4xf32>
    %cst_175 = arith.constant 0.000000e+00 : f32
    %173 = vector.broadcast %cst_175 : f32 to vector<64x4xf32>
    %174 = arith.maximumf %172, %173 : vector<64x4xf32>
    %c0_176 = arith.constant 0 : index
    %c0_177 = arith.constant 0 : index
    %175 = vector.load %arg22[%c0_176, %c0_177] : memref<10x1xf32, #tpu.memory_space<vmem>>, vector<10x1xf32>
    %c0_178 = arith.constant 0 : index
    %c0_179 = arith.constant 0 : index
    %c0_180 = arith.constant 0 : index
    %176 = vector.load %arg21[%c0_178, %c0_179, %c0_180] : memref<4x10x64xf32, #tpu.memory_space<vmem>>, vector<1x10x64xf32>
    %177 = vector.shape_cast %176 : vector<1x10x64xf32> to vector<10x64xf32>
    %178 = vector.extract_strided_slice %174 {offsets = [0, 0], sizes = [64, 1], strides = [1, 1]} : vector<64x4xf32> to vector<64x1xf32>
    %cst_181 = arith.constant dense<0.000000e+00> : vector<10x1xf32>
    %179 = tpu.matmul %177, %178, %cst_181 {dimension_numbers = #tpu.dot_dimension_numbers<[1], [0], [0], [1], [0, 0, 1, 1], [], []>} : vector<10x64xf32>, vector<64x1xf32>, vector<10x1xf32> -> vector<10x1xf32>
    %180 = arith.addf %175, %179 : vector<10x1xf32>
    %c1_182 = arith.constant 1 : index
    %c0_183 = arith.constant 0 : index
    %c0_184 = arith.constant 0 : index
    %181 = vector.load %arg21[%c1_182, %c0_183, %c0_184] : memref<4x10x64xf32, #tpu.memory_space<vmem>>, vector<1x10x64xf32>
    %182 = vector.shape_cast %181 : vector<1x10x64xf32> to vector<10x64xf32>
    %183 = vector.extract_strided_slice %174 {offsets = [0, 1], sizes = [64, 1], strides = [1, 1]} : vector<64x4xf32> to vector<64x1xf32>
    %cst_185 = arith.constant dense<0.000000e+00> : vector<10x1xf32>
    %184 = tpu.matmul %182, %183, %cst_185 {dimension_numbers = #tpu.dot_dimension_numbers<[1], [0], [0], [1], [0, 0, 1, 1], [], []>} : vector<10x64xf32>, vector<64x1xf32>, vector<10x1xf32> -> vector<10x1xf32>
    %185 = arith.addf %180, %184 : vector<10x1xf32>
    %c2_186 = arith.constant 2 : index
    %c0_187 = arith.constant 0 : index
    %c0_188 = arith.constant 0 : index
    %186 = vector.load %arg21[%c2_186, %c0_187, %c0_188] : memref<4x10x64xf32, #tpu.memory_space<vmem>>, vector<1x10x64xf32>
    %187 = vector.shape_cast %186 : vector<1x10x64xf32> to vector<10x64xf32>
    %188 = vector.extract_strided_slice %174 {offsets = [0, 2], sizes = [64, 1], strides = [1, 1]} : vector<64x4xf32> to vector<64x1xf32>
    %cst_189 = arith.constant dense<0.000000e+00> : vector<10x1xf32>
    %189 = tpu.matmul %187, %188, %cst_189 {dimension_numbers = #tpu.dot_dimension_numbers<[1], [0], [0], [1], [0, 0, 1, 1], [], []>} : vector<10x64xf32>, vector<64x1xf32>, vector<10x1xf32> -> vector<10x1xf32>
    %190 = arith.addf %185, %189 : vector<10x1xf32>
    %c3_190 = arith.constant 3 : index
    %c0_191 = arith.constant 0 : index
    %c0_192 = arith.constant 0 : index
    %191 = vector.load %arg21[%c3_190, %c0_191, %c0_192] : memref<4x10x64xf32, #tpu.memory_space<vmem>>, vector<1x10x64xf32>
    %192 = vector.shape_cast %191 : vector<1x10x64xf32> to vector<10x64xf32>
    %193 = vector.extract_strided_slice %174 {offsets = [0, 3], sizes = [64, 1], strides = [1, 1]} : vector<64x4xf32> to vector<64x1xf32>
    %cst_193 = arith.constant dense<0.000000e+00> : vector<10x1xf32>
    %194 = tpu.matmul %192, %193, %cst_193 {dimension_numbers = #tpu.dot_dimension_numbers<[1], [0], [0], [1], [0, 0, 1, 1], [], []>} : vector<10x64xf32>, vector<64x1xf32>, vector<10x1xf32> -> vector<10x1xf32>
    %195 = arith.addf %190, %194 : vector<10x1xf32>
    %c0_194 = arith.constant 0 : index
    %c0_195 = arith.constant 0 : index
    %c0_196 = arith.constant 0 : index
    %196 = vector.load %arg33[%c0_194, %c0_195, %c0_196] : memref<1x10x1xf32, #tpu.memory_space<vmem>>, vector<1x10x1xf32>
    %197 = vector.shape_cast %196 : vector<1x10x1xf32> to vector<10x1xf32>
    %198 = vector.shape_cast %195 : vector<10x1xf32> to vector<1x10x1xf32>
    tpu.vector_store %arg33[%c0_194, %c0_195, %c0_196], %198 {strides = array<i32>} : memref<1x10x1xf32, #tpu.memory_space<vmem>>, vector<1x10x1xf32>,
    %c0_197 = arith.constant 0 : index
    %c0_198 = arith.constant 0 : index
    %199 = vector.load %arg23[%c0_197, %c0_198] : memref<16x32xf32, #tpu.memory_space<vmem>>, vector<16x32xf32>
    %cst_199 = arith.constant dense<0.000000e+00> : vector<16x4xf32>
    %200 = tpu.matmul %199, %167, %cst_199 {dimension_numbers = #tpu.dot_dimension_numbers<[1], [0], [0], [1], [0, 0, 1, 1], [], []>} : vector<16x32xf32>, vector<32x4xf32>, vector<16x4xf32> -> vector<16x4xf32>
    %c0_200 = arith.constant 0 : index
    %c0_201 = arith.constant 0 : index
    %201 = vector.load %arg24[%c0_200, %c0_201] : memref<16x1xf32, #tpu.memory_space<vmem>>, vector<16x1xf32>
    %202 = vector.broadcast %201 : vector<16x1xf32> to vector<16x4xf32>
    %203 = arith.addf %200, %202 : vector<16x4xf32>
    %cst_202 = arith.constant 0.000000e+00 : f32
    %204 = vector.broadcast %cst_202 : f32 to vector<16x4xf32>
    %205 = arith.maximumf %203, %204 : vector<16x4xf32>
    %c0_203 = arith.constant 0 : index
    %c0_204 = arith.constant 0 : index
    %c0_205 = arith.constant 0 : index
    %206 = vector.load %arg25[%c0_203, %c0_204, %c0_205] : memref<9x32x16xf32, #tpu.memory_space<vmem>>, vector<1x32x16xf32>
    %207 = vector.shape_cast %206 : vector<1x32x16xf32> to vector<32x16xf32>
    %cst_206 = arith.constant dense<0.000000e+00> : vector<32x4xf32>
    %208 = tpu.matmul %207, %205, %cst_206 {dimension_numbers = #tpu.dot_dimension_numbers<[1], [0], [0], [1], [0, 0, 1, 1], [], []>} : vector<32x16xf32>, vector<16x4xf32>, vector<32x4xf32> -> vector<32x4xf32>
    %c3_207 = arith.constant 3 : index
    %c0_208 = arith.constant 0 : index
    %c0_209 = arith.constant 0 : index
    %209 = vector.load %arg25[%c3_207, %c0_208, %c0_209] : memref<9x32x16xf32, #tpu.memory_space<vmem>>, vector<1x32x16xf32>
    %210 = vector.shape_cast %209 : vector<1x32x16xf32> to vector<32x16xf32>
    %cst_210 = arith.constant dense<0.000000e+00> : vector<32x4xf32>
    %211 = tpu.matmul %210, %205, %cst_210 {dimension_numbers = #tpu.dot_dimension_numbers<[1], [0], [0], [1], [0, 0, 1, 1], [], []>} : vector<32x16xf32>, vector<16x4xf32>, vector<32x4xf32> -> vector<32x4xf32>
    %212 = arith.addf %208, %211 : vector<32x4xf32>
    %c6_211 = arith.constant 6 : index
    %c0_212 = arith.constant 0 : index
    %c0_213 = arith.constant 0 : index
    %213 = vector.load %arg25[%c6_211, %c0_212, %c0_213] : memref<9x32x16xf32, #tpu.memory_space<vmem>>, vector<1x32x16xf32>
    %214 = vector.shape_cast %213 : vector<1x32x16xf32> to vector<32x16xf32>
    %cst_214 = arith.constant dense<0.000000e+00> : vector<32x4xf32>
    %215 = tpu.matmul %214, %205, %cst_214 {dimension_numbers = #tpu.dot_dimension_numbers<[1], [0], [0], [1], [0, 0, 1, 1], [], []>} : vector<32x16xf32>, vector<16x4xf32>, vector<32x4xf32> -> vector<32x4xf32>
    %216 = arith.addf %212, %215 : vector<32x4xf32>
    %c0_215 = arith.constant 0 : index
    %c0_216 = arith.constant 0 : index
    %c0_217 = arith.constant 0 : index
    %217 = vector.load %arg26[%c0_215, %c0_216, %c0_217] : memref<3x4x8xf32, #tpu.memory_space<vmem>>, vector<1x4x8xf32>
    %218 = vector.shape_cast %217 : vector<1x4x8xf32> to vector<4x8xf32>
    %cst_218 = arith.constant dense<0.000000e+00> : vector<32x8xf32>
    %219 = tpu.matmul %216, %218, %cst_218 {dimension_numbers = #tpu.dot_dimension_numbers<[1], [0], [0], [1], [0, 0, 1, 1], [], []>} : vector<32x4xf32>, vector<4x8xf32>, vector<32x8xf32> -> vector<32x8xf32>
    %c1_219 = arith.constant 1 : index
    %c0_220 = arith.constant 0 : index
    %c0_221 = arith.constant 0 : index
    %220 = vector.load %arg25[%c1_219, %c0_220, %c0_221] : memref<9x32x16xf32, #tpu.memory_space<vmem>>, vector<1x32x16xf32>
    %221 = vector.shape_cast %220 : vector<1x32x16xf32> to vector<32x16xf32>
    %cst_222 = arith.constant dense<0.000000e+00> : vector<32x4xf32>
    %222 = tpu.matmul %221, %205, %cst_222 {dimension_numbers = #tpu.dot_dimension_numbers<[1], [0], [0], [1], [0, 0, 1, 1], [], []>} : vector<32x16xf32>, vector<16x4xf32>, vector<32x4xf32> -> vector<32x4xf32>
    %c4_223 = arith.constant 4 : index
    %c0_224 = arith.constant 0 : index
    %c0_225 = arith.constant 0 : index
    %223 = vector.load %arg25[%c4_223, %c0_224, %c0_225] : memref<9x32x16xf32, #tpu.memory_space<vmem>>, vector<1x32x16xf32>
    %224 = vector.shape_cast %223 : vector<1x32x16xf32> to vector<32x16xf32>
    %cst_226 = arith.constant dense<0.000000e+00> : vector<32x4xf32>
    %225 = tpu.matmul %224, %205, %cst_226 {dimension_numbers = #tpu.dot_dimension_numbers<[1], [0], [0], [1], [0, 0, 1, 1], [], []>} : vector<32x16xf32>, vector<16x4xf32>, vector<32x4xf32> -> vector<32x4xf32>
    %226 = arith.addf %222, %225 : vector<32x4xf32>
    %c7_227 = arith.constant 7 : index
    %c0_228 = arith.constant 0 : index
    %c0_229 = arith.constant 0 : index
    %227 = vector.load %arg25[%c7_227, %c0_228, %c0_229] : memref<9x32x16xf32, #tpu.memory_space<vmem>>, vector<1x32x16xf32>
    %228 = vector.shape_cast %227 : vector<1x32x16xf32> to vector<32x16xf32>
    %cst_230 = arith.constant dense<0.000000e+00> : vector<32x4xf32>
    %229 = tpu.matmul %228, %205, %cst_230 {dimension_numbers = #tpu.dot_dimension_numbers<[1], [0], [0], [1], [0, 0, 1, 1], [], []>} : vector<32x16xf32>, vector<16x4xf32>, vector<32x4xf32> -> vector<32x4xf32>
    %230 = arith.addf %226, %229 : vector<32x4xf32>
    %c1_231 = arith.constant 1 : index
    %c0_232 = arith.constant 0 : index
    %c0_233 = arith.constant 0 : index
    %231 = vector.load %arg26[%c1_231, %c0_232, %c0_233] : memref<3x4x8xf32, #tpu.memory_space<vmem>>, vector<1x4x8xf32>
    %232 = vector.shape_cast %231 : vector<1x4x8xf32> to vector<4x8xf32>
    %cst_234 = arith.constant dense<0.000000e+00> : vector<32x8xf32>
    %233 = tpu.matmul %230, %232, %cst_234 {dimension_numbers = #tpu.dot_dimension_numbers<[1], [0], [0], [1], [0, 0, 1, 1], [], []>} : vector<32x4xf32>, vector<4x8xf32>, vector<32x8xf32> -> vector<32x8xf32>
    %234 = arith.addf %219, %233 : vector<32x8xf32>
    %c2_235 = arith.constant 2 : index
    %c0_236 = arith.constant 0 : index
    %c0_237 = arith.constant 0 : index
    %235 = vector.load %arg25[%c2_235, %c0_236, %c0_237] : memref<9x32x16xf32, #tpu.memory_space<vmem>>, vector<1x32x16xf32>
    %236 = vector.shape_cast %235 : vector<1x32x16xf32> to vector<32x16xf32>
    %cst_238 = arith.constant dense<0.000000e+00> : vector<32x4xf32>
    %237 = tpu.matmul %236, %205, %cst_238 {dimension_numbers = #tpu.dot_dimension_numbers<[1], [0], [0], [1], [0, 0, 1, 1], [], []>} : vector<32x16xf32>, vector<16x4xf32>, vector<32x4xf32> -> vector<32x4xf32>
    %c5_239 = arith.constant 5 : index
    %c0_240 = arith.constant 0 : index
    %c0_241 = arith.constant 0 : index
    %238 = vector.load %arg25[%c5_239, %c0_240, %c0_241] : memref<9x32x16xf32, #tpu.memory_space<vmem>>, vector<1x32x16xf32>
    %239 = vector.shape_cast %238 : vector<1x32x16xf32> to vector<32x16xf32>
    %cst_242 = arith.constant dense<0.000000e+00> : vector<32x4xf32>
    %240 = tpu.matmul %239, %205, %cst_242 {dimension_numbers = #tpu.dot_dimension_numbers<[1], [0], [0], [1], [0, 0, 1, 1], [], []>} : vector<32x16xf32>, vector<16x4xf32>, vector<32x4xf32> -> vector<32x4xf32>
    %241 = arith.addf %237, %240 : vector<32x4xf32>
    %c8_243 = arith.constant 8 : index
    %c0_244 = arith.constant 0 : index
    %c0_245 = arith.constant 0 : index
    %242 = vector.load %arg25[%c8_243, %c0_244, %c0_245] : memref<9x32x16xf32, #tpu.memory_space<vmem>>, vector<1x32x16xf32>
    %243 = vector.shape_cast %242 : vector<1x32x16xf32> to vector<32x16xf32>
    %cst_246 = arith.constant dense<0.000000e+00> : vector<32x4xf32>
    %244 = tpu.matmul %243, %205, %cst_246 {dimension_numbers = #tpu.dot_dimension_numbers<[1], [0], [0], [1], [0, 0, 1, 1], [], []>} : vector<32x16xf32>, vector<16x4xf32>, vector<32x4xf32> -> vector<32x4xf32>
    %245 = arith.addf %241, %244 : vector<32x4xf32>
    %c2_247 = arith.constant 2 : index
    %c0_248 = arith.constant 0 : index
    %c0_249 = arith.constant 0 : index
    %246 = vector.load %arg26[%c2_247, %c0_248, %c0_249] : memref<3x4x8xf32, #tpu.memory_space<vmem>>, vector<1x4x8xf32>
    %247 = vector.shape_cast %246 : vector<1x4x8xf32> to vector<4x8xf32>
    %cst_250 = arith.constant dense<0.000000e+00> : vector<32x8xf32>
    %248 = tpu.matmul %245, %247, %cst_250 {dimension_numbers = #tpu.dot_dimension_numbers<[1], [0], [0], [1], [0, 0, 1, 1], [], []>} : vector<32x4xf32>, vector<4x8xf32>, vector<32x8xf32> -> vector<32x8xf32>
    %249 = arith.addf %234, %248 : vector<32x8xf32>
    %c0_251 = arith.constant 0 : index
    %c0_252 = arith.constant 0 : index
    %250 = vector.load %arg27[%c0_251, %c0_252] : memref<32x1xf32, #tpu.memory_space<vmem>>, vector<32x1xf32>
    %251 = vector.broadcast %250 : vector<32x1xf32> to vector<32x8xf32>
    %252 = arith.addf %249, %251 : vector<32x8xf32>
    %cst_253 = arith.constant 0.000000e+00 : f32
    %253 = vector.broadcast %cst_253 : f32 to vector<32x8xf32>
    %254 = arith.maximumf %252, %253 : vector<32x8xf32>
    %c0_254 = arith.constant 0 : index
    %c0_255 = arith.constant 0 : index
    %255 = vector.load %arg28[%c0_254, %c0_255] : memref<128x64xf32, #tpu.memory_space<vmem>>, vector<128x64xf32>
    %cst_256 = arith.constant dense<0.000000e+00> : vector<128x8xf32>
    %256 = tpu.matmul %255, %107, %cst_256 {dimension_numbers = #tpu.dot_dimension_numbers<[1], [0], [0], [1], [0, 0, 1, 1], [], []>} : vector<128x64xf32>, vector<64x8xf32>, vector<128x8xf32> -> vector<128x8xf32>
    %c0_257 = arith.constant 0 : index
    %c0_258 = arith.constant 0 : index
    %257 = vector.load %arg29[%c0_257, %c0_258] : memref<128x32xf32, #tpu.memory_space<vmem>>, vector<128x32xf32>
    %cst_259 = arith.constant dense<0.000000e+00> : vector<128x8xf32>
    %258 = tpu.matmul %257, %254, %cst_259 {dimension_numbers = #tpu.dot_dimension_numbers<[1], [0], [0], [1], [0, 0, 1, 1], [], []>} : vector<128x32xf32>, vector<32x8xf32>, vector<128x8xf32> -> vector<128x8xf32>
    %259 = arith.addf %256, %258 : vector<128x8xf32>
    %c0_260 = arith.constant 0 : index
    %c0_261 = arith.constant 0 : index
    %260 = vector.load %arg30[%c0_260, %c0_261] : memref<128x1xf32, #tpu.memory_space<vmem>>, vector<128x1xf32>
    %261 = vector.broadcast %260 : vector<128x1xf32> to vector<128x8xf32>
    %262 = arith.addf %259, %261 : vector<128x8xf32>
    %cst_262 = arith.constant 0.000000e+00 : f32
    %263 = vector.broadcast %cst_262 : f32 to vector<128x8xf32>
    %264 = arith.maximumf %262, %263 : vector<128x8xf32>
    %c0_263 = arith.constant 0 : index
    %c0_264 = arith.constant 0 : index
    %265 = vector.load %arg32[%c0_263, %c0_264] : memref<10x1xf32, #tpu.memory_space<vmem>>, vector<10x1xf32>
    %c0_265 = arith.constant 0 : index
    %c0_266 = arith.constant 0 : index
    %c0_267 = arith.constant 0 : index
    %266 = vector.load %arg31[%c0_265, %c0_266, %c0_267] : memref<8x10x128xf32, #tpu.memory_space<vmem>>, vector<1x10x128xf32>
    %267 = vector.shape_cast %266 : vector<1x10x128xf32> to vector<10x128xf32>
    %268 = vector.extract_strided_slice %264 {offsets = [0, 0], sizes = [128, 1], strides = [1, 1]} : vector<128x8xf32> to vector<128x1xf32>
    %cst_268 = arith.constant dense<0.000000e+00> : vector<10x1xf32>
    %269 = tpu.matmul %267, %268, %cst_268 {dimension_numbers = #tpu.dot_dimension_numbers<[1], [0], [0], [1], [0, 0, 1, 1], [], []>} : vector<10x128xf32>, vector<128x1xf32>, vector<10x1xf32> -> vector<10x1xf32>
    %270 = arith.addf %265, %269 : vector<10x1xf32>
    %c1_269 = arith.constant 1 : index
    %c0_270 = arith.constant 0 : index
    %c0_271 = arith.constant 0 : index
    %271 = vector.load %arg31[%c1_269, %c0_270, %c0_271] : memref<8x10x128xf32, #tpu.memory_space<vmem>>, vector<1x10x128xf32>
    %272 = vector.shape_cast %271 : vector<1x10x128xf32> to vector<10x128xf32>
    %273 = vector.extract_strided_slice %264 {offsets = [0, 1], sizes = [128, 1], strides = [1, 1]} : vector<128x8xf32> to vector<128x1xf32>
    %cst_272 = arith.constant dense<0.000000e+00> : vector<10x1xf32>
    %274 = tpu.matmul %272, %273, %cst_272 {dimension_numbers = #tpu.dot_dimension_numbers<[1], [0], [0], [1], [0, 0, 1, 1], [], []>} : vector<10x128xf32>, vector<128x1xf32>, vector<10x1xf32> -> vector<10x1xf32>
    %275 = arith.addf %270, %274 : vector<10x1xf32>
    %c2_273 = arith.constant 2 : index
    %c0_274 = arith.constant 0 : index
    %c0_275 = arith.constant 0 : index
    %276 = vector.load %arg31[%c2_273, %c0_274, %c0_275] : memref<8x10x128xf32, #tpu.memory_space<vmem>>, vector<1x10x128xf32>
    %277 = vector.shape_cast %276 : vector<1x10x128xf32> to vector<10x128xf32>
    %278 = vector.extract_strided_slice %264 {offsets = [0, 2], sizes = [128, 1], strides = [1, 1]} : vector<128x8xf32> to vector<128x1xf32>
    %cst_276 = arith.constant dense<0.000000e+00> : vector<10x1xf32>
    %279 = tpu.matmul %277, %278, %cst_276 {dimension_numbers = #tpu.dot_dimension_numbers<[1], [0], [0], [1], [0, 0, 1, 1], [], []>} : vector<10x128xf32>, vector<128x1xf32>, vector<10x1xf32> -> vector<10x1xf32>
    %280 = arith.addf %275, %279 : vector<10x1xf32>
    %c3_277 = arith.constant 3 : index
    %c0_278 = arith.constant 0 : index
    %c0_279 = arith.constant 0 : index
    %281 = vector.load %arg31[%c3_277, %c0_278, %c0_279] : memref<8x10x128xf32, #tpu.memory_space<vmem>>, vector<1x10x128xf32>
    %282 = vector.shape_cast %281 : vector<1x10x128xf32> to vector<10x128xf32>
    %283 = vector.extract_strided_slice %264 {offsets = [0, 3], sizes = [128, 1], strides = [1, 1]} : vector<128x8xf32> to vector<128x1xf32>
    %cst_280 = arith.constant dense<0.000000e+00> : vector<10x1xf32>
    %284 = tpu.matmul %282, %283, %cst_280 {dimension_numbers = #tpu.dot_dimension_numbers<[1], [0], [0], [1], [0, 0, 1, 1], [], []>} : vector<10x128xf32>, vector<128x1xf32>, vector<10x1xf32> -> vector<10x1xf32>
    %285 = arith.addf %280, %284 : vector<10x1xf32>
    %c4_281 = arith.constant 4 : index
    %c0_282 = arith.constant 0 : index
    %c0_283 = arith.constant 0 : index
    %286 = vector.load %arg31[%c4_281, %c0_282, %c0_283] : memref<8x10x128xf32, #tpu.memory_space<vmem>>, vector<1x10x128xf32>
    %287 = vector.shape_cast %286 : vector<1x10x128xf32> to vector<10x128xf32>
    %288 = vector.extract_strided_slice %264 {offsets = [0, 4], sizes = [128, 1], strides = [1, 1]} : vector<128x8xf32> to vector<128x1xf32>
    %cst_284 = arith.constant dense<0.000000e+00> : vector<10x1xf32>
    %289 = tpu.matmul %287, %288, %cst_284 {dimension_numbers = #tpu.dot_dimension_numbers<[1], [0], [0], [1], [0, 0, 1, 1], [], []>} : vector<10x128xf32>, vector<128x1xf32>, vector<10x1xf32> -> vector<10x1xf32>
    %290 = arith.addf %285, %289 : vector<10x1xf32>
    %c5_285 = arith.constant 5 : index
    %c0_286 = arith.constant 0 : index
    %c0_287 = arith.constant 0 : index
    %291 = vector.load %arg31[%c5_285, %c0_286, %c0_287] : memref<8x10x128xf32, #tpu.memory_space<vmem>>, vector<1x10x128xf32>
    %292 = vector.shape_cast %291 : vector<1x10x128xf32> to vector<10x128xf32>
    %293 = vector.extract_strided_slice %264 {offsets = [0, 5], sizes = [128, 1], strides = [1, 1]} : vector<128x8xf32> to vector<128x1xf32>
    %cst_288 = arith.constant dense<0.000000e+00> : vector<10x1xf32>
    %294 = tpu.matmul %292, %293, %cst_288 {dimension_numbers = #tpu.dot_dimension_numbers<[1], [0], [0], [1], [0, 0, 1, 1], [], []>} : vector<10x128xf32>, vector<128x1xf32>, vector<10x1xf32> -> vector<10x1xf32>
    %295 = arith.addf %290, %294 : vector<10x1xf32>
    %c6_289 = arith.constant 6 : index
    %c0_290 = arith.constant 0 : index
    %c0_291 = arith.constant 0 : index
    %296 = vector.load %arg31[%c6_289, %c0_290, %c0_291] : memref<8x10x128xf32, #tpu.memory_space<vmem>>, vector<1x10x128xf32>
    %297 = vector.shape_cast %296 : vector<1x10x128xf32> to vector<10x128xf32>
    %298 = vector.extract_strided_slice %264 {offsets = [0, 6], sizes = [128, 1], strides = [1, 1]} : vector<128x8xf32> to vector<128x1xf32>
    %cst_292 = arith.constant dense<0.000000e+00> : vector<10x1xf32>
    %299 = tpu.matmul %297, %298, %cst_292 {dimension_numbers = #tpu.dot_dimension_numbers<[1], [0], [0], [1], [0, 0, 1, 1], [], []>} : vector<10x128xf32>, vector<128x1xf32>, vector<10x1xf32> -> vector<10x1xf32>
    %300 = arith.addf %295, %299 : vector<10x1xf32>
    %c7_293 = arith.constant 7 : index
    %c0_294 = arith.constant 0 : index
    %c0_295 = arith.constant 0 : index
    %301 = vector.load %arg31[%c7_293, %c0_294, %c0_295] : memref<8x10x128xf32, #tpu.memory_space<vmem>>, vector<1x10x128xf32>
    %302 = vector.shape_cast %301 : vector<1x10x128xf32> to vector<10x128xf32>
    %303 = vector.extract_strided_slice %264 {offsets = [0, 7], sizes = [128, 1], strides = [1, 1]} : vector<128x8xf32> to vector<128x1xf32>
    %cst_296 = arith.constant dense<0.000000e+00> : vector<10x1xf32>
    %304 = tpu.matmul %302, %303, %cst_296 {dimension_numbers = #tpu.dot_dimension_numbers<[1], [0], [0], [1], [0, 0, 1, 1], [], []>} : vector<10x128xf32>, vector<128x1xf32>, vector<10x1xf32> -> vector<10x1xf32>
    %305 = arith.addf %300, %304 : vector<10x1xf32>
    %c0_297 = arith.constant 0 : index
    %c0_298 = arith.constant 0 : index
    %c0_299 = arith.constant 0 : index
    %306 = vector.load %arg34[%c0_297, %c0_298, %c0_299] : memref<1x10x1xf32, #tpu.memory_space<vmem>>, vector<1x10x1xf32>
    %307 = vector.shape_cast %306 : vector<1x10x1xf32> to vector<10x1xf32>
    %308 = vector.shape_cast %305 : vector<10x1xf32> to vector<1x10x1xf32>
    tpu.vector_store %arg34[%c0_297, %c0_298, %c0_299], %308 {strides = array<i32>} : memref<1x10x1xf32, #tpu.memory_space<vmem>>, vector<1x10x1xf32>,
    return
  }
  func.func @transform_0(%arg0: i32) -> (i32, i32, i32) {
    %c0_i32 = arith.constant 0 : i32
    %c0_i32_0 = arith.constant 0 : i32
    %c0_i32_1 = arith.constant 0 : i32
    return %arg0, %c0_i32, %c0_i32_0 : i32, i32, i32
  }
  func.func @transform_1(%arg0: i32) -> (i32, i32, i32) {
    %c0_i32 = arith.constant 0 : i32
    %c0_i32_0 = arith.constant 0 : i32
    %c0_i32_1 = arith.constant 0 : i32
    %c0_i32_2 = arith.constant 0 : i32
    return %c0_i32, %c0_i32_0, %c0_i32_1 : i32, i32, i32
  }
  func.func @transform_2(%arg0: i32) -> (i32, i32, i32) {
    %c0_i32 = arith.constant 0 : i32
    %c0_i32_0 = arith.constant 0 : i32
    %c0_i32_1 = arith.constant 0 : i32
    %c0_i32_2 = arith.constant 0 : i32
    return %c0_i32, %c0_i32_0, %c0_i32_1 : i32, i32, i32
  }
  func.func @transform_3(%arg0: i32) -> (i32, i32) {
    %c0_i32 = arith.constant 0 : i32
    %c0_i32_0 = arith.constant 0 : i32
    %c0_i32_1 = arith.constant 0 : i32
    return %c0_i32, %c0_i32_0 : i32, i32
  }
  func.func @transform_4(%arg0: i32) -> (i32, i32) {
    %c0_i32 = arith.constant 0 : i32
    %c0_i32_0 = arith.constant 0 : i32
    %c0_i32_1 = arith.constant 0 : i32
    return %c0_i32, %c0_i32_0 : i32, i32
  }
  func.func @transform_5(%arg0: i32) -> (i32, i32) {
    %c0_i32 = arith.constant 0 : i32
    %c0_i32_0 = arith.constant 0 : i32
    %c0_i32_1 = arith.constant 0 : i32
    return %c0_i32, %c0_i32_0 : i32, i32
  }
  func.func @transform_6(%arg0: i32) -> (i32, i32, i32) {
    %c0_i32 = arith.constant 0 : i32
    %c0_i32_0 = arith.constant 0 : i32
    %c0_i32_1 = arith.constant 0 : i32
    %c0_i32_2 = arith.constant 0 : i32
    return %c0_i32, %c0_i32_0, %c0_i32_1 : i32, i32, i32
  }
  func.func @transform_7(%arg0: i32) -> (i32, i32, i32) {
    %c0_i32 = arith.constant 0 : i32
    %c0_i32_0 = arith.constant 0 : i32
    %c0_i32_1 = arith.constant 0 : i32
    %c0_i32_2 = arith.constant 0 : i32
    return %c0_i32, %c0_i32_0, %c0_i32_1 : i32, i32, i32
  }
  func.func @transform_8(%arg0: i32) -> (i32, i32) {
    %c0_i32 = arith.constant 0 : i32
    %c0_i32_0 = arith.constant 0 : i32
    %c0_i32_1 = arith.constant 0 : i32
    return %c0_i32, %c0_i32_0 : i32, i32
  }
  func.func @transform_9(%arg0: i32) -> (i32, i32) {
    %c0_i32 = arith.constant 0 : i32
    %c0_i32_0 = arith.constant 0 : i32
    %c0_i32_1 = arith.constant 0 : i32
    return %c0_i32, %c0_i32_0 : i32, i32
  }
  func.func @transform_10(%arg0: i32) -> (i32, i32) {
    %c0_i32 = arith.constant 0 : i32
    %c0_i32_0 = arith.constant 0 : i32
    %c0_i32_1 = arith.constant 0 : i32
    return %c0_i32, %c0_i32_0 : i32, i32
  }
  func.func @transform_11(%arg0: i32) -> (i32, i32, i32) {
    %c0_i32 = arith.constant 0 : i32
    %c0_i32_0 = arith.constant 0 : i32
    %c0_i32_1 = arith.constant 0 : i32
    %c0_i32_2 = arith.constant 0 : i32
    return %c0_i32, %c0_i32_0, %c0_i32_1 : i32, i32, i32
  }
  func.func @transform_12(%arg0: i32) -> (i32, i32, i32) {
    %c0_i32 = arith.constant 0 : i32
    %c0_i32_0 = arith.constant 0 : i32
    %c0_i32_1 = arith.constant 0 : i32
    %c0_i32_2 = arith.constant 0 : i32
    return %c0_i32, %c0_i32_0, %c0_i32_1 : i32, i32, i32
  }
  func.func @transform_13(%arg0: i32) -> (i32, i32) {
    %c0_i32 = arith.constant 0 : i32
    %c0_i32_0 = arith.constant 0 : i32
    %c0_i32_1 = arith.constant 0 : i32
    return %c0_i32, %c0_i32_0 : i32, i32
  }
  func.func @transform_14(%arg0: i32) -> (i32, i32) {
    %c0_i32 = arith.constant 0 : i32
    %c0_i32_0 = arith.constant 0 : i32
    %c0_i32_1 = arith.constant 0 : i32
    return %c0_i32, %c0_i32_0 : i32, i32
  }
  func.func @transform_15(%arg0: i32) -> (i32, i32) {
    %c0_i32 = arith.constant 0 : i32
    %c0_i32_0 = arith.constant 0 : i32
    %c0_i32_1 = arith.constant 0 : i32
    return %c0_i32, %c0_i32_0 : i32, i32
  }
  func.func @transform_16(%arg0: i32) -> (i32, i32) {
    %c0_i32 = arith.constant 0 : i32
    %c0_i32_0 = arith.constant 0 : i32
    %c0_i32_1 = arith.constant 0 : i32
    return %c0_i32, %c0_i32_0 : i32, i32
  }
  func.func @transform_17(%arg0: i32) -> (i32, i32) {
    %c0_i32 = arith.constant 0 : i32
    %c0_i32_0 = arith.constant 0 : i32
    %c0_i32_1 = arith.constant 0 : i32
    return %c0_i32, %c0_i32_0 : i32, i32
  }
  func.func @transform_18(%arg0: i32) -> (i32, i32) {
    %c0_i32 = arith.constant 0 : i32
    %c0_i32_0 = arith.constant 0 : i32
    %c0_i32_1 = arith.constant 0 : i32
    return %c0_i32, %c0_i32_0 : i32, i32
  }
  func.func @transform_19(%arg0: i32) -> (i32, i32) {
    %c0_i32 = arith.constant 0 : i32
    %c0_i32_0 = arith.constant 0 : i32
    %c0_i32_1 = arith.constant 0 : i32
    return %c0_i32, %c0_i32_0 : i32, i32
  }
  func.func @transform_20(%arg0: i32) -> (i32, i32, i32) {
    %c0_i32 = arith.constant 0 : i32
    %c0_i32_0 = arith.constant 0 : i32
    %c0_i32_1 = arith.constant 0 : i32
    %c0_i32_2 = arith.constant 0 : i32
    return %c0_i32, %c0_i32_0, %c0_i32_1 : i32, i32, i32
  }
  func.func @transform_21(%arg0: i32) -> (i32, i32) {
    %c0_i32 = arith.constant 0 : i32
    %c0_i32_0 = arith.constant 0 : i32
    %c0_i32_1 = arith.constant 0 : i32
    return %c0_i32, %c0_i32_0 : i32, i32
  }
  func.func @transform_22(%arg0: i32) -> (i32, i32) {
    %c0_i32 = arith.constant 0 : i32
    %c0_i32_0 = arith.constant 0 : i32
    %c0_i32_1 = arith.constant 0 : i32
    return %c0_i32, %c0_i32_0 : i32, i32
  }
  func.func @transform_23(%arg0: i32) -> (i32, i32) {
    %c0_i32 = arith.constant 0 : i32
    %c0_i32_0 = arith.constant 0 : i32
    %c0_i32_1 = arith.constant 0 : i32
    return %c0_i32, %c0_i32_0 : i32, i32
  }
  func.func @transform_24(%arg0: i32) -> (i32, i32, i32) {
    %c0_i32 = arith.constant 0 : i32
    %c0_i32_0 = arith.constant 0 : i32
    %c0_i32_1 = arith.constant 0 : i32
    %c0_i32_2 = arith.constant 0 : i32
    return %c0_i32, %c0_i32_0, %c0_i32_1 : i32, i32, i32
  }
  func.func @transform_25(%arg0: i32) -> (i32, i32, i32) {
    %c0_i32 = arith.constant 0 : i32
    %c0_i32_0 = arith.constant 0 : i32
    %c0_i32_1 = arith.constant 0 : i32
    %c0_i32_2 = arith.constant 0 : i32
    return %c0_i32, %c0_i32_0, %c0_i32_1 : i32, i32, i32
  }
  func.func @transform_26(%arg0: i32) -> (i32, i32) {
    %c0_i32 = arith.constant 0 : i32
    %c0_i32_0 = arith.constant 0 : i32
    %c0_i32_1 = arith.constant 0 : i32
    return %c0_i32, %c0_i32_0 : i32, i32
  }
  func.func @transform_27(%arg0: i32) -> (i32, i32) {
    %c0_i32 = arith.constant 0 : i32
    %c0_i32_0 = arith.constant 0 : i32
    %c0_i32_1 = arith.constant 0 : i32
    return %c0_i32, %c0_i32_0 : i32, i32
  }
  func.func @transform_28(%arg0: i32) -> (i32, i32) {
    %c0_i32 = arith.constant 0 : i32
    %c0_i32_0 = arith.constant 0 : i32
    %c0_i32_1 = arith.constant 0 : i32
    return %c0_i32, %c0_i32_0 : i32, i32
  }
  func.func @transform_29(%arg0: i32) -> (i32, i32) {
    %c0_i32 = arith.constant 0 : i32
    %c0_i32_0 = arith.constant 0 : i32
    %c0_i32_1 = arith.constant 0 : i32
    return %c0_i32, %c0_i32_0 : i32, i32
  }
  func.func @transform_30(%arg0: i32) -> (i32, i32, i32) {
    %c0_i32 = arith.constant 0 : i32
    %c0_i32_0 = arith.constant 0 : i32
    %c0_i32_1 = arith.constant 0 : i32
    %c0_i32_2 = arith.constant 0 : i32
    return %c0_i32, %c0_i32_0, %c0_i32_1 : i32, i32, i32
  }
  func.func @transform_31(%arg0: i32) -> (i32, i32) {
    %c0_i32 = arith.constant 0 : i32
    %c0_i32_0 = arith.constant 0 : i32
    %c0_i32_1 = arith.constant 0 : i32
    return %c0_i32, %c0_i32_0 : i32, i32
  }
  func.func @transform_32(%arg0: i32) -> (i32, i32, i32) {
    %c0_i32 = arith.constant 0 : i32
    %c0_i32_0 = arith.constant 0 : i32
    %c0_i32_1 = arith.constant 0 : i32
    return %arg0, %c0_i32, %c0_i32_0 : i32, i32, i32
  }
  func.func @transform_33(%arg0: i32) -> (i32, i32, i32) {
    %c0_i32 = arith.constant 0 : i32
    %c0_i32_0 = arith.constant 0 : i32
    %c0_i32_1 = arith.constant 0 : i32
    return %arg0, %c0_i32, %c0_i32_0 : i32, i32, i32
  }
}

</mosaic_0001>

<bundles_post_ra>
// kernel: _forward.1
= control target key start
LH: loop header
LB: loop body
LE: loop exit
PB: predicated region body
PF: predicated region fallthrough
CT: control target
= control target key end

     0   :  { %s23112_s6 = smov 1   ;;  %s23113_s10 = smov 2   ;;  %s25901_s0 = inlined_call_operand.smem [shape: u32[34], index: -1, kind: input, shape index: {}] }
   0x1   :  { %s23161_s5 = sld [smem:[%s25901_s0]]   ;;  %s23114_s14 = smov 3  }
   0x2   :  { %s23166_s9 = sld [smem:[%s25901_s0 + %s23112_s6]]   ;;  %s23115_s18 = smov 4  }
   0x3   :  { %s23171_s13 = sld [smem:[%s25901_s0 + %s23113_s10]]   ;;  %s23116_s22 = smov 5  }
   0x4   :  { %s23176_s17 = sld [smem:[%s25901_s0 + %s23114_s14]]   ;;  %s23117_s26 = smov 6  }
   0x5   :  { %s23181_s21 = sld [smem:[%s25901_s0 + %s23115_s18]]   ;;  %s23118_s30 = smov 7  }
   0x6   :  { %s23186_s25 = sld [smem:[%s25901_s0 + %s23116_s22]]   ;;  %s23119_s4 = smov 8  }
   0x7   :  { %s23191_s29 = sld [smem:[%s25901_s0 + %s23117_s26]]   ;;  %s23120_s10 = smov 9  }
   0x8   :  { %s23196_s3 = sld [smem:[%s25901_s0 + %s23118_s30]]   ;;  %s23121_s15 = smov 10  }
   0x9   :  { %s23201_s8 = sld [smem:[%s25901_s0 + %s23119_s4]]   ;;  %s23122_s20 = smov 11  }
   0xa   :  { %s23206_s14 = sld [smem:[%s25901_s0 + %s23120_s10]]   ;;  %s23123_s26 = smov 12  }
   0xb   :  { %s23211_s19 = sld [smem:[%s25901_s0 + %s23121_s15]]   ;;  %s23124_s1 = smov 13  }
   0xc   :  { %s23216_s24 = sld [smem:[%s25901_s0 + %s23122_s20]]   ;;  %s23125_s7 = smov 14  }
   0xd   :  { %s23221_s30 = sld [smem:[%s25901_s0 + %s23123_s26]]   ;;  %s23126_s15 = smov 15  }
   0xe   :  { %25931 = sst [smem:[#allocation2_spill]] %s23196_s3  ;;  %s23127_s22 = smov 16  }
   0xf   :  { %s23226_s6 = sld [smem:[%s25901_s0 + %s23124_s1]]   ;;  %s23128_s28 = smov 17  }
  0x10   :  { %s23231_s12 = sld [smem:[%s25901_s0 + %s23125_s7]]   ;;  %s23129_s7 = smov 18  }
  0x11   :  { %25932 = sst [smem:[#allocation3_spill]] %s23211_s19 }
  0x12   :  { %25933 = sst [smem:[#allocation4_spill]] %s23216_s24 }
  0x13   :  { %25934 = sst [smem:[#allocation5_spill]] %s23221_s30 }
  0x14   :  { %s23236_s20 = sld [smem:[%s25901_s0 + %s23126_s15]]   ;;  %s23130_s15 = smov 19  }
  0x15   :  { %s23241_s27 = sld [smem:[%s25901_s0 + %s23127_s22]]   ;;  %s23131_s22 = smov 20  }
  0x16   :  { %25935 = sst [smem:[#allocation6_spill]] %s23231_s12 }
  0x17   :  { %s23246_s4 = sld [smem:[%s25901_s0 + %s23128_s28]]   ;;  %s23132_s28 = smov 21  }
  0x18   :  { %s23251_s12 = sld [smem:[%s25901_s0 + %s23129_s7]]   ;;  %s23133_s7 = smov 22  }
  0x19   :  { %s23266_s30 = sld [smem:[%s25901_s0 + %s23132_s28]]   ;;  %s23136_s28 = smov 25  }
  0x1a   :  { %25936 = sst [smem:[#allocation7_spill]] %s23236_s20 }
  0x1b   :  { %25937 = sst [smem:[#allocation8_spill]] %s23241_s27 }
  0x1c   :  { %s23256_s20 = sld [smem:[%s25901_s0 + %s23130_s15]]   ;;  %s23134_s15 = smov 23  }
  0x1d   :  { %s23261_s27 = sld [smem:[%s25901_s0 + %s23131_s22]]   ;;  %s23135_s22 = smov 24  }
  0x1e   :  { %25938 = sst [smem:[#allocation9_spill]] %s23251_s12 }
  0x1f   :  { %25940 = sst [smem:[#allocation11_spill]] %s23266_s30 }
  0x20   :  { %s23271_s12 = sld [smem:[%s25901_s0 + %s23133_s7]]   ;;  %s23137_s7 = smov 26  }
  0x21   :  { %s23276_s24 = sld [smem:[%s25901_s0 + %s23134_s15]]   ;;  %s23138_s15 = smov 27  }
  0x22   :  { %s23286_s30 = sld [smem:[%s25901_s0 + %s23136_s28]]   ;;  %s23140_s28 = smov 29  }
  0x23   :  { %25939 = sst [smem:[#allocation10_spill]] %s23261_s27 }
  0x24   :  { %s23281_s27 = sld [smem:[%s25901_s0 + %s23135_s22]]   ;;  %s23139_s22 = smov 28  }
  0x25   :  { %s23296_s19 = sld [smem:[%s25901_s0 + %s23138_s15]]   ;;  %s23142_s15 = smov 31  }
  0x26   :  { %25941 = sst [smem:[#allocation12_spill]] %s23271_s12 }
  0x27   :  { %s23291_s12 = sld [smem:[%s25901_s0 + %s23137_s7]]   ;;  %s23141_s7 = smov 30  }
  0x28   :  { %25943 = sst [smem:[#allocation14_spill]] %s23286_s30 }
  0x29   :  { %s23306_s30 = sld [smem:[%s25901_s0 + %s23140_s28]]   ;;  %s23144_s28 = smov 33  }
  0x2a   :  { %25942 = sst [smem:[#allocation13_spill]] %s23281_s27 }
  0x2b   :  { %25945 = sst [smem:[#allocation16_spill]] %s23296_s19 }
  0x2c   :  { %s23301_s27 = sld [smem:[%s25901_s0 + %s23139_s22]]   ;;  %s23143_s22 = smov 32  }
  0x2d   :  { %25944 = sst [smem:[#allocation15_spill]] %s23291_s12 }
  0x2e   :  { %s23311_s12 = sld [smem:[%s25901_s0 + %s23141_s7]]   ;;  %s23328_s7 = smov 0  }
  0x2f   :  { %25947 = sst [smem:[#allocation18_spill]] %s23306_s30 }
  0x30   :  { %s23316_s19 = sld [smem:[%s25901_s0 + %s23142_s15]]  }
  0x31   :  { %s23326_s30 = sld [smem:[%s25901_s0 + %s23144_s28]]  }
  0x32   :  { %25946 = sst [smem:[#allocation17_spill]] %s23301_s27 }
  0x33   :  { %s23321_s27 = sld [smem:[%s25901_s0 + %s23143_s22]]  }
  0x34 LB: > { %s25948_s3 = sld [smem:[#allocation2_spill]]  ;;  %s15555_s10 = sadd.s32 4294967295, %s23110_s7   ;;  %s23110_s7 = sphi %s23328_s7, %s78_s7  }
  0x35   : > { %p15559_p0 = scmp.ge.s32.totalorder %s23110_s7, 1  ;;  %p924_p1 = scmp.lt.s32.totalorder %s23110_s7, 3 }
  0x37   : > { %p925_p2 = pnand %p15559_p0, %p924_p1 }
  0x38   : > { %p1013_p3 = scmp.lt.s32.totalorder (!%p925_p2), %s15555_s10, 1  ;;  %v15565_v0 = vld [vmem:[%s23166_s9 + $0x180] sm:$0xff] (!%p925_p2)  ;;  %vm1073_vm0 = vcmask (!%p925_p2), 785408   ;;  %v15566_v20 = vld [vmem:[%s23166_s9 + $0x188] sm:$0xff] (!%p925_p2)  ;;  %v15567_v22 = vld [vmem:[%s23166_s9 + $0x190] sm:$0xff] (!%p925_p2)  ;;  %vm2341_vm1 = vcmask (!%p925_p2), 261120  }
  0x39   : > { %928 = sbr.rel (%p925_p2) target bundleno = 5408 (0x1520), region = 148  ;;  %v1040_v1 = vld [vmem:[%s23166_s9] sm:$0xff] (!%p925_p2)  ;;  %18617 = vmatprep.mubr.msk.f32.mxu1 (!%p925_p2), %vm1073_vm0, %v15565_v0  ;;  %v1041_v21 = vld [vmem:[%s23166_s9 + $0x8] sm:$0xff] (!%p925_p2)  ;;  %v1042_v23 = vld [vmem:[%s23166_s9 + $0x10] sm:$0xff] (!%p925_p2)  ;;  %vm3995_vm2 = vcmask (!%p925_p2), 523264   ;;  %vm5259_vm3 = vcmask (!%p925_p2), 130048  }
  0x3a   : > { %18665 = vmatprep.mubr.msk.f32.mxu0 (!%p925_p2), %vm1073_vm0, %v1040_v1  ;;  %v15568_v24 = vld [vmem:[%s23166_s9 + $0x198] sm:$0xff] (!%p925_p2)  ;;  %v15569_v26 = vld [vmem:[%s23166_s9 + $0x1a0] sm:$0xff] (!%p925_p2)  ;;  %v15570_v28 = vld [vmem:[%s23166_s9 + $0x1a8] sm:$0xff] (!%p925_p2)  ;;  %s25949_s15 = sld [smem:[#allocation3_spill]] (!%p925_p2)  ;;  %s25950_s16 = sld [smem:[#allocation4_spill]] (!%p925_p2)  ;;  %vm9066_vm4 = vcmask (!%p925_p2), 64512  }
  0x3b   : > { %v1043_v25 = vld [vmem:[%s23166_s9 + $0x18] sm:$0xff] (!%p925_p2)  ;;  %v1044_v27 = vld [vmem:[%s23166_s9 + $0x20] sm:$0xff] (!%p925_p2)  ;;  %v1045_v29 = vld [vmem:[%s23166_s9 + $0x28] sm:$0xff] (!%p925_p2)  ;;  %s25951_s18 = sld [smem:[#allocation5_spill]] (!%p925_p2)  ;;  %s25952_s22 = sld [smem:[#allocation6_spill]] (!%p925_p2)  ;;  %vm13256_vm5 = vcmask (!%p925_p2), 1043456  }
  0x3c   : > { %v15571_v30 = vld [vmem:[%s23166_s9 + $0x1b0] sm:$0xff] (!%p925_p2)  ;;  %v15572_v32 = vld [vmem:[%s23166_s9 + $0x1b8] sm:$0xff] (!%p925_p2)  ;;  %v15573_v34 = vld [vmem:[%s23166_s9 + $0x1c0] sm:$0xff] (!%p925_p2)  ;;  %s25953_s23 = sld [smem:[#allocation7_spill]] (!%p925_p2)  ;;  %s25954_s26 = sld [smem:[#allocation8_spill]] (!%p925_p2)  ;;  %vm13243_vm6 = vcmask (!%p925_p2), 31744  }
  0x3d   : > { %v1046_v31 = vld [vmem:[%s23166_s9 + $0x30] sm:$0xff] (!%p925_p2)  ;;  %v1047_v33 = vld [vmem:[%s23166_s9 + $0x38] sm:$0xff] (!%p925_p2)  ;;  %v1048_v35 = vld [vmem:[%s23166_s9 + $0x40] sm:$0xff] (!%p925_p2)  ;;  %s25955_s28 = sld [smem:[#allocation9_spill]] (!%p925_p2)  ;;  %s25956_s1 = sld [smem:[#allocation12_spill]] (!%p925_p2)  ;;  %vm12522_vm7 = vcmask (!%p925_p2), 1024  }
  0x3e   : > { %v15574_v36 = vld [vmem:[%s23166_s9 + $0x1c8] sm:$0xff] (!%p925_p2)  ;;  %v15575_v38 = vld [vmem:[%s23166_s9 + $0x1d0] sm:$0xff] (!%p925_p2)  ;;  %v15576_v40 = vld [vmem:[%s23166_s9 + $0x1d8] sm:$0xff] (!%p925_p2)  ;;  %s25957_s2 = sld [smem:[#allocation13_spill]] (!%p925_p2)  ;;  %vm12520_vm8 = vcmask (!%p925_p2), 7168  }
  0x3f   : > { %v1049_v37 = vld [vmem:[%s23166_s9 + $0x48] sm:$0xff] (!%p925_p2)  ;;  %v1050_v39 = vld [vmem:[%s23166_s9 + $0x50] sm:$0xff] (!%p925_p2)  ;;  %v1051_v41 = vld [vmem:[%s23166_s9 + $0x58] sm:$0xff] (!%p925_p2) }
  0x40   : > { %s25970_s10 = smov (!%p1013_p3, %s15555_s10), 1  ;;  %v15577_v42 = vld [vmem:[%s23166_s9 + $0x1e0] sm:$0xff]  ;;  %v15578_v44 = vld [vmem:[%s23166_s9 + $0x1e8] sm:$0xff]  ;;  %v15579_v46 = vld [vmem:[%s23166_s9 + $0x1f0] sm:$0xff] }
  0x41   : > { %s22712_s0 = smul.u32 96, %s25970_s10  ;;  %v1052_v43 = vld [vmem:[%s23166_s9 + $0x60] sm:$0xff]  ;;  %v1053_v45 = vld [vmem:[%s23166_s9 + $0x68] sm:$0xff]  ;;  %v1054_v47 = vld [vmem:[%s23166_s9 + $0x70] sm:$0xff] }
  0x42   : > { %v15580_v48 = vld [vmem:[%s23166_s9 + $0x1f8] sm:$0xff]  ;;  %v15613_v50 = vld [vmem:[%s23166_s9 + $0x300] sm:$0xff]  ;;  %v15614_v52 = vld [vmem:[%s23166_s9 + $0x308] sm:$0xff] }
  0x43   : > { %s23344_s11 = scalar_lea.vmem %s23161_s5, %s22712_s0  ;;  %v1055_v49 = vld [vmem:[%s23166_s9 + $0x78] sm:$0xff]  ;;  %v15661_v51 = vld [vmem:[%s23166_s9 + $0x200] sm:$0xff]  ;;  %v15662_v53 = vld [vmem:[%s23166_s9 + $0x208] sm:$0xff]  ;;  %s25958_s0 = sld [smem:[#allocation10_spill]] }
  0x44   : > { %v1028_v2 = vld [vmem:[%s23344_s11] sm:$0xff]  ;;  %v1029_v3 = vld [vmem:[%s23344_s11 + $0x8] sm:$0xff]  ;;  %v1030_v4 = vld [vmem:[%s23344_s11 + $0x10] sm:$0xff] }
  0x45   : > { %v23349_v5 = vpack.c.bf16 %v1029_v3, %v1028_v2  ;;  %v1031_v6 = vld [vmem:[%s23344_s11 + $0x18] sm:$0xff]  ;;  %v1032_v8 = vld [vmem:[%s23344_s11 + $0x20] sm:$0xff]  ;;  %v1033_v9 = vld [vmem:[%s23344_s11 + $0x28] sm:$0xff] }
  0x46   : > { %v23352_v7 = vpack.c.bf16 %v1031_v6, %v1030_v4  ;;  %v23362_v10 = vpack.c.bf16 %v1033_v9, %v1032_v8  ;;  %v1034_v11 = vld [vmem:[%s23344_s11 + $0x30] sm:$0xff]  ;;  %v1035_v12 = vld [vmem:[%s23344_s11 + $0x38] sm:$0xff]  ;;  %v1036_v14 = vld [vmem:[%s23344_s11 + $0x40] sm:$0xff] }
  0x47   : > { %21053 = vmatprep.subr.bf16.mxu1 %v23349_v5  ;;  %21077 = vmatprep.subr.bf16.mxu0 %v23349_v5  ;;  %v23370_v13 = vpack.c.bf16 %v1035_v12, %v1034_v11  ;;  %v1037_v15 = vld [vmem:[%s23344_s11 + $0x48] sm:$0xff]  ;;  %v1038_v17 = vld [vmem:[%s23344_s11 + $0x50] sm:$0xff]  ;;  %v1039_v18 = vld [vmem:[%s23344_s11 + $0x58] sm:$0xff]  ;;  %s25917_s11 = smov 127  }
  0x48   : > { %21055 = vmatpush3.bf16.msra.mxu1 %v23349_v5  ;;  %21079 = vmatpush3.bf16.msra.mxu0 %v23349_v5  ;;  %v23378_v16 = vpack.c.bf16 %v1037_v15, %v1036_v14  ;;  %v23386_v19 = vpack.c.bf16 %v1039_v18, %v1038_v17  ;;  %v15615_v54 = vld [vmem:[%s23166_s9 + $0x310] sm:$0xff]  ;;  %v15616_v56 = vld [vmem:[%s23166_s9 + $0x318] sm:$0xff]  ;;  %v15617_v58 = vld [vmem:[%s23166_s9 + $0x320] sm:$0xff] }
  0x49   : > { %21057 = vmatprep.subr.bf16.mxu1 %v23352_v7  ;;  %21081 = vmatprep.subr.bf16.mxu0 %v23352_v7  ;;  %v15663_v55 = vld [vmem:[%s23166_s9 + $0x210] sm:$0xff]  ;;  %v15664_v57 = vld [vmem:[%s23166_s9 + $0x218] sm:$0xff]  ;;  %v15665_v59 = vld [vmem:[%s23166_s9 + $0x220] sm:$0xff] }
  0x4a   : > { %v15618_v60 = vld [vmem:[%s23166_s9 + $0x328] sm:$0xff]  ;;  %v15619_v62 = vld [vmem:[%s23166_s9 + $0x330] sm:$0xff]  ;;  %v15620_v0 = vld [vmem:[%s23166_s9 + $0x338] sm:$0xff] }
  0x4b   : > { %v15666_v61 = vld [vmem:[%s23166_s9 + $0x228] sm:$0xff]  ;;  %v15667_v63 = vld [vmem:[%s23166_s9 + $0x230] sm:$0xff]  ;;  %v15668_v1 = vld [vmem:[%s23166_s9 + $0x238] sm:$0xff] }
  0x4c   : > { %21059 = vmatpush3.bf16.msra.mxu1 %v23352_v7  ;;  %21083 = vmatpush3.bf16.msra.mxu0 %v23352_v7  ;;  %v15621_v2 = vld [vmem:[%s23166_s9 + $0x340] sm:$0xff]  ;;  %v15622_v4 = vld [vmem:[%s23166_s9 + $0x348] sm:$0xff]  ;;  %v15623_v8 = vld [vmem:[%s23166_s9 + $0x350] sm:$0xff] }
  0x4d   : > { %21061 = vmatprep.subr.bf16.mxu1 %v23362_v10  ;;  %21085 = vmatprep.subr.bf16.mxu0 %v23362_v10  ;;  %v15669_v3 = vld [vmem:[%s23166_s9 + $0x240] sm:$0xff]  ;;  %v15670_v6 = vld [vmem:[%s23166_s9 + $0x248] sm:$0xff]  ;;  %v15671_v9 = vld [vmem:[%s23166_s9 + $0x250] sm:$0xff] }
  0x4e   : > { %v15624_v11 = vld [vmem:[%s23166_s9 + $0x358] sm:$0xff]  ;;  %v15625_v14 = vld [vmem:[%s23166_s9 + $0x360] sm:$0xff]  ;;  %v15626_v17 = vld [vmem:[%s23166_s9 + $0x368] sm:$0xff] }
  0x4f   : > { %v15672_v12 = vld [vmem:[%s23166_s9 + $0x258] sm:$0xff]  ;;  %v15673_v15 = vld [vmem:[%s23166_s9 + $0x260] sm:$0xff]  ;;  %v15674_v18 = vld [vmem:[%s23166_s9 + $0x268] sm:$0xff] }
  0x50   : > { %21063 = vmatpush3.bf16.msra.mxu1 %v23362_v10  ;;  %21087 = vmatpush3.bf16.msra.mxu0 %v23362_v10 }
  0x51   : > { %21065 = vmatprep.subr.bf16.mxu1 %v23370_v13  ;;  %21089 = vmatprep.subr.bf16.mxu0 %v23370_v13 }
  0x54   : > { %21067 = vmatpush3.bf16.msra.mxu1 %v23370_v13  ;;  %21091 = vmatpush3.bf16.msra.mxu0 %v23370_v13 }
  0x55   : > { %21069 = vmatprep.subr.bf16.mxu1 %v23378_v16  ;;  %21093 = vmatprep.subr.bf16.mxu0 %v23378_v16 }
  0x58   : > { %21071 = vmatpush3.bf16.msra.mxu1 %v23378_v16  ;;  %21095 = vmatpush3.bf16.msra.mxu0 %v23378_v16 }
  0x59   : > { %21073 = vmatprep.subr.bf16.mxu1 %v23386_v19  ;;  %21097 = vmatprep.subr.bf16.mxu0 %v23386_v19 }
  0x5c   : > { %21075 = vmatpush3.bf16.msra.mxu1 %v23386_v19  ;;  %21099 = vmatpush3.bf16.msra.mxu0 %v23386_v19 }
  0x5d   : > { %21101 = vmatprep.subr.bf16.mxu0 %v23349_v5  ;;  %21125 = vmatprep.subr.bf16.mxu1 %v23349_v5 }
  0x5f   : > { %18618 = vmatmul.mubr.msk.f32.vlgmr.msra.gmra.mrb[0].mxu1 %vm1073_vm0, %v15566_v20  ;;  %18666 = vmatmul.mubr.msk.f32.vlgmr.msra.gmra.mrb[0].mxu0 %vm1073_vm0, %v1041_v21  ;;  %v15627_v20 = vld [vmem:[%s23166_s9 + $0x370] sm:$0xff] }
  0x60   : > { %18620 = vmatprep.mubr.msk.f32.mxu1 %vm1073_vm0, %v15567_v22  ;;  %18668 = vmatprep.mubr.msk.f32.mxu0 %vm1073_vm0, %v1042_v23  ;;  %v15675_v21 = vld [vmem:[%s23166_s9 + $0x270] sm:$0xff]  ;;  %v15628_v22 = vld [vmem:[%s23166_s9 + $0x378] sm:$0xff] }
  0x61   : > { %21103 = vmatpush3.bf16.msra.mxu0 %v23349_v5  ;;  %21127 = vmatpush3.bf16.msra.mxu1 %v23349_v5  ;;  %v15676_v23 = vld [vmem:[%s23166_s9 + $0x278] sm:$0xff] }
  0x62   : > { %21105 = vmatprep.subr.bf16.mxu0 %v23352_v7  ;;  %21129 = vmatprep.subr.bf16.mxu1 %v23352_v7 }
  0x63   : > { %18621 = vmatmul.mubr.msk.f32.gmra.mrb[2].mxu1 %vm1073_vm0, %v15568_v24  ;;  %18669 = vmatmul.mubr.msk.f32.gmra.mrb[2].mxu0 %vm1073_vm0, %v1043_v25  ;;  %v15645_v24 = vld [vmem:[%s23166_s9 + $0x80] sm:$0xff]  ;;  %v15646_v25 = vld [vmem:[%s23166_s9 + $0x88] sm:$0xff] }
  0x64   : > { %18623 = vmatprep.mubr.msk.f32.mxu1 %vm1073_vm0, %v15569_v26  ;;  %18671 = vmatprep.mubr.msk.f32.mxu0 %vm1073_vm0, %v1044_v27  ;;  %v15647_v26 = vld [vmem:[%s23166_s9 + $0x90] sm:$0xff]  ;;  %v15648_v27 = vld [vmem:[%s23166_s9 + $0x98] sm:$0xff] }
  0x65   : > { %21107 = vmatpush3.bf16.msra.mxu0 %v23352_v7  ;;  %21131 = vmatpush3.bf16.msra.mxu1 %v23352_v7 }
  0x66   : > { %21109 = vmatprep.subr.bf16.mxu0 %v23362_v10  ;;  %21133 = vmatprep.subr.bf16.mxu1 %v23362_v10 }
  0x67   : > { %18624 = vmatmul.mubr.msk.f32.gmra.mrb[4].mxu1 %vm1073_vm0, %v15570_v28  ;;  %18672 = vmatmul.mubr.msk.f32.gmra.mrb[4].mxu0 %vm1073_vm0, %v1045_v29  ;;  %v15649_v28 = vld [vmem:[%s23166_s9 + $0xa0] sm:$0xff]  ;;  %v15650_v29 = vld [vmem:[%s23166_s9 + $0xa8] sm:$0xff] }
  0x68   : > { %18626 = vmatprep.mubr.msk.f32.mxu1 %vm1073_vm0, %v15571_v30  ;;  %18674 = vmatprep.mubr.msk.f32.mxu0 %vm1073_vm0, %v1046_v31  ;;  %v15651_v30 = vld [vmem:[%s23166_s9 + $0xb0] sm:$0xff]  ;;  %v15652_v31 = vld [vmem:[%s23166_s9 + $0xb8] sm:$0xff] }
  0x69   : > { %21111 = vmatpush3.bf16.msra.mxu0 %v23362_v10  ;;  %21135 = vmatpush3.bf16.msra.mxu1 %v23362_v10 }
  0x6a   : > { %21113 = vmatprep.subr.bf16.mxu0 %v23370_v13  ;;  %21137 = vmatprep.subr.bf16.mxu1 %v23370_v13 }
  0x6b   : > { %18627 = vmatmul.mubr.msk.f32.gmra.mrb[6].mxu1 %vm1073_vm0, %v15572_v32  ;;  %18675 = vmatmul.mubr.msk.f32.gmra.mrb[6].mxu0 %vm1073_vm0, %v1047_v33  ;;  %v15653_v32 = vld [vmem:[%s23166_s9 + $0xc0] sm:$0xff]  ;;  %v15654_v33 = vld [vmem:[%s23166_s9 + $0xc8] sm:$0xff] }
  0x6c   : > { %18629 = vmatprep.mubr.msk.f32.mxu1 %vm1073_vm0, %v15573_v34  ;;  %18677 = vmatprep.mubr.msk.f32.mxu0 %vm1073_vm0, %v1048_v35  ;;  %v15655_v34 = vld [vmem:[%s23166_s9 + $0xd0] sm:$0xff]  ;;  %v15656_v35 = vld [vmem:[%s23166_s9 + $0xd8] sm:$0xff] }
  0x6d   : > { %21115 = vmatpush3.bf16.msra.mxu0 %v23370_v13  ;;  %21139 = vmatpush3.bf16.msra.mxu1 %v23370_v13 }
  0x6e   : > { %21117 = vmatprep.subr.bf16.mxu0 %v23378_v16  ;;  %21141 = vmatprep.subr.bf16.mxu1 %v23378_v16 }
  0x6f   : > { %18630 = vmatmul.mubr.msk.f32.gmra.mrb[8].mxu1 %vm1073_vm0, %v15574_v36  ;;  %18678 = vmatmul.mubr.msk.f32.gmra.mrb[8].mxu0 %vm1073_vm0, %v1049_v37  ;;  %v15657_v36 = vld [vmem:[%s23166_s9 + $0xe0] sm:$0xff]  ;;  %v15658_v37 = vld [vmem:[%s23166_s9 + $0xe8] sm:$0xff] }
  0x70   : > { %18632 = vmatprep.mubr.msk.f32.mxu1 %vm1073_vm0, %v15575_v38  ;;  %18680 = vmatprep.mubr.msk.f32.mxu0 %vm1073_vm0, %v1050_v39  ;;  %v15659_v38 = vld [vmem:[%s23166_s9 + $0xf0] sm:$0xff]  ;;  %v15660_v39 = vld [vmem:[%s23166_s9 + $0xf8] sm:$0xff] }
  0x71   : > { %21119 = vmatpush3.bf16.msra.mxu0 %v23378_v16  ;;  %21143 = vmatpush3.bf16.msra.mxu1 %v23378_v16 }
  0x72   : > { %21121 = vmatprep.subr.bf16.mxu0 %v23386_v19  ;;  %21145 = vmatprep.subr.bf16.mxu1 %v23386_v19 }
  0x73   : > { %18633 = vmatmul.mubr.msk.f32.gmra.mrb[10].mxu1 %vm1073_vm0, %v15576_v40  ;;  %18681 = vmatmul.mubr.msk.f32.gmra.mrb[10].mxu0 %vm1073_vm0, %v1051_v41  ;;  %v15709_v40 = vld [vmem:[%s23166_s9 + $0x380] sm:$0xff]  ;;  %v15710_v41 = vld [vmem:[%s23166_s9 + $0x388] sm:$0xff] }
  0x74   : > { %18635 = vmatprep.mubr.msk.f32.mxu1 %vm1073_vm0, %v15577_v42  ;;  %18683 = vmatprep.mubr.msk.f32.mxu0 %vm1073_vm0, %v1052_v43  ;;  %v15711_v42 = vld [vmem:[%s23166_s9 + $0x390] sm:$0xff]  ;;  %v15712_v43 = vld [vmem:[%s23166_s9 + $0x398] sm:$0xff] }
  0x75   : > { %21123 = vmatpush3.bf16.msra.mxu0 %v23386_v19  ;;  %21147 = vmatpush3.bf16.msra.mxu1 %v23386_v19 }
  0x76   : > { %21149 = vmatprep.subr.bf16.mxu1 %v23349_v5 }
  0x77   : > { %18636 = vmatmul.mubr.msk.f32.gmra.mrb[12].mxu1 %vm1073_vm0, %v15578_v44  ;;  %18684 = vmatmul.mubr.msk.f32.gmra.mrb[12].mxu0 %vm1073_vm0, %v1053_v45  ;;  %v15713_v44 = vld [vmem:[%s23166_s9 + $0x3a0] sm:$0xff]  ;;  %v15714_v45 = vld [vmem:[%s23166_s9 + $0x3a8] sm:$0xff] }
  0x78   : > { %18638 = vmatprep.mubr.msk.f32.mxu1 %vm1073_vm0, %v15579_v46  ;;  %18686 = vmatprep.mubr.msk.f32.mxu0 %vm1073_vm0, %v1054_v47  ;;  %v15715_v46 = vld [vmem:[%s23166_s9 + $0x3b0] sm:$0xff]  ;;  %v15716_v47 = vld [vmem:[%s23166_s9 + $0x3b8] sm:$0xff] }
  0x7b   : > { %18639 = vmatmul.mubr.msk.f32.gmra.mrb[14].mxu1 %vm1073_vm0, %v15580_v48  ;;  %18687 = vmatmul.mubr.msk.f32.gmra.mrb[14].mxu0 %vm1073_vm0, %v1055_v49  ;;  %v15717_v48 = vld [vmem:[%s23166_s9 + $0x3c0] sm:$0xff]  ;;  %v15718_v49 = vld [vmem:[%s23166_s9 + $0x3c8] sm:$0xff] }
  0x7c   : > { %18713 = vmatprep.mubr.msk.f32.mxu0 %vm1073_vm0, %v15613_v50  ;;  %18761 = vmatprep.mubr.msk.f32.mxu1 %vm1073_vm0, %v15661_v51  ;;  %v15719_v50 = vld [vmem:[%s23166_s9 + $0x3d0] sm:$0xff]  ;;  %v15720_v51 = vld [vmem:[%s23166_s9 + $0x3d8] sm:$0xff] }
  0x7f   : > { %18714 = vmatmul.mubr.msk.f32.vlgmr.msra.gmra.mrb[0].mxu0 %vm1073_vm0, %v15614_v52  ;;  %18762 = vmatmul.mubr.msk.f32.vlgmr.msra.gmra.mrb[16].mxu1 %vm1073_vm0, %v15662_v53  ;;  %v15721_v52 = vld [vmem:[%s23166_s9 + $0x3e0] sm:$0xff]  ;;  %v15722_v53 = vld [vmem:[%s23166_s9 + $0x3e8] sm:$0xff] }
  0x80   : > { %18716 = vmatprep.mubr.msk.f32.mxu0 %vm1073_vm0, %v15615_v54  ;;  %18764 = vmatprep.mubr.msk.f32.mxu1 %vm1073_vm0, %v15663_v55  ;;  %v15723_v54 = vld [vmem:[%s23166_s9 + $0x3f0] sm:$0xff]  ;;  %v15724_v55 = vld [vmem:[%s23166_s9 + $0x3f8] sm:$0xff] }
  0x81   : > { %21151 = vmatpush3.bf16.msra.mxu1 %v23349_v5 }
  0x82   : > { %21153 = vmatprep.subr.bf16.mxu1 %v23352_v7 }
  0x83   : > { %18717 = vmatmul.mubr.msk.f32.gmra.mrb[2].mxu0 %vm1073_vm0, %v15616_v56  ;;  %18765 = vmatmul.mubr.msk.f32.gmra.mrb[18].mxu1 %vm1073_vm0, %v15664_v57  ;;  %v15793_v56 = vld [vmem:[%s23166_s9 + $0x280] sm:$0xff]  ;;  %v15794_v57 = vld [vmem:[%s23166_s9 + $0x288] sm:$0xff] }
  0x84   : > { %18719 = vmatprep.mubr.msk.f32.mxu0 %vm1073_vm0, %v15617_v58  ;;  %18767 = vmatprep.mubr.msk.f32.mxu1 %vm1073_vm0, %v15665_v59  ;;  %v15795_v58 = vld [vmem:[%s23166_s9 + $0x290] sm:$0xff]  ;;  %v15796_v59 = vld [vmem:[%s23166_s9 + $0x298] sm:$0xff] }
  0x85   : > { %21155 = vmatpush3.bf16.msra.mxu1 %v23352_v7 }
  0x86   : > { %21157 = vmatprep.subr.bf16.mxu1 %v23362_v10 }
  0x87   : > { %18720 = vmatmul.mubr.msk.f32.gmra.mrb[4].mxu0 %vm1073_vm0, %v15618_v60  ;;  %18768 = vmatmul.mubr.msk.f32.gmra.mrb[20].mxu1 %vm1073_vm0, %v15666_v61  ;;  %v15797_v60 = vld [vmem:[%s23166_s9 + $0x2a0] sm:$0xff]  ;;  %v15798_v61 = vld [vmem:[%s23166_s9 + $0x2a8] sm:$0xff] }
  0x88   : > { %18722 = vmatprep.mubr.msk.f32.mxu0 %vm1073_vm0, %v15619_v62  ;;  %18770 = vmatprep.mubr.msk.f32.mxu1 %vm1073_vm0, %v15667_v63  ;;  %v15799_v62 = vld [vmem:[%s23166_s9 + $0x2b0] sm:$0xff]  ;;  %v15800_v63 = vld [vmem:[%s23166_s9 + $0x2b8] sm:$0xff] }
  0x89   : > { %21159 = vmatpush3.bf16.msra.mxu1 %v23362_v10 }
  0x8a   : > { %21161 = vmatprep.subr.bf16.mxu1 %v23370_v13 }
  0x8b   : > { %18723 = vmatmul.mubr.msk.f32.gmra.mrb[6].mxu0 %vm1073_vm0, %v15620_v0  ;;  %18771 = vmatmul.mubr.msk.f32.gmra.mrb[22].mxu1 %vm1073_vm0, %v15668_v1  ;;  %v15801_v0 = vld [vmem:[%s23166_s9 + $0x2c0] sm:$0xff]  ;;  %v15802_v1 = vld [vmem:[%s23166_s9 + $0x2c8] sm:$0xff] }
  0x8c   : > { %18725 = vmatprep.mubr.msk.f32.mxu0 %vm1073_vm0, %v15621_v2  ;;  %18773 = vmatprep.mubr.msk.f32.mxu1 %vm1073_vm0, %v15669_v3  ;;  %v15803_v2 = vld [vmem:[%s23166_s9 + $0x2d0] sm:$0xff]  ;;  %v15804_v3 = vld [vmem:[%s23166_s9 + $0x2d8] sm:$0xff] }
  0x8d   : > { %21163 = vmatpush3.bf16.msra.mxu1 %v23370_v13 }
  0x8e   : > { %21165 = vmatprep.subr.bf16.mxu1 %v23378_v16 }
  0x8f   : > { %18726 = vmatmul.mubr.msk.f32.gmra.mrb[8].mxu0 %vm1073_vm0, %v15622_v4  ;;  %18774 = vmatmul.mubr.msk.f32.gmra.mrb[24].mxu1 %vm1073_vm0, %v15670_v6  ;;  %v15741_v4 = vld [vmem:[%s23171_s13 + $0x20] sm:$0xff]  ;;  %v15742_v6 = vld [vmem:[%s23171_s13 + $0x28] sm:$0xff] }
  0x90   : > { %18728 = vmatprep.mubr.msk.f32.mxu0 %vm1073_vm0, %v15623_v8  ;;  %18776 = vmatprep.mubr.msk.f32.mxu1 %vm1073_vm0, %v15671_v9  ;;  %v15743_v8 = vld [vmem:[%s23171_s13 + $0x30] sm:$0xff]  ;;  %v15805_v9 = vld [vmem:[%s23166_s9 + $0x2e0] sm:$0xff] }
  0x91   : > { %21167 = vmatpush3.bf16.msra.mxu1 %v23378_v16 }
  0x92   : > { %21169 = vmatprep.subr.bf16.mxu1 %v23386_v19 }
  0x93   : > { %18729 = vmatmul.mubr.msk.f32.gmra.mrb[10].mxu0 %vm1073_vm0, %v15624_v11  ;;  %18777 = vmatmul.mubr.msk.f32.gmra.mrb[26].mxu1 %vm1073_vm0, %v15672_v12  ;;  %v21196_v11 = vpack.c.bf16 %v15742_v6, %v15741_v4  ;;  %v15744_v12 = vld [vmem:[%s23171_s13 + $0x38] sm:$0xff]  ;;  %v3598_v4 = vld [vmem:[%s23176_s17 + $0x50] sm:$0xff] }
  0x94   : > { %18731 = vmatprep.mubr.msk.f32.mxu0 %vm1073_vm0, %v15625_v14  ;;  %18779 = vmatprep.mubr.msk.f32.mxu1 %vm1073_vm0, %v15673_v15  ;;  %v21200_v14 = vpack.c.bf16 %v15744_v12, %v15743_v8  ;;  %v15806_v15 = vld [vmem:[%s23166_s9 + $0x2e8] sm:$0xff] }
  0x95   : > { %21171 = vmatpush3.bf16.msra.mxu1 %v23386_v19  ;;  %21197 = vmatprep.subr.bf16.mxu0 %v21196_v11 }
  0x96   : > { %21173 = vmatprep.subr.bf16.mxu1 %v23349_v5  ;;  %21199 = vmatpush3.bf16.msra.mxu0 %v21196_v11  ;;  %v3600_v11 = vld [vmem:[%s23176_s17 + $0x60] sm:$0xff] }
  0x97   : > { %18732 = vmatmul.mubr.msk.f32.gmra.mrb[12].mxu0 %vm1073_vm0, %v15626_v17  ;;  %18780 = vmatmul.mubr.msk.f32.gmra.mrb[28].mxu1 %vm1073_vm0, %v15674_v18  ;;  %v15807_v17 = vld [vmem:[%s23166_s9 + $0x2f0] sm:$0xff]  ;;  %v15808_v18 = vld [vmem:[%s23166_s9 + $0x2f8] sm:$0xff] }
  0x98   : > { %18734 = vmatprep.mubr.msk.f32.mxu0 %vm1073_vm0, %v15627_v20  ;;  %18782 = vmatprep.mubr.msk.f32.mxu1 %vm1073_vm0, %v15675_v21  ;;  %v15777_v20 = vld [vmem:[%s23166_s9 + $0x100] sm:$0xff]  ;;  %v15778_v21 = vld [vmem:[%s23166_s9 + $0x108] sm:$0xff] }
  0x99   : > { %21201 = vmatprep.subr.bf16.mxu0 %v21200_v14 }
  0x9a   : > { %21203 = vmatpush3.bf16.msra.mxu0 %v21200_v14 }
  0x9b   : > { %18735 = vmatmul.mubr.msk.f32.gmra.mrb[14].mxu0 %vm1073_vm0, %v15628_v22  ;;  %18783 = vmatmul.mubr.msk.f32.gmra.mrb[30].mxu1 %vm1073_vm0, %v15676_v23  ;;  %v15779_v22 = vld [vmem:[%s23166_s9 + $0x110] sm:$0xff]  ;;  %v15780_v23 = vld [vmem:[%s23166_s9 + $0x118] sm:$0xff] }
  0x9c   : > { %18809 = vmatprep.mubr.msk.f32.mxu1 %vm1073_vm0, %v15645_v24  ;;  %v15781_v24 = vld [vmem:[%s23166_s9 + $0x120] sm:$0xff] }
  0x9f   : > { %18810 = vmatmul.mubr.msk.f32.vlgmr.msra.gmra.mrb[16].mxu1 %vm1073_vm0, %v15646_v25  ;;  %v15782_v25 = vld [vmem:[%s23166_s9 + $0x128] sm:$0xff] }
  0xa0   : > { %18812 = vmatprep.mubr.msk.f32.mxu1 %vm1073_vm0, %v15647_v26  ;;  %21175 = vmatpush3.bf16.msra.mxu1 %v23349_v5  ;;  %v15783_v26 = vld [vmem:[%s23166_s9 + $0x130] sm:$0xff] }
  0xa1   : > { %21177 = vmatprep.subr.bf16.mxu1 %v23352_v7 }
  0xa3   : > { %18813 = vmatmul.mubr.msk.f32.gmra.mrb[18].mxu1 %vm1073_vm0, %v15648_v27  ;;  %v15785_v27 = vld [vmem:[%s23166_s9 + $0x140] sm:$0xff] }
  0xa4   : > { %18815 = vmatprep.mubr.msk.f32.mxu1 %vm1073_vm0, %v15649_v28  ;;  %21179 = vmatpush3.bf16.msra.mxu1 %v23352_v7  ;;  %v15787_v28 = vld [vmem:[%s23166_s9 + $0x150] sm:$0xff] }
  0xa5   : > { %21181 = vmatprep.subr.bf16.mxu1 %v23362_v10 }
  0xa7   : > { %18816 = vmatmul.mubr.msk.f32.gmra.mrb[20].mxu1 %vm1073_vm0, %v15650_v29  ;;  %v15789_v29 = vld [vmem:[%s23166_s9 + $0x160] sm:$0xff] }
  0xa8   : > { %18818 = vmatprep.mubr.msk.f32.mxu1 %vm1073_vm0, %v15651_v30  ;;  %21183 = vmatpush3.bf16.msra.mxu1 %v23362_v10  ;;  %v15791_v30 = vld [vmem:[%s23166_s9 + $0x170] sm:$0xff] }
  0xa9   : > { %21185 = vmatprep.subr.bf16.mxu1 %v23370_v13 }
  0xab   : > { %18819 = vmatmul.mubr.msk.f32.gmra.mrb[22].mxu1 %vm1073_vm0, %v15652_v31  ;;  %v15841_v31 = vld [vmem:[%s23166_s9 + $0x400] sm:$0xff] }
  0xac   : > { %18821 = vmatprep.mubr.msk.f32.mxu1 %vm1073_vm0, %v15653_v32  ;;  %21187 = vmatpush3.bf16.msra.mxu1 %v23370_v13  ;;  %v15842_v32 = vld [vmem:[%s23166_s9 + $0x408] sm:$0xff] }
  0xad   : > { %21189 = vmatprep.subr.bf16.mxu1 %v23378_v16 }
  0xaf   : > { %18822 = vmatmul.mubr.msk.f32.gmra.mrb[24].mxu1 %vm1073_vm0, %v15654_v33  ;;  %v15843_v33 = vld [vmem:[%s23166_s9 + $0x410] sm:$0xff] }
  0xb0   : > { %18824 = vmatprep.mubr.msk.f32.mxu1 %vm1073_vm0, %v15655_v34  ;;  %21191 = vmatpush3.bf16.msra.mxu1 %v23378_v16  ;;  %v15845_v34 = vld [vmem:[%s23166_s9 + $0x420] sm:$0xff] }
  0xb1   : > { %21193 = vmatprep.subr.bf16.mxu1 %v23386_v19 }
  0xb3   : > { %18825 = vmatmul.mubr.msk.f32.gmra.mrb[26].mxu1 %vm1073_vm0, %v15656_v35  ;;  %v15846_v35 = vld [vmem:[%s23166_s9 + $0x428] sm:$0xff] }
  0xb4   : > { %18827 = vmatprep.mubr.msk.f32.mxu1 %vm1073_vm0, %v15657_v36  ;;  %21195 = vmatpush3.bf16.msra.mxu1 %v23386_v19  ;;  %v15847_v36 = vld [vmem:[%s23166_s9 + $0x430] sm:$0xff] }
  0xb5   : > { %21213 = vmatprep.subr.bf16.mxu1 %v23349_v5 }
  0xb7   : > { %18828 = vmatmul.mubr.msk.f32.gmra.mrb[28].mxu1 %vm1073_vm0, %v15658_v37  ;;  %v15848_v37 = vld [vmem:[%s23166_s9 + $0x438] sm:$0xff] }
  0xb8   : > { %18830 = vmatprep.mubr.msk.f32.mxu1 %vm1073_vm0, %v15659_v38  ;;  %v15849_v38 = vld [vmem:[%s23166_s9 + $0x440] sm:$0xff] }
  0xbb   : > { %18831 = vmatmul.mubr.msk.f32.gmra.mrb[30].mxu1 %vm1073_vm0, %v15660_v39  ;;  %v1686_v39 = vld [vmem:[%s23171_s13] sm:$0xff] }
  0xbc   : > { %18857 = vmatprep.mubr.msk.f32.mxu1 %vm1073_vm0, %v15709_v40  ;;  %v1687_v40 = vld [vmem:[%s23171_s13 + $0x8] sm:$0xff] }
  0xbf   : > { %18858 = vmatmul.mubr.msk.f32.vlgmr.msra.gmra.mrb[16].mxu1 %vm1073_vm0, %v15710_v41  ;;  %v23753_v41 = vpack.c.bf16 %v1687_v40, %v1686_v39 }
  0xc0   : > { %18860 = vmatprep.mubr.msk.f32.mxu1 %vm1073_vm0, %v15711_v42  ;;  %21215 = vmatpush3.bf16.msra.mxu1 %v23349_v5  ;;  %v15850_v42 = vld [vmem:[%s23166_s9 + $0x448] sm:$0xff] }
  0xc1   : > { %21217 = vmatprep.subr.bf16.mxu1 %v23352_v7  ;;  %21205 = vmatprep.subr.bf16.mxu0 %v23753_v41 }
  0xc3   : > { %18861 = vmatmul.mubr.msk.f32.gmra.mrb[18].mxu1 %vm1073_vm0, %v15712_v43  ;;  %v15851_v43 = vld [vmem:[%s23166_s9 + $0x450] sm:$0xff] }
  0xc4   : > { %18863 = vmatprep.mubr.msk.f32.mxu1 %vm1073_vm0, %v15713_v44  ;;  %21219 = vmatpush3.bf16.msra.mxu1 %v23352_v7  ;;  %v23145_v44 = vmov 0  }
  0xc5   : > { %21221 = vmatprep.subr.bf16.mxu1 %v23362_v10  ;;  %22762 = vset.pattern.permute.xlu0 %v23145_v44 }
  0xc6   : > { %22763 = vset.pattern.permute.xlu1 %v23145_v44  ;;  %v6514_v44 = vld [vmem:[%s23201_s8 + $0x50] sm:$0xff] }
  0xc7   : > { %18864 = vmatmul.mubr.msk.f32.gmra.mrb[20].mxu1 %vm1073_vm0, %v15714_v45  ;;  %v3588_v45 = vld [vmem:[%s23176_s17] sm:$0xff] }
  0xc8   : > { %18866 = vmatprep.mubr.msk.f32.mxu1 %vm1073_vm0, %v15715_v46  ;;  %21223 = vmatpush3.bf16.msra.mxu1 %v23362_v10  ;;  %v15852_v46 = vld [vmem:[%s23166_s9 + $0x458] sm:$0xff] }
  0xc9   : > { %21225 = vmatprep.subr.bf16.mxu1 %v23370_v13  ;;  %3606 = vperm.xlu0 %22762, %v3588_v45  }
  0xcb   : > { %18867 = vmatmul.mubr.msk.f32.gmra.mrb[22].mxu1 %vm1073_vm0, %v15716_v47  ;;  %v15853_v47 = vld [vmem:[%s23166_s9 + $0x460] sm:$0xff] }
  0xcc   : > { %18869 = vmatprep.mubr.msk.f32.mxu1 %vm1073_vm0, %v15717_v48  ;;  %21227 = vmatpush3.bf16.msra.mxu1 %v23370_v13  ;;  %v3590_v48 = vld [vmem:[%s23176_s17 + $0x10] sm:$0xff] }
  0xcd   : > { %21229 = vmatprep.subr.bf16.mxu1 %v23378_v16  ;;  %3616 = vperm.xlu1 %22763, %v3590_v48  }
  0xcf   : > { %18870 = vmatmul.mubr.msk.f32.gmra.mrb[24].mxu1 %vm1073_vm0, %v15718_v49  ;;  %v3589_v49 = vld [vmem:[%s23176_s17 + $0x8] sm:$0xff] }
  0xd0   : > { %18872 = vmatprep.mubr.msk.f32.mxu1 %vm1073_vm0, %v15719_v50  ;;  %21231 = vmatpush3.bf16.msra.mxu1 %v23378_v16 }
  0xd1   : > { %21233 = vmatprep.subr.bf16.mxu1 %v23386_v19  ;;  %3611 = vperm.xlu0 %22762, %v3589_v49   ;;  %v6515_v49 = vld [vmem:[%s23201_s8 + $0x58] sm:$0xff] }
  0xd3   : > { %18873 = vmatmul.mubr.msk.f32.gmra.mrb[26].mxu1 %vm1073_vm0, %v15720_v51 }
  0xd4   : > { %18875 = vmatprep.mubr.msk.f32.mxu1 %vm1073_vm0, %v15721_v52  ;;  %21235 = vmatpush3.bf16.msra.mxu1 %v23386_v19  ;;  %v15854_v52 = vld [vmem:[%s23166_s9 + $0x468] sm:$0xff] }
  0xd5   : > { %21237 = vmatprep.subr.bf16.mxu1 %v23349_v5 }
  0xd7   : > { %18876 = vmatmul.mubr.msk.f32.gmra.mrb[28].mxu1 %vm1073_vm0, %v15722_v53  ;;  %v15855_v53 = vld [vmem:[%s23166_s9 + $0x470] sm:$0xff] }
  0xd8   : > { %18878 = vmatprep.mubr.msk.f32.mxu1 %vm1073_vm0, %v15723_v54  ;;  %v3591_v54 = vld [vmem:[%s23176_s17 + $0x18] sm:$0xff] }
  0xd9   : > { %3621 = vperm.xlu1 %22763, %v3591_v54  }
  0xdb   : > { %18879 = vmatmul.mubr.msk.f32.gmra.mrb[30].mxu1 %vm1073_vm0, %v15724_v55  ;;  %v3592_v55 = vld [vmem:[%s23176_s17 + $0x20] sm:$0xff] }
  0xdc   : > { %18969 = vmatprep.mubr.msk.f32.mxu1 %vm1073_vm0, %v15793_v56  ;;  %3626 = vperm.xlu0 %22762, %v3592_v55   ;;  %v6517_v55 = vld [vmem:[%s23201_s8 + $0x68] sm:$0xff] }
  0xdf   : > { %18970 = vmatmul.mubr.msk.f32.vlgmr.msra.gmra.mrb[32].mxu1 %vm1073_vm0, %v15794_v57 }
  0xe0   : > { %18972 = vmatprep.mubr.msk.f32.mxu1 %vm1073_vm0, %v15795_v58  ;;  %21239 = vmatpush3.bf16.msra.mxu1 %v23349_v5  ;;  %v15856_v58 = vld [vmem:[%s23166_s9 + $0x478] sm:$0xff] }
  0xe1   : > { %21241 = vmatprep.subr.bf16.mxu1 %v23352_v7 }
  0xe3   : > { %18973 = vmatmul.mubr.msk.f32.gmra.mrb[34].mxu1 %vm1073_vm0, %v15796_v59  ;;  %v3593_v59 = vld [vmem:[%s23176_s17 + $0x28] sm:$0xff] }
  0xe4   : > { %18975 = vmatprep.mubr.msk.f32.mxu1 %vm1073_vm0, %v15797_v60  ;;  %21243 = vmatpush3.bf16.msra.mxu1 %v23352_v7  ;;  %v3594_v60 = vld [vmem:[%s23176_s17 + $0x30] sm:$0xff] }
  0xe5   : > { %21245 = vmatprep.subr.bf16.mxu1 %v23362_v10  ;;  %3631 = vperm.xlu1 %22763, %v3593_v59  }
  0xe6   : > { %3636 = vperm.xlu0 %22762, %v3594_v60  }
  0xe7   : > { %18976 = vmatmul.mubr.msk.f32.gmra.mrb[36].mxu1 %vm1073_vm0, %v15798_v61 }
  0xe8   : > { %18978 = vmatprep.mubr.msk.f32.mxu1 %vm1073_vm0, %v15799_v62  ;;  %21247 = vmatpush3.bf16.msra.mxu1 %v23362_v10 }
  0xe9   : > { %21249 = vmatprep.subr.bf16.mxu1 %v23370_v13 }
  0xeb   : > { %18979 = vmatmul.mubr.msk.f32.gmra.mrb[38].mxu1 %vm1073_vm0, %v15800_v63  ;;  %v3595_v63 = vld [vmem:[%s23176_s17 + $0x38] sm:$0xff] }
  0xec   : > { %18981 = vmatprep.mubr.msk.f32.mxu1 %vm1073_vm0, %v15801_v0  ;;  %21251 = vmatpush3.bf16.msra.mxu1 %v23370_v13  ;;  %v3596_v0 = vld [vmem:[%s23176_s17 + $0x40] sm:$0xff] }
  0xed   : > { %21253 = vmatprep.subr.bf16.mxu1 %v23378_v16  ;;  %3641 = vperm.xlu1 %22763, %v3595_v63  }
  0xee   : > { %3646 = vperm.xlu0 %22762, %v3596_v0  }
  0xef   : > { %18982 = vmatmul.mubr.msk.f32.gmra.mrb[40].mxu1 %vm1073_vm0, %v15802_v1 }
  0xf0   : > { %18984 = vmatprep.mubr.msk.f32.mxu1 %vm1073_vm0, %v15803_v2  ;;  %21255 = vmatpush3.bf16.msra.mxu1 %v23378_v16 }
  0xf1   : > { %21257 = vmatprep.subr.bf16.mxu1 %v23386_v19 }
  0xf2   : > { %3656 = vperm.xlu0 %22762, %v3598_v4   ;;  %v11158_v4 = vld [vmem:[%s23226_s6] sm:$0xff] }
  0xf3   : > { %18985 = vmatmul.mubr.msk.f32.gmra.mrb[42].mxu1 %vm1073_vm0, %v15804_v3  ;;  %v3597_v3 = vld [vmem:[%s23176_s17 + $0x48] sm:$0xff] }
  0xf4   : > { %18987 = vmatprep.mubr.msk.f32.mxu1 %vm1073_vm0, %v15805_v9  ;;  %21259 = vmatpush3.bf16.msra.mxu1 %v23386_v19  ;;  %v3599_v9 = vld [vmem:[%s23176_s17 + $0x58] sm:$0xff] }
  0xf5   : > { %21261 = vmatprep.subr.bf16.mxu1 %v23349_v5  ;;  %3651 = vperm.xlu1 %22763, %v3597_v3   ;;  %v11175_v3 = vld [vmem:[%s23226_s6 + $0x88] sm:$0xff] }
  0xf6   : > { %3666 = vperm.xlu0 %22762, %v3600_v11   ;;  %v11177_v11 = vld [vmem:[%s23226_s6 + $0x98] sm:$0xff] }
  0xf7   : > { %18988 = vmatmul.mubr.msk.f32.gmra.mrb[44].mxu1 %vm1073_vm0, %v15806_v15  ;;  %v3601_v15 = vld [vmem:[%s23176_s17 + $0x68] sm:$0xff] }
  0xf8   : > { %18990 = vmatprep.mubr.msk.f32.mxu1 %vm1073_vm0, %v15807_v17  ;;  %v3602_v17 = vld [vmem:[%s23176_s17 + $0x70] sm:$0xff] }
  0xf9   : > { %3661 = vperm.xlu1 %22763, %v3599_v9   ;;  %v11176_v9 = vld [vmem:[%s23226_s6 + $0x90] sm:$0xff] }
  0xfa   : > { %3676 = vperm.xlu0 %22762, %v3602_v17   ;;  %v11179_v17 = vld [vmem:[%s23226_s6 + $0xa8] sm:$0xff] }
  0xfb   : > { %18991 = vmatmul.mubr.msk.f32.gmra.mrb[46].mxu1 %vm1073_vm0, %v15808_v18 }
  0xfc   : > { %19017 = vmatprep.mubr.msk.f32.mxu1 %vm1073_vm0, %v15777_v20 }
  0xfd   : > { %3671 = vperm.xlu1 %22763, %v3601_v15   ;;  %v11178_v15 = vld [vmem:[%s23226_s6 + $0xa0] sm:$0xff] }
  0xff   : > { %19018 = vmatmul.mubr.msk.f32.vlgmr.msra.gmra.mrb[32].mxu1 %vm1073_vm0, %v15778_v21  ;;  %v3603_v21 = vld [vmem:[%s23176_s17 + $0x78] sm:$0xff] }
 0x100   : > { %19020 = vmatprep.mubr.msk.f32.mxu1 %vm1073_vm0, %v15779_v22  ;;  %21263 = vmatpush3.bf16.msra.mxu1 %v23349_v5  ;;  %v15784_v5 = vld [vmem:[%s23166_s9 + $0x138] sm:$0xff]  ;;  %v6504_v22 = vld [vmem:[%s23201_s8] sm:$0xff] }
 0x101   : > { %21265 = vmatprep.subr.bf16.mxu1 %v23352_v7  ;;  %3681 = vperm.xlu1 %22763, %v3603_v21   ;;  %v11180_v21 = vld [vmem:[%s23226_s6 + $0xb0] sm:$0xff] }
 0x102   : > { %6522 = vperm.xlu0 %22762, %v6504_v22   ;;  %v11181_v22 = vld [vmem:[%s23226_s6 + $0xb8] sm:$0xff] }
 0x103   : > { %19021 = vmatmul.mubr.msk.f32.gmra.mrb[34].mxu1 %vm1073_vm0, %v15780_v23 }
 0x104   : > { %19023 = vmatprep.mubr.msk.f32.mxu1 %vm1073_vm0, %v15781_v24  ;;  %21267 = vmatpush3.bf16.msra.mxu1 %v23352_v7  ;;  %v15786_v7 = vld [vmem:[%s23166_s9 + $0x148] sm:$0xff] }
 0x105   : > { %21269 = vmatprep.subr.bf16.mxu1 %v23362_v10 }
 0x107   : > { %19024 = vmatmul.mubr.msk.f32.gmra.mrb[36].mxu1 %vm1073_vm0, %v15782_v25  ;;  %v6505_v25 = vld [vmem:[%s23201_s8 + $0x8] sm:$0xff] }
 0x108   : > { %19026 = vmatprep.mubr.msk.f32.mxu1 %vm1073_vm0, %v15783_v26  ;;  %21271 = vmatpush3.bf16.msra.mxu1 %v23362_v10  ;;  %v15788_v10 = vld [vmem:[%s23166_s9 + $0x158] sm:$0xff]  ;;  %v6506_v26 = vld [vmem:[%s23201_s8 + $0x10] sm:$0xff] }
 0x109   : > { %21273 = vmatprep.subr.bf16.mxu1 %v23370_v13  ;;  %6527 = vperm.xlu1 %22763, %v6505_v25   ;;  %v11182_v25 = vld [vmem:[%s23226_s6 + $0xc0] sm:$0xff] }
 0x10a   : > { %6532 = vperm.xlu0 %22762, %v6506_v26   ;;  %v1688_v26 = vld [vmem:[%s23171_s13 + $0x10] sm:$0xff] }
 0x10b   : > { %19027 = vmatmul.mubr.msk.f32.gmra.mrb[38].mxu1 %vm1073_vm0, %v15784_v5 }
 0x10c   : > { %19029 = vmatprep.mubr.msk.f32.mxu1 %vm1073_vm0, %v15785_v27  ;;  %21275 = vmatpush3.bf16.msra.mxu1 %v23370_v13  ;;  %v15790_v13 = vld [vmem:[%s23166_s9 + $0x168] sm:$0xff] }
 0x10d   : > { %21277 = vmatprep.subr.bf16.mxu1 %v23378_v16 }
 0x10f   : > { %19030 = vmatmul.mubr.msk.f32.gmra.mrb[40].mxu1 %vm1073_vm0, %v15786_v7 }
 0x110   : > { %19032 = vmatprep.mubr.msk.f32.mxu1 %vm1073_vm0, %v15787_v28  ;;  %21279 = vmatpush3.bf16.msra.mxu1 %v23378_v16  ;;  %v15792_v16 = vld [vmem:[%s23166_s9 + $0x178] sm:$0xff] }
 0x111   : > { %21281 = vmatprep.subr.bf16.mxu1 %v23386_v19  ;;  %v6507_v28 = vld [vmem:[%s23201_s8 + $0x18] sm:$0xff] }
 0x112   : > { %6537 = vperm.xlu1 %22763, %v6507_v28   ;;  %v11166_v28 = vld [vmem:[%s23226_s6 + $0x40] sm:$0xff] }
 0x113   : > { %19033 = vmatmul.mubr.msk.f32.gmra.mrb[42].mxu1 %vm1073_vm0, %v15788_v10  ;;  %v6508_v10 = vld [vmem:[%s23201_s8 + $0x20] sm:$0xff] }
 0x114   : > { %19035 = vmatprep.mubr.msk.f32.mxu1 %vm1073_vm0, %v15789_v29  ;;  %21283 = vmatpush3.bf16.msra.mxu1 %v23386_v19  ;;  %v15844_v19 = vld [vmem:[%s23166_s9 + $0x418] sm:$0xff] }
 0x115   : > { %6542 = vperm.xlu0 %22762, %v6508_v10  }
 0x117   : > { %19036 = vmatmul.mubr.msk.f32.gmra.mrb[44].mxu1 %vm1073_vm0, %v15790_v13 }
 0x118   : > { %19038 = vmatprep.mubr.msk.f32.mxu1 %vm1073_vm0, %v15791_v30 }
 0x11b   : > { %19039 = vmatmul.mubr.msk.f32.gmra.mrb[46].mxu1 %vm1073_vm0, %v15792_v16 }
 0x11c   : > { %19065 = vmatprep.mubr.msk.f32.mxu1 %vm1073_vm0, %v15841_v31  ;;  %v6509_v31 = vld [vmem:[%s23201_s8 + $0x28] sm:$0xff] }
 0x11d   : > { %6547 = vperm.xlu1 %22763, %v6509_v31   ;;  %v11167_v31 = vld [vmem:[%s23226_s6 + $0x48] sm:$0xff] }
 0x11f   : > { %19066 = vmatmul.mubr.msk.f32.vlgmr.msra.gmra.mrb[32].mxu1 %vm1073_vm0, %v15842_v32  ;;  %v6510_v32 = vld [vmem:[%s23201_s8 + $0x30] sm:$0xff] }
 0x120   : > { %19068 = vmatprep.mubr.msk.f32.mxu1 %vm1073_vm0, %v15843_v33  ;;  %6552 = vperm.xlu0 %22762, %v6510_v32   ;;  %v15873_v32 = vld [vmem:[%s23171_s13 + $0x40] sm:$0xff] }
 0x123   : > { %19069 = vmatmul.mubr.msk.f32.gmra.mrb[34].mxu1 %vm1073_vm0, %v15844_v19 }
 0x124   : > { %19071 = vmatprep.mubr.msk.f32.mxu1 %vm1073_vm0, %v15845_v34 }
 0x127   : > { %19072 = vmatmul.mubr.msk.f32.gmra.mrb[36].mxu1 %vm1073_vm0, %v15846_v35 }
 0x128   : > { %19074 = vmatprep.mubr.msk.f32.mxu1 %vm1073_vm0, %v15847_v36  ;;  %v6511_v36 = vld [vmem:[%s23201_s8 + $0x38] sm:$0xff] }
 0x129   : > { %6557 = vperm.xlu1 %22763, %v6511_v36  }
 0x12b   : > { %19075 = vmatmul.mubr.msk.f32.gmra.mrb[38].mxu1 %vm1073_vm0, %v15848_v37  ;;  %v6512_v37 = vld [vmem:[%s23201_s8 + $0x40] sm:$0xff] }
 0x12c   : > { %19077 = vmatprep.mubr.msk.f32.mxu1 %vm1073_vm0, %v15849_v38  ;;  %6562 = vperm.xlu0 %22762, %v6512_v37  }
 0x12f   : > { %19078 = vmatmul.mubr.msk.f32.gmra.mrb[40].mxu1 %vm1073_vm0, %v15850_v42 }
 0x130   : > { %19080 = vmatprep.mubr.msk.f32.mxu1 %vm1073_vm0, %v15851_v43  ;;  %v6513_v43 = vld [vmem:[%s23201_s8 + $0x48] sm:$0xff]  ;;  %6572 = vperm.xlu0 %22762, %v6514_v44  }
 0x131   : > { %6567 = vperm.xlu1 %22763, %v6513_v43   ;;  %v11168_v43 = vld [vmem:[%s23226_s6 + $0x50] sm:$0xff] }
 0x132   : > { %v18619_v50 = vpop.f32.mrb[0].mxu1 }
 0x133   : > { %v1188_v51 = vpop.f32.mrb[1].mxu1  ;;  %19081 = vmatmul.mubr.msk.f32.gmra.mrb[42].mxu1 %vm1073_vm0, %v15852_v46 }
 0x134   : > { %19083 = vmatprep.mubr.msk.f32.mxu1 %vm1073_vm0, %v15853_v47 }
 0x135   : > { %6577 = vperm.xlu1 %22763, %v6515_v49  }
 0x136   : > { %v18622_v56 = vpop.f32.mrb[2].mxu1 }
 0x137   : > { %v1198_v57 = vpop.f32.mrb[3].mxu1  ;;  %19084 = vmatmul.mubr.msk.f32.gmra.mrb[44].mxu1 %vm1073_vm0, %v15854_v52 }
 0x138   : > { %19086 = vmatprep.mubr.msk.f32.mxu1 %vm1073_vm0, %v15855_v53 }
 0x139   : > { %6587 = vperm.xlu1 %22763, %v6517_v55  }
 0x13a   : > { %v18625_v61 = vpop.f32.mrb[4].mxu1 }
 0x13b   : > { %v1208_v62 = vpop.f32.mrb[5].mxu1  ;;  %19087 = vmatmul.mubr.msk.f32.gmra.mrb[46].mxu1 %vm1073_vm0, %v15856_v58 }
 0x13e   : > { %v18628_v1 = vpop.f32.mrb[6].mxu1 }
 0x13f   : > { %v1218_v2 = vpop.f32.mrb[7].mxu1 }
 0x142   : > { %v18631_v6 = vpop.f32.mrb[8].mxu1 }
 0x143   : > { %v1228_v8 = vpop.f32.mrb[9].mxu1 }
 0x146   : > { %v18634_v12 = vpop.f32.mrb[10].mxu1 }
 0x147   : > { %v1238_v14 = vpop.f32.mrb[11].mxu1 }
 0x14a   : > { %v23786_v18 = vpop.f32.mrb[12].mxu1 }
 0x14b   : > { %v23788_v20 = vpop.f32.mrb[13].mxu1 }
 0x14e   : > { %v23792_v23 = vpop.f32.mrb[14].mxu1 }
 0x14f   : > { %v23794_v24 = vpop.f32.mrb[15].mxu1 }
 0x152   : > { %v18715_v5 = vpop.f32.mrb[0].mxu0 }
 0x153   : > { %v23798_v27 = vadd.f32 %v18715_v5, %v18619_v50  ;;  %v1591_v7 = vpop.f32.mrb[1].mxu0  ;;  %v6516_v50 = vld [vmem:[%s23201_s8 + $0x60] sm:$0xff]  ;;  %v1689_v5 = vld [vmem:[%s23171_s13 + $0x18] sm:$0xff] }
 0x154   : > { %v23802_v29 = vadd.f32 %v1591_v7, %v1188_v51  ;;  %6582 = vperm.xlu0 %22762, %v6516_v50   ;;  %v11183_v7 = vld [vmem:[%s23226_s6 + $0xc8] sm:$0xff] }
 0x156   : > { %v18718_v13 = vpop.f32.mrb[2].mxu0 }
 0x157   : > { %v23804_v30 = vadd.f32 %v18718_v13, %v18622_v56  ;;  %v1601_v16 = vpop.f32.mrb[3].mxu0  ;;  %v6518_v56 = vld [vmem:[%s23201_s8 + $0x70] sm:$0xff] }
 0x158   : > { %v23808_v33 = vadd.f32 %v1601_v16, %v1198_v57  ;;  %6592 = vperm.xlu0 %22762, %v6518_v56   ;;  %v21208_v16 = vpack.c.bf16 %v1689_v5, %v1688_v26 }
 0x15a   : > { %v18721_v19 = vpop.f32.mrb[4].mxu0 }
 0x15b   : > { %v23810_v34 = vadd.f32 %v18721_v19, %v18625_v61  ;;  %v1611_v35 = vpop.f32.mrb[5].mxu0  ;;  %v6519_v61 = vld [vmem:[%s23201_s8 + $0x78] sm:$0xff]  ;;  %v15874_v19 = vld [vmem:[%s23171_s13 + $0x48] sm:$0xff] }
 0x15c   : > { %v23814_v38 = vadd.f32 %v1611_v35, %v1208_v62  ;;  %v11174_v62 = vld [vmem:[%s23226_s6 + $0x80] sm:$0xff]  ;;  %6597 = vperm.xlu1 %22763, %v6519_v61   ;;  %v11184_v35 = vld [vmem:[%s23226_s6 + $0xd0] sm:$0xff] }
 0x15d   : > { %11272 = vperm.xlu0 %22762, %v11174_v62  }
 0x15e   : > { %v18724_v39 = vpop.f32.mrb[6].mxu0 }
 0x15f   : > { %v23816_v40 = vadd.f32 %v18724_v39, %v18628_v1  ;;  %v1621_v42 = vpop.f32.mrb[7].mxu0  ;;  %v23875_v39 = vpack.c.bf16 %v15874_v19, %v15873_v32  ;;  %v3830_v32 = vld [vmem:[%s23186_s25 + $0x8] sm:$0xff]  ;;  %v3831_v19 = vld [vmem:[%s23186_s25 + $0x10] sm:$0xff] }
 0x160   : > { %v23820_v45 = vadd.f32 %v1621_v42, %v1218_v2  ;;  %11277 = vperm.xlu1 %22763, %v11175_v3   ;;  %v11185_v42 = vld [vmem:[%s23226_s6 + $0xd8] sm:$0xff] }
 0x161   : > { %11192 = vperm.xlu0 %22762, %v11158_v4  }
 0x162   : > { %v18727_v46 = vpop.f32.mrb[8].mxu0 }
 0x163   : > { %v23822_v47 = vadd.f32 %v18727_v46, %v18631_v6  ;;  %v1631_v48 = vpop.f32.mrb[9].mxu0  ;;  %v11169_v46 = vld [vmem:[%s23226_s6 + $0x58] sm:$0xff] }
 0x164   : > { %v23826_v51 = vadd.f32 %v1631_v48, %v1228_v8  ;;  %v11159_v8 = vld [vmem:[%s23226_s6 + $0x8] sm:$0xff]  ;;  %v11186_v48 = vld [vmem:[%s23226_s6 + $0xe0] sm:$0xff] }
 0x165   : > { %11197 = vperm.xlu1 %22763, %v11159_v8   ;;  %11282 = vperm.xlu0 %22762, %v11176_v9   ;;  %v11173_v8 = vld [vmem:[%s23226_s6 + $0x78] sm:$0xff]  ;;  %v11789_v9 = vld [vmem:[%s23246_s4] sm:$0xff] }
 0x166   : > { %v18730_v52 = vpop.f32.mrb[10].mxu0 }
 0x167   : > { %v23828_v53 = vadd.f32 %v18730_v52, %v18634_v12  ;;  %v1641_v54 = vpop.f32.mrb[11].mxu0  ;;  %v11160_v12 = vld [vmem:[%s23226_s6 + $0x10] sm:$0xff]  ;;  %v11187_v52 = vld [vmem:[%s23226_s6 + $0xe8] sm:$0xff] }
 0x168   : > { %v23832_v57 = vadd.f32 %v1641_v54, %v1238_v14  ;;  %v11161_v14 = vld [vmem:[%s23226_s6 + $0x18] sm:$0xff]  ;;  %v11170_v54 = vld [vmem:[%s23226_s6 + $0x60] sm:$0xff] }
 0x169   : > { %11287 = vperm.xlu1 %22763, %v11177_v11   ;;  %11202 = vperm.xlu0 %22762, %v11160_v12  }
 0x16a   : > { %v18733_v58 = vpop.f32.mrb[12].mxu0 }
 0x16b   : > { %v23835_v59 = vadd.f32 %v18733_v58, %v23786_v18  ;;  %v1651_v60 = vpop.f32.mrb[13].mxu0  ;;  %v11162_v18 = vld [vmem:[%s23226_s6 + $0x20] sm:$0xff]  ;;  %v11171_v58 = vld [vmem:[%s23226_s6 + $0x68] sm:$0xff] }
 0x16c   : > { %v23840_v63 = vadd.f32 %v1651_v60, %v23788_v20  ;;  %v11163_v20 = vld [vmem:[%s23226_s6 + $0x28] sm:$0xff]  ;;  %v11188_v60 = vld [vmem:[%s23226_s6 + $0xf0] sm:$0xff] }
 0x16d   : > { %11207 = vperm.xlu1 %22763, %v11161_v14   ;;  %11292 = vperm.xlu0 %22762, %v11178_v15   ;;  %v11790_v14 = vld [vmem:[%s23246_s4 + $0x8] sm:$0xff]  ;;  %v15875_v15 = vld [vmem:[%s23171_s13 + $0x50] sm:$0xff] }
 0x16e   : > { %v18736_v0 = vpop.f32.mrb[14].mxu0 }
 0x16f   : > { %v23843_v1 = vadd.f32 %v18736_v0, %v23792_v23  ;;  %v1661_v2 = vpop.f32.mrb[15].mxu0  ;;  %v11164_v23 = vld [vmem:[%s23226_s6 + $0x30] sm:$0xff]  ;;  %v11189_v0 = vld [vmem:[%s23226_s6 + $0xf8] sm:$0xff] }
 0x170   : > { %v23848_v6 = vadd.f32 %v1661_v2, %v23794_v24  ;;  %v11165_v24 = vld [vmem:[%s23226_s6 + $0x38] sm:$0xff]  ;;  %v11172_v2 = vld [vmem:[%s23226_s6 + $0x70] sm:$0xff] }
 0x171   : > { %11297 = vperm.xlu1 %22763, %v11179_v17   ;;  %11212 = vperm.xlu0 %22762, %v11162_v18   ;;  %v15876_v17 = vld [vmem:[%s23171_s13 + $0x58] sm:$0xff]  ;;  %v11791_v18 = vld [vmem:[%s23246_s4 + $0x10] sm:$0xff] }
 0x175   : > { %11217 = vperm.xlu1 %22763, %v11163_v20   ;;  %11302 = vperm.xlu0 %22762, %v11180_v21   ;;  %v21288_v20 = vpack.c.bf16 %v15876_v17, %v15875_v15  ;;  %v11792_v21 = vld [vmem:[%s23246_s4 + $0x18] sm:$0xff] }
 0x179   : > { %11307 = vperm.xlu1 %22763, %v11181_v22   ;;  %11222 = vperm.xlu0 %22762, %v11164_v23   ;;  %v12526_v22 = vld [vmem:[%s23276_s24] sm:$0xff] }
 0x17a   : > { %v11910_v23 = vld [vmem:[%s23256_s20] sm:$0xff] }
 0x17d   : > { %11227 = vperm.xlu1 %22763, %v11165_v24   ;;  %11312 = vperm.xlu0 %22762, %v11182_v25   ;;  %v11915_v24 = vld [vmem:[%s23256_s20 + $0x28] sm:$0xff] }
 0x181   : > { %11317 = vperm.xlu1 %22763, %v11183_v7   ;;  %11232 = vperm.xlu0 %22762, %v11166_v28  }
 0x185   : > { %11237 = vperm.xlu1 %22763, %v11167_v31   ;;  %11322 = vperm.xlu0 %22762, %v11184_v35   ;;  %v3829_v31 = vld [vmem:[%s23186_s25] sm:$0xff] }
 0x186   : > { %v21324_v35 = vpack.c.bf16 %v3830_v32, %v3829_v31 }
 0x188   : > { %21325 = vmatprep.subr.bf16.mxu1 %v21324_v35 }
 0x189   : > { %11327 = vperm.xlu1 %22763, %v11185_v42   ;;  %11242 = vperm.xlu0 %22762, %v11168_v43   ;;  %v3607_v42 = vpop.permute.xlu0 %3606 }
 0x18a   : > { %21327 = vmatpush3.bf16.msra.mxu1 %v21324_v35 }
 0x18d   : > { %11247 = vperm.xlu1 %22763, %v11169_v46   ;;  %11332 = vperm.xlu0 %22762, %v11186_v48  }
 0x191   : > { %11337 = vperm.xlu1 %22763, %v11187_v52   ;;  %11252 = vperm.xlu0 %22762, %v11170_v54  }
 0x192   : > { %v18859_v10 = vpop.f32.mrb[16].mxu1 }
 0x193   : > { %v2241_v13 = vpop.f32.mrb[17].mxu1 }
 0x194   : > { %18889 = vmatprep.mubr.msk.f32.mxu0 %vm2341_vm1, %v2241_v13 }
 0x195   : > { %18890 = vmatmul.mubr.msk.f32.vlgmr.msra.gmra.mrb[16].mxu0 %vm2341_vm1, %v18859_v10  ;;  %11257 = vperm.xlu1 %22763, %v11171_v58  }
 0x196   : > { %v18862_v36 = vpop.f32.mrb[18].mxu1  ;;  %21207 = vmatpush3.bf16.msra.mxu0 %v23753_v41  ;;  %11342 = vperm.xlu0 %22762, %v11188_v60  }
 0x197   : > { %v2251_v37 = vpop.f32.mrb[19].mxu1  ;;  %21209 = vmatprep.subr.bf16.mxu0 %v21208_v16 }
 0x198   : > { %18892 = vmatprep.mubr.msk.f32.mxu0 %vm2341_vm1, %v2251_v37 }
 0x199   : > { %18893 = vmatmul.mubr.msk.f32.gmra.mrb[18].mxu0 %vm2341_vm1, %v18862_v36  ;;  %11347 = vperm.xlu1 %22763, %v11189_v0   ;;  %v3832_v36 = vld [vmem:[%s23186_s25 + $0x18] sm:$0xff] }
 0x19a   : > { %v18865_v44 = vpop.f32.mrb[20].mxu1  ;;  %21211 = vmatpush3.bf16.msra.mxu0 %v21208_v16  ;;  %11262 = vperm.xlu0 %22762, %v11172_v2   ;;  %v3716_v16 = vld [vmem:[%s23181_s21] sm:$0xff]  ;;  %v21328_v37 = vpack.c.bf16 %v3832_v36, %v3831_v19 }
 0x19b   : > { %v2261_v41 = vpop.f32.mrb[21].mxu1  ;;  %21285 = vmatprep.subr.bf16.mxu0 %v23875_v39 }
 0x19c   : > { %18895 = vmatprep.mubr.msk.f32.mxu0 %vm2341_vm1, %v2261_v41  ;;  %21329 = vmatprep.subr.bf16.mxu1 %v21328_v37 }
 0x19d   : > { %18896 = vmatmul.mubr.msk.f32.gmra.mrb[20].mxu0 %vm2341_vm1, %v18865_v44  ;;  %11267 = vperm.xlu1 %22763, %v11173_v8   ;;  %v3612_v44 = vpop.permute.xlu0 %3611 }
 0x19e   : > { %v18868_v49 = vpop.f32.mrb[22].mxu1  ;;  %11795 = vperm.xlu0 %22762, %v11789_v9   ;;  %21331 = vmatpush3.bf16.msra.mxu1 %v21328_v37 }
 0x19f   : > { %v2271_v50 = vpop.f32.mrb[23].mxu1 }
 0x1a0   : > { %18898 = vmatprep.mubr.msk.f32.mxu0 %vm2341_vm1, %v2271_v50 }
 0x1a1   : > { %18899 = vmatmul.mubr.msk.f32.gmra.mrb[22].mxu0 %vm2341_vm1, %v18868_v49  ;;  %11800 = vperm.xlu1 %22763, %v11790_v14   ;;  %v3627_v46 = vpop.permute.xlu0 %3626 }
 0x1a2   : > { %v18871_v55 = vpop.f32.mrb[24].mxu1  ;;  %11805 = vperm.xlu0 %22762, %v11791_v18  }
 0x1a3   : > { %v2281_v56 = vpop.f32.mrb[25].mxu1 }
 0x1a4   : > { %18901 = vmatprep.mubr.msk.f32.mxu0 %vm2341_vm1, %v2281_v56 }
 0x1a5   : > { %18902 = vmatmul.mubr.msk.f32.gmra.mrb[24].mxu0 %vm2341_vm1, %v18871_v55  ;;  %11810 = vperm.xlu1 %22763, %v11792_v21   ;;  %v3637_v60 = vpop.permute.xlu0 %3636 }
 0x1a6   : > { %v18874_v61 = vpop.f32.mrb[26].mxu1  ;;  %12530 = vperm.xlu0 %22762, %v12526_v22  }
 0x1a7   : > { %v2291_v62 = vpop.f32.mrb[27].mxu1 }
 0x1a8   : > { %18904 = vmatprep.mubr.msk.f32.mxu0 %vm2341_vm1, %v2291_v62 }
 0x1a9   : > { %18905 = vmatmul.mubr.msk.f32.gmra.mrb[26].mxu0 %vm2341_vm1, %v18874_v61  ;;  %v3647_v17 = vpop.permute.xlu0 %3646 }
 0x1aa   : > { %v18877_v3 = vpop.f32.mrb[28].mxu1  ;;  %11920 = vperm.xlu0 %22762, %v11910_v23  }
 0x1ab   : > { %v2301_v4 = vpop.f32.mrb[29].mxu1 }
 0x1ac   : > { %18907 = vmatprep.mubr.msk.f32.mxu0 %vm2341_vm1, %v2301_v4 }
 0x1ad   : > { %18908 = vmatmul.mubr.msk.f32.gmra.mrb[28].mxu0 %vm2341_vm1, %v18877_v3 }
 0x1ae   : > { %v18880_v11 = vpop.f32.mrb[30].mxu1 }
 0x1af   : > { %v2311_v12 = vpop.f32.mrb[31].mxu1 }
 0x1b0   : > { %18910 = vmatprep.mubr.msk.f32.mxu0 %vm2341_vm1, %v2311_v12 }
 0x1b1   : > { %18911 = vmatmul.mubr.msk.f32.gmra.mrb[30].mxu0 %vm2341_vm1, %v18880_v11 }
 0x1b2   : > { %18921 = vmatprep.mubr.msk.f32.mxu0 %vm2341_vm1, %v23802_v29  ;;  %v12527_v29 = vld [vmem:[%s23276_s24 + $0x8] sm:$0xff] }
 0x1b3   : > { %12535 = vperm.xlu1 %22763, %v12527_v29  }
 0x1b5   : > { %18922 = vmatmul.mubr.msk.f32.vlgmr.msra.gmra.mrb[16].mxu0 %vm2341_vm1, %v23798_v27  ;;  %v11911_v27 = vld [vmem:[%s23256_s20 + $0x8] sm:$0xff] }
 0x1b6   : > { %18924 = vmatprep.mubr.msk.f32.mxu0 %vm2341_vm1, %v23808_v33  ;;  %21287 = vmatpush3.bf16.msra.mxu0 %v23875_v39  ;;  %v11912_v33 = vld [vmem:[%s23256_s20 + $0x10] sm:$0xff]  ;;  %v3617_v39 = vpop.permute.xlu1 %3616 }
 0x1b7   : > { %21289 = vmatprep.subr.bf16.mxu0 %v21288_v20  ;;  %11925 = vperm.xlu1 %22763, %v11911_v27  }
 0x1b8   : > { %11930 = vperm.xlu0 %22762, %v11912_v33  }
 0x1b9   : > { %18925 = vmatmul.mubr.msk.f32.gmra.mrb[18].mxu0 %vm2341_vm1, %v23804_v30  ;;  %v11913_v30 = vld [vmem:[%s23256_s20 + $0x18] sm:$0xff] }
 0x1ba   : > { %18927 = vmatprep.mubr.msk.f32.mxu0 %vm2341_vm1, %v23814_v38  ;;  %21291 = vmatpush3.bf16.msra.mxu0 %v21288_v20  ;;  %v11914_v38 = vld [vmem:[%s23256_s20 + $0x20] sm:$0xff]  ;;  %v3622_v43 = vpop.permute.xlu1 %3621 }
 0x1bb   : > { %11935 = vperm.xlu1 %22763, %v11913_v30  }
 0x1bc   : > { %11940 = vperm.xlu0 %22762, %v11914_v38  }
 0x1bd   : > { %18928 = vmatmul.mubr.msk.f32.gmra.mrb[20].mxu0 %vm2341_vm1, %v23810_v34  ;;  %v11916_v34 = vld [vmem:[%s23256_s20 + $0x30] sm:$0xff] }
 0x1be   : > { %18930 = vmatprep.mubr.msk.f32.mxu0 %vm2341_vm1, %v23820_v45  ;;  %v11917_v45 = vld [vmem:[%s23256_s20 + $0x38] sm:$0xff]  ;;  %v3632_v41 = vpop.permute.xlu1 %3631 }
 0x1bf   : > { %11945 = vperm.xlu1 %22763, %v11915_v24  }
 0x1c0   : > { %11950 = vperm.xlu0 %22762, %v11916_v34   ;;  %v3657_v34 = vpop.permute.xlu0 %3656 }
 0x1c1   : > { %18931 = vmatmul.mubr.msk.f32.gmra.mrb[22].mxu0 %vm2341_vm1, %v23816_v40 }
 0x1c2   : > { %18933 = vmatprep.mubr.msk.f32.mxu0 %vm2341_vm1, %v23826_v51  ;;  %v3642_v55 = vpop.permute.xlu1 %3641 }
 0x1c3   : > { %11955 = vperm.xlu1 %22763, %v11917_v45  }
 0x1c5   : > { %18934 = vmatmul.mubr.msk.f32.gmra.mrb[24].mxu0 %vm2341_vm1, %v23822_v47 }
 0x1c6   : > { %18936 = vmatprep.mubr.msk.f32.mxu0 %vm2341_vm1, %v23832_v57  ;;  %v3652_v12 = vpop.permute.xlu1 %3651 }
 0x1c9   : > { %18937 = vmatmul.mubr.msk.f32.gmra.mrb[26].mxu0 %vm2341_vm1, %v23828_v53 }
 0x1ca   : > { %18939 = vmatprep.mubr.msk.f32.mxu0 %vm2341_vm1, %v23840_v63  ;;  %v3662_v30 = vpop.permute.xlu1 %3661 }
 0x1cd   : > { %18940 = vmatmul.mubr.msk.f32.gmra.mrb[28].mxu0 %vm2341_vm1, %v23835_v59 }
 0x1ce   : > { %18942 = vmatprep.mubr.msk.f32.mxu0 %vm2341_vm1, %v23848_v6 }
 0x1d1   : > { %18943 = vmatmul.mubr.msk.f32.gmra.mrb[30].mxu0 %vm2341_vm1, %v23843_v1 }
 0x1f2   : > { %v19067_v40 = vpop.f32.mrb[32].mxu1 }
 0x1f3   : > { %v3279_v47 = vpop.f32.mrb[33].mxu1 }
 0x1f4   : > { %19097 = vmatprep.mubr.msk.f32.mxu0 %vm2341_vm1, %v3279_v47 }
 0x1f5   : > { %19098 = vmatmul.mubr.msk.f32.vlgmr.msra.gmra.mrb[16].mxu0 %vm2341_vm1, %v19067_v40 }
 0x1f6   : > { %v19070_v51 = vpop.f32.mrb[34].mxu1 }
 0x1f7   : > { %v3289_v53 = vpop.f32.mrb[35].mxu1 }
 0x1f8   : > { %19100 = vmatprep.mubr.msk.f32.mxu0 %vm2341_vm1, %v3289_v53 }
 0x1f9   : > { %19101 = vmatmul.mubr.msk.f32.gmra.mrb[18].mxu0 %vm2341_vm1, %v19070_v51 }
 0x1fa   : > { %v19073_v57 = vpop.f32.mrb[36].mxu1 }
 0x1fb   : > { %v3299_v59 = vpop.f32.mrb[37].mxu1 }
 0x1fc   : > { %19103 = vmatprep.mubr.msk.f32.mxu0 %vm2341_vm1, %v3299_v59 }
 0x1fd   : > { %19104 = vmatmul.mubr.msk.f32.gmra.mrb[20].mxu0 %vm2341_vm1, %v19073_v57 }
 0x1fe   : > { %v19076_v63 = vpop.f32.mrb[38].mxu1 }
 0x1ff   : > { %v3309_v1 = vpop.f32.mrb[39].mxu1 }
 0x200   : > { %19106 = vmatprep.mubr.msk.f32.mxu0 %vm2341_vm1, %v3309_v1 }
 0x201   : > { %19107 = vmatmul.mubr.msk.f32.gmra.mrb[22].mxu0 %vm2341_vm1, %v19076_v63 }
 0x202   : > { %v19079_v6 = vpop.f32.mrb[40].mxu1 }
 0x203   : > { %v3319_v25 = vpop.f32.mrb[41].mxu1 }
 0x204   : > { %19109 = vmatprep.mubr.msk.f32.mxu0 %vm2341_vm1, %v3319_v25 }
 0x205   : > { %19110 = vmatmul.mubr.msk.f32.gmra.mrb[24].mxu0 %vm2341_vm1, %v19079_v6  ;;  %v3672_v6 = vpop.permute.xlu1 %3671 }
 0x206   : > { %v19082_v26 = vpop.f32.mrb[42].mxu1 }
 0x207   : > { %v3329_v5 = vpop.f32.mrb[43].mxu1 }
 0x208   : > { %19112 = vmatprep.mubr.msk.f32.mxu0 %vm2341_vm1, %v3329_v5  ;;  %v3667_v5 = vpop.permute.xlu0 %3666 }
 0x209   : > { %19113 = vmatmul.mubr.msk.f32.gmra.mrb[26].mxu0 %vm2341_vm1, %v19082_v26  ;;  %v3682_v35 = vpop.permute.xlu1 %3681 }
 0x20a   : > { %v19085_v7 = vpop.f32.mrb[44].mxu1 }
 0x20b   : > { %v3339_v28 = vpop.f32.mrb[45].mxu1 }
 0x20c   : > { %19115 = vmatprep.mubr.msk.f32.mxu0 %vm2341_vm1, %v3339_v28 }
 0x20d   : > { %19116 = vmatmul.mubr.msk.f32.gmra.mrb[28].mxu0 %vm2341_vm1, %v19085_v7 }
 0x20e   : > { %v19088_v10 = vpop.f32.mrb[46].mxu1 }
 0x20f   : > { %v3349_v13 = vpop.f32.mrb[47].mxu1 }
 0x210   : > { %19118 = vmatprep.mubr.msk.f32.mxu0 %vm2341_vm1, %v3349_v13 }
 0x211   : > { %19119 = vmatmul.mubr.msk.f32.gmra.mrb[30].mxu0 %vm2341_vm1, %v19088_v10 }
 0x212   : > { %19153 = vmatprep.mubr.f32.mxu0 %v3716_v16 }
 0x2c8   : > { %v19099_v48 = vpop.f32.mrb[16].mxu0 }
 0x2c9   : > { %v3685_v49 = vadd.f32 %v19099_v48, %v3612_v44  ;;  %v3493_v50 = vpop.f32.mrb[17].mxu0 }
 0x2ca   : > { %v3684_v52 = vadd.f32 %v3607_v42, %v3493_v50  ;;  %v3717_v50 = vld [vmem:[%s23181_s21 + $0x8] sm:$0xff] }
 0x2cb   : > { %v3701_v54 = vmax.f32 %v3685_v49, 0.0 }
 0x2cc   : > { %v3700_v56 = vmax.f32 %v3684_v52, 0.0  ;;  %v19102_v58 = vpop.f32.mrb[18].mxu0  ;;  %v3718_v52 = vld [vmem:[%s23181_s21 + $0x10] sm:$0xff] }
 0x2cd   : > { %v3687_v61 = vadd.f32 %v19102_v58, %v3622_v43  ;;  %v3503_v62 = vpop.f32.mrb[19].mxu0  ;;  %v3722_v58 = vld [vmem:[%s23181_s21 + $0x30] sm:$0xff] }
 0x2ce   : > { %v21292_v0 = vpack.c.bf16 %v3701_v54, %v3700_v56  ;;  %v3686_v2 = vadd.f32 %v3617_v39, %v3503_v62  ;;  %v3677_v39 = vpop.permute.xlu0 %3676  ;;  %v3719_v54 = vld [vmem:[%s23181_s21 + $0x18] sm:$0xff]  ;;  %v3721_v56 = vld [vmem:[%s23181_s21 + $0x28] sm:$0xff] }
 0x2cf   : > { %v3703_v3 = vmax.f32 %v3687_v61, 0.0 }
 0x2d0   : > { %v3702_v4 = vmax.f32 %v3686_v2, 0.0  ;;  %v19105_v8 = vpop.f32.mrb[20].mxu0  ;;  %21293 = vmatprep.subr.bf16.mxu0 %v21292_v0 }
 0x2d1   : > { %v3689_v9 = vadd.f32 %v19105_v8, %v3632_v41  ;;  %v3513_v11 = vpop.f32.mrb[21].mxu0  ;;  %21295 = vmatpush3.bf16.msra.mxu0 %v21292_v0 }
 0x2d2   : > { %v21296_v14 = vpack.c.bf16 %v3703_v3, %v3702_v4  ;;  %v3688_v15 = vadd.f32 %v3627_v46, %v3513_v11  ;;  %v15901_v11 = vld [vmem:[%s23191_s29 + $0x180] sm:$0xff] }
 0x2d3   : > { %v3705_v18 = vmax.f32 %v3689_v9, 0.0 }
 0x2d4   : > { %v3704_v20 = vmax.f32 %v3688_v15, 0.0  ;;  %v19108_v21 = vpop.f32.mrb[22].mxu0  ;;  %21297 = vmatprep.subr.bf16.mxu0 %v21296_v14 }
 0x2d5   : > { %v3691_v22 = vadd.f32 %v19108_v21, %v3642_v55  ;;  %v3523_v29 = vpop.f32.mrb[23].mxu0  ;;  %21299 = vmatpush3.bf16.msra.mxu0 %v21296_v14  ;;  %v3720_v55 = vld [vmem:[%s23181_s21 + $0x20] sm:$0xff] }
 0x2d6   : > { %v21300_v23 = vpack.c.bf16 %v3705_v18, %v3704_v20  ;;  %v3690_v27 = vadd.f32 %v3637_v60, %v3523_v29  ;;  %v3723_v60 = vld [vmem:[%s23181_s21 + $0x38] sm:$0xff] }
 0x2d7   : > { %v3707_v33 = vmax.f32 %v3691_v22, 0.0 }
 0x2d8   : > { %v3706_v38 = vmax.f32 %v3690_v27, 0.0  ;;  %v19111_v24 = vpop.f32.mrb[24].mxu0  ;;  %21301 = vmatprep.subr.bf16.mxu0 %v21300_v23 }
 0x2d9   : > { %v3693_v45 = vadd.f32 %v19111_v24, %v3652_v12  ;;  %v3533_v40 = vpop.f32.mrb[25].mxu0  ;;  %21303 = vmatpush3.bf16.msra.mxu0 %v21300_v23  ;;  %v15997_v12 = vld [vmem:[%s23191_s29 + $0x200] sm:$0xff]  ;;  %v15998_v24 = vld [vmem:[%s23191_s29 + $0x208] sm:$0xff] }
 0x2da   : > { %v21304_v47 = vpack.c.bf16 %v3707_v33, %v3706_v38  ;;  %v3692_v51 = vadd.f32 %v3647_v17, %v3533_v40  ;;  %v15902_v38 = vld [vmem:[%s23191_s29 + $0x188] sm:$0xff]  ;;  %v15904_v40 = vld [vmem:[%s23191_s29 + $0x198] sm:$0xff] }
 0x2db   : > { %v3709_v53 = vmax.f32 %v3693_v45, 0.0  ;;  %v15999_v45 = vld [vmem:[%s23191_s29 + $0x210] sm:$0xff] }
 0x2dc   : > { %v3708_v57 = vmax.f32 %v3692_v51, 0.0  ;;  %v19114_v59 = vpop.f32.mrb[26].mxu0  ;;  %21305 = vmatprep.subr.bf16.mxu0 %v21304_v47  ;;  %v15905_v51 = vld [vmem:[%s23191_s29 + $0x1a0] sm:$0xff] }
 0x2dd   : > { %v3695_v63 = vadd.f32 %v19114_v59, %v3662_v30  ;;  %v3543_v1 = vpop.f32.mrb[27].mxu0  ;;  %21307 = vmatpush3.bf16.msra.mxu0 %v21304_v47  ;;  %v16000_v47 = vld [vmem:[%s23191_s29 + $0x218] sm:$0xff]  ;;  %v16002_v59 = vld [vmem:[%s23191_s29 + $0x228] sm:$0xff] }
 0x2de   : > { %v21308_v25 = vpack.c.bf16 %v3709_v53, %v3708_v57  ;;  %v3694_v26 = vadd.f32 %v3657_v34, %v3543_v1  ;;  %v15903_v34 = vld [vmem:[%s23191_s29 + $0x190] sm:$0xff]  ;;  %v16001_v53 = vld [vmem:[%s23191_s29 + $0x220] sm:$0xff]  ;;  %v15906_v57 = vld [vmem:[%s23191_s29 + $0x1a8] sm:$0xff] }
 0x2df   : > { %v3711_v7 = vmax.f32 %v3695_v63, 0.0  ;;  %v15907_v63 = vld [vmem:[%s23191_s29 + $0x1b0] sm:$0xff] }
 0x2e0   : > { %v3710_v28 = vmax.f32 %v3694_v26, 0.0  ;;  %v19117_v10 = vpop.f32.mrb[28].mxu0  ;;  %21309 = vmatprep.subr.bf16.mxu0 %v21308_v25  ;;  %v16003_v1 = vld [vmem:[%s23191_s29 + $0x230] sm:$0xff]  ;;  %v15909_v26 = vld [vmem:[%s23191_s29 + $0x1c0] sm:$0xff] }
 0x2e1   : > { %v3697_v13 = vadd.f32 %v19117_v10, %v3672_v6  ;;  %v3553_v16 = vpop.f32.mrb[29].mxu0  ;;  %21311 = vmatpush3.bf16.msra.mxu0 %v21308_v25  ;;  %v15908_v6 = vld [vmem:[%s23191_s29 + $0x1b8] sm:$0xff]  ;;  %v15911_v10 = vld [vmem:[%s23191_s29 + $0x1d0] sm:$0xff] }
 0x2e2   : > { %v21312_v31 = vpack.c.bf16 %v3711_v7, %v3710_v28  ;;  %v3696_v32 = vadd.f32 %v3667_v5, %v3553_v16  ;;  %v16004_v25 = vld [vmem:[%s23191_s29 + $0x238] sm:$0xff]  ;;  %v16005_v5 = vld [vmem:[%s23191_s29 + $0x240] sm:$0xff]  ;;  %v15910_v7 = vld [vmem:[%s23191_s29 + $0x1c8] sm:$0xff] }
 0x2e3   : > { %v3713_v19 = vmax.f32 %v3697_v13, 0.0  ;;  %v16006_v28 = vld [vmem:[%s23191_s29 + $0x248] sm:$0xff]  ;;  %v16007_v13 = vld [vmem:[%s23191_s29 + $0x250] sm:$0xff]  ;;  %v15912_v16 = vld [vmem:[%s23191_s29 + $0x1d8] sm:$0xff] }
 0x2e4   : > { %v3712_v36 = vmax.f32 %v3696_v32, 0.0  ;;  %v19120_v37 = vpop.f32.mrb[30].mxu0  ;;  %21313 = vmatprep.subr.bf16.mxu0 %v21312_v31  ;;  %v15913_v32 = vld [vmem:[%s23191_s29 + $0x1e0] sm:$0xff] }
 0x2e5   : > { %v3699_v42 = vadd.f32 %v19120_v37, %v3682_v35  ;;  %v3563_v43 = vpop.f32.mrb[31].mxu0  ;;  %21315 = vmatpush3.bf16.msra.mxu0 %v21312_v31  ;;  %v16008_v31 = vld [vmem:[%s23191_s29 + $0x258] sm:$0xff]  ;;  %v15914_v35 = vld [vmem:[%s23191_s29 + $0x1e8] sm:$0xff]  ;;  %v15915_v37 = vld [vmem:[%s23191_s29 + $0x1f0] sm:$0xff] }
 0x2e6   : > { %v21316_v44 = vpack.c.bf16 %v3713_v19, %v3712_v36  ;;  %v3698_v41 = vadd.f32 %v3677_v39, %v3563_v43  ;;  %v16009_v19 = vld [vmem:[%s23191_s29 + $0x260] sm:$0xff]  ;;  %v16010_v36 = vld [vmem:[%s23191_s29 + $0x268] sm:$0xff]  ;;  %v16011_v39 = vld [vmem:[%s23191_s29 + $0x270] sm:$0xff] }
 0x2e7   : > { %v3715_v46 = vmax.f32 %v3699_v42, 0.0  ;;  %v15916_v42 = vld [vmem:[%s23191_s29 + $0x1f8] sm:$0xff] }
 0x2e8   : > { %v3714_v48 = vmax.f32 %v3698_v41, 0.0  ;;  %21317 = vmatprep.subr.bf16.mxu0 %v21316_v44  ;;  %v16012_v43 = vld [vmem:[%s23191_s29 + $0x278] sm:$0xff]  ;;  %v15981_v41 = vld [vmem:[%s23191_s29 + $0x80] sm:$0xff] }
 0x2e9   : > { %21319 = vmatpush3.bf16.msra.mxu0 %v21316_v44  ;;  %v3962_v44 = vld [vmem:[%s23191_s29] sm:$0xff] }
 0x2ea   : > { %v21320_v49 = vpack.c.bf16 %v3715_v46, %v3714_v48  ;;  %v3963_v46 = vld [vmem:[%s23191_s29 + $0x8] sm:$0xff] }
 0x2eb   : > { %v15982_v48 = vld [vmem:[%s23191_s29 + $0x88] sm:$0xff] }
 0x2ec   : > { %21321 = vmatprep.subr.bf16.mxu0 %v21320_v49 }
 0x2ed   : > { %21323 = vmatpush3.bf16.msra.mxu0 %v21320_v49  ;;  %v3964_v49 = vld [vmem:[%s23191_s29 + $0x10] sm:$0xff] }
 0x2f0   : > { %19154 = vmatmul.mubr.f32.vlgmr.msra.gmra.mrb[32].mxu0 %v3717_v50  ;;  %v15983_v50 = vld [vmem:[%s23191_s29 + $0x90] sm:$0xff] }
 0x2f1   : > { %19156 = vmatprep.mubr.f32.mxu0 %v3718_v52  ;;  %v3965_v52 = vld [vmem:[%s23191_s29 + $0x18] sm:$0xff] }
 0x2f4   : > { %19157 = vmatmul.mubr.f32.gmra.mrb[34].mxu0 %v3719_v54  ;;  %v15984_v54 = vld [vmem:[%s23191_s29 + $0x98] sm:$0xff] }
 0x2f5   : > { %19159 = vmatprep.mubr.f32.mxu0 %v3720_v55  ;;  %v3966_v55 = vld [vmem:[%s23191_s29 + $0x20] sm:$0xff] }
 0x2f8   : > { %19160 = vmatmul.mubr.f32.gmra.mrb[36].mxu0 %v3721_v56  ;;  %v15985_v56 = vld [vmem:[%s23191_s29 + $0xa0] sm:$0xff] }
 0x2f9   : > { %19162 = vmatprep.mubr.f32.mxu0 %v3722_v58  ;;  %v3967_v58 = vld [vmem:[%s23191_s29 + $0x28] sm:$0xff] }
 0x2fc   : > { %19163 = vmatmul.mubr.f32.gmra.mrb[38].mxu0 %v3723_v60  ;;  %v15986_v60 = vld [vmem:[%s23191_s29 + $0xa8] sm:$0xff] }
 0x2fd   : > { %19201 = vmatprep.mubr.msk.f32.mxu0 %vm3995_vm2, %v15901_v11  ;;  %v3972_v11 = vld [vmem:[%s23191_s29 + $0x50] sm:$0xff] }
 0x3c3   : > { %v19155_v61 = vpop.f32.mrb[32].mxu0 }
 0x3c4   : > { %v3790_v62 = vpop.f32.mrb[33].mxu0 }
 0x3c5   : > { %19173 = vmatprep.mubr.msk.f32.mxu1 %vm2341_vm1, %v3790_v62  ;;  %v15987_v62 = vld [vmem:[%s23191_s29 + $0xb0] sm:$0xff] }
 0x3c6   : > { %19174 = vmatmul.mubr.msk.f32.vlgmr.msra.gmra.mrb[48].mxu1 %vm2341_vm1, %v19155_v61  ;;  %v3968_v61 = vld [vmem:[%s23191_s29 + $0x30] sm:$0xff] }
 0x3c7   : > { %v19158_v0 = vpop.f32.mrb[34].mxu0 }
 0x3c8   : > { %v3800_v2 = vpop.f32.mrb[35].mxu0 }
 0x3c9   : > { %19176 = vmatprep.mubr.msk.f32.mxu1 %vm2341_vm1, %v3800_v2  ;;  %v15988_v2 = vld [vmem:[%s23191_s29 + $0xb8] sm:$0xff] }
 0x3ca   : > { %19177 = vmatmul.mubr.msk.f32.gmra.mrb[50].mxu1 %vm2341_vm1, %v19158_v0  ;;  %v3969_v0 = vld [vmem:[%s23191_s29 + $0x38] sm:$0xff] }
 0x3cb   : > { %v19161_v3 = vpop.f32.mrb[36].mxu0 }
 0x3cc   : > { %v3810_v4 = vpop.f32.mrb[37].mxu0 }
 0x3cd   : > { %19179 = vmatprep.mubr.msk.f32.mxu1 %vm2341_vm1, %v3810_v4  ;;  %v15989_v4 = vld [vmem:[%s23191_s29 + $0xc0] sm:$0xff] }
 0x3ce   : > { %19180 = vmatmul.mubr.msk.f32.gmra.mrb[52].mxu1 %vm2341_vm1, %v19161_v3  ;;  %v3970_v3 = vld [vmem:[%s23191_s29 + $0x40] sm:$0xff] }
 0x3cf   : > { %v19164_v8 = vpop.f32.mrb[38].mxu0 }
 0x3d0   : > { %v3820_v9 = vpop.f32.mrb[39].mxu0 }
 0x3d1   : > { %19182 = vmatprep.mubr.msk.f32.mxu1 %vm2341_vm1, %v3820_v9  ;;  %v15990_v9 = vld [vmem:[%s23191_s29 + $0xc8] sm:$0xff] }
 0x3d2   : > { %19183 = vmatmul.mubr.msk.f32.gmra.mrb[54].mxu1 %vm2341_vm1, %v19164_v8  ;;  %v3971_v8 = vld [vmem:[%s23191_s29 + $0x48] sm:$0xff] }
 0x3d3   : > { %19321 = vmatprep.mubr.msk.f32.mxu1 %vm3995_vm2, %v15997_v12  ;;  %v15991_v12 = vld [vmem:[%s23191_s29 + $0xd0] sm:$0xff] }
 0x499   : > { %v19175_v14 = vpop.f32.mrb[48].mxu1 }
 0x49a   : > { %v3923_v15 = vpop.f32.mrb[49].mxu1 }
 0x49b   : > { %v23992_v17 = vpack.c.bf16 %v19175_v14, %v3923_v15  ;;  %v3973_v14 = vld [vmem:[%s23191_s29 + $0x58] sm:$0xff] }
 0x49c   : > { %v15992_v15 = vld [vmem:[%s23191_s29 + $0xd8] sm:$0xff] }
 0x49d   : > { %v19178_v18 = vpop.f32.mrb[50].mxu1  ;;  %21333 = vmatprep.subr.bf16.mxu0 %v23992_v17  ;;  %21381 = vmatprep.subr.bf16.mxu1 %v23992_v17 }
 0x49e   : > { %v3933_v20 = vpop.f32.mrb[51].mxu1  ;;  %21335 = vmatpush3.bf16.msra.mxu0 %v23992_v17  ;;  %21383 = vmatpush3.bf16.msra.mxu1 %v23992_v17 }
 0x49f   : > { %v23998_v21 = vpack.c.bf16 %v19178_v18, %v3933_v20  ;;  %v3974_v18 = vld [vmem:[%s23191_s29 + $0x60] sm:$0xff] }
 0x4a0   : > { %v15993_v20 = vld [vmem:[%s23191_s29 + $0xe0] sm:$0xff] }
 0x4a1   : > { %v19181_v22 = vpop.f32.mrb[52].mxu1  ;;  %21337 = vmatprep.subr.bf16.mxu0 %v23998_v21  ;;  %21385 = vmatprep.subr.bf16.mxu1 %v23998_v21 }
 0x4a2   : > { %v3943_v29 = vpop.f32.mrb[53].mxu1  ;;  %21339 = vmatpush3.bf16.msra.mxu0 %v23998_v21  ;;  %21387 = vmatpush3.bf16.msra.mxu1 %v23998_v21 }
 0x4a3   : > { %v24004_v23 = vpack.c.bf16 %v19181_v22, %v3943_v29  ;;  %v3975_v22 = vld [vmem:[%s23191_s29 + $0x68] sm:$0xff] }
 0x4a4   : > { %v15994_v29 = vld [vmem:[%s23191_s29 + $0xe8] sm:$0xff] }
 0x4a5   : > { %v19184_v27 = vpop.f32.mrb[54].mxu1  ;;  %21341 = vmatprep.subr.bf16.mxu0 %v24004_v23  ;;  %21389 = vmatprep.subr.bf16.mxu1 %v24004_v23 }
 0x4a6   : > { %v3953_v33 = vpop.f32.mrb[55].mxu1  ;;  %21343 = vmatpush3.bf16.msra.mxu0 %v24004_v23  ;;  %21391 = vmatpush3.bf16.msra.mxu1 %v24004_v23 }
 0x4a7   : > { %v24010_v30 = vpack.c.bf16 %v19184_v27, %v3953_v33  ;;  %v3976_v27 = vld [vmem:[%s23191_s29 + $0x70] sm:$0xff] }
 0x4a8   : > { %v15995_v33 = vld [vmem:[%s23191_s29 + $0xf0] sm:$0xff] }
 0x4a9   : > { %21345 = vmatprep.subr.bf16.mxu0 %v24010_v30  ;;  %21393 = vmatprep.subr.bf16.mxu1 %v24010_v30 }
 0x4aa   : > { %21347 = vmatpush3.bf16.msra.mxu0 %v24010_v30  ;;  %21395 = vmatpush3.bf16.msra.mxu1 %v24010_v30 }
 0x4ab   : > { %21349 = vmatprep.subr.bf16.mxu0 %v23992_v17  ;;  %21397 = vmatprep.subr.bf16.mxu1 %v23992_v17 }
 0x4ad   : > { %19202 = vmatmul.mubr.msk.f32.vlgmr.msra.gmra.mrb[40].mxu0 %vm3995_vm2, %v15902_v38  ;;  %19322 = vmatmul.mubr.msk.f32.vlgmr.msra.gmra.mrb[56].mxu1 %vm3995_vm2, %v15998_v24  ;;  %v3977_v38 = vld [vmem:[%s23191_s29 + $0x78] sm:$0xff] }
 0x4ae   : > { %21351 = vmatpush3.bf16.msra.mxu0 %v23992_v17  ;;  %21399 = vmatpush3.bf16.msra.mxu1 %v23992_v17  ;;  %v15996_v24 = vld [vmem:[%s23191_s29 + $0xf8] sm:$0xff] }
 0x4af   : > { %21353 = vmatprep.subr.bf16.mxu0 %v23998_v21  ;;  %21401 = vmatprep.subr.bf16.mxu1 %v23998_v21 }
 0x4b0   : > { %19204 = vmatprep.mubr.msk.f32.mxu0 %vm3995_vm2, %v15903_v34  ;;  %19324 = vmatprep.mubr.msk.f32.mxu1 %vm3995_vm2, %v15999_v45  ;;  %v15949_v34 = vld [vmem:[%s23191_s29 + $0x300] sm:$0xff] }
 0x4b1   : > { %19205 = vmatmul.mubr.msk.f32.gmra.mrb[42].mxu0 %vm3995_vm2, %v15904_v40  ;;  %19325 = vmatmul.mubr.msk.f32.gmra.mrb[58].mxu1 %vm3995_vm2, %v16000_v47  ;;  %v16045_v45 = vld [vmem:[%s23191_s29 + $0x380] sm:$0xff]  ;;  %v16077_v40 = vld [vmem:[%s25948_s3 + $0x10] sm:$0xff]  ;;  %v16078_v47 = vld [vmem:[%s25948_s3 + $0x18] sm:$0xff] }
 0x4b2   : > { %21355 = vmatpush3.bf16.msra.mxu0 %v23998_v21  ;;  %21403 = vmatpush3.bf16.msra.mxu1 %v23998_v21 }
 0x4b3   : > { %21357 = vmatprep.subr.bf16.mxu0 %v24004_v23  ;;  %21405 = vmatprep.subr.bf16.mxu1 %v24004_v23 }
 0x4b4   : > { %19207 = vmatprep.mubr.msk.f32.mxu0 %vm3995_vm2, %v15905_v51  ;;  %19327 = vmatprep.mubr.msk.f32.mxu1 %vm3995_vm2, %v16001_v53  ;;  %v15950_v51 = vld [vmem:[%s23191_s29 + $0x308] sm:$0xff] }
 0x4b5   : > { %19208 = vmatmul.mubr.msk.f32.gmra.mrb[44].mxu0 %vm3995_vm2, %v15906_v57  ;;  %19328 = vmatmul.mubr.msk.f32.gmra.mrb[60].mxu1 %vm3995_vm2, %v16002_v59  ;;  %v16046_v53 = vld [vmem:[%s23191_s29 + $0x388] sm:$0xff]  ;;  %v21428_v57 = vpack.c.bf16 %v16078_v47, %v16077_v40  ;;  %v15951_v59 = vld [vmem:[%s23191_s29 + $0x310] sm:$0xff]  ;;  %v16126_v40 = vld [vmem:[%s23191_s29 + $0x178] sm:$0xff] }
 0x4b6   : > { %21359 = vmatpush3.bf16.msra.mxu0 %v24004_v23  ;;  %21407 = vmatpush3.bf16.msra.mxu1 %v24004_v23  ;;  %v16175_v47 = vld [vmem:[%s23191_s29 + $0x400] sm:$0xff] }
 0x4b7   : > { %21361 = vmatprep.subr.bf16.mxu0 %v24010_v30  ;;  %21409 = vmatprep.subr.bf16.mxu1 %v24010_v30 }
 0x4b8   : > { %19210 = vmatprep.mubr.msk.f32.mxu0 %vm3995_vm2, %v15907_v63  ;;  %19330 = vmatprep.mubr.msk.f32.mxu1 %vm3995_vm2, %v16003_v1  ;;  %v16047_v63 = vld [vmem:[%s23191_s29 + $0x390] sm:$0xff]  ;;  %v15952_v1 = vld [vmem:[%s23191_s29 + $0x318] sm:$0xff] }
 0x4b9   : > { %19211 = vmatmul.mubr.msk.f32.gmra.mrb[46].mxu0 %vm3995_vm2, %v15908_v6  ;;  %19331 = vmatmul.mubr.msk.f32.gmra.mrb[62].mxu1 %vm3995_vm2, %v16004_v25  ;;  %v16048_v6 = vld [vmem:[%s23191_s29 + $0x398] sm:$0xff]  ;;  %v15953_v25 = vld [vmem:[%s23191_s29 + $0x320] sm:$0xff] }
 0x4ba   : > { %21363 = vmatpush3.bf16.msra.mxu0 %v24010_v30  ;;  %21411 = vmatpush3.bf16.msra.mxu1 %v24010_v30 }
 0x4bb   : > { %21365 = vmatprep.subr.bf16.mxu0 %v23992_v17  ;;  %21413 = vmatprep.subr.bf16.mxu1 %v23992_v17 }
 0x4bc   : > { %19213 = vmatprep.mubr.msk.f32.mxu0 %vm3995_vm2, %v15909_v26  ;;  %19333 = vmatprep.mubr.msk.f32.mxu1 %vm3995_vm2, %v16005_v5  ;;  %v16049_v26 = vld [vmem:[%s23191_s29 + $0x3a0] sm:$0xff]  ;;  %v15954_v5 = vld [vmem:[%s23191_s29 + $0x328] sm:$0xff] }
 0x4bd   : > { %19214 = vmatmul.mubr.msk.f32.gmra.mrb[48].mxu0 %vm3995_vm2, %v15910_v7  ;;  %19334 = vmatmul.mubr.msk.f32.gmra.mrb[64].mxu1 %vm3995_vm2, %v16006_v28  ;;  %v16050_v7 = vld [vmem:[%s23191_s29 + $0x3a8] sm:$0xff]  ;;  %v15955_v28 = vld [vmem:[%s23191_s29 + $0x330] sm:$0xff] }
 0x4be   : > { %19216 = vmatprep.mubr.msk.f32.mxu0 %vm3995_vm2, %v15911_v10  ;;  %19336 = vmatprep.mubr.msk.f32.mxu1 %vm3995_vm2, %v16007_v13  ;;  %v16051_v10 = vld [vmem:[%s23191_s29 + $0x3b0] sm:$0xff]  ;;  %v15956_v13 = vld [vmem:[%s23191_s29 + $0x338] sm:$0xff] }
 0x4c1   : > { %19217 = vmatmul.mubr.msk.f32.gmra.mrb[50].mxu0 %vm3995_vm2, %v15912_v16  ;;  %19337 = vmatmul.mubr.msk.f32.gmra.mrb[66].mxu1 %vm3995_vm2, %v16008_v31  ;;  %v16052_v16 = vld [vmem:[%s23191_s29 + $0x3b8] sm:$0xff]  ;;  %v15957_v31 = vld [vmem:[%s23191_s29 + $0x340] sm:$0xff] }
 0x4c2   : > { %19219 = vmatprep.mubr.msk.f32.mxu0 %vm3995_vm2, %v15913_v32  ;;  %19339 = vmatprep.mubr.msk.f32.mxu1 %vm3995_vm2, %v16009_v19  ;;  %v16053_v32 = vld [vmem:[%s23191_s29 + $0x3c0] sm:$0xff]  ;;  %v15958_v19 = vld [vmem:[%s23191_s29 + $0x348] sm:$0xff] }
 0x4c5   : > { %19220 = vmatmul.mubr.msk.f32.gmra.mrb[52].mxu0 %vm3995_vm2, %v15914_v35  ;;  %19340 = vmatmul.mubr.msk.f32.gmra.mrb[68].mxu1 %vm3995_vm2, %v16010_v36  ;;  %v16054_v35 = vld [vmem:[%s23191_s29 + $0x3c8] sm:$0xff]  ;;  %v15959_v36 = vld [vmem:[%s23191_s29 + $0x350] sm:$0xff] }
 0x4c6   : > { %19222 = vmatprep.mubr.msk.f32.mxu0 %vm3995_vm2, %v15915_v37  ;;  %19342 = vmatprep.mubr.msk.f32.mxu1 %vm3995_vm2, %v16011_v39  ;;  %v16055_v37 = vld [vmem:[%s23191_s29 + $0x3d0] sm:$0xff]  ;;  %v15960_v39 = vld [vmem:[%s23191_s29 + $0x358] sm:$0xff] }
 0x4c9   : > { %19223 = vmatmul.mubr.msk.f32.gmra.mrb[54].mxu0 %vm3995_vm2, %v15916_v42  ;;  %19343 = vmatmul.mubr.msk.f32.gmra.mrb[70].mxu1 %vm3995_vm2, %v16012_v43  ;;  %v16056_v42 = vld [vmem:[%s23191_s29 + $0x3d8] sm:$0xff]  ;;  %v15961_v43 = vld [vmem:[%s23191_s29 + $0x360] sm:$0xff] }
 0x4ca   : > { %19241 = vmatprep.mubr.msk.f32.mxu0 %vm3995_vm2, %v3962_v44  ;;  %19361 = vmatprep.mubr.msk.f32.mxu1 %vm3995_vm2, %v15981_v41  ;;  %v16057_v44 = vld [vmem:[%s23191_s29 + $0x3e0] sm:$0xff]  ;;  %v15962_v41 = vld [vmem:[%s23191_s29 + $0x368] sm:$0xff] }
 0x4cd   : > { %19242 = vmatmul.mubr.msk.f32.vlgmr.msra.gmra.mrb[40].mxu0 %vm3995_vm2, %v3963_v46  ;;  %19362 = vmatmul.mubr.msk.f32.vlgmr.msra.gmra.mrb[56].mxu1 %vm3995_vm2, %v15982_v48  ;;  %v16058_v46 = vld [vmem:[%s23191_s29 + $0x3e8] sm:$0xff]  ;;  %v15963_v48 = vld [vmem:[%s23191_s29 + $0x370] sm:$0xff] }
 0x4ce   : > { %21367 = vmatpush3.bf16.msra.mxu0 %v23992_v17  ;;  %21415 = vmatpush3.bf16.msra.mxu1 %v23992_v17 }
 0x4cf   : > { %21369 = vmatprep.subr.bf16.mxu0 %v23998_v21  ;;  %21417 = vmatprep.subr.bf16.mxu1 %v23998_v21 }
 0x4d0   : > { %19244 = vmatprep.mubr.msk.f32.mxu0 %vm3995_vm2, %v3964_v49  ;;  %19364 = vmatprep.mubr.msk.f32.mxu1 %vm3995_vm2, %v15983_v50  ;;  %v16059_v49 = vld [vmem:[%s23191_s29 + $0x3f0] sm:$0xff]  ;;  %v15964_v50 = vld [vmem:[%s23191_s29 + $0x378] sm:$0xff] }
 0x4d1   : > { %19245 = vmatmul.mubr.msk.f32.gmra.mrb[42].mxu0 %vm3995_vm2, %v3965_v52  ;;  %19365 = vmatmul.mubr.msk.f32.gmra.mrb[58].mxu1 %vm3995_vm2, %v15984_v54  ;;  %v16060_v52 = vld [vmem:[%s23191_s29 + $0x3f8] sm:$0xff]  ;;  %v16127_v54 = vld [vmem:[%s23191_s29 + $0x280] sm:$0xff] }
 0x4d2   : > { %21371 = vmatpush3.bf16.msra.mxu0 %v23998_v21  ;;  %21419 = vmatpush3.bf16.msra.mxu1 %v23998_v21 }
 0x4d3   : > { %21373 = vmatprep.subr.bf16.mxu0 %v24004_v23  ;;  %21421 = vmatprep.subr.bf16.mxu1 %v24004_v23 }
 0x4d4   : > { %19247 = vmatprep.mubr.msk.f32.mxu0 %vm3995_vm2, %v3966_v55  ;;  %19367 = vmatprep.mubr.msk.f32.mxu1 %vm3995_vm2, %v15985_v56  ;;  %v16128_v55 = vld [vmem:[%s23191_s29 + $0x288] sm:$0xff]  ;;  %v16129_v56 = vld [vmem:[%s23191_s29 + $0x290] sm:$0xff] }
 0x4d5   : > { %19248 = vmatmul.mubr.msk.f32.gmra.mrb[44].mxu0 %vm3995_vm2, %v3967_v58  ;;  %19368 = vmatmul.mubr.msk.f32.gmra.mrb[60].mxu1 %vm3995_vm2, %v15986_v60  ;;  %v16130_v58 = vld [vmem:[%s23191_s29 + $0x298] sm:$0xff]  ;;  %v16131_v60 = vld [vmem:[%s23191_s29 + $0x2a0] sm:$0xff] }
 0x4d6   : > { %21375 = vmatpush3.bf16.msra.mxu0 %v24004_v23  ;;  %21423 = vmatpush3.bf16.msra.mxu1 %v24004_v23 }
 0x4d7   : > { %21377 = vmatprep.subr.bf16.mxu0 %v24010_v30  ;;  %21425 = vmatprep.subr.bf16.mxu1 %v24010_v30 }
 0x4d8   : > { %19250 = vmatprep.mubr.msk.f32.mxu0 %vm3995_vm2, %v3968_v61  ;;  %19370 = vmatprep.mubr.msk.f32.mxu1 %vm3995_vm2, %v15987_v62  ;;  %v16132_v61 = vld [vmem:[%s23191_s29 + $0x2a8] sm:$0xff]  ;;  %v16133_v62 = vld [vmem:[%s23191_s29 + $0x2b0] sm:$0xff] }
 0x4d9   : > { %19251 = vmatmul.mubr.msk.f32.gmra.mrb[46].mxu0 %vm3995_vm2, %v3969_v0  ;;  %19371 = vmatmul.mubr.msk.f32.gmra.mrb[62].mxu1 %vm3995_vm2, %v15988_v2  ;;  %v16134_v0 = vld [vmem:[%s23191_s29 + $0x2b8] sm:$0xff]  ;;  %v16135_v2 = vld [vmem:[%s23191_s29 + $0x2c0] sm:$0xff] }
 0x4da   : > { %21379 = vmatpush3.bf16.msra.mxu0 %v24010_v30  ;;  %21427 = vmatpush3.bf16.msra.mxu1 %v24010_v30 }
 0x4db   : > { %21437 = vmatprep.subr.bf16.mxu1 %v23992_v17  ;;  %19253 = vmatprep.mubr.msk.f32.mxu0 %vm3995_vm2, %v3970_v3  ;;  %v16136_v3 = vld [vmem:[%s23191_s29 + $0x2c8] sm:$0xff] }
 0x4dc   : > { %19373 = vmatprep.mubr.msk.f32.mxu1 %vm3995_vm2, %v15989_v4  ;;  %21429 = vmatprep.subr.bf16.mxu0 %v21428_v57  ;;  %v16137_v4 = vld [vmem:[%s23191_s29 + $0x2d0] sm:$0xff] }
 0x4dd   : > { %19254 = vmatmul.mubr.msk.f32.gmra.mrb[48].mxu0 %vm3995_vm2, %v3971_v8  ;;  %19374 = vmatmul.mubr.msk.f32.gmra.mrb[64].mxu1 %vm3995_vm2, %v15990_v9  ;;  %v16138_v8 = vld [vmem:[%s23191_s29 + $0x2d8] sm:$0xff]  ;;  %v16139_v9 = vld [vmem:[%s23191_s29 + $0x2e0] sm:$0xff] }
 0x4de   : > { %19256 = vmatprep.mubr.msk.f32.mxu0 %vm3995_vm2, %v3972_v11  ;;  %19376 = vmatprep.mubr.msk.f32.mxu1 %vm3995_vm2, %v15991_v12  ;;  %v16140_v11 = vld [vmem:[%s23191_s29 + $0x2e8] sm:$0xff]  ;;  %v16141_v12 = vld [vmem:[%s23191_s29 + $0x2f0] sm:$0xff] }
 0x4e1   : > { %19257 = vmatmul.mubr.msk.f32.gmra.mrb[50].mxu0 %vm3995_vm2, %v3973_v14  ;;  %19377 = vmatmul.mubr.msk.f32.gmra.mrb[66].mxu1 %vm3995_vm2, %v15992_v15  ;;  %v16142_v14 = vld [vmem:[%s23191_s29 + $0x2f8] sm:$0xff]  ;;  %v16111_v15 = vld [vmem:[%s23191_s29 + $0x100] sm:$0xff] }
 0x4e2   : > { %19259 = vmatprep.mubr.msk.f32.mxu0 %vm3995_vm2, %v3974_v18  ;;  %19379 = vmatprep.mubr.msk.f32.mxu1 %vm3995_vm2, %v15993_v20  ;;  %v16112_v18 = vld [vmem:[%s23191_s29 + $0x108] sm:$0xff]  ;;  %v16113_v20 = vld [vmem:[%s23191_s29 + $0x110] sm:$0xff] }
 0x4e5   : > { %19260 = vmatmul.mubr.msk.f32.gmra.mrb[52].mxu0 %vm3995_vm2, %v3975_v22  ;;  %19380 = vmatmul.mubr.msk.f32.gmra.mrb[68].mxu1 %vm3995_vm2, %v15994_v29  ;;  %v16114_v22 = vld [vmem:[%s23191_s29 + $0x118] sm:$0xff]  ;;  %v16115_v29 = vld [vmem:[%s23191_s29 + $0x120] sm:$0xff] }
 0x4e6   : > { %19262 = vmatprep.mubr.msk.f32.mxu0 %vm3995_vm2, %v3976_v27  ;;  %19382 = vmatprep.mubr.msk.f32.mxu1 %vm3995_vm2, %v15995_v33  ;;  %v16116_v27 = vld [vmem:[%s23191_s29 + $0x128] sm:$0xff]  ;;  %v16118_v33 = vld [vmem:[%s23191_s29 + $0x138] sm:$0xff] }
 0x4e9   : > { %19263 = vmatmul.mubr.msk.f32.gmra.mrb[54].mxu0 %vm3995_vm2, %v3977_v38  ;;  %19383 = vmatmul.mubr.msk.f32.gmra.mrb[70].mxu1 %vm3995_vm2, %v15996_v24  ;;  %v16120_v38 = vld [vmem:[%s23191_s29 + $0x148] sm:$0xff]  ;;  %v16121_v24 = vld [vmem:[%s23191_s29 + $0x150] sm:$0xff] }
 0x4ea   : > { %19281 = vmatprep.mubr.msk.f32.mxu0 %vm3995_vm2, %v15949_v34  ;;  %19401 = vmatprep.mubr.msk.f32.mxu1 %vm3995_vm2, %v16045_v45  ;;  %v16123_v34 = vld [vmem:[%s23191_s29 + $0x160] sm:$0xff]  ;;  %v16124_v45 = vld [vmem:[%s23191_s29 + $0x168] sm:$0xff] }
 0x4ed   : > { %19282 = vmatmul.mubr.msk.f32.vlgmr.msra.gmra.mrb[40].mxu0 %vm3995_vm2, %v15950_v51  ;;  %19402 = vmatmul.mubr.msk.f32.vlgmr.msra.gmra.mrb[56].mxu1 %vm3995_vm2, %v16046_v53  ;;  %v16176_v51 = vld [vmem:[%s23191_s29 + $0x408] sm:$0xff]  ;;  %v16177_v53 = vld [vmem:[%s23191_s29 + $0x410] sm:$0xff] }
 0x4ee   : > { %21439 = vmatpush3.bf16.msra.mxu1 %v23992_v17  ;;  %19284 = vmatprep.mubr.msk.f32.mxu0 %vm3995_vm2, %v15951_v59  ;;  %v16179_v59 = vld [vmem:[%s23191_s29 + $0x420] sm:$0xff] }
 0x4ef   : > { %21441 = vmatprep.subr.bf16.mxu1 %v23998_v21  ;;  %19404 = vmatprep.mubr.msk.f32.mxu1 %vm3995_vm2, %v16047_v63  ;;  %v16180_v63 = vld [vmem:[%s23191_s29 + $0x428] sm:$0xff] }
 0x4f0   : > { %21431 = vmatpush3.bf16.msra.mxu0 %v21428_v57  ;;  %v16178_v57 = vld [vmem:[%s23191_s29 + $0x418] sm:$0xff] }
 0x4f1   : > { %19285 = vmatmul.mubr.msk.f32.gmra.mrb[42].mxu0 %vm3995_vm2, %v15952_v1  ;;  %19405 = vmatmul.mubr.msk.f32.gmra.mrb[58].mxu1 %vm3995_vm2, %v16048_v6  ;;  %v16181_v1 = vld [vmem:[%s23191_s29 + $0x430] sm:$0xff]  ;;  %v16182_v6 = vld [vmem:[%s23191_s29 + $0x438] sm:$0xff] }
 0x4f2   : > { %21443 = vmatpush3.bf16.msra.mxu1 %v23998_v21  ;;  %19287 = vmatprep.mubr.msk.f32.mxu0 %vm3995_vm2, %v15953_v25  ;;  %v16183_v25 = vld [vmem:[%s23191_s29 + $0x440] sm:$0xff] }
 0x4f3   : > { %21445 = vmatprep.subr.bf16.mxu1 %v24004_v23  ;;  %19407 = vmatprep.mubr.msk.f32.mxu1 %vm3995_vm2, %v16049_v26  ;;  %v16184_v26 = vld [vmem:[%s23191_s29 + $0x448] sm:$0xff] }
 0x4f5   : > { %19288 = vmatmul.mubr.msk.f32.gmra.mrb[44].mxu0 %vm3995_vm2, %v15954_v5  ;;  %19408 = vmatmul.mubr.msk.f32.gmra.mrb[60].mxu1 %vm3995_vm2, %v16050_v7  ;;  %v16185_v5 = vld [vmem:[%s23191_s29 + $0x450] sm:$0xff]  ;;  %v4608_v7 = vld [vmem:[%s25948_s3] sm:$0xff] }
 0x4f6   : > { %21447 = vmatpush3.bf16.msra.mxu1 %v24004_v23  ;;  %19290 = vmatprep.mubr.msk.f32.mxu0 %vm3995_vm2, %v15955_v28  ;;  %v4609_v28 = vld [vmem:[%s25948_s3 + $0x8] sm:$0xff] }
 0x4f7   : > { %21449 = vmatprep.subr.bf16.mxu1 %v24010_v30  ;;  %19410 = vmatprep.mubr.msk.f32.mxu1 %vm3995_vm2, %v16051_v10  ;;  %v16186_v10 = vld [vmem:[%s23191_s29 + $0x458] sm:$0xff] }
 0x4f9   : > { %19291 = vmatmul.mubr.msk.f32.gmra.mrb[46].mxu0 %vm3995_vm2, %v15956_v13  ;;  %19411 = vmatmul.mubr.msk.f32.gmra.mrb[62].mxu1 %vm3995_vm2, %v16052_v16  ;;  %v21432_v13 = vpack.c.bf16 %v4609_v28, %v4608_v7  ;;  %v16187_v16 = vld [vmem:[%s23191_s29 + $0x460] sm:$0xff]  ;;  %v6523_v7 = vpop.permute.xlu0 %6522 }
 0x4fa   : > { %21451 = vmatpush3.bf16.msra.mxu1 %v24010_v30  ;;  %19293 = vmatprep.mubr.msk.f32.mxu0 %vm3995_vm2, %v15957_v31  ;;  %v16188_v31 = vld [vmem:[%s23191_s29 + $0x468] sm:$0xff] }
 0x4fb   : > { %21453 = vmatprep.subr.bf16.mxu1 %v23992_v17  ;;  %19413 = vmatprep.mubr.msk.f32.mxu1 %vm3995_vm2, %v16053_v32  ;;  %v16189_v32 = vld [vmem:[%s23191_s29 + $0x470] sm:$0xff] }
 0x4fc   : > { %21433 = vmatprep.subr.bf16.mxu0 %v21432_v13 }
 0x4fd   : > { %19294 = vmatmul.mubr.msk.f32.gmra.mrb[48].mxu0 %vm3995_vm2, %v15958_v19  ;;  %19414 = vmatmul.mubr.msk.f32.gmra.mrb[64].mxu1 %vm3995_vm2, %v16054_v35  ;;  %v16190_v19 = vld [vmem:[%s23191_s29 + $0x478] sm:$0xff]  ;;  %v16207_v35 = vld [vmem:[%s25948_s3 + $0x20] sm:$0xff] }
 0x4fe   : > { %19296 = vmatprep.mubr.msk.f32.mxu0 %vm3995_vm2, %v15959_v36  ;;  %19416 = vmatprep.mubr.msk.f32.mxu1 %vm3995_vm2, %v16055_v37  ;;  %v16208_v36 = vld [vmem:[%s25948_s3 + $0x28] sm:$0xff] }
 0x501   : > { %19297 = vmatmul.mubr.msk.f32.gmra.mrb[50].mxu0 %vm3995_vm2, %v15960_v39  ;;  %19417 = vmatmul.mubr.msk.f32.gmra.mrb[66].mxu1 %vm3995_vm2, %v16056_v42 }
 0x502   : > { %19299 = vmatprep.mubr.msk.f32.mxu0 %vm3995_vm2, %v15961_v43  ;;  %19419 = vmatprep.mubr.msk.f32.mxu1 %vm3995_vm2, %v16057_v44  ;;  %v21484_v44 = vpack.c.bf16 %v16208_v36, %v16207_v35 }
 0x505   : > { %19300 = vmatmul.mubr.msk.f32.gmra.mrb[52].mxu0 %vm3995_vm2, %v15962_v41  ;;  %19420 = vmatmul.mubr.msk.f32.gmra.mrb[68].mxu1 %vm3995_vm2, %v16058_v46 }
 0x506   : > { %19302 = vmatprep.mubr.msk.f32.mxu0 %vm3995_vm2, %v15963_v48  ;;  %19422 = vmatprep.mubr.msk.f32.mxu1 %vm3995_vm2, %v16059_v49 }
 0x509   : > { %19303 = vmatmul.mubr.msk.f32.gmra.mrb[54].mxu0 %vm3995_vm2, %v15964_v50  ;;  %19423 = vmatmul.mubr.msk.f32.gmra.mrb[70].mxu1 %vm3995_vm2, %v16060_v52 }
 0x50a   : > { %19497 = vmatprep.mubr.msk.f32.mxu1 %vm3995_vm2, %v16127_v54 }
 0x50d   : > { %19498 = vmatmul.mubr.msk.f32.vlgmr.msra.gmra.mrb[72].mxu1 %vm3995_vm2, %v16128_v55 }
 0x50e   : > { %21455 = vmatpush3.bf16.msra.mxu1 %v23992_v17  ;;  %19500 = vmatprep.mubr.msk.f32.mxu1 %vm3995_vm2, %v16129_v56 }
 0x50f   : > { %21457 = vmatprep.subr.bf16.mxu1 %v23998_v21 }
 0x511   : > { %19501 = vmatmul.mubr.msk.f32.gmra.mrb[74].mxu1 %vm3995_vm2, %v16130_v58 }
 0x512   : > { %21459 = vmatpush3.bf16.msra.mxu1 %v23998_v21  ;;  %19503 = vmatprep.mubr.msk.f32.mxu1 %vm3995_vm2, %v16131_v60 }
 0x513   : > { %21461 = vmatprep.subr.bf16.mxu1 %v24004_v23 }
 0x515   : > { %19504 = vmatmul.mubr.msk.f32.gmra.mrb[76].mxu1 %vm3995_vm2, %v16132_v61 }
 0x516   : > { %21463 = vmatpush3.bf16.msra.mxu1 %v24004_v23  ;;  %19506 = vmatprep.mubr.msk.f32.mxu1 %vm3995_vm2, %v16133_v62 }
 0x517   : > { %21465 = vmatprep.subr.bf16.mxu1 %v24010_v30 }
 0x519   : > { %19507 = vmatmul.mubr.msk.f32.gmra.mrb[78].mxu1 %vm3995_vm2, %v16134_v0 }
 0x51a   : > { %21467 = vmatpush3.bf16.msra.mxu1 %v24010_v30  ;;  %19509 = vmatprep.mubr.msk.f32.mxu1 %vm3995_vm2, %v16135_v2 }
 0x51b   : > { %21469 = vmatprep.subr.bf16.mxu1 %v23992_v17 }
 0x51d   : > { %19510 = vmatmul.mubr.msk.f32.gmra.mrb[80].mxu1 %vm3995_vm2, %v16136_v3 }
 0x51e   : > { %19512 = vmatprep.mubr.msk.f32.mxu1 %vm3995_vm2, %v16137_v4 }
 0x521   : > { %19513 = vmatmul.mubr.msk.f32.gmra.mrb[82].mxu1 %vm3995_vm2, %v16138_v8 }
 0x522   : > { %19515 = vmatprep.mubr.msk.f32.mxu1 %vm3995_vm2, %v16139_v9 }
 0x525   : > { %19516 = vmatmul.mubr.msk.f32.gmra.mrb[84].mxu1 %vm3995_vm2, %v16140_v11 }
 0x526   : > { %19518 = vmatprep.mubr.msk.f32.mxu1 %vm3995_vm2, %v16141_v12 }
 0x529   : > { %19519 = vmatmul.mubr.msk.f32.gmra.mrb[86].mxu1 %vm3995_vm2, %v16142_v14 }
 0x52a   : > { %19537 = vmatprep.mubr.msk.f32.mxu1 %vm3995_vm2, %v16111_v15 }
 0x52d   : > { %19538 = vmatmul.mubr.msk.f32.vlgmr.msra.gmra.mrb[72].mxu1 %vm3995_vm2, %v16112_v18 }
 0x52e   : > { %21471 = vmatpush3.bf16.msra.mxu1 %v23992_v17  ;;  %19540 = vmatprep.mubr.msk.f32.mxu1 %vm3995_vm2, %v16113_v20  ;;  %v16117_v17 = vld [vmem:[%s23191_s29 + $0x130] sm:$0xff] }
 0x52f   : > { %21473 = vmatprep.subr.bf16.mxu1 %v23998_v21 }
 0x531   : > { %19541 = vmatmul.mubr.msk.f32.gmra.mrb[74].mxu1 %vm3995_vm2, %v16114_v22 }
 0x532   : > { %21475 = vmatpush3.bf16.msra.mxu1 %v23998_v21  ;;  %19543 = vmatprep.mubr.msk.f32.mxu1 %vm3995_vm2, %v16115_v29  ;;  %v16119_v21 = vld [vmem:[%s23191_s29 + $0x140] sm:$0xff] }
 0x533   : > { %21477 = vmatprep.subr.bf16.mxu1 %v24004_v23 }
 0x535   : > { %19544 = vmatmul.mubr.msk.f32.gmra.mrb[76].mxu1 %vm3995_vm2, %v16116_v27 }
 0x536   : > { %21479 = vmatpush3.bf16.msra.mxu1 %v24004_v23  ;;  %19546 = vmatprep.mubr.msk.f32.mxu1 %vm3995_vm2, %v16117_v17  ;;  %v16122_v23 = vld [vmem:[%s23191_s29 + $0x158] sm:$0xff] }
 0x537   : > { %21481 = vmatprep.subr.bf16.mxu1 %v24010_v30 }
 0x539   : > { %19547 = vmatmul.mubr.msk.f32.gmra.mrb[78].mxu1 %vm3995_vm2, %v16118_v33 }
 0x53a   : > { %21483 = vmatpush3.bf16.msra.mxu1 %v24010_v30  ;;  %19549 = vmatprep.mubr.msk.f32.mxu1 %vm3995_vm2, %v16119_v21  ;;  %v16125_v30 = vld [vmem:[%s23191_s29 + $0x170] sm:$0xff] }
 0x53d   : > { %19550 = vmatmul.mubr.msk.f32.gmra.mrb[80].mxu1 %vm3995_vm2, %v16120_v38 }
 0x53e   : > { %19552 = vmatprep.mubr.msk.f32.mxu1 %vm3995_vm2, %v16121_v24 }
 0x541   : > { %19553 = vmatmul.mubr.msk.f32.gmra.mrb[82].mxu1 %vm3995_vm2, %v16122_v23 }
 0x542   : > { %19555 = vmatprep.mubr.msk.f32.mxu1 %vm3995_vm2, %v16123_v34 }
 0x545   : > { %19556 = vmatmul.mubr.msk.f32.gmra.mrb[84].mxu1 %vm3995_vm2, %v16124_v45 }
 0x546   : > { %19558 = vmatprep.mubr.msk.f32.mxu1 %vm3995_vm2, %v16125_v30 }
 0x549   : > { %19559 = vmatmul.mubr.msk.f32.gmra.mrb[86].mxu1 %vm3995_vm2, %v16126_v40 }
 0x54a   : > { %19577 = vmatprep.mubr.msk.f32.mxu1 %vm3995_vm2, %v16175_v47 }
 0x54d   : > { %19578 = vmatmul.mubr.msk.f32.vlgmr.msra.gmra.mrb[72].mxu1 %vm3995_vm2, %v16176_v51 }
 0x54e   : > { %19580 = vmatprep.mubr.msk.f32.mxu1 %vm3995_vm2, %v16177_v53 }
 0x551   : > { %19581 = vmatmul.mubr.msk.f32.gmra.mrb[74].mxu1 %vm3995_vm2, %v16178_v57 }
 0x552   : > { %19583 = vmatprep.mubr.msk.f32.mxu1 %vm3995_vm2, %v16179_v59 }
 0x555   : > { %19584 = vmatmul.mubr.msk.f32.gmra.mrb[76].mxu1 %vm3995_vm2, %v16180_v63 }
 0x556   : > { %19586 = vmatprep.mubr.msk.f32.mxu1 %vm3995_vm2, %v16181_v1  ;;  %v6632_v1 = vld [vmem:[%s23206_s14] sm:$0xff] }
 0x559   : > { %19587 = vmatmul.mubr.msk.f32.gmra.mrb[78].mxu1 %vm3995_vm2, %v16182_v6  ;;  %v6745_v6 = vld [vmem:[%s25949_s15] sm:$0xff] }
 0x55a   : > { %19589 = vmatprep.mubr.msk.f32.mxu1 %vm3995_vm2, %v16183_v25  ;;  %v6746_v25 = vld [vmem:[%s25949_s15 + $0x8] sm:$0xff] }
 0x55d   : > { %19590 = vmatmul.mubr.msk.f32.gmra.mrb[80].mxu1 %vm3995_vm2, %v16184_v26  ;;  %v21520_v26 = vpack.c.bf16 %v6746_v25, %v6745_v6 }
 0x55e   : > { %19592 = vmatprep.mubr.msk.f32.mxu1 %vm3995_vm2, %v16185_v5  ;;  %v6528_v5 = vpop.permute.xlu1 %6527 }
 0x55f   : > { %21521 = vmatprep.subr.bf16.mxu1 %v21520_v26 }
 0x560   : > { %21523 = vmatpush3.bf16.msra.mxu1 %v21520_v26 }
 0x561   : > { %19593 = vmatmul.mubr.msk.f32.gmra.mrb[82].mxu1 %vm3995_vm2, %v16186_v10  ;;  %v6533_v10 = vpop.permute.xlu0 %6532 }
 0x562   : > { %19595 = vmatprep.mubr.msk.f32.mxu1 %vm3995_vm2, %v16187_v16  ;;  %v6538_v28 = vpop.permute.xlu1 %6537 }
 0x565   : > { %19596 = vmatmul.mubr.msk.f32.gmra.mrb[84].mxu1 %vm3995_vm2, %v16188_v31  ;;  %v6543_v16 = vpop.permute.xlu0 %6542 }
 0x566   : > { %19598 = vmatprep.mubr.msk.f32.mxu1 %vm3995_vm2, %v16189_v32 }
 0x569   : > { %19599 = vmatmul.mubr.msk.f32.gmra.mrb[86].mxu1 %vm3995_vm2, %v16190_v19 }
 0x5c0   : > { %v19283_v37 = vpop.f32.mrb[40].mxu0  ;;  %v19403_v39 = vpop.f32.mrb[56].mxu1 }
 0x5c1   : > { %v4513_v42 = vpop.f32.mrb[41].mxu0  ;;  %v5161_v43 = vpop.f32.mrb[57].mxu1 }
 0x5c2   : > { %19429 = vmatprep.mubr.msk.f32.mxu0 %vm5259_vm3, %v5161_v43  ;;  %v6553_v43 = vpop.permute.xlu0 %6552 }
 0x5c3   : > { %19430 = vmatmul.mubr.msk.f32.vlgmr.msra.gmra.mrb[56].mxu0 %vm5259_vm3, %v19403_v39 }
 0x5c4   : > { %v19286_v41 = vpop.f32.mrb[42].mxu0  ;;  %v19406_v46 = vpop.f32.mrb[58].mxu1  ;;  %21435 = vmatpush3.bf16.msra.mxu0 %v21432_v13 }
 0x5c5   : > { %v4523_v48 = vpop.f32.mrb[43].mxu0  ;;  %v5171_v49 = vpop.f32.mrb[59].mxu1  ;;  %21485 = vmatprep.subr.bf16.mxu0 %v21484_v44 }
 0x5c6   : > { %19432 = vmatprep.mubr.msk.f32.mxu0 %vm5259_vm3, %v5171_v49  ;;  %v6548_v13 = vpop.permute.xlu1 %6547 }
 0x5c7   : > { %19433 = vmatmul.mubr.msk.f32.gmra.mrb[58].mxu0 %vm5259_vm3, %v19406_v46 }
 0x5c8   : > { %v19289_v50 = vpop.f32.mrb[44].mxu0  ;;  %v19409_v52 = vpop.f32.mrb[60].mxu1 }
 0x5c9   : > { %v4533_v54 = vpop.f32.mrb[45].mxu0  ;;  %v5181_v55 = vpop.f32.mrb[61].mxu1 }
 0x5ca   : > { %19435 = vmatprep.mubr.msk.f32.mxu0 %vm5259_vm3, %v5181_v55 }
 0x5cb   : > { %19436 = vmatmul.mubr.msk.f32.gmra.mrb[60].mxu0 %vm5259_vm3, %v19409_v52 }
 0x5cc   : > { %v19292_v56 = vpop.f32.mrb[46].mxu0  ;;  %v19412_v58 = vpop.f32.mrb[62].mxu1 }
 0x5cd   : > { %v4543_v60 = vpop.f32.mrb[47].mxu0  ;;  %v5191_v61 = vpop.f32.mrb[63].mxu1 }
 0x5ce   : > { %19438 = vmatprep.mubr.msk.f32.mxu0 %vm5259_vm3, %v5191_v61  ;;  %v6563_v61 = vpop.permute.xlu0 %6562 }
 0x5cf   : > { %19439 = vmatmul.mubr.msk.f32.gmra.mrb[62].mxu0 %vm5259_vm3, %v19412_v58 }
 0x5d0   : > { %v19295_v62 = vpop.f32.mrb[48].mxu0  ;;  %v19415_v0 = vpop.f32.mrb[64].mxu1 }
 0x5d1   : > { %v4553_v2 = vpop.f32.mrb[49].mxu0  ;;  %v5201_v3 = vpop.f32.mrb[65].mxu1 }
 0x5d2   : > { %19441 = vmatprep.mubr.msk.f32.mxu0 %vm5259_vm3, %v5201_v3 }
 0x5d3   : > { %19442 = vmatmul.mubr.msk.f32.gmra.mrb[64].mxu0 %vm5259_vm3, %v19415_v0 }
 0x5d4   : > { %v19298_v4 = vpop.f32.mrb[50].mxu0  ;;  %v19418_v8 = vpop.f32.mrb[66].mxu1 }
 0x5d5   : > { %v4563_v9 = vpop.f32.mrb[51].mxu0  ;;  %v5211_v11 = vpop.f32.mrb[67].mxu1 }
 0x5d6   : > { %19444 = vmatprep.mubr.msk.f32.mxu0 %vm5259_vm3, %v5211_v11 }
 0x5d7   : > { %19445 = vmatmul.mubr.msk.f32.gmra.mrb[66].mxu0 %vm5259_vm3, %v19418_v8 }
 0x5d8   : > { %v19301_v12 = vpop.f32.mrb[52].mxu0  ;;  %v19421_v14 = vpop.f32.mrb[68].mxu1 }
 0x5d9   : > { %v4573_v15 = vpop.f32.mrb[53].mxu0  ;;  %v5221_v18 = vpop.f32.mrb[69].mxu1 }
 0x5da   : > { %19447 = vmatprep.mubr.msk.f32.mxu0 %vm5259_vm3, %v5221_v18  ;;  %v6573_v18 = vpop.permute.xlu0 %6572 }
 0x5db   : > { %19448 = vmatmul.mubr.msk.f32.gmra.mrb[68].mxu0 %vm5259_vm3, %v19421_v14 }
 0x5dc   : > { %v19304_v20 = vpop.f32.mrb[54].mxu0  ;;  %v19424_v22 = vpop.f32.mrb[70].mxu1 }
 0x5dd   : > { %v4583_v29 = vpop.f32.mrb[55].mxu0  ;;  %v5231_v27 = vpop.f32.mrb[71].mxu1 }
 0x5de   : > { %19450 = vmatprep.mubr.msk.f32.mxu0 %vm5259_vm3, %v5231_v27 }
 0x5df   : > { %19451 = vmatmul.mubr.msk.f32.gmra.mrb[70].mxu0 %vm5259_vm3, %v19424_v22 }
 0x5e0   : > { %19457 = vmatprep.mubr.msk.f32.mxu0 %vm5259_vm3, %v4513_v42 }
 0x5e3   : > { %19458 = vmatmul.mubr.msk.f32.vlgmr.msra.gmra.mrb[56].mxu0 %vm5259_vm3, %v19283_v37  ;;  %v6558_v37 = vpop.permute.xlu1 %6557 }
 0x5e4   : > { %19460 = vmatprep.mubr.msk.f32.mxu0 %vm5259_vm3, %v4523_v48  ;;  %21487 = vmatpush3.bf16.msra.mxu0 %v21484_v44 }
 0x5e7   : > { %19461 = vmatmul.mubr.msk.f32.gmra.mrb[58].mxu0 %vm5259_vm3, %v19286_v41 }
 0x5e8   : > { %19463 = vmatprep.mubr.msk.f32.mxu0 %vm5259_vm3, %v4533_v54 }
 0x5eb   : > { %19464 = vmatmul.mubr.msk.f32.gmra.mrb[60].mxu0 %vm5259_vm3, %v19289_v50 }
 0x5ec   : > { %19466 = vmatprep.mubr.msk.f32.mxu0 %vm5259_vm3, %v4543_v60 }
 0x5ef   : > { %19467 = vmatmul.mubr.msk.f32.gmra.mrb[62].mxu0 %vm5259_vm3, %v19292_v56  ;;  %v6568_v56 = vpop.permute.xlu1 %6567 }
 0x5f0   : > { %19469 = vmatprep.mubr.msk.f32.mxu0 %vm5259_vm3, %v4553_v2 }
 0x5f3   : > { %19470 = vmatmul.mubr.msk.f32.gmra.mrb[64].mxu0 %vm5259_vm3, %v19295_v62 }
 0x5f4   : > { %19472 = vmatprep.mubr.msk.f32.mxu0 %vm5259_vm3, %v4563_v9 }
 0x5f7   : > { %19473 = vmatmul.mubr.msk.f32.gmra.mrb[66].mxu0 %vm5259_vm3, %v19298_v4 }
 0x5f8   : > { %19475 = vmatprep.mubr.msk.f32.mxu0 %vm5259_vm3, %v4573_v15 }
 0x5fb   : > { %19476 = vmatmul.mubr.msk.f32.gmra.mrb[68].mxu0 %vm5259_vm3, %v19301_v12  ;;  %v6578_v12 = vpop.permute.xlu1 %6577 }
 0x5fc   : > { %19478 = vmatprep.mubr.msk.f32.mxu0 %vm5259_vm3, %v4583_v29 }
 0x5ff   : > { %19479 = vmatmul.mubr.msk.f32.gmra.mrb[70].mxu0 %vm5259_vm3, %v19304_v20 }
 0x620   : > { %v19579_v17 = vpop.f32.mrb[72].mxu1 }
 0x621   : > { %v6197_v33 = vpop.f32.mrb[73].mxu1 }
 0x622   : > { %19605 = vmatprep.mubr.msk.f32.mxu0 %vm5259_vm3, %v6197_v33 }
 0x623   : > { %19606 = vmatmul.mubr.msk.f32.vlgmr.msra.gmra.mrb[56].mxu0 %vm5259_vm3, %v19579_v17 }
 0x624   : > { %v19582_v21 = vpop.f32.mrb[74].mxu1 }
 0x625   : > { %v6207_v38 = vpop.f32.mrb[75].mxu1 }
 0x626   : > { %19608 = vmatprep.mubr.msk.f32.mxu0 %vm5259_vm3, %v6207_v38 }
 0x627   : > { %19609 = vmatmul.mubr.msk.f32.gmra.mrb[58].mxu0 %vm5259_vm3, %v19582_v21 }
 0x628   : > { %v19585_v24 = vpop.f32.mrb[76].mxu1 }
 0x629   : > { %v6217_v23 = vpop.f32.mrb[77].mxu1 }
 0x62a   : > { %19611 = vmatprep.mubr.msk.f32.mxu0 %vm5259_vm3, %v6217_v23  ;;  %v6588_v23 = vpop.permute.xlu1 %6587 }
 0x62b   : > { %19612 = vmatmul.mubr.msk.f32.gmra.mrb[60].mxu0 %vm5259_vm3, %v19585_v24 }
 0x62c   : > { %v19588_v34 = vpop.f32.mrb[78].mxu1 }
 0x62d   : > { %v6227_v45 = vpop.f32.mrb[79].mxu1 }
 0x62e   : > { %19614 = vmatprep.mubr.msk.f32.mxu0 %vm5259_vm3, %v6227_v45  ;;  %v6598_v6 = vpop.permute.xlu1 %6597 }
 0x62f   : > { %19615 = vmatmul.mubr.msk.f32.gmra.mrb[62].mxu0 %vm5259_vm3, %v19588_v34 }
 0x630   : > { %v19591_v30 = vpop.f32.mrb[80].mxu1 }
 0x631   : > { %v6237_v40 = vpop.f32.mrb[81].mxu1 }
 0x632   : > { %19617 = vmatprep.mubr.msk.f32.mxu0 %vm5259_vm3, %v6237_v40 }
 0x633   : > { %19618 = vmatmul.mubr.msk.f32.gmra.mrb[64].mxu0 %vm5259_vm3, %v19591_v30  ;;  %v6583_v30 = vpop.permute.xlu0 %6582 }
 0x634   : > { %v19594_v47 = vpop.f32.mrb[82].mxu1 }
 0x635   : > { %v6247_v51 = vpop.f32.mrb[83].mxu1 }
 0x636   : > { %19620 = vmatprep.mubr.msk.f32.mxu0 %vm5259_vm3, %v6247_v51 }
 0x637   : > { %19621 = vmatmul.mubr.msk.f32.gmra.mrb[66].mxu0 %vm5259_vm3, %v19594_v47 }
 0x638   : > { %v19597_v53 = vpop.f32.mrb[84].mxu1 }
 0x639   : > { %v6257_v57 = vpop.f32.mrb[85].mxu1 }
 0x63a   : > { %19623 = vmatprep.mubr.msk.f32.mxu0 %vm5259_vm3, %v6257_v57 }
 0x63b   : > { %19624 = vmatmul.mubr.msk.f32.gmra.mrb[68].mxu0 %vm5259_vm3, %v19597_v53 }
 0x63c   : > { %v19600_v59 = vpop.f32.mrb[86].mxu1 }
 0x63d   : > { %v6267_v63 = vpop.f32.mrb[87].mxu1 }
 0x63e   : > { %19626 = vmatprep.mubr.msk.f32.mxu0 %vm5259_vm3, %v6267_v63 }
 0x63f   : > { %19627 = vmatmul.mubr.msk.f32.gmra.mrb[70].mxu0 %vm5259_vm3, %v19600_v59 }
 0x640   : > { %19661 = vmatprep.mubr.f32.mxu0 %v6632_v1 }
 0x6f6   : > { %v19607_v31 = vpop.f32.mrb[56].mxu0 }
 0x6f7   : > { %v6601_v32 = vadd.f32 %v19607_v31, %v6528_v5  ;;  %v6409_v19 = vpop.f32.mrb[57].mxu0  ;;  %v6593_v5 = vpop.permute.xlu0 %6592 }
 0x6f8   : > { %v6600_v35 = vadd.f32 %v6523_v7, %v6409_v19  ;;  %v6633_v19 = vld [vmem:[%s23206_s14 + $0x8] sm:$0xff] }
 0x6f9   : > { %v6617_v36 = vmax.f32 %v6601_v32, 0.0 }
 0x6fa   : > { %v6616_v39 = vmax.f32 %v6600_v35, 0.0  ;;  %v19610_v42 = vpop.f32.mrb[58].mxu0  ;;  %v6634_v35 = vld [vmem:[%s23206_s14 + $0x10] sm:$0xff] }
 0x6fb   : > { %v6603_v44 = vadd.f32 %v19610_v42, %v6538_v28  ;;  %v6419_v41 = vpop.f32.mrb[59].mxu0  ;;  %v6638_v42 = vld [vmem:[%s23206_s14 + $0x30] sm:$0xff] }
 0x6fc   : > { %v21488_v46 = vpack.c.bf16 %v6617_v36, %v6616_v39  ;;  %v6602_v48 = vadd.f32 %v6533_v10, %v6419_v41  ;;  %v6635_v36 = vld [vmem:[%s23206_s14 + $0x18] sm:$0xff]  ;;  %v6637_v39 = vld [vmem:[%s23206_s14 + $0x28] sm:$0xff] }
 0x6fd   : > { %v6619_v49 = vmax.f32 %v6603_v44, 0.0 }
 0x6fe   : > { %v6618_v50 = vmax.f32 %v6602_v48, 0.0  ;;  %v19613_v52 = vpop.f32.mrb[60].mxu0  ;;  %21489 = vmatprep.subr.bf16.mxu0 %v21488_v46 }
 0x6ff   : > { %v6605_v54 = vadd.f32 %v19613_v52, %v6548_v13  ;;  %v6429_v55 = vpop.f32.mrb[61].mxu0  ;;  %21491 = vmatpush3.bf16.msra.mxu0 %v21488_v46 }
 0x700   : > { %v21492_v58 = vpack.c.bf16 %v6619_v49, %v6618_v50  ;;  %v6604_v60 = vadd.f32 %v6543_v16, %v6429_v55  ;;  %v16233_v55 = vld [vmem:[%s25950_s16 + $0x300] sm:$0xff] }
 0x701   : > { %v6621_v62 = vmax.f32 %v6605_v54, 0.0 }
 0x702   : > { %v6620_v0 = vmax.f32 %v6604_v60, 0.0  ;;  %v19616_v2 = vpop.f32.mrb[62].mxu0  ;;  %21493 = vmatprep.subr.bf16.mxu0 %v21492_v58 }
 0x703   : > { %v6607_v3 = vadd.f32 %v19616_v2, %v6558_v37  ;;  %v6439_v4 = vpop.f32.mrb[63].mxu0  ;;  %21495 = vmatpush3.bf16.msra.mxu0 %v21492_v58  ;;  %v6636_v37 = vld [vmem:[%s23206_s14 + $0x20] sm:$0xff] }
 0x704   : > { %v21496_v8 = vpack.c.bf16 %v6621_v62, %v6620_v0  ;;  %v6606_v9 = vadd.f32 %v6553_v43, %v6439_v4  ;;  %v6639_v43 = vld [vmem:[%s23206_s14 + $0x38] sm:$0xff] }
 0x705   : > { %v6623_v11 = vmax.f32 %v6607_v3, 0.0 }
 0x706   : > { %v6622_v14 = vmax.f32 %v6606_v9, 0.0  ;;  %v19619_v15 = vpop.f32.mrb[64].mxu0  ;;  %21497 = vmatprep.subr.bf16.mxu0 %v21496_v8 }
 0x707   : > { %v6609_v20 = vadd.f32 %v19619_v15, %v6568_v56  ;;  %v6449_v22 = vpop.f32.mrb[65].mxu0  ;;  %21499 = vmatpush3.bf16.msra.mxu0 %v21496_v8  ;;  %v6876_v56 = vld [vmem:[%s25950_s16] sm:$0xff]  ;;  %v6877_v15 = vld [vmem:[%s25950_s16 + $0x8] sm:$0xff] }
 0x708   : > { %v21500_v29 = vpack.c.bf16 %v6623_v11, %v6622_v14  ;;  %v6608_v27 = vadd.f32 %v6563_v61, %v6449_v22  ;;  %v16234_v14 = vld [vmem:[%s25950_s16 + $0x308] sm:$0xff]  ;;  %v16236_v22 = vld [vmem:[%s25950_s16 + $0x318] sm:$0xff] }
 0x709   : > { %v6625_v17 = vmax.f32 %v6609_v20, 0.0  ;;  %v6878_v20 = vld [vmem:[%s25950_s16 + $0x10] sm:$0xff] }
 0x70a   : > { %v6624_v33 = vmax.f32 %v6608_v27, 0.0  ;;  %v19622_v21 = vpop.f32.mrb[66].mxu0  ;;  %21501 = vmatprep.subr.bf16.mxu0 %v21500_v29  ;;  %v16237_v27 = vld [vmem:[%s25950_s16 + $0x320] sm:$0xff] }
 0x70b   : > { %v6611_v38 = vadd.f32 %v19622_v21, %v6578_v12  ;;  %v6459_v24 = vpop.f32.mrb[67].mxu0  ;;  %21503 = vmatpush3.bf16.msra.mxu0 %v21500_v29  ;;  %v6879_v29 = vld [vmem:[%s25950_s16 + $0x18] sm:$0xff]  ;;  %v6881_v21 = vld [vmem:[%s25950_s16 + $0x28] sm:$0xff] }
 0x70c   : > { %v21504_v34 = vpack.c.bf16 %v6625_v17, %v6624_v33  ;;  %v6610_v45 = vadd.f32 %v6573_v18, %v6459_v24  ;;  %v16235_v18 = vld [vmem:[%s25950_s16 + $0x310] sm:$0xff]  ;;  %v6880_v17 = vld [vmem:[%s25950_s16 + $0x20] sm:$0xff]  ;;  %v16238_v33 = vld [vmem:[%s25950_s16 + $0x328] sm:$0xff] }
 0x70d   : > { %v6627_v40 = vmax.f32 %v6611_v38, 0.0  ;;  %v16239_v38 = vld [vmem:[%s25950_s16 + $0x330] sm:$0xff] }
 0x70e   : > { %v6626_v47 = vmax.f32 %v6610_v45, 0.0  ;;  %v19625_v51 = vpop.f32.mrb[68].mxu0  ;;  %21505 = vmatprep.subr.bf16.mxu0 %v21504_v34  ;;  %v6882_v24 = vld [vmem:[%s25950_s16 + $0x30] sm:$0xff]  ;;  %v16241_v45 = vld [vmem:[%s25950_s16 + $0x340] sm:$0xff] }
 0x70f   : > { %v6613_v53 = vadd.f32 %v19625_v51, %v6588_v23  ;;  %v6469_v57 = vpop.f32.mrb[69].mxu0  ;;  %21507 = vmatpush3.bf16.msra.mxu0 %v21504_v34  ;;  %v16240_v23 = vld [vmem:[%s25950_s16 + $0x338] sm:$0xff]  ;;  %v16243_v51 = vld [vmem:[%s25950_s16 + $0x350] sm:$0xff] }
 0x710   : > { %v21508_v59 = vpack.c.bf16 %v6627_v40, %v6626_v47  ;;  %v6612_v63 = vadd.f32 %v6583_v30, %v6469_v57  ;;  %v6883_v34 = vld [vmem:[%s25950_s16 + $0x38] sm:$0xff]  ;;  %v6884_v30 = vld [vmem:[%s25950_s16 + $0x40] sm:$0xff]  ;;  %v16242_v40 = vld [vmem:[%s25950_s16 + $0x348] sm:$0xff] }
 0x711   : > { %v6629_v1 = vmax.f32 %v6613_v53, 0.0  ;;  %v6885_v47 = vld [vmem:[%s25950_s16 + $0x48] sm:$0xff]  ;;  %v6886_v53 = vld [vmem:[%s25950_s16 + $0x50] sm:$0xff]  ;;  %v16244_v57 = vld [vmem:[%s25950_s16 + $0x358] sm:$0xff] }
 0x712   : > { %v6628_v25 = vmax.f32 %v6612_v63, 0.0  ;;  %v19628_v26 = vpop.f32.mrb[70].mxu0  ;;  %21509 = vmatprep.subr.bf16.mxu0 %v21508_v59  ;;  %v16245_v63 = vld [vmem:[%s25950_s16 + $0x360] sm:$0xff] }
 0x713   : > { %v6615_v7 = vadd.f32 %v19628_v26, %v6598_v6  ;;  %v6479_v28 = vpop.f32.mrb[71].mxu0  ;;  %21511 = vmatpush3.bf16.msra.mxu0 %v21508_v59  ;;  %v6887_v59 = vld [vmem:[%s25950_s16 + $0x58] sm:$0xff]  ;;  %v16246_v6 = vld [vmem:[%s25950_s16 + $0x368] sm:$0xff]  ;;  %v16247_v26 = vld [vmem:[%s25950_s16 + $0x370] sm:$0xff] }
 0x714   : > { %v21512_v10 = vpack.c.bf16 %v6629_v1, %v6628_v25  ;;  %v6614_v13 = vadd.f32 %v6593_v5, %v6479_v28  ;;  %v6888_v1 = vld [vmem:[%s25950_s16 + $0x60] sm:$0xff]  ;;  %v6889_v25 = vld [vmem:[%s25950_s16 + $0x68] sm:$0xff]  ;;  %v6890_v5 = vld [vmem:[%s25950_s16 + $0x70] sm:$0xff] }
 0x715   : > { %v6631_v16 = vmax.f32 %v6615_v7, 0.0  ;;  %v16248_v7 = vld [vmem:[%s25950_s16 + $0x378] sm:$0xff] }
 0x716   : > { %v6630_v31 = vmax.f32 %v6614_v13, 0.0  ;;  %21513 = vmatprep.subr.bf16.mxu0 %v21512_v10  ;;  %v6891_v28 = vld [vmem:[%s25950_s16 + $0x78] sm:$0xff]  ;;  %v6892_v13 = vld [vmem:[%s25950_s16 + $0x80] sm:$0xff] }
 0x717   : > { %21515 = vmatpush3.bf16.msra.mxu0 %v21512_v10  ;;  %v16249_v10 = vld [vmem:[%s25950_s16 + $0x380] sm:$0xff] }
 0x718   : > { %v21516_v32 = vpack.c.bf16 %v6631_v16, %v6630_v31  ;;  %v16250_v16 = vld [vmem:[%s25950_s16 + $0x388] sm:$0xff] }
 0x719   : > { %v6893_v31 = vld [vmem:[%s25950_s16 + $0x88] sm:$0xff] }
 0x71a   : > { %21517 = vmatprep.subr.bf16.mxu0 %v21516_v32 }
 0x71b   : > { %21519 = vmatpush3.bf16.msra.mxu0 %v21516_v32  ;;  %v16251_v32 = vld [vmem:[%s25950_s16 + $0x390] sm:$0xff] }
 0x71e   : > { %19662 = vmatmul.mubr.f32.vlgmr.msra.gmra.mrb[72].mxu0 %v6633_v19  ;;  %v6894_v19 = vld [vmem:[%s25950_s16 + $0x90] sm:$0xff] }
 0x71f   : > { %19664 = vmatprep.mubr.f32.mxu0 %v6634_v35  ;;  %v16252_v35 = vld [vmem:[%s25950_s16 + $0x398] sm:$0xff] }
 0x722   : > { %19665 = vmatmul.mubr.f32.gmra.mrb[74].mxu0 %v6635_v36  ;;  %v6895_v36 = vld [vmem:[%s25950_s16 + $0x98] sm:$0xff] }
 0x723   : > { %19667 = vmatprep.mubr.f32.mxu0 %v6636_v37  ;;  %v16253_v37 = vld [vmem:[%s25950_s16 + $0x3a0] sm:$0xff] }
 0x726   : > { %19668 = vmatmul.mubr.f32.gmra.mrb[76].mxu0 %v6637_v39  ;;  %v6896_v39 = vld [vmem:[%s25950_s16 + $0xa0] sm:$0xff] }
 0x727   : > { %19670 = vmatprep.mubr.f32.mxu0 %v6638_v42  ;;  %v16254_v42 = vld [vmem:[%s25950_s16 + $0x3a8] sm:$0xff] }
 0x72a   : > { %19671 = vmatmul.mubr.f32.gmra.mrb[78].mxu0 %v6639_v43  ;;  %v6897_v43 = vld [vmem:[%s25950_s16 + $0xa8] sm:$0xff] }
 0x72b   : > { %19769 = vmatprep.mubr.msk.f32.mxu0 %vm3995_vm2, %v6876_v56  ;;  %v6902_v56 = vld [vmem:[%s25950_s16 + $0xd0] sm:$0xff] }
 0x7f1   : > { %v19663_v44 = vpop.f32.mrb[72].mxu0 }
 0x7f2   : > { %v6706_v41 = vpop.f32.mrb[73].mxu0 }
 0x7f3   : > { %19677 = vmatprep.mubr.msk.f32.mxu1 %vm5259_vm3, %v6706_v41  ;;  %v6898_v41 = vld [vmem:[%s25950_s16 + $0xb0] sm:$0xff] }
 0x7f4   : > { %19678 = vmatmul.mubr.msk.f32.vlgmr.msra.gmra.mrb[88].mxu1 %vm5259_vm3, %v19663_v44  ;;  %v16255_v44 = vld [vmem:[%s25950_s16 + $0x3b0] sm:$0xff] }
 0x7f5   : > { %v19666_v46 = vpop.f32.mrb[74].mxu0 }
 0x7f6   : > { %v6716_v48 = vpop.f32.mrb[75].mxu0 }
 0x7f7   : > { %19680 = vmatprep.mubr.msk.f32.mxu1 %vm5259_vm3, %v6716_v48  ;;  %v6899_v48 = vld [vmem:[%s25950_s16 + $0xb8] sm:$0xff] }
 0x7f8   : > { %19681 = vmatmul.mubr.msk.f32.gmra.mrb[90].mxu1 %vm5259_vm3, %v19666_v46  ;;  %v16256_v46 = vld [vmem:[%s25950_s16 + $0x3b8] sm:$0xff] }
 0x7f9   : > { %v19669_v49 = vpop.f32.mrb[76].mxu0 }
 0x7fa   : > { %v6726_v50 = vpop.f32.mrb[77].mxu0 }
 0x7fb   : > { %19683 = vmatprep.mubr.msk.f32.mxu1 %vm5259_vm3, %v6726_v50  ;;  %v6900_v50 = vld [vmem:[%s25950_s16 + $0xc0] sm:$0xff] }
 0x7fc   : > { %19684 = vmatmul.mubr.msk.f32.gmra.mrb[92].mxu1 %vm5259_vm3, %v19669_v49  ;;  %v16257_v49 = vld [vmem:[%s25950_s16 + $0x3c0] sm:$0xff] }
 0x7fd   : > { %v19672_v52 = vpop.f32.mrb[78].mxu0 }
 0x7fe   : > { %v6736_v54 = vpop.f32.mrb[79].mxu0 }
 0x7ff   : > { %19686 = vmatprep.mubr.msk.f32.mxu1 %vm5259_vm3, %v6736_v54  ;;  %v6901_v54 = vld [vmem:[%s25950_s16 + $0xc8] sm:$0xff] }
 0x800   : > { %19687 = vmatmul.mubr.msk.f32.gmra.mrb[94].mxu1 %vm5259_vm3, %v19672_v52  ;;  %v16258_v52 = vld [vmem:[%s25950_s16 + $0x3c8] sm:$0xff] }
 0x801   : > { %19705 = vmatprep.mubr.msk.f32.mxu1 %vm3995_vm2, %v16233_v55  ;;  %v16259_v55 = vld [vmem:[%s25950_s16 + $0x3d0] sm:$0xff] }
 0x8c7   : > { %v19679_v58 = vpop.f32.mrb[88].mxu1 }
 0x8c8   : > { %v6837_v60 = vpop.f32.mrb[89].mxu1 }
 0x8c9   : > { %v24432_v61 = vpack.c.bf16 %v19679_v58, %v6837_v60  ;;  %v16260_v58 = vld [vmem:[%s25950_s16 + $0x3d8] sm:$0xff] }
 0x8ca   : > { %v6903_v60 = vld [vmem:[%s25950_s16 + $0xd8] sm:$0xff] }
 0x8cb   : > { %v19682_v62 = vpop.f32.mrb[90].mxu1  ;;  %21525 = vmatprep.subr.bf16.mxu1 %v24432_v61  ;;  %21541 = vmatprep.subr.bf16.mxu0 %v24432_v61 }
 0x8cc   : > { %v6847_v0 = vpop.f32.mrb[91].mxu1  ;;  %21527 = vmatpush3.bf16.msra.mxu1 %v24432_v61  ;;  %21543 = vmatpush3.bf16.msra.mxu0 %v24432_v61 }
 0x8cd   : > { %v24438_v2 = vpack.c.bf16 %v19682_v62, %v6847_v0  ;;  %v16261_v62 = vld [vmem:[%s25950_s16 + $0x3e0] sm:$0xff] }
 0x8ce   : > { %v6904_v0 = vld [vmem:[%s25950_s16 + $0xe0] sm:$0xff] }
 0x8cf   : > { %v19685_v3 = vpop.f32.mrb[92].mxu1  ;;  %21529 = vmatprep.subr.bf16.mxu1 %v24438_v2  ;;  %21545 = vmatprep.subr.bf16.mxu0 %v24438_v2 }
 0x8d0   : > { %v6857_v4 = vpop.f32.mrb[93].mxu1  ;;  %21531 = vmatpush3.bf16.msra.mxu1 %v24438_v2  ;;  %21547 = vmatpush3.bf16.msra.mxu0 %v24438_v2 }
 0x8d1   : > { %v24444_v8 = vpack.c.bf16 %v19685_v3, %v6857_v4  ;;  %v16262_v3 = vld [vmem:[%s25950_s16 + $0x3e8] sm:$0xff] }
 0x8d2   : > { %v6905_v4 = vld [vmem:[%s25950_s16 + $0xe8] sm:$0xff] }
 0x8d3   : > { %v19688_v9 = vpop.f32.mrb[94].mxu1  ;;  %21533 = vmatprep.subr.bf16.mxu1 %v24444_v8  ;;  %21549 = vmatprep.subr.bf16.mxu0 %v24444_v8 }
 0x8d4   : > { %v6867_v11 = vpop.f32.mrb[95].mxu1  ;;  %21535 = vmatpush3.bf16.msra.mxu1 %v24444_v8  ;;  %21551 = vmatpush3.bf16.msra.mxu0 %v24444_v8 }
 0x8d5   : > { %v24450_v12 = vpack.c.bf16 %v19688_v9, %v6867_v11  ;;  %v16263_v9 = vld [vmem:[%s25950_s16 + $0x3f0] sm:$0xff] }
 0x8d6   : > { %v6906_v11 = vld [vmem:[%s25950_s16 + $0xf0] sm:$0xff] }
 0x8d7   : > { %21537 = vmatprep.subr.bf16.mxu1 %v24450_v12  ;;  %21553 = vmatprep.subr.bf16.mxu0 %v24450_v12 }
 0x8d8   : > { %21539 = vmatpush3.bf16.msra.mxu1 %v24450_v12  ;;  %21555 = vmatpush3.bf16.msra.mxu0 %v24450_v12 }
 0x8d9   : > { %21557 = vmatprep.subr.bf16.mxu0 %v24432_v61  ;;  %21573 = vmatprep.subr.bf16.mxu1 %v24432_v61 }
 0x8db   : > { %19706 = vmatmul.mubr.msk.f32.vlgmr.msra.gmra.mrb[96].mxu1 %vm3995_vm2, %v16234_v14  ;;  %19770 = vmatmul.mubr.msk.f32.vlgmr.msra.gmra.mrb[80].mxu0 %vm3995_vm2, %v6877_v15  ;;  %v16264_v14 = vld [vmem:[%s25950_s16 + $0x3f8] sm:$0xff] }
 0x8dc   : > { %21559 = vmatpush3.bf16.msra.mxu0 %v24432_v61  ;;  %21575 = vmatpush3.bf16.msra.mxu1 %v24432_v61  ;;  %v6907_v15 = vld [vmem:[%s25950_s16 + $0xf8] sm:$0xff] }
 0x8dd   : > { %21561 = vmatprep.subr.bf16.mxu0 %v24438_v2  ;;  %21577 = vmatprep.subr.bf16.mxu1 %v24438_v2 }
 0x8de   : > { %19708 = vmatprep.mubr.msk.f32.mxu1 %vm3995_vm2, %v16235_v18  ;;  %19772 = vmatprep.mubr.msk.f32.mxu0 %vm3995_vm2, %v6878_v20  ;;  %v16329_v18 = vld [vmem:[%s25950_s16 + $0x600] sm:$0xff] }
 0x8df   : > { %19709 = vmatmul.mubr.msk.f32.gmra.mrb[98].mxu1 %vm3995_vm2, %v16236_v22  ;;  %19773 = vmatmul.mubr.msk.f32.gmra.mrb[82].mxu0 %vm3995_vm2, %v6879_v29  ;;  %v16425_v20 = vld [vmem:[%s25950_s16 + $0x400] sm:$0xff]  ;;  %v16330_v22 = vld [vmem:[%s25950_s16 + $0x608] sm:$0xff] }
 0x8e0   : > { %21563 = vmatpush3.bf16.msra.mxu0 %v24438_v2  ;;  %21579 = vmatpush3.bf16.msra.mxu1 %v24438_v2  ;;  %v16426_v29 = vld [vmem:[%s25950_s16 + $0x408] sm:$0xff] }
 0x8e1   : > { %21565 = vmatprep.subr.bf16.mxu0 %v24444_v8  ;;  %21581 = vmatprep.subr.bf16.mxu1 %v24444_v8 }
 0x8e2   : > { %19711 = vmatprep.mubr.msk.f32.mxu1 %vm3995_vm2, %v16237_v27  ;;  %19775 = vmatprep.mubr.msk.f32.mxu0 %vm3995_vm2, %v6880_v17  ;;  %v16331_v27 = vld [vmem:[%s25950_s16 + $0x610] sm:$0xff] }
 0x8e3   : > { %19712 = vmatmul.mubr.msk.f32.gmra.mrb[100].mxu1 %vm3995_vm2, %v16238_v33  ;;  %19776 = vmatmul.mubr.msk.f32.gmra.mrb[84].mxu0 %vm3995_vm2, %v6881_v21  ;;  %v16427_v17 = vld [vmem:[%s25950_s16 + $0x410] sm:$0xff]  ;;  %v16332_v33 = vld [vmem:[%s25950_s16 + $0x618] sm:$0xff] }
 0x8e4   : > { %21567 = vmatpush3.bf16.msra.mxu0 %v24444_v8  ;;  %21583 = vmatpush3.bf16.msra.mxu1 %v24444_v8  ;;  %v16428_v21 = vld [vmem:[%s25950_s16 + $0x418] sm:$0xff] }
 0x8e5   : > { %21569 = vmatprep.subr.bf16.mxu0 %v24450_v12  ;;  %21585 = vmatprep.subr.bf16.mxu1 %v24450_v12 }
 0x8e6   : > { %19714 = vmatprep.mubr.msk.f32.mxu1 %vm3995_vm2, %v16239_v38  ;;  %19778 = vmatprep.mubr.msk.f32.mxu0 %vm3995_vm2, %v6882_v24  ;;  %v16333_v38 = vld [vmem:[%s25950_s16 + $0x620] sm:$0xff] }
 0x8e7   : > { %19715 = vmatmul.mubr.msk.f32.gmra.mrb[102].mxu1 %vm3995_vm2, %v16240_v23  ;;  %19779 = vmatmul.mubr.msk.f32.gmra.mrb[86].mxu0 %vm3995_vm2, %v6883_v34  ;;  %v16429_v24 = vld [vmem:[%s25950_s16 + $0x420] sm:$0xff]  ;;  %v16334_v23 = vld [vmem:[%s25950_s16 + $0x628] sm:$0xff] }
 0x8e8   : > { %21571 = vmatpush3.bf16.msra.mxu0 %v24450_v12  ;;  %21587 = vmatpush3.bf16.msra.mxu1 %v24450_v12  ;;  %v16430_v34 = vld [vmem:[%s25950_s16 + $0x428] sm:$0xff] }
 0x8e9   : > { %21589 = vmatprep.subr.bf16.mxu1 %v24432_v61  ;;  %19717 = vmatprep.mubr.msk.f32.mxu1 %vm3995_vm2, %v16241_v45  ;;  %v16335_v45 = vld [vmem:[%s25950_s16 + $0x630] sm:$0xff] }
 0x8ea   : > { %19781 = vmatprep.mubr.msk.f32.mxu0 %vm3995_vm2, %v6884_v30  ;;  %v16431_v30 = vld [vmem:[%s25950_s16 + $0x430] sm:$0xff] }
 0x8eb   : > { %19718 = vmatmul.mubr.msk.f32.gmra.mrb[104].mxu1 %vm3995_vm2, %v16242_v40  ;;  %19782 = vmatmul.mubr.msk.f32.gmra.mrb[88].mxu0 %vm3995_vm2, %v6885_v47  ;;  %v16336_v40 = vld [vmem:[%s25950_s16 + $0x638] sm:$0xff] }
 0x8ec   : > { %19720 = vmatprep.mubr.msk.f32.mxu1 %vm3995_vm2, %v16243_v51  ;;  %19784 = vmatprep.mubr.msk.f32.mxu0 %vm3995_vm2, %v6886_v53  ;;  %v16432_v47 = vld [vmem:[%s25950_s16 + $0x438] sm:$0xff]  ;;  %v16337_v51 = vld [vmem:[%s25950_s16 + $0x640] sm:$0xff] }
 0x8ed   : > { %v16433_v53 = vld [vmem:[%s25950_s16 + $0x440] sm:$0xff] }
 0x8ef   : > { %19721 = vmatmul.mubr.msk.f32.gmra.mrb[106].mxu1 %vm3995_vm2, %v16244_v57  ;;  %19785 = vmatmul.mubr.msk.f32.gmra.mrb[90].mxu0 %vm3995_vm2, %v6887_v59  ;;  %v16338_v57 = vld [vmem:[%s25950_s16 + $0x648] sm:$0xff] }
 0x8f0   : > { %19723 = vmatprep.mubr.msk.f32.mxu1 %vm3995_vm2, %v16245_v63  ;;  %19787 = vmatprep.mubr.msk.f32.mxu0 %vm3995_vm2, %v6888_v1  ;;  %v16434_v59 = vld [vmem:[%s25950_s16 + $0x448] sm:$0xff]  ;;  %v16339_v63 = vld [vmem:[%s25950_s16 + $0x650] sm:$0xff] }
 0x8f1   : > { %v16435_v1 = vld [vmem:[%s25950_s16 + $0x450] sm:$0xff] }
 0x8f3   : > { %19724 = vmatmul.mubr.msk.f32.gmra.mrb[108].mxu1 %vm3995_vm2, %v16246_v6  ;;  %19788 = vmatmul.mubr.msk.f32.gmra.mrb[92].mxu0 %vm3995_vm2, %v6889_v25  ;;  %v16340_v6 = vld [vmem:[%s25950_s16 + $0x658] sm:$0xff] }
 0x8f4   : > { %19726 = vmatprep.mubr.msk.f32.mxu1 %vm3995_vm2, %v16247_v26  ;;  %19790 = vmatprep.mubr.msk.f32.mxu0 %vm3995_vm2, %v6890_v5  ;;  %v16436_v25 = vld [vmem:[%s25950_s16 + $0x458] sm:$0xff]  ;;  %v16341_v26 = vld [vmem:[%s25950_s16 + $0x660] sm:$0xff] }
 0x8f5   : > { %v16437_v5 = vld [vmem:[%s25950_s16 + $0x460] sm:$0xff] }
 0x8f7   : > { %19727 = vmatmul.mubr.msk.f32.gmra.mrb[110].mxu1 %vm3995_vm2, %v16248_v7  ;;  %19791 = vmatmul.mubr.msk.f32.gmra.mrb[94].mxu0 %vm3995_vm2, %v6891_v28  ;;  %v16342_v7 = vld [vmem:[%s25950_s16 + $0x668] sm:$0xff] }
 0x8f8   : > { %19729 = vmatprep.mubr.msk.f32.mxu1 %vm3995_vm2, %v16249_v10  ;;  %19793 = vmatprep.mubr.msk.f32.mxu0 %vm3995_vm2, %v6892_v13  ;;  %v16438_v28 = vld [vmem:[%s25950_s16 + $0x468] sm:$0xff]  ;;  %v16343_v10 = vld [vmem:[%s25950_s16 + $0x670] sm:$0xff] }
 0x8f9   : > { %v16439_v13 = vld [vmem:[%s25950_s16 + $0x470] sm:$0xff] }
 0x8fb   : > { %19730 = vmatmul.mubr.msk.f32.gmra.mrb[112].mxu1 %vm3995_vm2, %v16250_v16  ;;  %19794 = vmatmul.mubr.msk.f32.gmra.mrb[96].mxu0 %vm3995_vm2, %v6893_v31  ;;  %v16344_v16 = vld [vmem:[%s25950_s16 + $0x678] sm:$0xff] }
 0x8fc   : > { %19732 = vmatprep.mubr.msk.f32.mxu1 %vm3995_vm2, %v16251_v32  ;;  %19796 = vmatprep.mubr.msk.f32.mxu0 %vm3995_vm2, %v6894_v19  ;;  %v16440_v31 = vld [vmem:[%s25950_s16 + $0x478] sm:$0xff]  ;;  %v16345_v32 = vld [vmem:[%s25950_s16 + $0x680] sm:$0xff] }
 0x8fd   : > { %v16441_v19 = vld [vmem:[%s25950_s16 + $0x480] sm:$0xff] }
 0x8ff   : > { %19733 = vmatmul.mubr.msk.f32.gmra.mrb[114].mxu1 %vm3995_vm2, %v16252_v35  ;;  %19797 = vmatmul.mubr.msk.f32.gmra.mrb[98].mxu0 %vm3995_vm2, %v6895_v36  ;;  %v16346_v35 = vld [vmem:[%s25950_s16 + $0x688] sm:$0xff] }
 0x900   : > { %19735 = vmatprep.mubr.msk.f32.mxu1 %vm3995_vm2, %v16253_v37  ;;  %19799 = vmatprep.mubr.msk.f32.mxu0 %vm3995_vm2, %v6896_v39  ;;  %v16442_v36 = vld [vmem:[%s25950_s16 + $0x488] sm:$0xff]  ;;  %v16347_v37 = vld [vmem:[%s25950_s16 + $0x690] sm:$0xff] }
 0x901   : > { %v16443_v39 = vld [vmem:[%s25950_s16 + $0x490] sm:$0xff] }
 0x903   : > { %19736 = vmatmul.mubr.msk.f32.gmra.mrb[116].mxu1 %vm3995_vm2, %v16254_v42  ;;  %19800 = vmatmul.mubr.msk.f32.gmra.mrb[100].mxu0 %vm3995_vm2, %v6897_v43  ;;  %v16348_v42 = vld [vmem:[%s25950_s16 + $0x698] sm:$0xff] }
 0x904   : > { %19738 = vmatprep.mubr.msk.f32.mxu1 %vm3995_vm2, %v16255_v44  ;;  %19802 = vmatprep.mubr.msk.f32.mxu0 %vm3995_vm2, %v6898_v41  ;;  %v16444_v43 = vld [vmem:[%s25950_s16 + $0x498] sm:$0xff]  ;;  %v16349_v44 = vld [vmem:[%s25950_s16 + $0x6a0] sm:$0xff] }
 0x905   : > { %v16445_v41 = vld [vmem:[%s25950_s16 + $0x4a0] sm:$0xff] }
 0x907   : > { %19739 = vmatmul.mubr.msk.f32.gmra.mrb[118].mxu1 %vm3995_vm2, %v16256_v46  ;;  %19803 = vmatmul.mubr.msk.f32.gmra.mrb[102].mxu0 %vm3995_vm2, %v6899_v48  ;;  %v16350_v46 = vld [vmem:[%s25950_s16 + $0x6a8] sm:$0xff] }
 0x908   : > { %19741 = vmatprep.mubr.msk.f32.mxu1 %vm3995_vm2, %v16257_v49  ;;  %19805 = vmatprep.mubr.msk.f32.mxu0 %vm3995_vm2, %v6900_v50  ;;  %v16446_v48 = vld [vmem:[%s25950_s16 + $0x4a8] sm:$0xff]  ;;  %v16351_v49 = vld [vmem:[%s25950_s16 + $0x6b0] sm:$0xff] }
 0x909   : > { %v16447_v50 = vld [vmem:[%s25950_s16 + $0x4b0] sm:$0xff] }
 0x90b   : > { %19742 = vmatmul.mubr.msk.f32.gmra.mrb[120].mxu1 %vm3995_vm2, %v16258_v52  ;;  %19806 = vmatmul.mubr.msk.f32.gmra.mrb[104].mxu0 %vm3995_vm2, %v6901_v54  ;;  %v16352_v52 = vld [vmem:[%s25950_s16 + $0x6b8] sm:$0xff] }
 0x90c   : > { %19744 = vmatprep.mubr.msk.f32.mxu1 %vm3995_vm2, %v16259_v55  ;;  %19808 = vmatprep.mubr.msk.f32.mxu0 %vm3995_vm2, %v6902_v56  ;;  %v16448_v54 = vld [vmem:[%s25950_s16 + $0x4b8] sm:$0xff]  ;;  %v16353_v55 = vld [vmem:[%s25950_s16 + $0x6c0] sm:$0xff] }
 0x90d   : > { %v16449_v56 = vld [vmem:[%s25950_s16 + $0x4c0] sm:$0xff] }
 0x90f   : > { %19745 = vmatmul.mubr.msk.f32.gmra.mrb[122].mxu1 %vm3995_vm2, %v16260_v58  ;;  %19809 = vmatmul.mubr.msk.f32.gmra.mrb[106].mxu0 %vm3995_vm2, %v6903_v60  ;;  %v16354_v58 = vld [vmem:[%s25950_s16 + $0x6c8] sm:$0xff] }
 0x910   : > { %19747 = vmatprep.mubr.msk.f32.mxu1 %vm3995_vm2, %v16261_v62  ;;  %19811 = vmatprep.mubr.msk.f32.mxu0 %vm3995_vm2, %v6904_v0  ;;  %v16450_v60 = vld [vmem:[%s25950_s16 + $0x4c8] sm:$0xff]  ;;  %v16355_v62 = vld [vmem:[%s25950_s16 + $0x6d0] sm:$0xff] }
 0x911   : > { %v16451_v0 = vld [vmem:[%s25950_s16 + $0x4d0] sm:$0xff] }
 0x913   : > { %19748 = vmatmul.mubr.msk.f32.gmra.mrb[124].mxu1 %vm3995_vm2, %v16262_v3  ;;  %19812 = vmatmul.mubr.msk.f32.gmra.mrb[108].mxu0 %vm3995_vm2, %v6905_v4  ;;  %v16356_v3 = vld [vmem:[%s25950_s16 + $0x6d8] sm:$0xff] }
 0x914   : > { %19750 = vmatprep.mubr.msk.f32.mxu1 %vm3995_vm2, %v16263_v9  ;;  %19814 = vmatprep.mubr.msk.f32.mxu0 %vm3995_vm2, %v6906_v11  ;;  %v16452_v4 = vld [vmem:[%s25950_s16 + $0x4d8] sm:$0xff]  ;;  %v16357_v9 = vld [vmem:[%s25950_s16 + $0x6e0] sm:$0xff] }
 0x915   : > { %v16453_v11 = vld [vmem:[%s25950_s16 + $0x4e0] sm:$0xff] }
 0x917   : > { %19751 = vmatmul.mubr.msk.f32.gmra.mrb[126].mxu1 %vm3995_vm2, %v16264_v14  ;;  %19815 = vmatmul.mubr.msk.f32.gmra.mrb[110].mxu0 %vm3995_vm2, %v6907_v15  ;;  %v16358_v14 = vld [vmem:[%s25950_s16 + $0x6e8] sm:$0xff] }
 0x918   : > { %19833 = vmatprep.mubr.msk.f32.mxu0 %vm3995_vm2, %v16329_v18  ;;  %19897 = vmatprep.mubr.msk.f32.mxu1 %vm3995_vm2, %v16425_v20  ;;  %v16454_v15 = vld [vmem:[%s25950_s16 + $0x4e8] sm:$0xff]  ;;  %v16359_v18 = vld [vmem:[%s25950_s16 + $0x6f0] sm:$0xff] }
 0x919   : > { %v16455_v20 = vld [vmem:[%s25950_s16 + $0x4f0] sm:$0xff] }
 0x91b   : > { %19834 = vmatmul.mubr.msk.f32.vlgmr.msra.gmra.mrb[80].mxu0 %vm3995_vm2, %v16330_v22  ;;  %19898 = vmatmul.mubr.msk.f32.vlgmr.msra.gmra.mrb[128].mxu1 %vm3995_vm2, %v16426_v29  ;;  %v16360_v22 = vld [vmem:[%s25950_s16 + $0x6f8] sm:$0xff] }
 0x91c   : > { %21591 = vmatpush3.bf16.msra.mxu1 %v24432_v61  ;;  %19836 = vmatprep.mubr.msk.f32.mxu0 %vm3995_vm2, %v16331_v27  ;;  %v16456_v29 = vld [vmem:[%s25950_s16 + $0x4f8] sm:$0xff]  ;;  %v16393_v27 = vld [vmem:[%s25950_s16 + $0x100] sm:$0xff] }
 0x91d   : > { %21593 = vmatprep.subr.bf16.mxu1 %v24438_v2  ;;  %19900 = vmatprep.mubr.msk.f32.mxu1 %vm3995_vm2, %v16427_v17  ;;  %v16394_v17 = vld [vmem:[%s25950_s16 + $0x108] sm:$0xff] }
 0x91f   : > { %19837 = vmatmul.mubr.msk.f32.gmra.mrb[82].mxu0 %vm3995_vm2, %v16332_v33  ;;  %19901 = vmatmul.mubr.msk.f32.gmra.mrb[130].mxu1 %vm3995_vm2, %v16428_v21  ;;  %v16395_v33 = vld [vmem:[%s25950_s16 + $0x110] sm:$0xff]  ;;  %v16396_v21 = vld [vmem:[%s25950_s16 + $0x118] sm:$0xff] }
 0x920   : > { %21595 = vmatpush3.bf16.msra.mxu1 %v24438_v2  ;;  %19839 = vmatprep.mubr.msk.f32.mxu0 %vm3995_vm2, %v16333_v38  ;;  %v16397_v38 = vld [vmem:[%s25950_s16 + $0x120] sm:$0xff] }
 0x921   : > { %21597 = vmatprep.subr.bf16.mxu1 %v24444_v8  ;;  %19903 = vmatprep.mubr.msk.f32.mxu1 %vm3995_vm2, %v16429_v24  ;;  %v16398_v24 = vld [vmem:[%s25950_s16 + $0x128] sm:$0xff] }
 0x923   : > { %19840 = vmatmul.mubr.msk.f32.gmra.mrb[84].mxu0 %vm3995_vm2, %v16334_v23  ;;  %19904 = vmatmul.mubr.msk.f32.gmra.mrb[132].mxu1 %vm3995_vm2, %v16430_v34  ;;  %v16399_v23 = vld [vmem:[%s25950_s16 + $0x130] sm:$0xff]  ;;  %v16400_v34 = vld [vmem:[%s25950_s16 + $0x138] sm:$0xff] }
 0x924   : > { %21599 = vmatpush3.bf16.msra.mxu1 %v24444_v8  ;;  %19842 = vmatprep.mubr.msk.f32.mxu0 %vm3995_vm2, %v16335_v45  ;;  %v16401_v45 = vld [vmem:[%s25950_s16 + $0x140] sm:$0xff] }
 0x925   : > { %21601 = vmatprep.subr.bf16.mxu1 %v24450_v12  ;;  %19906 = vmatprep.mubr.msk.f32.mxu1 %vm3995_vm2, %v16431_v30  ;;  %v16402_v30 = vld [vmem:[%s25950_s16 + $0x148] sm:$0xff] }
 0x927   : > { %19843 = vmatmul.mubr.msk.f32.gmra.mrb[86].mxu0 %vm3995_vm2, %v16336_v40  ;;  %19907 = vmatmul.mubr.msk.f32.gmra.mrb[134].mxu1 %vm3995_vm2, %v16432_v47  ;;  %v16403_v40 = vld [vmem:[%s25950_s16 + $0x150] sm:$0xff]  ;;  %v16404_v47 = vld [vmem:[%s25950_s16 + $0x158] sm:$0xff] }
 0x928   : > { %21603 = vmatpush3.bf16.msra.mxu1 %v24450_v12  ;;  %19845 = vmatprep.mubr.msk.f32.mxu0 %vm3995_vm2, %v16337_v51  ;;  %v16405_v51 = vld [vmem:[%s25950_s16 + $0x160] sm:$0xff] }
 0x929   : > { %21605 = vmatprep.subr.bf16.mxu1 %v24432_v61  ;;  %19909 = vmatprep.mubr.msk.f32.mxu1 %vm3995_vm2, %v16433_v53  ;;  %v16406_v53 = vld [vmem:[%s25950_s16 + $0x168] sm:$0xff] }
 0x92b   : > { %19846 = vmatmul.mubr.msk.f32.gmra.mrb[88].mxu0 %vm3995_vm2, %v16338_v57  ;;  %19910 = vmatmul.mubr.msk.f32.gmra.mrb[136].mxu1 %vm3995_vm2, %v16434_v59  ;;  %v16407_v57 = vld [vmem:[%s25950_s16 + $0x170] sm:$0xff]  ;;  %v16408_v59 = vld [vmem:[%s25950_s16 + $0x178] sm:$0xff] }
 0x92c   : > { %19848 = vmatprep.mubr.msk.f32.mxu0 %vm3995_vm2, %v16339_v63  ;;  %19912 = vmatprep.mubr.msk.f32.mxu1 %vm3995_vm2, %v16435_v1  ;;  %v16409_v63 = vld [vmem:[%s25950_s16 + $0x180] sm:$0xff]  ;;  %v16410_v1 = vld [vmem:[%s25950_s16 + $0x188] sm:$0xff] }
 0x92f   : > { %19849 = vmatmul.mubr.msk.f32.gmra.mrb[90].mxu0 %vm3995_vm2, %v16340_v6  ;;  %19913 = vmatmul.mubr.msk.f32.gmra.mrb[138].mxu1 %vm3995_vm2, %v16436_v25  ;;  %v16411_v6 = vld [vmem:[%s25950_s16 + $0x190] sm:$0xff]  ;;  %v16412_v25 = vld [vmem:[%s25950_s16 + $0x198] sm:$0xff] }
 0x930   : > { %19851 = vmatprep.mubr.msk.f32.mxu0 %vm3995_vm2, %v16341_v26  ;;  %19915 = vmatprep.mubr.msk.f32.mxu1 %vm3995_vm2, %v16437_v5  ;;  %v16413_v26 = vld [vmem:[%s25950_s16 + $0x1a0] sm:$0xff]  ;;  %v16414_v5 = vld [vmem:[%s25950_s16 + $0x1a8] sm:$0xff] }
 0x933   : > { %19852 = vmatmul.mubr.msk.f32.gmra.mrb[92].mxu0 %vm3995_vm2, %v16342_v7  ;;  %19916 = vmatmul.mubr.msk.f32.gmra.mrb[140].mxu1 %vm3995_vm2, %v16438_v28  ;;  %v16415_v7 = vld [vmem:[%s25950_s16 + $0x1b0] sm:$0xff]  ;;  %v16416_v28 = vld [vmem:[%s25950_s16 + $0x1b8] sm:$0xff] }
 0x934   : > { %19854 = vmatprep.mubr.msk.f32.mxu0 %vm3995_vm2, %v16343_v10  ;;  %19918 = vmatprep.mubr.msk.f32.mxu1 %vm3995_vm2, %v16439_v13  ;;  %v16417_v10 = vld [vmem:[%s25950_s16 + $0x1c0] sm:$0xff]  ;;  %v16418_v13 = vld [vmem:[%s25950_s16 + $0x1c8] sm:$0xff] }
 0x937   : > { %19855 = vmatmul.mubr.msk.f32.gmra.mrb[94].mxu0 %vm3995_vm2, %v16344_v16  ;;  %19919 = vmatmul.mubr.msk.f32.gmra.mrb[142].mxu1 %vm3995_vm2, %v16440_v31  ;;  %v16419_v16 = vld [vmem:[%s25950_s16 + $0x1d0] sm:$0xff]  ;;  %v16420_v31 = vld [vmem:[%s25950_s16 + $0x1d8] sm:$0xff] }
 0x938   : > { %19857 = vmatprep.mubr.msk.f32.mxu0 %vm3995_vm2, %v16345_v32  ;;  %19921 = vmatprep.mubr.msk.f32.mxu1 %vm3995_vm2, %v16441_v19  ;;  %v16421_v32 = vld [vmem:[%s25950_s16 + $0x1e0] sm:$0xff]  ;;  %v16422_v19 = vld [vmem:[%s25950_s16 + $0x1e8] sm:$0xff] }
 0x93b   : > { %19858 = vmatmul.mubr.msk.f32.gmra.mrb[96].mxu0 %vm3995_vm2, %v16346_v35  ;;  %19922 = vmatmul.mubr.msk.f32.gmra.mrb[144].mxu1 %vm3995_vm2, %v16442_v36  ;;  %v16423_v35 = vld [vmem:[%s25950_s16 + $0x1f0] sm:$0xff]  ;;  %v16424_v36 = vld [vmem:[%s25950_s16 + $0x1f8] sm:$0xff] }
 0x93c   : > { %19860 = vmatprep.mubr.msk.f32.mxu0 %vm3995_vm2, %v16347_v37  ;;  %19924 = vmatprep.mubr.msk.f32.mxu1 %vm3995_vm2, %v16443_v39  ;;  %v16521_v37 = vld [vmem:[%s25950_s16 + $0x700] sm:$0xff]  ;;  %v16522_v39 = vld [vmem:[%s25950_s16 + $0x708] sm:$0xff] }
 0x93f   : > { %19861 = vmatmul.mubr.msk.f32.gmra.mrb[98].mxu0 %vm3995_vm2, %v16348_v42  ;;  %19925 = vmatmul.mubr.msk.f32.gmra.mrb[146].mxu1 %vm3995_vm2, %v16444_v43  ;;  %v16523_v42 = vld [vmem:[%s25950_s16 + $0x710] sm:$0xff]  ;;  %v16524_v43 = vld [vmem:[%s25950_s16 + $0x718] sm:$0xff] }
 0x940   : > { %19863 = vmatprep.mubr.msk.f32.mxu0 %vm3995_vm2, %v16349_v44  ;;  %19927 = vmatprep.mubr.msk.f32.mxu1 %vm3995_vm2, %v16445_v41  ;;  %v16525_v44 = vld [vmem:[%s25950_s16 + $0x720] sm:$0xff]  ;;  %v16526_v41 = vld [vmem:[%s25950_s16 + $0x728] sm:$0xff] }
 0x943   : > { %19864 = vmatmul.mubr.msk.f32.gmra.mrb[100].mxu0 %vm3995_vm2, %v16350_v46  ;;  %19928 = vmatmul.mubr.msk.f32.gmra.mrb[148].mxu1 %vm3995_vm2, %v16446_v48  ;;  %v16527_v46 = vld [vmem:[%s25950_s16 + $0x730] sm:$0xff]  ;;  %v16528_v48 = vld [vmem:[%s25950_s16 + $0x738] sm:$0xff] }
 0x944   : > { %19866 = vmatprep.mubr.msk.f32.mxu0 %vm3995_vm2, %v16351_v49  ;;  %19930 = vmatprep.mubr.msk.f32.mxu1 %vm3995_vm2, %v16447_v50  ;;  %v16529_v49 = vld [vmem:[%s25950_s16 + $0x740] sm:$0xff]  ;;  %v16530_v50 = vld [vmem:[%s25950_s16 + $0x748] sm:$0xff] }
 0x947   : > { %19867 = vmatmul.mubr.msk.f32.gmra.mrb[102].mxu0 %vm3995_vm2, %v16352_v52  ;;  %19931 = vmatmul.mubr.msk.f32.gmra.mrb[150].mxu1 %vm3995_vm2, %v16448_v54  ;;  %v16531_v52 = vld [vmem:[%s25950_s16 + $0x750] sm:$0xff]  ;;  %v16532_v54 = vld [vmem:[%s25950_s16 + $0x758] sm:$0xff] }
 0x948   : > { %19869 = vmatprep.mubr.msk.f32.mxu0 %vm3995_vm2, %v16353_v55  ;;  %19933 = vmatprep.mubr.msk.f32.mxu1 %vm3995_vm2, %v16449_v56  ;;  %v16533_v55 = vld [vmem:[%s25950_s16 + $0x760] sm:$0xff] }
 0x94b   : > { %19870 = vmatmul.mubr.msk.f32.gmra.mrb[104].mxu0 %vm3995_vm2, %v16354_v58  ;;  %19934 = vmatmul.mubr.msk.f32.gmra.mrb[152].mxu1 %vm3995_vm2, %v16450_v60  ;;  %v16534_v60 = vld [vmem:[%s25950_s16 + $0x768] sm:$0xff] }
 0x94c   : > { %19872 = vmatprep.mubr.msk.f32.mxu0 %vm3995_vm2, %v16355_v62  ;;  %19936 = vmatprep.mubr.msk.f32.mxu1 %vm3995_vm2, %v16451_v0  ;;  %v16535_v62 = vld [vmem:[%s25950_s16 + $0x770] sm:$0xff] }
 0x94f   : > { %19873 = vmatmul.mubr.msk.f32.gmra.mrb[106].mxu0 %vm3995_vm2, %v16356_v3  ;;  %19937 = vmatmul.mubr.msk.f32.gmra.mrb[154].mxu1 %vm3995_vm2, %v16452_v4  ;;  %v16536_v4 = vld [vmem:[%s25950_s16 + $0x778] sm:$0xff] }
 0x950   : > { %19875 = vmatprep.mubr.msk.f32.mxu0 %vm3995_vm2, %v16357_v9  ;;  %19939 = vmatprep.mubr.msk.f32.mxu1 %vm3995_vm2, %v16453_v11  ;;  %v16537_v9 = vld [vmem:[%s25950_s16 + $0x780] sm:$0xff] }
 0x953   : > { %19876 = vmatmul.mubr.msk.f32.gmra.mrb[108].mxu0 %vm3995_vm2, %v16358_v14  ;;  %19940 = vmatmul.mubr.msk.f32.gmra.mrb[156].mxu1 %vm3995_vm2, %v16454_v15  ;;  %v16538_v15 = vld [vmem:[%s25950_s16 + $0x788] sm:$0xff] }
 0x954   : > { %19878 = vmatprep.mubr.msk.f32.mxu0 %vm3995_vm2, %v16359_v18  ;;  %19942 = vmatprep.mubr.msk.f32.mxu1 %vm3995_vm2, %v16455_v20  ;;  %v16539_v18 = vld [vmem:[%s25950_s16 + $0x790] sm:$0xff] }
 0x957   : > { %19879 = vmatmul.mubr.msk.f32.gmra.mrb[110].mxu0 %vm3995_vm2, %v16360_v22  ;;  %19943 = vmatmul.mubr.msk.f32.gmra.mrb[158].mxu1 %vm3995_vm2, %v16456_v29  ;;  %v16540_v29 = vld [vmem:[%s25950_s16 + $0x798] sm:$0xff] }
 0x958   : > { %19961 = vmatprep.mubr.msk.f32.mxu1 %vm3995_vm2, %v16393_v27  ;;  %v16541_v27 = vld [vmem:[%s25950_s16 + $0x7a0] sm:$0xff] }
 0x95b   : > { %19962 = vmatmul.mubr.msk.f32.vlgmr.msra.gmra.mrb[128].mxu1 %vm3995_vm2, %v16394_v17 }
 0x95c   : > { %21607 = vmatpush3.bf16.msra.mxu1 %v24432_v61  ;;  %19964 = vmatprep.mubr.msk.f32.mxu1 %vm3995_vm2, %v16395_v33 }
 0x95d   : > { %21609 = vmatprep.subr.bf16.mxu1 %v24438_v2 }
 0x95f   : > { %19965 = vmatmul.mubr.msk.f32.gmra.mrb[130].mxu1 %vm3995_vm2, %v16396_v21  ;;  %v16542_v21 = vld [vmem:[%s25950_s16 + $0x7a8] sm:$0xff] }
 0x960   : > { %21611 = vmatpush3.bf16.msra.mxu1 %v24438_v2  ;;  %19967 = vmatprep.mubr.msk.f32.mxu1 %vm3995_vm2, %v16397_v38  ;;  %v16543_v38 = vld [vmem:[%s25950_s16 + $0x7b0] sm:$0xff] }
 0x961   : > { %21613 = vmatprep.subr.bf16.mxu1 %v24444_v8 }
 0x963   : > { %19968 = vmatmul.mubr.msk.f32.gmra.mrb[132].mxu1 %vm3995_vm2, %v16398_v24 }
 0x964   : > { %21615 = vmatpush3.bf16.msra.mxu1 %v24444_v8  ;;  %19970 = vmatprep.mubr.msk.f32.mxu1 %vm3995_vm2, %v16399_v23 }
 0x965   : > { %21617 = vmatprep.subr.bf16.mxu1 %v24450_v12 }
 0x967   : > { %19971 = vmatmul.mubr.msk.f32.gmra.mrb[134].mxu1 %vm3995_vm2, %v16400_v34  ;;  %v16544_v34 = vld [vmem:[%s25950_s16 + $0x7b8] sm:$0xff] }
 0x968   : > { %21619 = vmatpush3.bf16.msra.mxu1 %v24450_v12  ;;  %19973 = vmatprep.mubr.msk.f32.mxu1 %vm3995_vm2, %v16401_v45  ;;  %v16545_v45 = vld [vmem:[%s25950_s16 + $0x7c0] sm:$0xff] }
 0x969   : > { %21621 = vmatprep.subr.bf16.mxu1 %v24432_v61 }
 0x96b   : > { %19974 = vmatmul.mubr.msk.f32.gmra.mrb[136].mxu1 %vm3995_vm2, %v16402_v30 }
 0x96c   : > { %19976 = vmatprep.mubr.msk.f32.mxu1 %vm3995_vm2, %v16403_v40 }
 0x96f   : > { %19977 = vmatmul.mubr.msk.f32.gmra.mrb[138].mxu1 %vm3995_vm2, %v16404_v47  ;;  %v16546_v47 = vld [vmem:[%s25950_s16 + $0x7c8] sm:$0xff] }
 0x970   : > { %19979 = vmatprep.mubr.msk.f32.mxu1 %vm3995_vm2, %v16405_v51  ;;  %v16547_v51 = vld [vmem:[%s25950_s16 + $0x7d0] sm:$0xff] }
 0x973   : > { %19980 = vmatmul.mubr.msk.f32.gmra.mrb[140].mxu1 %vm3995_vm2, %v16406_v53 }
 0x974   : > { %19982 = vmatprep.mubr.msk.f32.mxu1 %vm3995_vm2, %v16407_v57 }
 0x977   : > { %19983 = vmatmul.mubr.msk.f32.gmra.mrb[142].mxu1 %vm3995_vm2, %v16408_v59  ;;  %v16548_v59 = vld [vmem:[%s25950_s16 + $0x7d8] sm:$0xff] }
 0x978   : > { %19985 = vmatprep.mubr.msk.f32.mxu1 %vm3995_vm2, %v16409_v63  ;;  %v16549_v63 = vld [vmem:[%s25950_s16 + $0x7e0] sm:$0xff] }
 0x97b   : > { %19986 = vmatmul.mubr.msk.f32.gmra.mrb[144].mxu1 %vm3995_vm2, %v16410_v1 }
 0x97c   : > { %19988 = vmatprep.mubr.msk.f32.mxu1 %vm3995_vm2, %v16411_v6 }
 0x97f   : > { %19989 = vmatmul.mubr.msk.f32.gmra.mrb[146].mxu1 %vm3995_vm2, %v16412_v25  ;;  %v16550_v25 = vld [vmem:[%s25950_s16 + $0x7e8] sm:$0xff] }
 0x980   : > { %19991 = vmatprep.mubr.msk.f32.mxu1 %vm3995_vm2, %v16413_v26  ;;  %v16551_v26 = vld [vmem:[%s25950_s16 + $0x7f0] sm:$0xff] }
 0x983   : > { %19992 = vmatmul.mubr.msk.f32.gmra.mrb[148].mxu1 %vm3995_vm2, %v16414_v5 }
 0x984   : > { %19994 = vmatprep.mubr.msk.f32.mxu1 %vm3995_vm2, %v16415_v7 }
 0x987   : > { %19995 = vmatmul.mubr.msk.f32.gmra.mrb[150].mxu1 %vm3995_vm2, %v16416_v28  ;;  %v16552_v28 = vld [vmem:[%s25950_s16 + $0x7f8] sm:$0xff] }
 0x988   : > { %19997 = vmatprep.mubr.msk.f32.mxu1 %vm3995_vm2, %v16417_v10  ;;  %v16682_v10 = vld [vmem:[%s25950_s16 + $0x500] sm:$0xff] }
 0x98b   : > { %19998 = vmatmul.mubr.msk.f32.gmra.mrb[152].mxu1 %vm3995_vm2, %v16418_v13 }
 0x98c   : > { %20000 = vmatprep.mubr.msk.f32.mxu1 %vm3995_vm2, %v16419_v16 }
 0x98f   : > { %20001 = vmatmul.mubr.msk.f32.gmra.mrb[154].mxu1 %vm3995_vm2, %v16420_v31  ;;  %v16683_v31 = vld [vmem:[%s25950_s16 + $0x508] sm:$0xff] }
 0x990   : > { %20003 = vmatprep.mubr.msk.f32.mxu1 %vm3995_vm2, %v16421_v32  ;;  %v16684_v32 = vld [vmem:[%s25950_s16 + $0x510] sm:$0xff] }
 0x993   : > { %20004 = vmatmul.mubr.msk.f32.gmra.mrb[156].mxu1 %vm3995_vm2, %v16422_v19 }
 0x994   : > { %20006 = vmatprep.mubr.msk.f32.mxu1 %vm3995_vm2, %v16423_v35 }
 0x997   : > { %20007 = vmatmul.mubr.msk.f32.gmra.mrb[158].mxu1 %vm3995_vm2, %v16424_v36  ;;  %v16685_v36 = vld [vmem:[%s25950_s16 + $0x518] sm:$0xff] }
 0x998   : > { %20025 = vmatprep.mubr.msk.f32.mxu1 %vm3995_vm2, %v16521_v37  ;;  %v16686_v37 = vld [vmem:[%s25950_s16 + $0x520] sm:$0xff] }
 0x99b   : > { %20026 = vmatmul.mubr.msk.f32.vlgmr.msra.gmra.mrb[128].mxu1 %vm3995_vm2, %v16522_v39 }
 0x99c   : > { %21623 = vmatpush3.bf16.msra.mxu1 %v24432_v61  ;;  %20028 = vmatprep.mubr.msk.f32.mxu1 %vm3995_vm2, %v16523_v42 }
 0x99d   : > { %21625 = vmatprep.subr.bf16.mxu1 %v24438_v2 }
 0x99f   : > { %20029 = vmatmul.mubr.msk.f32.gmra.mrb[130].mxu1 %vm3995_vm2, %v16524_v43  ;;  %v16687_v43 = vld [vmem:[%s25950_s16 + $0x528] sm:$0xff] }
 0x9a0   : > { %21627 = vmatpush3.bf16.msra.mxu1 %v24438_v2  ;;  %20031 = vmatprep.mubr.msk.f32.mxu1 %vm3995_vm2, %v16525_v44  ;;  %v16688_v44 = vld [vmem:[%s25950_s16 + $0x530] sm:$0xff] }
 0x9a1   : > { %21629 = vmatprep.subr.bf16.mxu1 %v24444_v8 }
 0x9a3   : > { %20032 = vmatmul.mubr.msk.f32.gmra.mrb[132].mxu1 %vm3995_vm2, %v16526_v41 }
 0x9a4   : > { %21631 = vmatpush3.bf16.msra.mxu1 %v24444_v8  ;;  %20034 = vmatprep.mubr.msk.f32.mxu1 %vm3995_vm2, %v16527_v46 }
 0x9a5   : > { %21633 = vmatprep.subr.bf16.mxu1 %v24450_v12 }
 0x9a7   : > { %20035 = vmatmul.mubr.msk.f32.gmra.mrb[134].mxu1 %vm3995_vm2, %v16528_v48  ;;  %v16689_v48 = vld [vmem:[%s25950_s16 + $0x538] sm:$0xff] }
 0x9a8   : > { %21635 = vmatpush3.bf16.msra.mxu1 %v24450_v12  ;;  %20037 = vmatprep.mubr.msk.f32.mxu1 %vm3995_vm2, %v16529_v49  ;;  %v16690_v49 = vld [vmem:[%s25950_s16 + $0x540] sm:$0xff] }
 0x9a9   : > { %21637 = vmatprep.subr.bf16.mxu1 %v24432_v61 }
 0x9ab   : > { %20038 = vmatmul.mubr.msk.f32.gmra.mrb[136].mxu1 %vm3995_vm2, %v16530_v50 }
 0x9ac   : > { %20040 = vmatprep.mubr.msk.f32.mxu1 %vm3995_vm2, %v16531_v52 }
 0x9ae   : > { %v24837_v56 = vpop.f32.mrb[96].mxu1 }
 0x9af   : > { %v24839_v58 = vpop.f32.mrb[97].mxu1  ;;  %20041 = vmatmul.mubr.msk.f32.gmra.mrb[138].mxu1 %vm3995_vm2, %v16532_v54  ;;  %v16691_v54 = vld [vmem:[%s25950_s16 + $0x548] sm:$0xff] }
 0x9b0   : > { %20043 = vmatprep.mubr.msk.f32.mxu1 %vm3995_vm2, %v16533_v55  ;;  %v16692_v55 = vld [vmem:[%s25950_s16 + $0x550] sm:$0xff] }
 0x9b2   : > { %v24845_v0 = vpop.f32.mrb[98].mxu1 }
 0x9b3   : > { %v24847_v3 = vpop.f32.mrb[99].mxu1  ;;  %20044 = vmatmul.mubr.msk.f32.gmra.mrb[140].mxu1 %vm3995_vm2, %v16534_v60 }
 0x9b4   : > { %20046 = vmatprep.mubr.msk.f32.mxu1 %vm3995_vm2, %v16535_v62 }
 0x9b6   : > { %v24853_v11 = vpop.f32.mrb[100].mxu1 }
 0x9b7   : > { %v24855_v14 = vpop.f32.mrb[101].mxu1  ;;  %20047 = vmatmul.mubr.msk.f32.gmra.mrb[142].mxu1 %vm3995_vm2, %v16536_v4  ;;  %v16693_v4 = vld [vmem:[%s25950_s16 + $0x558] sm:$0xff] }
 0x9b8   : > { %20049 = vmatprep.mubr.msk.f32.mxu1 %vm3995_vm2, %v16537_v9  ;;  %v16694_v9 = vld [vmem:[%s25950_s16 + $0x560] sm:$0xff] }
 0x9ba   : > { %v24861_v20 = vpop.f32.mrb[102].mxu1 }
 0x9bb   : > { %v24863_v22 = vpop.f32.mrb[103].mxu1  ;;  %20050 = vmatmul.mubr.msk.f32.gmra.mrb[144].mxu1 %vm3995_vm2, %v16538_v15 }
 0x9bc   : > { %20052 = vmatprep.mubr.msk.f32.mxu1 %vm3995_vm2, %v16539_v18 }
 0x9be   : > { %v24869_v17 = vpop.f32.mrb[104].mxu1 }
 0x9bf   : > { %v24871_v33 = vpop.f32.mrb[105].mxu1  ;;  %20053 = vmatmul.mubr.msk.f32.gmra.mrb[146].mxu1 %vm3995_vm2, %v16540_v29 }
 0x9c0   : > { %20055 = vmatprep.mubr.msk.f32.mxu1 %vm3995_vm2, %v16541_v27  ;;  %v16585_v27 = vld [vmem:[%s25951_s18 + $0x8] sm:$0xff] }
 0x9c1   : > { %20073 = vmatprep.subr.mxu0 %v16585_v27 }
 0x9c2   : > { %v24877_v24 = vpop.f32.mrb[106].mxu1  ;;  %20074 = vmatpush3.msra.mxu0 %v16585_v27  ;;  %v16708_v27 = vld [vmem:[%s25950_s16 + $0x5d0] sm:$0xff] }
 0x9c3   : > { %v24879_v23 = vpop.f32.mrb[107].mxu1  ;;  %20056 = vmatmul.mubr.msk.f32.gmra.mrb[148].mxu1 %vm3995_vm2, %v16542_v21 }
 0x9c4   : > { %20058 = vmatprep.mubr.msk.f32.mxu1 %vm3995_vm2, %v16543_v38  ;;  %v16695_v38 = vld [vmem:[%s25950_s16 + $0x568] sm:$0xff] }
 0x9c6   : > { %v24885_v30 = vpop.f32.mrb[108].mxu1 }
 0x9c7   : > { %v24887_v40 = vpop.f32.mrb[109].mxu1  ;;  %20059 = vmatmul.mubr.msk.f32.gmra.mrb[150].mxu1 %vm3995_vm2, %v16544_v34  ;;  %v16696_v34 = vld [vmem:[%s25950_s16 + $0x570] sm:$0xff] }
 0x9c8   : > { %20061 = vmatprep.mubr.msk.f32.mxu1 %vm3995_vm2, %v16545_v45 }
 0x9ca   : > { %v24893_v53 = vpop.f32.mrb[110].mxu1 }
 0x9cb   : > { %v24895_v57 = vpop.f32.mrb[111].mxu1  ;;  %20062 = vmatmul.mubr.msk.f32.gmra.mrb[152].mxu1 %vm3995_vm2, %v16546_v47 }
 0x9cc   : > { %20064 = vmatprep.mubr.msk.f32.mxu1 %vm3995_vm2, %v16547_v51 }
 0x9ce   : > { %v24901_v1 = vpop.f32.mrb[112].mxu1 }
 0x9cf   : > { %v24903_v6 = vpop.f32.mrb[113].mxu1  ;;  %20065 = vmatmul.mubr.msk.f32.gmra.mrb[154].mxu1 %vm3995_vm2, %v16548_v59  ;;  %v16698_v59 = vld [vmem:[%s25950_s16 + $0x580] sm:$0xff] }
 0x9d0   : > { %20067 = vmatprep.mubr.msk.f32.mxu1 %vm3995_vm2, %v16549_v63 }
 0x9d2   : > { %v24909_v5 = vpop.f32.mrb[114].mxu1 }
 0x9d3   : > { %v24911_v7 = vpop.f32.mrb[115].mxu1  ;;  %20068 = vmatmul.mubr.msk.f32.gmra.mrb[156].mxu1 %vm3995_vm2, %v16550_v25 }
 0x9d4   : > { %20070 = vmatprep.mubr.msk.f32.mxu1 %vm3995_vm2, %v16551_v26 }
 0x9d6   : > { %v24917_v13 = vpop.f32.mrb[116].mxu1 }
 0x9d7   : > { %v24919_v16 = vpop.f32.mrb[117].mxu1  ;;  %20071 = vmatmul.mubr.msk.f32.gmra.mrb[158].mxu1 %vm3995_vm2, %v16552_v28  ;;  %v16700_v28 = vld [vmem:[%s25950_s16 + $0x590] sm:$0xff] }
 0x9d8   : > { %20189 = vmatprep.mubr.msk.f32.mxu1 %vm3995_vm2, %v16682_v10 }
 0x9da   : > { %v24925_v19 = vpop.f32.mrb[118].mxu1 }
 0x9db   : > { %v24927_v35 = vpop.f32.mrb[119].mxu1  ;;  %20190 = vmatmul.mubr.msk.f32.vlgmr.msra.gmra.mrb[160].mxu1 %vm3995_vm2, %v16683_v31 }
 0x9dc   : > { %21639 = vmatpush3.bf16.msra.mxu1 %v24432_v61  ;;  %20192 = vmatprep.mubr.msk.f32.mxu1 %vm3995_vm2, %v16684_v32 }
 0x9dd   : > { %21641 = vmatprep.subr.bf16.mxu1 %v24438_v2 }
 0x9de   : > { %v24935_v39 = vpop.f32.mrb[120].mxu1 }
 0x9df   : > { %v24937_v42 = vpop.f32.mrb[121].mxu1  ;;  %20193 = vmatmul.mubr.msk.f32.gmra.mrb[162].mxu1 %vm3995_vm2, %v16685_v36  ;;  %v16702_v36 = vld [vmem:[%s25950_s16 + $0x5a0] sm:$0xff] }
 0x9e0   : > { %21643 = vmatpush3.bf16.msra.mxu1 %v24438_v2  ;;  %20195 = vmatprep.mubr.msk.f32.mxu1 %vm3995_vm2, %v16686_v37 }
 0x9e1   : > { %21645 = vmatprep.subr.bf16.mxu1 %v24444_v8 }
 0x9e2   : > { %v24945_v41 = vpop.f32.mrb[122].mxu1 }
 0x9e3   : > { %v24947_v46 = vpop.f32.mrb[123].mxu1  ;;  %20196 = vmatmul.mubr.msk.f32.gmra.mrb[164].mxu1 %vm3995_vm2, %v16687_v43 }
 0x9e4   : > { %21647 = vmatpush3.bf16.msra.mxu1 %v24444_v8  ;;  %20198 = vmatprep.mubr.msk.f32.mxu1 %vm3995_vm2, %v16688_v44 }
 0x9e5   : > { %21649 = vmatprep.subr.bf16.mxu1 %v24450_v12 }
 0x9e6   : > { %v24955_v50 = vpop.f32.mrb[124].mxu1 }
 0x9e7   : > { %v24957_v52 = vpop.f32.mrb[125].mxu1  ;;  %20199 = vmatmul.mubr.msk.f32.gmra.mrb[166].mxu1 %vm3995_vm2, %v16689_v48  ;;  %v16704_v48 = vld [vmem:[%s25950_s16 + $0x5b0] sm:$0xff] }
 0x9e8   : > { %21651 = vmatpush3.bf16.msra.mxu1 %v24450_v12  ;;  %20201 = vmatprep.mubr.msk.f32.mxu1 %vm3995_vm2, %v16690_v49 }
 0x9e9   : > { %21653 = vmatprep.subr.bf16.mxu1 %v24432_v61 }
 0x9ea   : > { %v24965_v60 = vpop.f32.mrb[126].mxu1 }
 0x9eb   : > { %v24967_v62 = vpop.f32.mrb[127].mxu1  ;;  %20202 = vmatmul.mubr.msk.f32.gmra.mrb[168].mxu1 %vm3995_vm2, %v16691_v54 }
 0x9ec   : > { %20204 = vmatprep.mubr.msk.f32.mxu1 %vm3995_vm2, %v16692_v55 }
 0x9ee   : > { %v19835_v15 = vpop.f32.mrb[80].mxu0 }
 0x9ef   : > { %v24974_v18 = vadd.f32 %v19835_v15, %v24837_v56  ;;  %v7778_v29 = vpop.f32.mrb[81].mxu0  ;;  %20205 = vmatmul.mubr.msk.f32.gmra.mrb[170].mxu1 %vm3995_vm2, %v16693_v4  ;;  %v16706_v4 = vld [vmem:[%s25950_s16 + $0x5c0] sm:$0xff] }
 0x9f0   : > { %v24979_v21 = vadd.f32 %v7778_v29, %v24839_v58  ;;  %20207 = vmatprep.mubr.msk.f32.mxu1 %vm3995_vm2, %v16694_v9  ;;  %v16697_v58 = vld [vmem:[%s25950_s16 + $0x578] sm:$0xff] }
 0x9f2   : > { %v19838_v45 = vpop.f32.mrb[82].mxu0 }
 0x9f3   : > { %v24985_v56 = vadd.f32 %v19838_v45, %v24845_v0  ;;  %v7788_v47 = vpop.f32.mrb[83].mxu0  ;;  %20208 = vmatmul.mubr.msk.f32.gmra.mrb[172].mxu1 %vm3995_vm2, %v16695_v38 }
 0x9f4   : > { %v24989_v51 = vadd.f32 %v7788_v47, %v24847_v3  ;;  %20210 = vmatprep.mubr.msk.f32.mxu1 %vm3995_vm2, %v16696_v34  ;;  %v16699_v3 = vld [vmem:[%s25950_s16 + $0x588] sm:$0xff]  ;;  %v16710_v47 = vld [vmem:[%s25950_s16 + $0x5e0] sm:$0xff] }
 0x9f6   : > { %v19841_v63 = vpop.f32.mrb[84].mxu0 }
 0x9f7   : > { %v24995_v25 = vadd.f32 %v19841_v63, %v24853_v11  ;;  %v7798_v26 = vpop.f32.mrb[85].mxu0  ;;  %20211 = vmatmul.mubr.msk.f32.gmra.mrb[174].mxu1 %vm3995_vm2, %v16697_v58 }
 0x9f8   : > { %v24999_v0 = vadd.f32 %v7798_v26, %v24855_v14  ;;  %20213 = vmatprep.mubr.msk.f32.mxu1 %vm3995_vm2, %v16698_v59  ;;  %v16701_v14 = vld [vmem:[%s25950_s16 + $0x598] sm:$0xff]  ;;  %v16712_v26 = vld [vmem:[%s25950_s16 + $0x5f0] sm:$0xff] }
 0x9fa   : > { %v19844_v10 = vpop.f32.mrb[86].mxu0 }
 0x9fb   : > { %v25005_v31 = vadd.f32 %v19844_v10, %v24861_v20  ;;  %v7808_v32 = vpop.f32.mrb[87].mxu0  ;;  %20214 = vmatmul.mubr.msk.f32.gmra.mrb[176].mxu1 %vm3995_vm2, %v16699_v3 }
 0x9fc   : > { %v25009_v11 = vadd.f32 %v7808_v32, %v24863_v22  ;;  %20216 = vmatprep.mubr.msk.f32.mxu1 %vm3995_vm2, %v16700_v28  ;;  %v16703_v22 = vld [vmem:[%s25950_s16 + $0x5a8] sm:$0xff]  ;;  %v16650_v32 = vld [vmem:[%s25950_s16 + $0x200] sm:$0xff] }
 0x9fe   : > { %v19847_v37 = vpop.f32.mrb[88].mxu0 }
 0x9ff   : > { %v25015_v43 = vadd.f32 %v19847_v37, %v24869_v17  ;;  %v7818_v44 = vpop.f32.mrb[89].mxu0  ;;  %20217 = vmatmul.mubr.msk.f32.gmra.mrb[178].mxu1 %vm3995_vm2, %v16701_v14 }
 0xa00   : > { %v25019_v20 = vadd.f32 %v7818_v44, %v24871_v33  ;;  %20219 = vmatprep.mubr.msk.f32.mxu1 %vm3995_vm2, %v16702_v36  ;;  %v16705_v33 = vld [vmem:[%s25950_s16 + $0x5b8] sm:$0xff]  ;;  %v16652_v44 = vld [vmem:[%s25950_s16 + $0x210] sm:$0xff] }
 0xa02   : > { %v19850_v49 = vpop.f32.mrb[90].mxu0 }
 0xa03   : > { %v25025_v54 = vadd.f32 %v19850_v49, %v24877_v24  ;;  %v7828_v55 = vpop.f32.mrb[91].mxu0  ;;  %20220 = vmatmul.mubr.msk.f32.gmra.mrb[180].mxu1 %vm3995_vm2, %v16703_v22 }
 0xa04   : > { %v25029_v17 = vadd.f32 %v7828_v55, %v24879_v23  ;;  %20222 = vmatprep.mubr.msk.f32.mxu1 %vm3995_vm2, %v16704_v48  ;;  %v16707_v23 = vld [vmem:[%s25950_s16 + $0x5c8] sm:$0xff]  ;;  %v16654_v55 = vld [vmem:[%s25950_s16 + $0x220] sm:$0xff] }
 0xa06   : > { %v19853_v9 = vpop.f32.mrb[92].mxu0 }
 0xa07   : > { %v25035_v15 = vadd.f32 %v19853_v9, %v24885_v30  ;;  %v7838_v29 = vpop.f32.mrb[93].mxu0  ;;  %20223 = vmatmul.mubr.msk.f32.gmra.mrb[182].mxu1 %vm3995_vm2, %v16705_v33  ;;  %v16655_v9 = vld [vmem:[%s25950_s16 + $0x228] sm:$0xff] }
 0xa08   : > { %v25039_v24 = vadd.f32 %v7838_v29, %v24887_v40  ;;  %20225 = vmatprep.mubr.msk.f32.mxu1 %vm3995_vm2, %v16706_v4  ;;  %v16709_v40 = vld [vmem:[%s25950_s16 + $0x5d8] sm:$0xff]  ;;  %v16656_v29 = vld [vmem:[%s25950_s16 + $0x230] sm:$0xff] }
 0xa0a   : > { %v19856_v38 = vpop.f32.mrb[94].mxu0 }
 0xa0b   : > { %v25045_v34 = vadd.f32 %v19856_v38, %v24893_v53  ;;  %v7848_v45 = vpop.f32.mrb[95].mxu0  ;;  %20226 = vmatmul.mubr.msk.f32.gmra.mrb[184].mxu1 %vm3995_vm2, %v16707_v23  ;;  %v16657_v38 = vld [vmem:[%s25950_s16 + $0x238] sm:$0xff] }
 0xa0c   : > { %v25049_v30 = vadd.f32 %v7848_v45, %v24895_v57  ;;  %20228 = vmatprep.mubr.msk.f32.mxu1 %vm3995_vm2, %v16708_v27  ;;  %v16711_v57 = vld [vmem:[%s25950_s16 + $0x5e8] sm:$0xff]  ;;  %v16658_v45 = vld [vmem:[%s25950_s16 + $0x240] sm:$0xff] }
 0xa0e   : > { %v19859_v58 = vpop.f32.mrb[96].mxu0 }
 0xa0f   : > { %v25055_v59 = vadd.f32 %v19859_v58, %v24901_v1  ;;  %v7858_v63 = vpop.f32.mrb[97].mxu0  ;;  %20229 = vmatmul.mubr.msk.f32.gmra.mrb[186].mxu1 %vm3995_vm2, %v16709_v40  ;;  %v16659_v58 = vld [vmem:[%s25950_s16 + $0x248] sm:$0xff] }
 0xa10   : > { %v25059_v53 = vadd.f32 %v7858_v63, %v24903_v6  ;;  %20231 = vmatprep.mubr.msk.f32.mxu1 %vm3995_vm2, %v16710_v47  ;;  %v16713_v6 = vld [vmem:[%s25950_s16 + $0x5f8] sm:$0xff]  ;;  %v16660_v63 = vld [vmem:[%s25950_s16 + $0x250] sm:$0xff] }
 0xa12   : > { %v19862_v3 = vpop.f32.mrb[98].mxu0 }
 0xa13   : > { %v25065_v28 = vadd.f32 %v19862_v3, %v24909_v5  ;;  %v7868_v10 = vpop.f32.mrb[99].mxu0  ;;  %20232 = vmatmul.mubr.msk.f32.gmra.mrb[188].mxu1 %vm3995_vm2, %v16711_v57  ;;  %v16661_v3 = vld [vmem:[%s25950_s16 + $0x258] sm:$0xff] }
 0xa14   : > { %v25069_v1 = vadd.f32 %v7868_v10, %v24911_v7  ;;  %20234 = vmatprep.mubr.msk.f32.mxu1 %vm3995_vm2, %v16712_v26  ;;  %v16651_v7 = vld [vmem:[%s25950_s16 + $0x208] sm:$0xff]  ;;  %v16662_v10 = vld [vmem:[%s25950_s16 + $0x260] sm:$0xff] }
 0xa16   : > { %v19865_v14 = vpop.f32.mrb[100].mxu0 }
 0xa17   : > { %v25075_v36 = vadd.f32 %v19865_v14, %v24917_v13  ;;  %v7878_v37 = vpop.f32.mrb[101].mxu0  ;;  %20235 = vmatmul.mubr.msk.f32.gmra.mrb[190].mxu1 %vm3995_vm2, %v16713_v6  ;;  %v25142_v6 = vld [vmem:[%s25951_s18] sm:$0xff] }
 0xa18   : > { %v25079_v5 = vadd.f32 %v7878_v37, %v24919_v16  ;;  %20253 = vmatprep.mubr.msk.f32.mxu1 %vm3995_vm2, %v16650_v32  ;;  %v16653_v16 = vld [vmem:[%s25950_s16 + $0x218] sm:$0xff]  ;;  %20123 = vmatprep.subr.mxu0 %v25142_v6  ;;  %v16666_v14 = vld [vmem:[%s25950_s16 + $0x280] sm:$0xff]  ;;  %v16667_v37 = vld [vmem:[%s25950_s16 + $0x288] sm:$0xff] }
 0xa19   : > { %v16665_v32 = vld [vmem:[%s25950_s16 + $0x278] sm:$0xff] }
 0xa1a   : > { %v19868_v22 = vpop.f32.mrb[102].mxu0 }
 0xa1b   : > { %v25085_v48 = vadd.f32 %v19868_v22, %v24925_v19  ;;  %v7888_v49 = vpop.f32.mrb[103].mxu0  ;;  %20254 = vmatmul.mubr.msk.f32.vlgmr.msra.gmra.mrb[160].mxu1 %vm3995_vm2, %v16651_v7  ;;  %v16668_v7 = vld [vmem:[%s25950_s16 + $0x290] sm:$0xff]  ;;  %v16670_v22 = vld [vmem:[%s25950_s16 + $0x2a0] sm:$0xff] }
 0xa1c   : > { %v25089_v13 = vadd.f32 %v7888_v49, %v24927_v35  ;;  %21655 = vmatpush3.bf16.msra.mxu1 %v24432_v61  ;;  %20256 = vmatprep.mubr.msk.f32.mxu1 %vm3995_vm2, %v16652_v44  ;;  %v16669_v44 = vld [vmem:[%s25950_s16 + $0x298] sm:$0xff]  ;;  %v16671_v49 = vld [vmem:[%s25950_s16 + $0x2a8] sm:$0xff] }
 0xa1d   : > { %21657 = vmatprep.subr.bf16.mxu1 %v24438_v2 }
 0xa1e   : > { %v19871_v33 = vpop.f32.mrb[104].mxu0 }
 0xa1f   : > { %v25097_v19 = vadd.f32 %v19871_v33, %v24935_v39  ;;  %v7898_v4 = vpop.f32.mrb[105].mxu0  ;;  %20257 = vmatmul.mubr.msk.f32.gmra.mrb[162].mxu1 %vm3995_vm2, %v16653_v16  ;;  %v16672_v16 = vld [vmem:[%s25950_s16 + $0x2b0] sm:$0xff]  ;;  %v16674_v33 = vld [vmem:[%s25950_s16 + $0x2c0] sm:$0xff] }
 0xa20   : > { %v25101_v35 = vadd.f32 %v7898_v4, %v24937_v42  ;;  %21659 = vmatpush3.bf16.msra.mxu1 %v24438_v2  ;;  %20259 = vmatprep.mubr.msk.f32.mxu1 %vm3995_vm2, %v16654_v55  ;;  %v16673_v55 = vld [vmem:[%s25950_s16 + $0x2b8] sm:$0xff]  ;;  %v16675_v4 = vld [vmem:[%s25950_s16 + $0x2c8] sm:$0xff] }
 0xa21   : > { %21661 = vmatprep.subr.bf16.mxu1 %v24444_v8 }
 0xa22   : > { %v19874_v23 = vpop.f32.mrb[106].mxu0 }
 0xa23   : > { %v25109_v39 = vadd.f32 %v19874_v23, %v24945_v41  ;;  %v7908_v27 = vpop.f32.mrb[107].mxu0  ;;  %20260 = vmatmul.mubr.msk.f32.gmra.mrb[164].mxu1 %vm3995_vm2, %v16655_v9  ;;  %v16676_v9 = vld [vmem:[%s25950_s16 + $0x2d0] sm:$0xff]  ;;  %v16678_v23 = vld [vmem:[%s25950_s16 + $0x2e0] sm:$0xff] }
 0xa24   : > { %v25113_v42 = vadd.f32 %v7908_v27, %v24947_v46  ;;  %21663 = vmatpush3.bf16.msra.mxu1 %v24444_v8  ;;  %20262 = vmatprep.mubr.msk.f32.mxu1 %vm3995_vm2, %v16656_v29  ;;  %v16677_v29 = vld [vmem:[%s25950_s16 + $0x2d8] sm:$0xff]  ;;  %v16679_v27 = vld [vmem:[%s25950_s16 + $0x2e8] sm:$0xff] }
 0xa25   : > { %21665 = vmatprep.subr.bf16.mxu1 %v24450_v12 }
 0xa26   : > { %v19877_v40 = vpop.f32.mrb[108].mxu0 }
 0xa27   : > { %v25121_v41 = vadd.f32 %v19877_v40, %v24955_v50  ;;  %v7918_v47 = vpop.f32.mrb[109].mxu0  ;;  %20263 = vmatmul.mubr.msk.f32.gmra.mrb[166].mxu1 %vm3995_vm2, %v16657_v38  ;;  %v16680_v38 = vld [vmem:[%s25950_s16 + $0x2f0] sm:$0xff]  ;;  %v16778_v40 = vld [vmem:[%s25950_s16 + $0x800] sm:$0xff] }
 0xa28   : > { %v25125_v46 = vadd.f32 %v7918_v47, %v24957_v52  ;;  %21667 = vmatpush3.bf16.msra.mxu1 %v24450_v12  ;;  %20265 = vmatprep.mubr.msk.f32.mxu1 %vm3995_vm2, %v16658_v45  ;;  %v16681_v45 = vld [vmem:[%s25950_s16 + $0x2f8] sm:$0xff]  ;;  %v16779_v47 = vld [vmem:[%s25950_s16 + $0x808] sm:$0xff] }
 0xa2a   : > { %v19880_v57 = vpop.f32.mrb[110].mxu0 }
 0xa2b   : > { %v25132_v50 = vadd.f32 %v19880_v57, %v24965_v60  ;;  %v7928_v26 = vpop.f32.mrb[111].mxu0  ;;  %20266 = vmatmul.mubr.msk.f32.gmra.mrb[168].mxu1 %vm3995_vm2, %v16659_v58  ;;  %v16663_v60 = vld [vmem:[%s25950_s16 + $0x268] sm:$0xff]  ;;  %v16780_v58 = vld [vmem:[%s25950_s16 + $0x810] sm:$0xff]  ;;  %v16782_v57 = vld [vmem:[%s25950_s16 + $0x820] sm:$0xff] }
 0xa2c   : > { %v25136_v52 = vadd.f32 %v7928_v26, %v24967_v62  ;;  %20268 = vmatprep.mubr.msk.f32.mxu1 %vm3995_vm2, %v16660_v63  ;;  %v16664_v62 = vld [vmem:[%s25950_s16 + $0x270] sm:$0xff]  ;;  %v16781_v63 = vld [vmem:[%s25950_s16 + $0x818] sm:$0xff]  ;;  %v16783_v26 = vld [vmem:[%s25950_s16 + $0x828] sm:$0xff] }
 0xa2f   : > { %20269 = vmatmul.mubr.msk.f32.gmra.mrb[170].mxu1 %vm3995_vm2, %v16661_v3  ;;  %v16784_v3 = vld [vmem:[%s25950_s16 + $0x830] sm:$0xff] }
 0xa30   : > { %20271 = vmatprep.mubr.msk.f32.mxu1 %vm3995_vm2, %v16662_v10  ;;  %v16785_v10 = vld [vmem:[%s25950_s16 + $0x838] sm:$0xff] }
 0xa33   : > { %20272 = vmatmul.mubr.msk.f32.gmra.mrb[172].mxu1 %vm3995_vm2, %v16663_v60  ;;  %v16786_v60 = vld [vmem:[%s25950_s16 + $0x840] sm:$0xff] }
 0xa34   : > { %20274 = vmatprep.mubr.msk.f32.mxu1 %vm3995_vm2, %v16664_v62  ;;  %v16787_v62 = vld [vmem:[%s25950_s16 + $0x848] sm:$0xff] }
 0xa37   : > { %20275 = vmatmul.mubr.msk.f32.gmra.mrb[174].mxu1 %vm3995_vm2, %v16665_v32  ;;  %v16788_v32 = vld [vmem:[%s25950_s16 + $0x850] sm:$0xff] }
 0xa38   : > { %20277 = vmatprep.mubr.msk.f32.mxu1 %vm3995_vm2, %v16666_v14  ;;  %v16789_v14 = vld [vmem:[%s25950_s16 + $0x858] sm:$0xff] }
 0xa3b   : > { %20278 = vmatmul.mubr.msk.f32.gmra.mrb[176].mxu1 %vm3995_vm2, %v16667_v37  ;;  %v16790_v37 = vld [vmem:[%s25950_s16 + $0x860] sm:$0xff] }
 0xa3c   : > { %20280 = vmatprep.mubr.msk.f32.mxu1 %vm3995_vm2, %v16668_v7 }
 0xa3f   : > { %20281 = vmatmul.mubr.msk.f32.gmra.mrb[178].mxu1 %vm3995_vm2, %v16669_v44 }
 0xa40   : > { %20283 = vmatprep.mubr.msk.f32.mxu1 %vm3995_vm2, %v16670_v22  ;;  %v16791_v22 = vld [vmem:[%s25950_s16 + $0x868] sm:$0xff] }
 0xa43   : > { %20284 = vmatmul.mubr.msk.f32.gmra.mrb[180].mxu1 %vm3995_vm2, %v16671_v49  ;;  %v25214_v49 = vld [vmem:[%s25951_s18 + $0x10] sm:$0xff] }
 0xa44   : > { %20286 = vmatprep.mubr.msk.f32.mxu1 %vm3995_vm2, %v16672_v16  ;;  %v16792_v16 = vld [vmem:[%s25950_s16 + $0x870] sm:$0xff] }
 0xa47   : > { %20287 = vmatmul.mubr.msk.f32.gmra.mrb[182].mxu1 %vm3995_vm2, %v16673_v55 }
 0xa48   : > { %20289 = vmatprep.mubr.msk.f32.mxu1 %vm3995_vm2, %v16674_v33 }
 0xa4b   : > { %20290 = vmatmul.mubr.msk.f32.gmra.mrb[184].mxu1 %vm3995_vm2, %v16675_v4  ;;  %v16793_v4 = vld [vmem:[%s25950_s16 + $0x878] sm:$0xff] }
 0xa4c   : > { %20292 = vmatprep.mubr.msk.f32.mxu1 %vm3995_vm2, %v16676_v9  ;;  %v16794_v9 = vld [vmem:[%s25950_s16 + $0x880] sm:$0xff] }
 0xa4f   : > { %20293 = vmatmul.mubr.msk.f32.gmra.mrb[186].mxu1 %vm3995_vm2, %v16677_v29 }
 0xa50   : > { %20295 = vmatprep.mubr.msk.f32.mxu1 %vm3995_vm2, %v16678_v23 }
 0xa53   : > { %20296 = vmatmul.mubr.msk.f32.gmra.mrb[188].mxu1 %vm3995_vm2, %v16679_v27  ;;  %v16796_v27 = vld [vmem:[%s25950_s16 + $0x890] sm:$0xff] }
 0xa54   : > { %20298 = vmatprep.mubr.msk.f32.mxu1 %vm3995_vm2, %v16680_v38 }
 0xa57   : > { %20299 = vmatmul.mubr.msk.f32.gmra.mrb[190].mxu1 %vm3995_vm2, %v16681_v45 }
 0xa58   : > { %20317 = vmatprep.mubr.msk.f32.mxu1 %vm3995_vm2, %v16778_v40  ;;  %v16797_v40 = vld [vmem:[%s25950_s16 + $0x898] sm:$0xff] }
 0xa5b   : > { %20318 = vmatmul.mubr.msk.f32.vlgmr.msra.gmra.mrb[160].mxu1 %vm3995_vm2, %v16779_v47  ;;  %v16798_v47 = vld [vmem:[%s25950_s16 + $0x8a0] sm:$0xff] }
 0xa5c   : > { %20320 = vmatprep.mubr.msk.f32.mxu1 %vm3995_vm2, %v16780_v58 }
 0xa5f   : > { %20321 = vmatmul.mubr.msk.f32.gmra.mrb[162].mxu1 %vm3995_vm2, %v16781_v63 }
 0xa60   : > { %20323 = vmatprep.mubr.msk.f32.mxu1 %vm3995_vm2, %v16782_v57  ;;  %v16799_v57 = vld [vmem:[%s25950_s16 + $0x8a8] sm:$0xff] }
 0xa63   : > { %20324 = vmatmul.mubr.msk.f32.gmra.mrb[164].mxu1 %vm3995_vm2, %v16783_v26  ;;  %v16800_v26 = vld [vmem:[%s25950_s16 + $0x8b0] sm:$0xff] }
 0xa64   : > { %20326 = vmatprep.mubr.msk.f32.mxu1 %vm3995_vm2, %v16784_v3 }
 0xa67   : > { %20327 = vmatmul.mubr.msk.f32.gmra.mrb[166].mxu1 %vm3995_vm2, %v16785_v10 }
 0xa68   : > { %20329 = vmatprep.mubr.msk.f32.mxu1 %vm3995_vm2, %v16786_v60  ;;  %v16801_v60 = vld [vmem:[%s25950_s16 + $0x8b8] sm:$0xff] }
 0xa6b   : > { %20330 = vmatmul.mubr.msk.f32.gmra.mrb[168].mxu1 %vm3995_vm2, %v16787_v62  ;;  %v16802_v62 = vld [vmem:[%s25950_s16 + $0x8c0] sm:$0xff] }
 0xa6c   : > { %20332 = vmatprep.mubr.msk.f32.mxu1 %vm3995_vm2, %v16788_v32 }
 0xa6e   : > { %v20027_v7 = vpop.f32.mrb[128].mxu1 }
 0xa6f   : > { %v8873_v44 = vpop.f32.mrb[129].mxu1  ;;  %20333 = vmatmul.mubr.msk.f32.gmra.mrb[170].mxu1 %vm3995_vm2, %v16789_v14 }
 0xa70   : > { %20075 = vmatprep.mubr.msk.f32.mxu0 %vm9066_vm4, %v8873_v44  ;;  %20335 = vmatprep.mubr.msk.f32.mxu1 %vm3995_vm2, %v16790_v37  ;;  %v16803_v37 = vld [vmem:[%s25950_s16 + $0x8c8] sm:$0xff] }
 0xa71   : > { %20076 = vmatmul.mubr.msk.f32.vlgmr.msra.gmra.mrb[112].mxu0 %vm9066_vm4, %v20027_v7  ;;  %v16804_v7 = vld [vmem:[%s25950_s16 + $0x8d0] sm:$0xff] }
 0xa72   : > { %v20030_v55 = vpop.f32.mrb[130].mxu1  ;;  %20124 = vmatpush3.msra.mxu0 %v25142_v6  ;;  %v16795_v6 = vld [vmem:[%s25950_s16 + $0x888] sm:$0xff] }
 0xa73   : > { %v8883_v33 = vpop.f32.mrb[131].mxu1  ;;  %20336 = vmatmul.mubr.msk.f32.gmra.mrb[172].mxu1 %vm3995_vm2, %v16791_v22  ;;  %20365 = vmatprep.subr.mxu0 %v25214_v49 }
 0xa74   : > { %20078 = vmatprep.mubr.msk.f32.mxu0 %vm9066_vm4, %v8883_v33  ;;  %20338 = vmatprep.mubr.msk.f32.mxu1 %vm3995_vm2, %v16792_v16  ;;  %v16805_v16 = vld [vmem:[%s25950_s16 + $0x8d8] sm:$0xff] }
 0xa75   : > { %20079 = vmatmul.mubr.msk.f32.gmra.mrb[114].mxu0 %vm9066_vm4, %v20030_v55  ;;  %v16806_v55 = vld [vmem:[%s25950_s16 + $0x8e0] sm:$0xff] }
 0xa76   : > { %v20033_v29 = vpop.f32.mrb[132].mxu1 }
 0xa77   : > { %v8893_v23 = vpop.f32.mrb[133].mxu1  ;;  %20339 = vmatmul.mubr.msk.f32.gmra.mrb[174].mxu1 %vm3995_vm2, %v16793_v4 }
 0xa78   : > { %20081 = vmatprep.mubr.msk.f32.mxu0 %vm9066_vm4, %v8893_v23  ;;  %20341 = vmatprep.mubr.msk.f32.mxu1 %vm3995_vm2, %v16794_v9  ;;  %v16807_v9 = vld [vmem:[%s25950_s16 + $0x8e8] sm:$0xff] }
 0xa79   : > { %20082 = vmatmul.mubr.msk.f32.gmra.mrb[116].mxu0 %vm9066_vm4, %v20033_v29  ;;  %v16808_v29 = vld [vmem:[%s25950_s16 + $0x8f0] sm:$0xff] }
 0xa7a   : > { %v20036_v38 = vpop.f32.mrb[134].mxu1 }
 0xa7b   : > { %v8903_v45 = vpop.f32.mrb[135].mxu1  ;;  %20342 = vmatmul.mubr.msk.f32.gmra.mrb[176].mxu1 %vm3995_vm2, %v16795_v6 }
 0xa7c   : > { %20084 = vmatprep.mubr.msk.f32.mxu0 %vm9066_vm4, %v8903_v45  ;;  %20344 = vmatprep.mubr.msk.f32.mxu1 %vm3995_vm2, %v16796_v27  ;;  %v16809_v27 = vld [vmem:[%s25950_s16 + $0x8f8] sm:$0xff] }
 0xa7d   : > { %20085 = vmatmul.mubr.msk.f32.gmra.mrb[118].mxu0 %vm9066_vm4, %v20036_v38 }
 0xa7e   : > { %v20039_v58 = vpop.f32.mrb[136].mxu1 }
 0xa7f   : > { %v8913_v63 = vpop.f32.mrb[137].mxu1  ;;  %20345 = vmatmul.mubr.msk.f32.gmra.mrb[178].mxu1 %vm3995_vm2, %v16797_v40 }
 0xa80   : > { %20087 = vmatprep.mubr.msk.f32.mxu0 %vm9066_vm4, %v8913_v63  ;;  %20347 = vmatprep.mubr.msk.f32.mxu1 %vm3995_vm2, %v16798_v47 }
 0xa81   : > { %20088 = vmatmul.mubr.msk.f32.gmra.mrb[120].mxu0 %vm9066_vm4, %v20039_v58 }
 0xa82   : > { %v20042_v3 = vpop.f32.mrb[138].mxu1 }
 0xa83   : > { %v8923_v10 = vpop.f32.mrb[139].mxu1  ;;  %20348 = vmatmul.mubr.msk.f32.gmra.mrb[180].mxu1 %vm3995_vm2, %v16799_v57 }
 0xa84   : > { %20090 = vmatprep.mubr.msk.f32.mxu0 %vm9066_vm4, %v8923_v10  ;;  %20350 = vmatprep.mubr.msk.f32.mxu1 %vm3995_vm2, %v16800_v26 }
 0xa85   : > { %20091 = vmatmul.mubr.msk.f32.gmra.mrb[122].mxu0 %vm9066_vm4, %v20042_v3 }
 0xa86   : > { %v20045_v32 = vpop.f32.mrb[140].mxu1 }
 0xa87   : > { %v8933_v14 = vpop.f32.mrb[141].mxu1  ;;  %20351 = vmatmul.mubr.msk.f32.gmra.mrb[182].mxu1 %vm3995_vm2, %v16801_v60 }
 0xa88   : > { %20093 = vmatprep.mubr.msk.f32.mxu0 %vm9066_vm4, %v8933_v14  ;;  %20353 = vmatprep.mubr.msk.f32.mxu1 %vm3995_vm2, %v16802_v62  ;;  %v11415_v14 = vld [vmem:[%s25952_s22 + $0x8] sm:$0xff] }
 0xa89   : > { %20094 = vmatmul.mubr.msk.f32.gmra.mrb[124].mxu0 %vm9066_vm4, %v20045_v32  ;;  %v25385_v32 = vpop.permute.xlu0 %11272 }
 0xa8a   : > { %v20048_v44 = vpop.f32.mrb[142].mxu1 }
 0xa8b   : > { %v8943_v22 = vpop.f32.mrb[143].mxu1  ;;  %20354 = vmatmul.mubr.msk.f32.gmra.mrb[184].mxu1 %vm3995_vm2, %v16803_v37 }
 0xa8c   : > { %20096 = vmatprep.mubr.msk.f32.mxu0 %vm9066_vm4, %v8943_v22  ;;  %20356 = vmatprep.mubr.msk.f32.mxu1 %vm3995_vm2, %v16804_v7 }
 0xa8d   : > { %20097 = vmatmul.mubr.msk.f32.gmra.mrb[126].mxu0 %vm9066_vm4, %v20048_v44  ;;  %v11193_v7 = vpop.permute.xlu0 %11192 }
 0xa8e   : > { %v20051_v33 = vpop.f32.mrb[144].mxu1 }
 0xa8f   : > { %v8953_v4 = vpop.f32.mrb[145].mxu1  ;;  %20357 = vmatmul.mubr.msk.f32.gmra.mrb[186].mxu1 %vm3995_vm2, %v16805_v16 }
 0xa90   : > { %20099 = vmatprep.mubr.msk.f32.mxu0 %vm9066_vm4, %v8953_v4  ;;  %20359 = vmatprep.mubr.msk.f32.mxu1 %vm3995_vm2, %v16806_v55 }
 0xa91   : > { %20100 = vmatmul.mubr.msk.f32.gmra.mrb[128].mxu0 %vm9066_vm4, %v20051_v33  ;;  %v25390_v22 = vpop.permute.xlu0 %11282 }
 0xa92   : > { %v20054_v23 = vpop.f32.mrb[146].mxu1 }
 0xa93   : > { %v8963_v6 = vpop.f32.mrb[147].mxu1  ;;  %20360 = vmatmul.mubr.msk.f32.gmra.mrb[188].mxu1 %vm3995_vm2, %v16807_v9 }
 0xa94   : > { %20102 = vmatprep.mubr.msk.f32.mxu0 %vm9066_vm4, %v8963_v6  ;;  %20362 = vmatprep.mubr.msk.f32.mxu1 %vm3995_vm2, %v16808_v29 }
 0xa95   : > { %20103 = vmatmul.mubr.msk.f32.gmra.mrb[130].mxu0 %vm9066_vm4, %v20054_v23  ;;  %v11203_v55 = vpop.permute.xlu0 %11202 }
 0xa96   : > { %v20057_v38 = vpop.f32.mrb[148].mxu1 }
 0xa97   : > { %v8973_v45 = vpop.f32.mrb[149].mxu1  ;;  %20363 = vmatmul.mubr.msk.f32.gmra.mrb[190].mxu1 %vm3995_vm2, %v16809_v27 }
 0xa98   : > { %20105 = vmatprep.mubr.msk.f32.mxu0 %vm9066_vm4, %v8973_v45 }
 0xa99   : > { %20106 = vmatmul.mubr.msk.f32.gmra.mrb[132].mxu0 %vm9066_vm4, %v20057_v38  ;;  %v25394_v4 = vpop.permute.xlu0 %11292 }
 0xa9a   : > { %v20060_v40 = vpop.f32.mrb[150].mxu1 }
 0xa9b   : > { %v8983_v47 = vpop.f32.mrb[151].mxu1 }
 0xa9c   : > { %20108 = vmatprep.mubr.msk.f32.mxu0 %vm9066_vm4, %v8983_v47 }
 0xa9d   : > { %20109 = vmatmul.mubr.msk.f32.gmra.mrb[134].mxu0 %vm9066_vm4, %v20060_v40  ;;  %v11213_v29 = vpop.permute.xlu0 %11212 }
 0xa9e   : > { %v20063_v58 = vpop.f32.mrb[152].mxu1 }
 0xa9f   : > { %v8993_v63 = vpop.f32.mrb[153].mxu1 }
 0xaa0   : > { %20111 = vmatprep.mubr.msk.f32.mxu0 %vm9066_vm4, %v8993_v63 }
 0xaa1   : > { %20112 = vmatmul.mubr.msk.f32.gmra.mrb[136].mxu0 %vm9066_vm4, %v20063_v58  ;;  %v25398_v6 = vpop.permute.xlu0 %11302 }
 0xaa2   : > { %v20066_v57 = vpop.f32.mrb[154].mxu1 }
 0xaa3   : > { %v9003_v26 = vpop.f32.mrb[155].mxu1 }
 0xaa4   : > { %20114 = vmatprep.mubr.msk.f32.mxu0 %vm9066_vm4, %v9003_v26 }
 0xaa5   : > { %20115 = vmatmul.mubr.msk.f32.gmra.mrb[138].mxu0 %vm9066_vm4, %v20066_v57  ;;  %v11223_v38 = vpop.permute.xlu0 %11222 }
 0xaa6   : > { %v20069_v3 = vpop.f32.mrb[156].mxu1 }
 0xaa7   : > { %v9013_v10 = vpop.f32.mrb[157].mxu1 }
 0xaa8   : > { %20117 = vmatprep.mubr.msk.f32.mxu0 %vm9066_vm4, %v9013_v10 }
 0xaa9   : > { %20118 = vmatmul.mubr.msk.f32.gmra.mrb[140].mxu0 %vm9066_vm4, %v20069_v3  ;;  %v25402_v40 = vpop.permute.xlu0 %11312 }
 0xaaa   : > { %v20072_v60 = vpop.f32.mrb[158].mxu1 }
 0xaab   : > { %v9023_v62 = vpop.f32.mrb[159].mxu1 }
 0xaac   : > { %20120 = vmatprep.mubr.msk.f32.mxu0 %vm9066_vm4, %v9023_v62 }
 0xaad   : > { %20121 = vmatmul.mubr.msk.f32.gmra.mrb[142].mxu0 %vm9066_vm4, %v20072_v60  ;;  %v11233_v58 = vpop.permute.xlu0 %11232 }
 0xaae   : > { %20125 = vmatprep.mubr.msk.f32.mxu0 %vm9066_vm4, %v24979_v21 }
 0xab1   : > { %20126 = vmatmul.mubr.msk.f32.vlgmr.msra.gmra.mrb[112].mxu0 %vm9066_vm4, %v24974_v18  ;;  %v25406_v57 = vpop.permute.xlu0 %11322 }
 0xab2   : > { %20128 = vmatprep.mubr.msk.f32.mxu0 %vm9066_vm4, %v24989_v51  ;;  %20366 = vmatpush3.msra.mxu0 %v25214_v49  ;;  %v25383_v49 = vpop.permute.xlu1 %11277 }
 0xab5   : > { %20129 = vmatmul.mubr.msk.f32.gmra.mrb[114].mxu0 %vm9066_vm4, %v24985_v56 }
 0xab6   : > { %20131 = vmatprep.mubr.msk.f32.mxu0 %vm9066_vm4, %v24999_v0  ;;  %v11198_v37 = vpop.permute.xlu1 %11197 }
 0xab9   : > { %20132 = vmatmul.mubr.msk.f32.gmra.mrb[116].mxu0 %vm9066_vm4, %v24995_v25 }
 0xaba   : > { %20134 = vmatprep.mubr.msk.f32.mxu0 %vm9066_vm4, %v25009_v11  ;;  %v25388_v44 = vpop.permute.xlu1 %11287 }
 0xabd   : > { %20135 = vmatmul.mubr.msk.f32.gmra.mrb[118].mxu0 %vm9066_vm4, %v25005_v31 }
 0xabe   : > { %20137 = vmatprep.mubr.msk.f32.mxu0 %vm9066_vm4, %v25019_v20  ;;  %v11208_v16 = vpop.permute.xlu1 %11207 }
 0xac1   : > { %20138 = vmatmul.mubr.msk.f32.gmra.mrb[120].mxu0 %vm9066_vm4, %v25015_v43 }
 0xac2   : > { %20140 = vmatprep.mubr.msk.f32.mxu0 %vm9066_vm4, %v25029_v17  ;;  %v25392_v33 = vpop.permute.xlu1 %11297 }
 0xac5   : > { %20141 = vmatmul.mubr.msk.f32.gmra.mrb[122].mxu0 %vm9066_vm4, %v25025_v54 }
 0xac6   : > { %20143 = vmatprep.mubr.msk.f32.mxu0 %vm9066_vm4, %v25039_v24  ;;  %v11218_v9 = vpop.permute.xlu1 %11217 }
 0xac9   : > { %20144 = vmatmul.mubr.msk.f32.gmra.mrb[124].mxu0 %vm9066_vm4, %v25035_v15 }
 0xaca   : > { %20146 = vmatprep.mubr.msk.f32.mxu0 %vm9066_vm4, %v25049_v30  ;;  %v25396_v23 = vpop.permute.xlu1 %11307 }
 0xacd   : > { %20147 = vmatmul.mubr.msk.f32.gmra.mrb[126].mxu0 %vm9066_vm4, %v25045_v34 }
 0xace   : > { %20149 = vmatprep.mubr.msk.f32.mxu0 %vm9066_vm4, %v25059_v53  ;;  %v11228_v27 = vpop.permute.xlu1 %11227 }
 0xad1   : > { %20150 = vmatmul.mubr.msk.f32.gmra.mrb[128].mxu0 %vm9066_vm4, %v25055_v59 }
 0xad2   : > { %20152 = vmatprep.mubr.msk.f32.mxu0 %vm9066_vm4, %v25069_v1  ;;  %v25400_v45 = vpop.permute.xlu1 %11317 }
 0xad5   : > { %20153 = vmatmul.mubr.msk.f32.gmra.mrb[130].mxu0 %vm9066_vm4, %v25065_v28 }
 0xad6   : > { %20155 = vmatprep.mubr.msk.f32.mxu0 %vm9066_vm4, %v25079_v5  ;;  %v11238_v47 = vpop.permute.xlu1 %11237 }
 0xad9   : > { %20156 = vmatmul.mubr.msk.f32.gmra.mrb[132].mxu0 %vm9066_vm4, %v25075_v36 }
 0xada   : > { %20158 = vmatprep.mubr.msk.f32.mxu0 %vm9066_vm4, %v25089_v13  ;;  %v25404_v63 = vpop.permute.xlu1 %11327 }
 0xadd   : > { %20159 = vmatmul.mubr.msk.f32.gmra.mrb[134].mxu0 %vm9066_vm4, %v25085_v48 }
 0xade   : > { %20161 = vmatprep.mubr.msk.f32.mxu0 %vm9066_vm4, %v25101_v35 }
 0xae1   : > { %20162 = vmatmul.mubr.msk.f32.gmra.mrb[136].mxu0 %vm9066_vm4, %v25097_v19 }
 0xae2   : > { %20164 = vmatprep.mubr.msk.f32.mxu0 %vm9066_vm4, %v25113_v42 }
 0xae5   : > { %20165 = vmatmul.mubr.msk.f32.gmra.mrb[138].mxu0 %vm9066_vm4, %v25109_v39 }
 0xae6   : > { %20167 = vmatprep.mubr.msk.f32.mxu0 %vm9066_vm4, %v25125_v46 }
 0xae9   : > { %20168 = vmatmul.mubr.msk.f32.gmra.mrb[140].mxu0 %vm9066_vm4, %v25121_v41 }
 0xaea   : > { %20170 = vmatprep.mubr.msk.f32.mxu0 %vm9066_vm4, %v25136_v52 }
 0xaed   : > { %20171 = vmatmul.mubr.msk.f32.gmra.mrb[142].mxu0 %vm9066_vm4, %v25132_v50 }
 0xb2e   : > { %v20319_v18 = vpop.f32.mrb[160].mxu1 }
 0xb2f   : > { %v10612_v21 = vpop.f32.mrb[161].mxu1 }
 0xb30   : > { %20367 = vmatprep.mubr.msk.f32.mxu0 %vm9066_vm4, %v10612_v21 }
 0xb31   : > { %20368 = vmatmul.mubr.msk.f32.vlgmr.msra.gmra.mrb[112].mxu0 %vm9066_vm4, %v20319_v18  ;;  %v11248_v18 = vpop.permute.xlu1 %11247 }
 0xb32   : > { %v20322_v56 = vpop.f32.mrb[162].mxu1 }
 0xb33   : > { %v10622_v51 = vpop.f32.mrb[163].mxu1 }
 0xb34   : > { %20370 = vmatprep.mubr.msk.f32.mxu0 %vm9066_vm4, %v10622_v51  ;;  %v11243_v51 = vpop.permute.xlu0 %11242 }
 0xb35   : > { %20371 = vmatmul.mubr.msk.f32.gmra.mrb[114].mxu0 %vm9066_vm4, %v20322_v56 }
 0xb36   : > { %v20325_v25 = vpop.f32.mrb[164].mxu1 }
 0xb37   : > { %v10632_v0 = vpop.f32.mrb[165].mxu1 }
 0xb38   : > { %20373 = vmatprep.mubr.msk.f32.mxu0 %vm9066_vm4, %v10632_v0 }
 0xb39   : > { %20374 = vmatmul.mubr.msk.f32.gmra.mrb[116].mxu0 %vm9066_vm4, %v20325_v25 }
 0xb3a   : > { %v20328_v31 = vpop.f32.mrb[166].mxu1 }
 0xb3b   : > { %v10642_v11 = vpop.f32.mrb[167].mxu1 }
 0xb3c   : > { %20376 = vmatprep.mubr.msk.f32.mxu0 %vm9066_vm4, %v10642_v11 }
 0xb3d   : > { %20377 = vmatmul.mubr.msk.f32.gmra.mrb[118].mxu0 %vm9066_vm4, %v20328_v31 }
 0xb3e   : > { %v20331_v43 = vpop.f32.mrb[168].mxu1 }
 0xb3f   : > { %v10652_v20 = vpop.f32.mrb[169].mxu1 }
 0xb40   : > { %20379 = vmatprep.mubr.msk.f32.mxu0 %vm9066_vm4, %v10652_v20 }
 0xb41   : > { %20380 = vmatmul.mubr.msk.f32.gmra.mrb[120].mxu0 %vm9066_vm4, %v20331_v43 }
 0xb42   : > { %v20334_v54 = vpop.f32.mrb[170].mxu1 }
 0xb43   : > { %v10662_v17 = vpop.f32.mrb[171].mxu1 }
 0xb44   : > { %20382 = vmatprep.mubr.msk.f32.mxu0 %vm9066_vm4, %v10662_v17 }
 0xb45   : > { %20383 = vmatmul.mubr.msk.f32.gmra.mrb[122].mxu0 %vm9066_vm4, %v20334_v54 }
 0xb46   : > { %v20337_v15 = vpop.f32.mrb[172].mxu1 }
 0xb47   : > { %v10672_v24 = vpop.f32.mrb[173].mxu1 }
 0xb48   : > { %20385 = vmatprep.mubr.msk.f32.mxu0 %vm9066_vm4, %v10672_v24  ;;  %v25410_v24 = vpop.permute.xlu1 %11337 }
 0xb49   : > { %20386 = vmatmul.mubr.msk.f32.gmra.mrb[124].mxu0 %vm9066_vm4, %v20337_v15 }
 0xb4a   : > { %v20340_v34 = vpop.f32.mrb[174].mxu1 }
 0xb4b   : > { %v10682_v30 = vpop.f32.mrb[175].mxu1 }
 0xb4c   : > { %20388 = vmatprep.mubr.msk.f32.mxu0 %vm9066_vm4, %v10682_v30 }
 0xb4d   : > { %20389 = vmatmul.mubr.msk.f32.gmra.mrb[126].mxu0 %vm9066_vm4, %v20340_v34 }
 0xb4e   : > { %v20343_v59 = vpop.f32.mrb[176].mxu1 }
 0xb4f   : > { %v10692_v53 = vpop.f32.mrb[177].mxu1 }
 0xb50   : > { %20391 = vmatprep.mubr.msk.f32.mxu0 %vm9066_vm4, %v10692_v53 }
 0xb51   : > { %20392 = vmatmul.mubr.msk.f32.gmra.mrb[128].mxu0 %vm9066_vm4, %v20343_v59  ;;  %v25414_v59 = vpop.permute.xlu0 %11332 }
 0xb52   : > { %v20346_v28 = vpop.f32.mrb[178].mxu1 }
 0xb53   : > { %v10702_v1 = vpop.f32.mrb[179].mxu1 }
 0xb54   : > { %20394 = vmatprep.mubr.msk.f32.mxu0 %vm9066_vm4, %v10702_v1 }
 0xb55   : > { %20395 = vmatmul.mubr.msk.f32.gmra.mrb[130].mxu0 %vm9066_vm4, %v20346_v28 }
 0xb56   : > { %v20349_v36 = vpop.f32.mrb[180].mxu1 }
 0xb57   : > { %v10712_v5 = vpop.f32.mrb[181].mxu1 }
 0xb58   : > { %20397 = vmatprep.mubr.msk.f32.mxu0 %vm9066_vm4, %v10712_v5 }
 0xb59   : > { %20398 = vmatmul.mubr.msk.f32.gmra.mrb[132].mxu0 %vm9066_vm4, %v20349_v36 }
 0xb5a   : > { %v20352_v48 = vpop.f32.mrb[182].mxu1 }
 0xb5b   : > { %v10722_v13 = vpop.f32.mrb[183].mxu1 }
 0xb5c   : > { %20400 = vmatprep.mubr.msk.f32.mxu0 %vm9066_vm4, %v10722_v13 }
 0xb5d   : > { %20401 = vmatmul.mubr.msk.f32.gmra.mrb[134].mxu0 %vm9066_vm4, %v20352_v48 }
 0xb5e   : > { %v20355_v19 = vpop.f32.mrb[184].mxu1 }
 0xb5f   : > { %v10732_v35 = vpop.f32.mrb[185].mxu1 }
 0xb60   : > { %20403 = vmatprep.mubr.msk.f32.mxu0 %vm9066_vm4, %v10732_v35  ;;  %v11258_v35 = vpop.permute.xlu1 %11257 }
 0xb61   : > { %20404 = vmatmul.mubr.msk.f32.gmra.mrb[136].mxu0 %vm9066_vm4, %v20355_v19 }
 0xb62   : > { %v20358_v39 = vpop.f32.mrb[186].mxu1 }
 0xb63   : > { %v10742_v42 = vpop.f32.mrb[187].mxu1 }
 0xb64   : > { %20406 = vmatprep.mubr.msk.f32.mxu0 %vm9066_vm4, %v10742_v42 }
 0xb65   : > { %20407 = vmatmul.mubr.msk.f32.gmra.mrb[138].mxu0 %vm9066_vm4, %v20358_v39 }
 0xb66   : > { %v20361_v41 = vpop.f32.mrb[188].mxu1 }
 0xb67   : > { %v10752_v46 = vpop.f32.mrb[189].mxu1 }
 0xb68   : > { %20409 = vmatprep.mubr.msk.f32.mxu0 %vm9066_vm4, %v10752_v46 }
 0xb69   : > { %20410 = vmatmul.mubr.msk.f32.gmra.mrb[140].mxu0 %vm9066_vm4, %v20361_v41  ;;  %v11253_v41 = vpop.permute.xlu0 %11252 }
 0xb6a   : > { %v20364_v50 = vpop.f32.mrb[190].mxu1 }
 0xb6b   : > { %v10762_v52 = vpop.f32.mrb[191].mxu1 }
 0xb6c   : > { %20412 = vmatprep.mubr.msk.f32.mxu0 %vm9066_vm4, %v10762_v52 }
 0xb6d   : > { %20413 = vmatmul.mubr.msk.f32.gmra.mrb[142].mxu0 %vm9066_vm4, %v20364_v50 }
 0xb6e   : > { %11510 = vmatprep.mubr.f32.mxu0 %v11415_v14 }
 0xc04   : > { %v20369_v26 = vpop.f32.mrb[112].mxu0 }
 0xc05   : > { %v11351_v3 = vadd.f32 %v20369_v26, %v11198_v37  ;;  %v10967_v10 = vpop.f32.mrb[113].mxu0  ;;  %v25424_v26 = vpop.permute.xlu0 %11342 }
 0xc06   : > { %v11350_v60 = vadd.f32 %v11193_v7, %v10967_v10 }
 0xc07   : > { %v11383_v62 = vmax.f32 %v11351_v3, 0.0 }
 0xc08   : > { %v11382_v21 = vmax.f32 %v11350_v60, 0.0  ;;  %v20372_v56 = vpop.f32.mrb[114].mxu0 }
 0xc09   : > { %v11353_v25 = vadd.f32 %v20372_v56, %v11208_v16  ;;  %v10977_v0 = vpop.f32.mrb[115].mxu0 }
 0xc0a   : > { %v25408_v31 = vpack.c.bf16 %v11383_v62, %v11382_v21  ;;  %v11352_v11 = vadd.f32 %v11203_v55, %v10977_v0 }
 0xc0b   : > { %v11385_v43 = vmax.f32 %v11353_v25, 0.0 }
 0xc0c   : > { %v11384_v20 = vmax.f32 %v11352_v11, 0.0  ;;  %v20375_v54 = vpop.f32.mrb[116].mxu0  ;;  %v11263_v11 = vpop.permute.xlu0 %11262 }
 0xc0d   : > { %v11355_v17 = vadd.f32 %v20375_v54, %v11218_v9  ;;  %v10987_v15 = vpop.f32.mrb[117].mxu0 }
 0xc0e   : > { %v25412_v34 = vpack.c.bf16 %v11385_v43, %v11384_v20  ;;  %v11354_v30 = vadd.f32 %v11213_v29, %v10987_v15  ;;  %v25420_v29 = vpop.permute.xlu1 %11347 }
 0xc0f   : > { %v11387_v53 = vmax.f32 %v11355_v17, 0.0 }
 0xc10   : > { %v11386_v28 = vmax.f32 %v11354_v30, 0.0  ;;  %v20378_v1 = vpop.f32.mrb[118].mxu0 }
 0xc11   : > { %v11357_v36 = vadd.f32 %v20378_v1, %v11228_v27  ;;  %v10997_v5 = vpop.f32.mrb[119].mxu0 }
 0xc12   : > { %v25416_v48 = vpack.c.bf16 %v11387_v53, %v11386_v28  ;;  %v11356_v13 = vadd.f32 %v11223_v38, %v10997_v5  ;;  %v11268_v25 = vpop.permute.xlu1 %11267 }
 0xc13   : > { %v11389_v19 = vmax.f32 %v11357_v36, 0.0 }
 0xc14   : > { %v11388_v39 = vmax.f32 %v11356_v13, 0.0  ;;  %v20381_v42 = vpop.f32.mrb[120].mxu0 }
 0xc15   : > { %v11359_v46 = vadd.f32 %v20381_v42, %v11238_v47  ;;  %v11007_v50 = vpop.f32.mrb[121].mxu0 }
 0xc16   : > { %v25418_v52 = vpack.c.bf16 %v11389_v19, %v11388_v39  ;;  %v11358_v14 = vadd.f32 %v11233_v58, %v11007_v50 }
 0xc17   : > { %v11391_v37 = vmax.f32 %v11359_v46, 0.0 }
 0xc18   : > { %v11390_v7 = vmax.f32 %v11358_v14, 0.0  ;;  %v20384_v16 = vpop.f32.mrb[122].mxu0 }
 0xc19   : > { %v11361_v55 = vadd.f32 %v20384_v16, %v11248_v18  ;;  %v11017_v9 = vpop.f32.mrb[123].mxu0 }
 0xc1a   : > { %v25422_v27 = vpack.c.bf16 %v11391_v37, %v11390_v7  ;;  %v11360_v38 = vadd.f32 %v11243_v51, %v11017_v9 }
 0xc1b   : > { %v11393_v3 = vmax.f32 %v11361_v55, 0.0 }
 0xc1c   : > { %v11392_v10 = vmax.f32 %v11360_v38, 0.0  ;;  %v20387_v60 = vpop.f32.mrb[124].mxu0 }
 0xc1d   : > { %v11363_v47 = vadd.f32 %v20387_v60, %v11258_v35  ;;  %v11027_v62 = vpop.f32.mrb[125].mxu0 }
 0xc1e   : > { %v25426_v21 = vpack.c.bf16 %v11393_v3, %v11392_v10  ;;  %v11362_v58 = vadd.f32 %v11253_v41, %v11027_v62 }
 0xc1f   : > { %v11395_v56 = vmax.f32 %v11363_v47, 0.0 }
 0xc20   : > { %v11394_v0 = vmax.f32 %v11362_v58, 0.0  ;;  %v20390_v18 = vpop.f32.mrb[126].mxu0 }
 0xc21   : > { %v11365_v43 = vadd.f32 %v20390_v18, %v11268_v25  ;;  %v11037_v20 = vpop.f32.mrb[127].mxu0 }
 0xc22   : > { %v25428_v54 = vpack.c.bf16 %v11395_v56, %v11394_v0  ;;  %v11364_v51 = vadd.f32 %v11263_v11, %v11037_v20 }
 0xc23   : > { %v11397_v17 = vmax.f32 %v11365_v43, 0.0 }
 0xc24   : > { %v11396_v15 = vmax.f32 %v11364_v51, 0.0  ;;  %v20393_v30 = vpop.f32.mrb[128].mxu0 }
 0xc25   : > { %v11367_v53 = vadd.f32 %v20393_v30, %v25383_v49  ;;  %v11047_v28 = vpop.f32.mrb[129].mxu0 }
 0xc26   : > { %v25431_v1 = vpack.c.bf16 %v11397_v17, %v11396_v15  ;;  %v11366_v36 = vadd.f32 %v25385_v32, %v11047_v28  ;;  %v11418_v28 = vld [vmem:[%s25952_s22 + $0x20] sm:$0xff] }
 0xc27   : > { %v11399_v5 = vmax.f32 %v11367_v53, 0.0  ;;  %v11417_v53 = vld [vmem:[%s25952_s22 + $0x18] sm:$0xff] }
 0xc28   : > { %v11398_v13 = vmax.f32 %v11366_v36, 0.0  ;;  %v20396_v19 = vpop.f32.mrb[130].mxu0  ;;  %v11420_v36 = vld [vmem:[%s25952_s22 + $0x30] sm:$0xff] }
 0xc29   : > { %v11369_v35 = vadd.f32 %v20396_v19, %v25388_v44  ;;  %v11057_v39 = vpop.f32.mrb[131].mxu0  ;;  %v11424_v19 = vld [vmem:[%s25952_s22 + $0x50] sm:$0xff] }
 0xc2a   : > { %v21668_v42 = vpack.c.bf16 %v11399_v5, %v11398_v13  ;;  %v11368_v41 = vadd.f32 %v25390_v22, %v11057_v39  ;;  %v11422_v5 = vld [vmem:[%s25952_s22 + $0x40] sm:$0xff]  ;;  %v11425_v13 = vld [vmem:[%s25952_s22 + $0x58] sm:$0xff] }
 0xc2b   : > { %v11401_v46 = vmax.f32 %v11369_v35, 0.0  ;;  %v11427_v35 = vld [vmem:[%s25952_s22 + $0x68] sm:$0xff]  ;;  %v11426_v39 = vld [vmem:[%s25952_s22 + $0x60] sm:$0xff] }
 0xc2c   : > { %v11400_v50 = vmax.f32 %v11368_v41, 0.0  ;;  %v20399_v14 = vpop.f32.mrb[132].mxu0  ;;  %21669 = vmatprep.subr.bf16.mxu0 %v21668_v42  ;;  %v11429_v42 = vld [vmem:[%s25952_s22 + $0x78] sm:$0xff]  ;;  %v11428_v41 = vld [vmem:[%s25952_s22 + $0x70] sm:$0xff] }
 0xc2d   : > { %v11371_v49 = vadd.f32 %v20399_v14, %v25392_v33  ;;  %v11067_v37 = vpop.f32.mrb[133].mxu0  ;;  %21671 = vmatpush3.bf16.msra.mxu0 %v25408_v31  ;;  %v11433_v14 = vld [vmem:[%s25952_s22 + $0x98] sm:$0xff] }
 0xc2e   : > { %v21672_v7 = vpack.c.bf16 %v11401_v46, %v11400_v50  ;;  %v11370_v32 = vadd.f32 %v25394_v4, %v11067_v37  ;;  %v11431_v46 = vld [vmem:[%s25952_s22 + $0x88] sm:$0xff]  ;;  %v11430_v50 = vld [vmem:[%s25952_s22 + $0x80] sm:$0xff] }
 0xc2f   : > { %v11403_v16 = vmax.f32 %v11371_v49, 0.0  ;;  %v11432_v49 = vld [vmem:[%s25952_s22 + $0x90] sm:$0xff]  ;;  %v11435_v37 = vld [vmem:[%s25952_s22 + $0xa8] sm:$0xff] }
 0xc30   : > { %v11402_v55 = vmax.f32 %v11370_v32, 0.0  ;;  %v20402_v9 = vpop.f32.mrb[134].mxu0  ;;  %21673 = vmatprep.subr.bf16.mxu0 %v21672_v7  ;;  %v11434_v7 = vld [vmem:[%s25952_s22 + $0xa0] sm:$0xff]  ;;  %v11437_v32 = vld [vmem:[%s25952_s22 + $0xb8] sm:$0xff] }
 0xc31   : > { %v11373_v44 = vadd.f32 %v20402_v9, %v25396_v23  ;;  %v11077_v38 = vpop.f32.mrb[135].mxu0  ;;  %21675 = vmatpush3.bf16.msra.mxu0 %v25412_v34  ;;  %v11438_v9 = vld [vmem:[%s25952_s22 + $0xc0] sm:$0xff] }
 0xc32   : > { %v21676_v22 = vpack.c.bf16 %v11403_v16, %v11402_v55  ;;  %v11372_v3 = vadd.f32 %v25398_v6, %v11077_v38  ;;  %v11436_v16 = vld [vmem:[%s25952_s22 + $0xb0] sm:$0xff]  ;;  %v11439_v55 = vld [vmem:[%s25952_s22 + $0xc8] sm:$0xff] }
 0xc33   : > { %v11405_v10 = vmax.f32 %v11373_v44, 0.0  ;;  %v11441_v44 = vld [vmem:[%s25952_s22 + $0xd8] sm:$0xff]  ;;  %v11440_v38 = vld [vmem:[%s25952_s22 + $0xd0] sm:$0xff] }
 0xc34   : > { %v11404_v33 = vmax.f32 %v11372_v3, 0.0  ;;  %v20405_v60 = vpop.f32.mrb[136].mxu0  ;;  %21677 = vmatprep.subr.bf16.mxu0 %v21676_v22  ;;  %v11443_v22 = vld [vmem:[%s25952_s22 + $0xe8] sm:$0xff]  ;;  %v11442_v3 = vld [vmem:[%s25952_s22 + $0xe0] sm:$0xff] }
 0xc35   : > { %v11375_v31 = vadd.f32 %v20405_v60, %v25400_v45  ;;  %v11087_v47 = vpop.f32.mrb[137].mxu0  ;;  %21679 = vmatpush3.bf16.msra.mxu0 %v25416_v48  ;;  %v11591_v60 = vld [vmem:[%s25953_s23] sm:$0xff]  ;;  %s25920_s23 = smov 126  }
 0xc36   : > { %v21680_v4 = vpack.c.bf16 %v11405_v10, %v11404_v33  ;;  %v11374_v62 = vadd.f32 %v25402_v40, %v11087_v47  ;;  %v11445_v10 = vld [vmem:[%s25952_s22 + $0xf8] sm:$0xff]  ;;  %v11444_v33 = vld [vmem:[%s25952_s22 + $0xf0] sm:$0xff]  ;;  %20415 = vmatprep.subr.mxu1 %v11591_v60 }
 0xc37   : > { %v11407_v58 = vmax.f32 %v11375_v31, 0.0  ;;  %20416 = vmatpush3.msra.mxu1 %v11591_v60 }
 0xc38   : > { %v11406_v23 = vmax.f32 %v11374_v62, 0.0  ;;  %v20408_v56 = vpop.f32.mrb[138].mxu0  ;;  %21681 = vmatprep.subr.bf16.mxu0 %v21680_v4 }
 0xc39   : > { %v11377_v34 = vadd.f32 %v20408_v56, %v25404_v63  ;;  %v11097_v25 = vpop.f32.mrb[139].mxu0  ;;  %21683 = vmatpush3.bf16.msra.mxu0 %v25418_v52 }
 0xc3a   : > { %v21684_v6 = vpack.c.bf16 %v11407_v58, %v11406_v23  ;;  %v11376_v0 = vadd.f32 %v25406_v57, %v11097_v25 }
 0xc3b   : > { %v11409_v18 = vmax.f32 %v11377_v34, 0.0 }
 0xc3c   : > { %v11408_v45 = vmax.f32 %v11376_v0, 0.0  ;;  %v20411_v11 = vpop.f32.mrb[140].mxu0  ;;  %21685 = vmatprep.subr.bf16.mxu0 %v21684_v6 }
 0xc3d   : > { %v11379_v48 = vadd.f32 %v20411_v11, %v25410_v24  ;;  %v11107_v43 = vpop.f32.mrb[141].mxu0  ;;  %21687 = vmatpush3.bf16.msra.mxu0 %v25422_v27 }
 0xc3e   : > { %v21688_v40 = vpack.c.bf16 %v11409_v18, %v11408_v45  ;;  %v11378_v20 = vadd.f32 %v25414_v59, %v11107_v43 }
 0xc3f   : > { %v11411_v51 = vmax.f32 %v11379_v48, 0.0 }
 0xc40   : > { %v11410_v63 = vmax.f32 %v11378_v20, 0.0  ;;  %v20414_v52 = vpop.f32.mrb[142].mxu0  ;;  %21689 = vmatprep.subr.bf16.mxu0 %v21688_v40 }
 0xc41   : > { %v11381_v57 = vadd.f32 %v20414_v52, %v25420_v29  ;;  %v11117_v17 = vpop.f32.mrb[143].mxu0  ;;  %21691 = vmatpush3.bf16.msra.mxu0 %v25426_v21  ;;  %v11414_v29 = vld [vmem:[%s25952_s22] sm:$0xff]  ;;  %v11419_v21 = vld [vmem:[%s25952_s22 + $0x28] sm:$0xff] }
 0xc42   : > { %v21692_v24 = vpack.c.bf16 %v11411_v51, %v11410_v63  ;;  %v11380_v15 = vadd.f32 %v25424_v26, %v11117_v17  ;;  %v11416_v26 = vld [vmem:[%s25952_s22 + $0x10] sm:$0xff] }
 0xc43   : > { %v11413_v27 = vmax.f32 %v11381_v57, 0.0 }
 0xc44   : > { %v11412_v59 = vmax.f32 %v11380_v15, 0.0  ;;  %21693 = vmatprep.subr.bf16.mxu0 %v21692_v24 }
 0xc45   : > { %21695 = vmatpush3.bf16.msra.mxu0 %v25428_v54  ;;  %v11421_v54 = vld [vmem:[%s25952_s22 + $0x38] sm:$0xff] }
 0xc46   : > { %v21696_v30 = vpack.c.bf16 %v11413_v27, %v11412_v59 }
 0xc48   : > { %21697 = vmatprep.subr.bf16.mxu0 %v21696_v30 }
 0xc49   : > { %21699 = vmatpush3.bf16.msra.mxu0 %v25431_v1  ;;  %v11423_v1 = vld [vmem:[%s25952_s22 + $0x48] sm:$0xff] }
 0xc4c   : > { %11511 = vmatmul.mubr.f32.vlgmr.msra.gmra.mrb[144].mxu0 %v11414_v29 }
 0xc4d   : > { %11515 = vmatprep.mubr.f32.mxu0 %v11417_v53 }
 0xc50   : > { %11516 = vmatmul.mubr.f32.gmra.mrb[146].mxu0 %v11416_v26 }
 0xc51   : > { %11520 = vmatprep.mubr.f32.mxu0 %v11419_v21 }
 0xc54   : > { %11521 = vmatmul.mubr.f32.gmra.mrb[148].mxu0 %v11418_v28 }
 0xc55   : > { %11525 = vmatprep.mubr.f32.mxu0 %v11421_v54 }
 0xc58   : > { %11526 = vmatmul.mubr.f32.gmra.mrb[150].mxu0 %v11420_v36 }
 0xc59   : > { %11530 = vmatprep.mubr.f32.mxu0 %v11423_v1 }
 0xc5c   : > { %11531 = vmatmul.mubr.f32.gmra.mrb[152].mxu0 %v11422_v5 }
 0xc5d   : > { %11535 = vmatprep.mubr.f32.mxu0 %v11425_v13 }
 0xc60   : > { %11536 = vmatmul.mubr.f32.gmra.mrb[154].mxu0 %v11424_v19 }
 0xc61   : > { %11540 = vmatprep.mubr.f32.mxu0 %v11427_v35 }
 0xc64   : > { %11541 = vmatmul.mubr.f32.gmra.mrb[156].mxu0 %v11426_v39 }
 0xc65   : > { %11545 = vmatprep.mubr.f32.mxu0 %v11429_v42 }
 0xc68   : > { %11546 = vmatmul.mubr.f32.gmra.mrb[158].mxu0 %v11428_v41 }
 0xc69   : > { %11550 = vmatprep.mubr.f32.mxu0 %v11431_v46 }
 0xc6c   : > { %11551 = vmatmul.mubr.f32.gmra.mrb[160].mxu0 %v11430_v50 }
 0xc6d   : > { %11555 = vmatprep.mubr.f32.mxu0 %v11433_v14 }
 0xc70   : > { %11556 = vmatmul.mubr.f32.gmra.mrb[162].mxu0 %v11432_v49 }
 0xc71   : > { %11560 = vmatprep.mubr.f32.mxu0 %v11435_v37 }
 0xc74   : > { %11561 = vmatmul.mubr.f32.gmra.mrb[164].mxu0 %v11434_v7  ;;  %v11785_v7 = vld [vmem:[%s25954_s26] sm:$0xff] }
 0xc75   : > { %11565 = vmatprep.mubr.f32.mxu0 %v11437_v32 }
 0xc78   : > { %11566 = vmatmul.mubr.f32.gmra.mrb[166].mxu0 %v11436_v16 }
 0xc79   : > { %11570 = vmatprep.mubr.f32.mxu0 %v11439_v55 }
 0xc7c   : > { %11571 = vmatmul.mubr.f32.gmra.mrb[168].mxu0 %v11438_v9 }
 0xc7d   : > { %11575 = vmatprep.mubr.f32.mxu0 %v11441_v44 }
 0xc80   : > { %11576 = vmatmul.mubr.f32.gmra.mrb[170].mxu0 %v11440_v38 }
 0xc81   : > { %11580 = vmatprep.mubr.f32.mxu0 %v11443_v22 }
 0xc84   : > { %11581 = vmatmul.mubr.f32.gmra.mrb[172].mxu0 %v11442_v3 }
 0xc85   : > { %11585 = vmatprep.mubr.f32.mxu0 %v11445_v10 }
 0xc88   : > { %11586 = vmatmul.mubr.f32.gmra.mrb[174].mxu0 %v11444_v33 }
 0xd1f   : > { %v18193_v31 = vpop.f32.mrb[144].mxu0 }
 0xd20   : > { %v18194_v47 = vpop.f32.mrb[145].mxu0 }
 0xd21   : > { %v18195_v4 = vadd.f32 %v18194_v47, %v18193_v31 }
 0xd23   : > { %v18196_v62 = vpop.f32.mrb[146].mxu0  ;;  %20417 = vmatprep.mubr.msk.f32.mxu1 %vm9066_vm4, %v18195_v4 }
 0xd24   : > { %v18197_v58 = vpop.f32.mrb[147].mxu0 }
 0xd25   : > { %v18198_v23 = vadd.f32 %v18197_v58, %v18196_v62 }
 0xd27   : > { %v18199_v56 = vpop.f32.mrb[148].mxu0  ;;  %20418 = vmatmul.mubr.msk.f32.vlgmr.msra.gmra.mrb[192].mxu1 %vm9066_vm4, %v18198_v23 }
 0xd28   : > { %v18200_v34 = vpop.f32.mrb[149].mxu0 }
 0xd29   : > { %v18201_v25 = vadd.f32 %v18200_v34, %v18199_v56 }
 0xd2b   : > { %v18202_v6 = vpop.f32.mrb[150].mxu0  ;;  %20420 = vmatprep.mubr.msk.f32.mxu1 %vm9066_vm4, %v18201_v25 }
 0xd2c   : > { %v18203_v0 = vpop.f32.mrb[151].mxu0 }
 0xd2d   : > { %v18204_v18 = vadd.f32 %v18203_v0, %v18202_v6 }
 0xd2f   : > { %v18205_v45 = vpop.f32.mrb[152].mxu0  ;;  %20421 = vmatmul.mubr.msk.f32.gmra.mrb[194].mxu1 %vm9066_vm4, %v18204_v18 }
 0xd30   : > { %v18206_v11 = vpop.f32.mrb[153].mxu0 }
 0xd31   : > { %v18207_v48 = vadd.f32 %v18206_v11, %v18205_v45  ;;  %v11786_v11 = vld [vmem:[%s25954_s26 + $0x8] sm:$0xff] }
 0xd33   : > { %v18208_v43 = vpop.f32.mrb[154].mxu0  ;;  %20423 = vmatprep.mubr.msk.f32.mxu1 %vm9066_vm4, %v18207_v48  ;;  %v11787_v48 = vld [vmem:[%s25954_s26 + $0x10] sm:$0xff] }
 0xd34   : > { %v18209_v40 = vpop.f32.mrb[155].mxu0 }
 0xd35   : > { %v18210_v20 = vadd.f32 %v18209_v40, %v18208_v43  ;;  %v11788_v43 = vld [vmem:[%s25954_s26 + $0x18] sm:$0xff]  ;;  %v11902_v40 = vld [vmem:[%s25955_s28] sm:$0xff] }
 0xd37   : > { %v18211_v51 = vpop.f32.mrb[156].mxu0  ;;  %20424 = vmatmul.mubr.msk.f32.gmra.mrb[196].mxu1 %vm9066_vm4, %v18210_v20  ;;  %v12524_v20 = vld [vmem:[%s25956_s1] sm:$0xff] }
 0xd38   : > { %v18212_v63 = vpop.f32.mrb[157].mxu0  ;;  %20583 = vmatprep.mubr.msk.f32.mxu0 %vm2341_vm1, %v12524_v20 }
 0xd39   : > { %v18213_v52 = vadd.f32 %v18212_v63, %v18211_v51  ;;  %v11801_v51 = vpop.permute.xlu1 %11800  ;;  %v11796_v63 = vpop.permute.xlu0 %11795 }
 0xd3b   : > { %v18214_v57 = vpop.f32.mrb[158].mxu0  ;;  %20426 = vmatprep.mubr.msk.f32.mxu1 %vm9066_vm4, %v18213_v52 }
 0xd3c   : > { %v18215_v17 = vpop.f32.mrb[159].mxu0 }
 0xd3d   : > { %v18216_v24 = vadd.f32 %v18215_v17, %v18214_v57 }
 0xd3f   : > { %v18217_v15 = vpop.f32.mrb[160].mxu0  ;;  %20427 = vmatmul.mubr.msk.f32.gmra.mrb[198].mxu1 %vm9066_vm4, %v18216_v24 }
 0xd40   : > { %v18218_v27 = vpop.f32.mrb[161].mxu0 }
 0xd41   : > { %v18219_v59 = vadd.f32 %v18218_v27, %v18217_v15  ;;  %v11811_v27 = vpop.permute.xlu1 %11810 }
 0xd43   : > { %v18220_v30 = vpop.f32.mrb[162].mxu0  ;;  %20429 = vmatprep.mubr.msk.f32.mxu1 %vm9066_vm4, %v18219_v59 }
 0xd44   : > { %v18221_v29 = vpop.f32.mrb[163].mxu0 }
 0xd45   : > { %v18222_v53 = vadd.f32 %v18221_v29, %v18220_v30  ;;  %v11806_v29 = vpop.permute.xlu0 %11805 }
 0xd47   : > { %v18223_v26 = vpop.f32.mrb[164].mxu0  ;;  %20430 = vmatmul.mubr.msk.f32.gmra.mrb[200].mxu1 %vm9066_vm4, %v18222_v53 }
 0xd48   : > { %v18224_v21 = vpop.f32.mrb[165].mxu0 }
 0xd49   : > { %v18225_v28 = vadd.f32 %v18224_v21, %v18223_v26 }
 0xd4b   : > { %v18226_v54 = vpop.f32.mrb[166].mxu0  ;;  %20432 = vmatprep.mubr.msk.f32.mxu1 %vm9066_vm4, %v18225_v28 }
 0xd4c   : > { %v18227_v36 = vpop.f32.mrb[167].mxu0 }
 0xd4d   : > { %v18228_v1 = vadd.f32 %v18227_v36, %v18226_v54 }
 0xd4f   : > { %v18229_v5 = vpop.f32.mrb[168].mxu0  ;;  %20433 = vmatmul.mubr.msk.f32.gmra.mrb[202].mxu1 %vm9066_vm4, %v18228_v1 }
 0xd50   : > { %v18230_v13 = vpop.f32.mrb[169].mxu0 }
 0xd51   : > { %v18231_v19 = vadd.f32 %v18230_v13, %v18229_v5  ;;  %v11903_v5 = vld [vmem:[%s25955_s28 + $0x8] sm:$0xff] }
 0xd52   : > { %v12525_v13 = vld [vmem:[%s25956_s1 + $0x8] sm:$0xff]  ;;  %s25922_s1 = smov 125  }
 0xd53   : > { %v18232_v35 = vpop.f32.mrb[170].mxu0  ;;  %20435 = vmatprep.mubr.msk.f32.mxu1 %vm9066_vm4, %v18231_v19  ;;  %v11904_v19 = vld [vmem:[%s25955_s28 + $0x10] sm:$0xff] }
 0xd54   : > { %v18233_v39 = vpop.f32.mrb[171].mxu0 }
 0xd55   : > { %v18234_v42 = vadd.f32 %v18233_v39, %v18232_v35  ;;  %v11905_v35 = vld [vmem:[%s25955_s28 + $0x18] sm:$0xff]  ;;  %v11906_v39 = vld [vmem:[%s25955_s28 + $0x20] sm:$0xff] }
 0xd57   : > { %v18235_v41 = vpop.f32.mrb[172].mxu0  ;;  %20436 = vmatmul.mubr.msk.f32.gmra.mrb[204].mxu1 %vm9066_vm4, %v18234_v42  ;;  %v11907_v42 = vld [vmem:[%s25955_s28 + $0x28] sm:$0xff] }
 0xd58   : > { %v18236_v46 = vpop.f32.mrb[173].mxu0 }
 0xd59   : > { %v18237_v50 = vadd.f32 %v18236_v46, %v18235_v41  ;;  %v11908_v41 = vld [vmem:[%s25955_s28 + $0x30] sm:$0xff]  ;;  %v11909_v46 = vld [vmem:[%s25955_s28 + $0x38] sm:$0xff] }
 0xd5b   : > { %v18238_v14 = vpop.f32.mrb[174].mxu0  ;;  %20438 = vmatprep.mubr.msk.f32.mxu1 %vm9066_vm4, %v18237_v50  ;;  %v16915_v50 = vld [vmem:[%s25957_s2 + $0x60] sm:$0xff] }
 0xd5c   : > { %v18239_v49 = vpop.f32.mrb[175].mxu0 }
 0xd5d   : > { %v18240_v37 = vadd.f32 %v18239_v49, %v18238_v14  ;;  %v12531_v14 = vpop.permute.xlu0 %12530  ;;  %v12536_v49 = vpop.permute.xlu1 %12535 }
 0xd5f   : > { %20439 = vmatmul.mubr.msk.f32.gmra.mrb[206].mxu1 %vm9066_vm4, %v18240_v37 }
 0xd60   : > { %20473 = vmatprep.mubr.f32.mxu1 %v11785_v7 }
 0xd61   : > { %v11921_v37 = vpop.permute.xlu0 %11920  ;;  %v11926_v7 = vpop.permute.xlu1 %11925 }
 0xdfa   : > { %v20419_v32 = vpop.f32.mrb[192].mxu1 }
 0xdfb   : > { %v11706_v16 = vpop.f32.mrb[193].mxu1 }
 0xdfc   : > { %v21700_v55 = vpack.c.bf16 %v20419_v32, %v11706_v16  ;;  %v11931_v32 = vpop.permute.xlu0 %11930  ;;  %v11936_v16 = vpop.permute.xlu1 %11935 }
 0xdfe   : > { %21701 = vmatprep.subr.bf16.mxu1 %v21700_v55 }
 0xdff   : > { %21703 = vmatpush3.bf16.msra.mxu1 %v21700_v55 }
 0xe02   : > { %v20422_v9 = vpop.f32.mrb[194].mxu1 }
 0xe03   : > { %v11716_v44 = vpop.f32.mrb[195].mxu1 }
 0xe04   : > { %v21704_v38 = vpack.c.bf16 %v20422_v9, %v11716_v44  ;;  %v12097_v44 = vld [vmem:[%s25958_s0] sm:$0xff] }
 0xe06   : > { %21705 = vmatprep.subr.bf16.mxu1 %v21704_v38 }
 0xe07   : > { %21707 = vmatpush3.bf16.msra.mxu1 %v21704_v38 }
 0xe0a   : > { %v20425_v22 = vpop.f32.mrb[196].mxu1 }
 0xe0b   : > { %v11726_v3 = vpop.f32.mrb[197].mxu1 }
 0xe0c   : > { %v21708_v10 = vpack.c.bf16 %v20425_v22, %v11726_v3 }
 0xe0e   : > { %21709 = vmatprep.subr.bf16.mxu1 %v21708_v10 }
 0xe0f   : > { %21711 = vmatpush3.bf16.msra.mxu1 %v21708_v10 }
 0xe12   : > { %v20428_v33 = vpop.f32.mrb[198].mxu1 }
 0xe13   : > { %v11736_v60 = vpop.f32.mrb[199].mxu1 }
 0xe14   : > { %v21712_v31 = vpack.c.bf16 %v20428_v33, %v11736_v60 }
 0xe16   : > { %21713 = vmatprep.subr.bf16.mxu1 %v21712_v31 }
 0xe17   : > { %21715 = vmatpush3.bf16.msra.mxu1 %v21712_v31 }
 0xe1a   : > { %v20431_v47 = vpop.f32.mrb[200].mxu1 }
 0xe1b   : > { %v11746_v4 = vpop.f32.mrb[201].mxu1 }
 0xe1c   : > { %v21716_v62 = vpack.c.bf16 %v20431_v47, %v11746_v4 }
 0xe1e   : > { %21717 = vmatprep.subr.bf16.mxu1 %v21716_v62 }
 0xe1f   : > { %21719 = vmatpush3.bf16.msra.mxu1 %v21716_v62 }
 0xe22   : > { %v20434_v58 = vpop.f32.mrb[202].mxu1 }
 0xe23   : > { %v11756_v23 = vpop.f32.mrb[203].mxu1 }
 0xe24   : > { %v21720_v56 = vpack.c.bf16 %v20434_v58, %v11756_v23 }
 0xe26   : > { %21721 = vmatprep.subr.bf16.mxu1 %v21720_v56 }
 0xe27   : > { %21723 = vmatpush3.bf16.msra.mxu1 %v21720_v56 }
 0xe2a   : > { %v20437_v34 = vpop.f32.mrb[204].mxu1 }
 0xe2b   : > { %v11766_v25 = vpop.f32.mrb[205].mxu1 }
 0xe2c   : > { %v21724_v6 = vpack.c.bf16 %v20437_v34, %v11766_v25  ;;  %v11946_v34 = vpop.permute.xlu1 %11945 }
 0xe2e   : > { %21725 = vmatprep.subr.bf16.mxu1 %v21724_v6 }
 0xe2f   : > { %21727 = vmatpush3.bf16.msra.mxu1 %v21724_v6 }
 0xe32   : > { %v20440_v0 = vpop.f32.mrb[206].mxu1 }
 0xe33   : > { %v11776_v18 = vpop.f32.mrb[207].mxu1 }
 0xe34   : > { %v21728_v45 = vpack.c.bf16 %v20440_v0, %v11776_v18 }
 0xe36   : > { %21729 = vmatprep.subr.bf16.mxu1 %v21728_v45 }
 0xe37   : > { %21731 = vmatpush3.bf16.msra.mxu1 %v21728_v45  ;;  %v11941_v45 = vpop.permute.xlu0 %11940 }
 0xe3a   : > { %20474 = vmatmul.mubr.f32.vlgmr.msra.gmra.mrb[208].mxu1 %v11786_v11 }
 0xe3b   : > { %20476 = vmatprep.mubr.f32.mxu1 %v11787_v48 }
 0xe3e   : > { %20477 = vmatmul.mubr.f32.gmra.mrb[210].mxu1 %v11788_v43 }
 0xe3f   : > { %20487 = vmatprep.mubr.msk.f32.mxu1 %vm2341_vm1, %v11902_v40 }
 0xf0d   : > { %v20475_v52 = vpop.f32.mrb[208].mxu1 }
 0xf0e   : > { %v11885_v57 = vadd.f32 %v20475_v52, %v11801_v51  ;;  %v11879_v17 = vpop.f32.mrb[209].mxu1  ;;  %v16916_v51 = vld [vmem:[%s25957_s2 + $0x68] sm:$0xff] }
 0xf0f   : > { %v11880_v24 = vadd.f32 %v11879_v17, %v11796_v63 }
 0xf10   : > { %v11899_v15 = vmax.f32 %v11885_v57, 0.0 }
 0xf11   : > { %v11898_v59 = vmax.f32 %v11880_v24, 0.0  ;;  %v20478_v30 = vpop.f32.mrb[210].mxu1  ;;  %v11956_v24 = vpop.permute.xlu1 %11955 }
 0xf12   : > { %v11895_v53 = vadd.f32 %v20478_v30, %v11811_v27  ;;  %v11889_v26 = vpop.f32.mrb[211].mxu1  ;;  %v11951_v30 = vpop.permute.xlu0 %11950 }
 0xf13   : > { %v21732_v21 = vpack.c.bf16 %v11899_v15, %v11898_v59  ;;  %v11890_v28 = vadd.f32 %v11889_v26, %v11806_v29  ;;  %v16917_v59 = vld [vmem:[%s25957_s2 + $0x70] sm:$0xff]  ;;  %v16918_v26 = vld [vmem:[%s25957_s2 + $0x78] sm:$0xff] }
 0xf14   : > { %v11901_v54 = vmax.f32 %v11895_v53, 0.0 }
 0xf15   : > { %v11900_v36 = vmax.f32 %v11890_v28, 0.0  ;;  %21733 = vmatprep.subr.bf16.mxu1 %v21732_v21  ;;  %21805 = vmatprep.subr.bf16.mxu0 %v21732_v21 }
 0xf16   : > { %21735 = vmatpush3.bf16.msra.mxu1 %v21732_v21  ;;  %21807 = vmatpush3.bf16.msra.mxu0 %v21732_v21 }
 0xf17   : > { %v21736_v1 = vpack.c.bf16 %v11901_v54, %v11900_v36  ;;  %v12621_v36 = vld [vmem:[%s25957_s2] sm:$0xff] }
 0xf19   : > { %21737 = vmatprep.subr.bf16.mxu1 %v21736_v1  ;;  %21809 = vmatprep.subr.bf16.mxu0 %v21736_v1 }
 0xf1a   : > { %21739 = vmatpush3.bf16.msra.mxu1 %v21736_v1  ;;  %21811 = vmatpush3.bf16.msra.mxu0 %v21736_v1 }
 0xf1d   : > { %20488 = vmatmul.mubr.msk.f32.vlgmr.msra.gmra.mrb[212].mxu1 %vm2341_vm1, %v11903_v5  ;;  %20584 = vmatmul.mubr.msk.f32.vlgmr.msra.gmra.mrb[176].mxu0 %vm2341_vm1, %v12525_v13  ;;  %v12622_v13 = vld [vmem:[%s25957_s2 + $0x8] sm:$0xff] }
 0xf1e   : > { %20490 = vmatprep.mubr.msk.f32.mxu1 %vm2341_vm1, %v11904_v19  ;;  %20590 = vmatprep.mubr.msk.f32.mxu0 %vm5259_vm3, %v16915_v50  ;;  %v16901_v50 = vld [vmem:[%s25958_s0 + $0x10] sm:$0xff] }
 0xf21   : > { %20491 = vmatmul.mubr.msk.f32.gmra.mrb[214].mxu1 %vm2341_vm1, %v11905_v35 }
 0xf22   : > { %20493 = vmatprep.mubr.msk.f32.mxu1 %vm2341_vm1, %v11906_v39  ;;  %v12623_v39 = vld [vmem:[%s25957_s2 + $0x10] sm:$0xff] }
 0xf25   : > { %20494 = vmatmul.mubr.msk.f32.gmra.mrb[216].mxu1 %vm2341_vm1, %v11907_v42  ;;  %v12624_v42 = vld [vmem:[%s25957_s2 + $0x18] sm:$0xff] }
 0xf26   : > { %20496 = vmatprep.mubr.msk.f32.mxu1 %vm2341_vm1, %v11908_v41  ;;  %v16927_v41 = vld [vmem:[%s25957_s2 + $0xc0] sm:$0xff] }
 0xf29   : > { %20497 = vmatmul.mubr.msk.f32.gmra.mrb[218].mxu1 %vm2341_vm1, %v11909_v46  ;;  %v12098_v46 = vld [vmem:[%s25958_s0 + $0x8] sm:$0x3] }
 0xf2a   : > { %20515 = vmatprep.mubr.msk.f32.mxu1 %vm3995_vm2, %v12097_v44 }
 0xff0   : > { %v20489_v55 = vpop.f32.mrb[212].mxu1  ;;  %v20585_v9 = vpop.f32.mrb[176].mxu0 }
 0xff1   : > { %v12054_v38 = vadd.f32 %v20489_v55, %v11926_v7  ;;  %v12616_v22 = vadd.f32 %v20585_v9, %v12536_v49  ;;  %v12048_v3 = vpop.f32.mrb[213].mxu1  ;;  %v12610_v10 = vpop.f32.mrb[177].mxu0  ;;  %v16929_v49 = vld [vmem:[%s25957_s2 + $0xd0] sm:$0xff]  ;;  %v16939_v7 = vld [vmem:[%s25957_s2 + $0x80] sm:$0xff]  ;;  %v16942_v9 = vld [vmem:[%s25957_s2 + $0x98] sm:$0xff] }
 0xff2   : > { %v12049_v33 = vadd.f32 %v12048_v3, %v11921_v37  ;;  %v12611_v60 = vadd.f32 %v12610_v10, %v12531_v14  ;;  %v16928_v14 = vld [vmem:[%s25957_s2 + $0xc8] sm:$0xff]  ;;  %v16930_v37 = vld [vmem:[%s25957_s2 + $0xd8] sm:$0xff]  ;;  %v16941_v55 = vld [vmem:[%s25957_s2 + $0x90] sm:$0xff] }
 0xff3   : > { %v12088_v31 = vmax.f32 %v12054_v38, 0.0  ;;  %v12620_v47 = vmax.f32 %v12616_v22, 0.0  ;;  %v16935_v22 = vld [vmem:[%s25957_s2 + $0x20] sm:$0xff]  ;;  %v16936_v3 = vld [vmem:[%s25957_s2 + $0x28] sm:$0xff] }
 0xff4   : > { %v12087_v4 = vmax.f32 %v12049_v33, 0.0  ;;  %v12619_v62 = vmax.f32 %v12611_v60, 0.0  ;;  %v20492_v58 = vpop.f32.mrb[214].mxu1  ;;  %v16937_v60 = vld [vmem:[%s25957_s2 + $0x30] sm:$0xff] }
 0xff5   : > { %v12064_v23 = vadd.f32 %v20492_v58, %v11936_v16  ;;  %v12058_v56 = vpop.f32.mrb[215].mxu1  ;;  %v16952_v58 = vld [vmem:[%s25957_s2 + $0xe8] sm:$0xff] }
 0xff6   : > { %v25532_v25 = vpack.c.bf16 %v12620_v47, %v12619_v62  ;;  %v12059_v6 = vadd.f32 %v12058_v56, %v11931_v32  ;;  %v25534_v0 = vpack.i.bf16 %v12088_v31, %v12087_v4  ;;  %v21740_v18 = vpack.c.bf16 %v12088_v31, %v12087_v4  ;;  %v16940_v32 = vld [vmem:[%s25957_s2 + $0x88] sm:$0xff]  ;;  %v16938_v31 = vld [vmem:[%s25957_s2 + $0x38] sm:$0xff]  ;;  %v16951_v62 = vld [vmem:[%s25957_s2 + $0xe0] sm:$0xff] }
 0xff7   : > { %v12090_v11 = vmax.f32 %v12064_v23, 0.0 }
 0xff8   : > { %v12089_v48 = vmax.f32 %v12059_v6, 0.0  ;;  %v20495_v43 = vpop.f32.mrb[216].mxu1  ;;  %21813 = vmatprep.subr.bf16.mxu0 %v25532_v25  ;;  %22765 = vrot.lane.b32.xlu0 %v25534_v0, %s25917_s11  ;;  %v16954_v6 = vld [vmem:[%s25957_s2 + $0xf8] sm:$0xff] }
 0xff9   : > { %v12074_v40 = vadd.f32 %v20495_v43, %v11946_v34  ;;  %21741 = vmatprep.subr.bf16.mxu1 %v21740_v18  ;;  %v12068_v20 = vpop.f32.mrb[217].mxu1  ;;  %21815 = vmatpush3.bf16.msra.mxu0 %v25532_v25  ;;  %v16953_v34 = vld [vmem:[%s25957_s2 + $0xf0] sm:$0xff] }
 0xffa   : > { %v12069_v63 = vadd.f32 %v12068_v20, %v11941_v45  ;;  %21743 = vmatpush3.bf16.msra.mxu1 %v21740_v18  ;;  %21817 = vmatprep.subr.bf16.mxu0 %v25532_v25  ;;  %v25542_v52 = vpack.i.bf16 %v12090_v11, %v12089_v48  ;;  %v21744_v57 = vpack.c.bf16 %v12090_v11, %v12089_v48  ;;  %v16974_v45 = vld [vmem:[%s25957_s2 + $0xa0] sm:$0xff]  ;;  %v16975_v11 = vld [vmem:[%s25957_s2 + $0xa8] sm:$0xff]  ;;  %v16977_v20 = vld [vmem:[%s25957_s2 + $0xb8] sm:$0xff] }
 0xffb   : > { %v12092_v17 = vmax.f32 %v12074_v40, 0.0  ;;  %v16976_v40 = vld [vmem:[%s25957_s2 + $0xb0] sm:$0xff] }
 0xffc   : > { %v12091_v15 = vmax.f32 %v12069_v63, 0.0  ;;  %v20498_v27 = vpop.f32.mrb[218].mxu1  ;;  %20591 = vmatmul.mubr.msk.f32.vlgmr.msra.gmra.mrb[178].mxu0 %vm5259_vm3, %v16916_v51  ;;  %22770 = vrot.lane.b32.xlu1 %v25542_v52, %s25917_s11 }
 0xffd   : > { %v12084_v29 = vadd.f32 %v20498_v27, %v11956_v24  ;;  %21745 = vmatprep.subr.bf16.mxu1 %v21744_v57  ;;  %v12078_v53 = vpop.f32.mrb[219].mxu1  ;;  %21819 = vmatpush3.bf16.msra.mxu0 %v25532_v25  ;;  %v16973_v27 = vld [vmem:[%s25957_s2 + $0x58] sm:$0xff] }
 0xffe   : > { %v12079_v21 = vadd.f32 %v12078_v53, %v11951_v30  ;;  %21747 = vmatpush3.bf16.msra.mxu1 %v21744_v57  ;;  %21821 = vmatprep.subr.bf16.mxu0 %v25532_v25  ;;  %v22774_v28 = vpack.i.bf16 %v12092_v17, %v12091_v15  ;;  %v21748_v54 = vpack.c.bf16 %v12092_v17, %v12091_v15  ;;  %v16971_v57 = vld [vmem:[%s25957_s2 + $0x48] sm:$0xff]  ;;  %v16972_v15 = vld [vmem:[%s25957_s2 + $0x50] sm:$0xff] }
 0xfff   : > { %v12094_v1 = vmax.f32 %v12084_v29, 0.0  ;;  %20593 = vmatprep.mubr.msk.f32.mxu0 %vm5259_vm3, %v16917_v59  ;;  %v16986_v29 = vld [vmem:[%s25957_s2 + $0x100] sm:$0xff]  ;;  %v16987_v53 = vld [vmem:[%s25957_s2 + $0x108] sm:$0xff] }
0x1000   : > { %v12093_v5 = vmax.f32 %v12079_v21, 0.0  ;;  %20594 = vmatmul.mubr.msk.f32.gmra.mrb[180].mxu0 %vm5259_vm3, %v16918_v26  ;;  %22775 = vrot.lane.b32.xlu0 %v22774_v28, %s25917_s11  ;;  %v16988_v21 = vld [vmem:[%s25957_s2 + $0x110] sm:$0xff] }
0x1001   : > { %21749 = vmatprep.subr.bf16.mxu1 %v21748_v54  ;;  %20600 = vmatprep.mubr.msk.f32.mxu0 %vm5259_vm3, %v12621_v36 }
0x1002   : > { %21751 = vmatpush3.bf16.msra.mxu1 %v21748_v54  ;;  %v22779_v19 = vpack.i.bf16 %v12094_v1, %v12093_v5  ;;  %v21752_v35 = vpack.c.bf16 %v12094_v1, %v12093_v5 }
0x1004   : > { %20601 = vmatmul.mubr.msk.f32.vlgmr.msra.gmra.mrb[178].mxu0 %vm5259_vm3, %v12622_v13  ;;  %22780 = vrot.lane.b32.xlu1 %v22779_v19, %s25917_s11  ;;  %s25959_s11 = sld [smem:[#allocation15_spill]] }
0x1005   : > { %21823 = vmatpush3.bf16.msra.mxu0 %v25532_v25  ;;  %22785 = vrot.lane.b32.xlu0 %v25534_v0, %s25920_s23 }
0x1006   : > { %21753 = vmatprep.subr.bf16.mxu1 %v21752_v35  ;;  %21825 = vmatprep.subr.bf16.mxu0 %v25532_v25 }
0x1007   : > { %21755 = vmatpush3.bf16.msra.mxu1 %v21752_v35  ;;  %20603 = vmatprep.mubr.msk.f32.mxu0 %vm5259_vm3, %v12623_v39 }
0x1008   : > { %20604 = vmatmul.mubr.msk.f32.gmra.mrb[180].mxu0 %vm5259_vm3, %v12624_v42  ;;  %22790 = vrot.lane.b32.xlu1 %v25542_v52, %s25920_s23 }
0x1009   : > { %22795 = vrot.lane.b32.xlu0 %v22774_v28, %s25920_s23  ;;  %20610 = vmatprep.mubr.msk.f32.mxu0 %vm5259_vm3, %v16927_v41 }
0x100a   : > { %20516 = vmatmul.mubr.msk.f32.vlgmr.msra.gmra.mrb[220].mxu1 %vm3995_vm2, %v12098_v46  ;;  %v13861_v16 = vld [vmem:[%s25959_s11] sm:$0xff]  ;;  %v13862_v44 = vld [vmem:[%s25959_s11 + $0x8] sm:$0xff]  ;;  %v13863_v38 = vld [vmem:[%s25959_s11 + $0x10] sm:$0xff] }
0x100b   : > { %20534 = vmatprep.mubr.msk.f32.mxu1 %vm3995_vm2, %v16901_v50  ;;  %v13864_v10 = vld [vmem:[%s25959_s11 + $0x18] sm:$0xff] }
0x100c   : > { %20611 = vmatmul.mubr.msk.f32.vlgmr.msra.gmra.mrb[178].mxu0 %vm5259_vm3, %v16928_v14  ;;  %22800 = vrot.lane.b32.xlu1 %v22779_v19, %s25920_s23  ;;  %s25960_s23 = sld [smem:[#allocation18_spill]] }
0x100d   : > { %21827 = vmatpush3.bf16.msra.mxu0 %v25532_v25  ;;  %22805 = vrot.lane.b32.xlu0 %v25534_v0, %s25922_s1 }
0x100e   : > { %21829 = vmatprep.subr.bf16.mxu0 %v25532_v25  ;;  %20613 = vmatprep.mubr.msk.f32.mxu0 %vm5259_vm3, %v16929_v49 }
0x1010   : > { %20614 = vmatmul.mubr.msk.f32.gmra.mrb[180].mxu0 %vm5259_vm3, %v16930_v37  ;;  %22810 = vrot.lane.b32.xlu1 %v25542_v52, %s25922_s1  ;;  %v16970_v52 = vld [vmem:[%s25957_s2 + $0x40] sm:$0xff] }
0x1011   : > { %22815 = vrot.lane.b32.xlu0 %v22774_v28, %s25922_s1  ;;  %20620 = vmatprep.mubr.msk.f32.mxu0 %vm5259_vm3, %v16939_v7 }
0x1012   : > { %v14311_v33 = vld [vmem:[%s25960_s23] sm:$0xff]  ;;  %v14312_v47 = vld [vmem:[%s25960_s23 + $0x8] sm:$0xff]  ;;  %v14313_v4 = vld [vmem:[%s25960_s23 + $0x10] sm:$0xff] }
0x1013   : > { %v14314_v23 = vld [vmem:[%s25960_s23 + $0x18] sm:$0xff]  ;;  %v14315_v56 = vld [vmem:[%s25960_s23 + $0x20] sm:$0xff]  ;;  %v14316_v0 = vld [vmem:[%s25960_s23 + $0x28] sm:$0xff] }
0x1014   : > { %20621 = vmatmul.mubr.msk.f32.vlgmr.msra.gmra.mrb[182].mxu0 %vm5259_vm3, %v16940_v32  ;;  %22820 = vrot.lane.b32.xlu1 %v22779_v19, %s25922_s1  ;;  %v14317_v18 = vld [vmem:[%s25960_s23 + $0x30] sm:$0xff]  ;;  %v14318_v48 = vld [vmem:[%s25960_s23 + $0x38] sm:$0xff]  ;;  %v14319_v43 = vld [vmem:[%s25960_s23 + $0x40] sm:$0xff]  ;;  %s25961_s1 = sld [smem:[#allocation14_spill]] }
0x1015   : > { %21831 = vmatpush3.bf16.msra.mxu0 %v25532_v25  ;;  %13867 = vperm.xlu0 %22762, %v13861_v16   ;;  %v14320_v51 = vld [vmem:[%s25960_s23 + $0x48] sm:$0xff]  ;;  %v14321_v63 = vld [vmem:[%s25960_s23 + $0x50] sm:$0xff]  ;;  %v14322_v17 = vld [vmem:[%s25960_s23 + $0x58] sm:$0xff] }
0x1016   : > { %21833 = vmatprep.subr.bf16.mxu0 %v25532_v25  ;;  %20623 = vmatprep.mubr.msk.f32.mxu0 %vm5259_vm3, %v16941_v55  ;;  %v14323_v24 = vld [vmem:[%s25960_s23 + $0x60] sm:$0xff]  ;;  %v14324_v59 = vld [vmem:[%s25960_s23 + $0x68] sm:$0xff]  ;;  %v14325_v30 = vld [vmem:[%s25960_s23 + $0x70] sm:$0xff] }
0x1017   : > { %v14326_v26 = vld [vmem:[%s25960_s23 + $0x78] sm:$0xff] }
0x1018   : > { %20624 = vmatmul.mubr.msk.f32.gmra.mrb[184].mxu0 %vm5259_vm3, %v16942_v9  ;;  %13872 = vperm.xlu1 %22763, %v13862_v44  }
0x1019   : > { %13877 = vperm.xlu0 %22762, %v13863_v38   ;;  %20630 = vmatprep.mubr.msk.f32.mxu0 %vm5259_vm3, %v16935_v22 }
0x101c   : > { %20631 = vmatmul.mubr.msk.f32.vlgmr.msra.gmra.mrb[182].mxu0 %vm5259_vm3, %v16936_v3  ;;  %13882 = vperm.xlu1 %22763, %v13864_v10   ;;  %v16902_v3 = vld [vmem:[%s25958_s0 + $0x18] sm:$0x3]  ;;  %v16905_v10 = vld [vmem:[%s25958_s0 + $0x20] sm:$0xff] }
0x101d   : > { %21835 = vmatpush3.bf16.msra.mxu0 %v25532_v25  ;;  %14329 = vperm.xlu0 %22762, %v14311_v33  }
0x101e   : > { %21837 = vmatprep.subr.bf16.mxu0 %v25532_v25  ;;  %20633 = vmatprep.mubr.msk.f32.mxu0 %vm5259_vm3, %v16937_v60 }
0x1020   : > { %20634 = vmatmul.mubr.msk.f32.gmra.mrb[184].mxu0 %vm5259_vm3, %v16938_v31  ;;  %14334 = vperm.xlu1 %22763, %v14312_v47  }
0x1021   : > { %14339 = vperm.xlu0 %22762, %v14313_v4   ;;  %20640 = vmatprep.mubr.msk.f32.mxu0 %vm5259_vm3, %v16951_v62 }
0x1024   : > { %20641 = vmatmul.mubr.msk.f32.vlgmr.msra.gmra.mrb[182].mxu0 %vm5259_vm3, %v16952_v58  ;;  %14344 = vperm.xlu1 %22763, %v14314_v23  }
0x1025   : > { %21839 = vmatpush3.bf16.msra.mxu0 %v25532_v25  ;;  %14349 = vperm.xlu0 %22762, %v14315_v56  }
0x1026   : > { %21841 = vmatprep.subr.bf16.mxu0 %v25532_v25  ;;  %20643 = vmatprep.mubr.msk.f32.mxu0 %vm5259_vm3, %v16953_v34 }
0x1028   : > { %20644 = vmatmul.mubr.msk.f32.gmra.mrb[184].mxu0 %vm5259_vm3, %v16954_v6  ;;  %14354 = vperm.xlu1 %22763, %v14316_v0  }
0x1029   : > { %14359 = vperm.xlu0 %22762, %v14317_v18   ;;  %20666 = vmatprep.mubr.msk.f32.mxu0 %vm5259_vm3, %v16974_v45 }
0x102c   : > { %20667 = vmatmul.mubr.msk.f32.vlgmr.msra.gmra.mrb[186].mxu0 %vm5259_vm3, %v16975_v11  ;;  %14364 = vperm.xlu1 %22763, %v14318_v48  }
0x102d   : > { %21843 = vmatpush3.bf16.msra.mxu0 %v25532_v25  ;;  %14369 = vperm.xlu0 %22762, %v14319_v43   ;;  %v16906_v43 = vld [vmem:[%s25958_s0 + $0x28] sm:$0x3] }
0x102e   : > { %21845 = vmatprep.subr.bf16.mxu0 %v25532_v25  ;;  %20669 = vmatprep.mubr.msk.f32.mxu0 %vm5259_vm3, %v16976_v40  ;;  %v16909_v40 = vld [vmem:[%s25958_s0 + $0x30] sm:$0xff] }
0x1030   : > { %20670 = vmatmul.mubr.msk.f32.gmra.mrb[188].mxu0 %vm5259_vm3, %v16977_v20  ;;  %14374 = vperm.xlu1 %22763, %v14320_v51  }
0x1031   : > { %14379 = vperm.xlu0 %22762, %v14321_v63   ;;  %20676 = vmatprep.mubr.msk.f32.mxu0 %vm5259_vm3, %v16970_v52 }
0x1034   : > { %20677 = vmatmul.mubr.msk.f32.vlgmr.msra.gmra.mrb[186].mxu0 %vm5259_vm3, %v16971_v57  ;;  %14384 = vperm.xlu1 %22763, %v14322_v17  }
0x1035   : > { %21847 = vmatpush3.bf16.msra.mxu0 %v25532_v25  ;;  %14389 = vperm.xlu0 %22762, %v14323_v24   ;;  %v16989_v25 = vld [vmem:[%s25957_s2 + $0x118] sm:$0xff]  ;;  %s25928_s2 = sshll.u32 %s25970_s10, 4 }
0x1036   : > { %20679 = vmatprep.mubr.msk.f32.mxu0 %vm5259_vm3, %v16972_v15  ;;  %s1022_s3 = scalar_lea.vmem %s23321_s27, %s25928_s2  ;;  %s25965_s2 = smov 127  }
0x1038   : > { %20680 = vmatmul.mubr.msk.f32.gmra.mrb[188].mxu0 %vm5259_vm3, %v16973_v27  ;;  %14394 = vperm.xlu1 %22763, %v14324_v59   ;;  %v16959_v27 = vld [vmem:[%s25961_s1 + $0x4] sm:$0xf]  ;;  %v16910_v59 = vld [vmem:[%s25958_s0 + $0x38] sm:$0x3]  ;;  %s25962_s0 = sld [smem:[#allocation11_spill]] }
0x1039   : > { %14399 = vperm.xlu0 %22762, %v14325_v30   ;;  %20686 = vmatprep.mubr.msk.f32.mxu0 %vm5259_vm3, %v16986_v29  ;;  %v12930_v30 = vld [vmem:[%s25961_s1] sm:$0xf] }
0x103c   : > { %20687 = vmatmul.mubr.msk.f32.vlgmr.msra.gmra.mrb[186].mxu0 %vm5259_vm3, %v16987_v53  ;;  %14404 = vperm.xlu1 %22763, %v14326_v26  }
0x103d   : > { %20689 = vmatprep.mubr.msk.f32.mxu0 %vm5259_vm3, %v16988_v21 }
0x1040   : > { %20690 = vmatmul.mubr.msk.f32.gmra.mrb[188].mxu0 %vm5259_vm3, %v16989_v25 }
0x106a   : > { %v22766_v28 = vpop.permute.xlu0 %22765 }
0x106b   : > { %v22768_v54 = vunpack.i.h.bf16 %v22766_v28  ;;  %v22767_v36 = vunpack.i.l.bf16 %v22766_v28 }
0x106d   : > { %v21756_v1 = vpack.c.bf16 %v22768_v54, %v22767_v36  ;;  %v16994_v54 = vld [vmem:[%s25961_s1 + $0x8] sm:$0xf]  ;;  %s25963_s1 = sld [smem:[#allocation17_spill]] }
0x106e   : > { %v22771_v5 = vpop.permute.xlu1 %22770 }
0x106f   : > { %v22773_v13 = vunpack.i.h.bf16 %v22771_v5  ;;  %v22772_v19 = vunpack.i.l.bf16 %v22771_v5  ;;  %21757 = vmatprep.subr.bf16.mxu1 %v21756_v1 }
0x1070   : > { %21759 = vmatpush3.bf16.msra.mxu1 %v21756_v1 }
0x1071   : > { %v21760_v35 = vpack.c.bf16 %v22773_v13, %v22772_v19 }
0x1072   : > { %v22776_v39 = vpop.permute.xlu0 %22775 }
0x1073   : > { %v22778_v42 = vunpack.i.h.bf16 %v22776_v39  ;;  %v22777_v41 = vunpack.i.l.bf16 %v22776_v39  ;;  %21761 = vmatprep.subr.bf16.mxu1 %v21760_v35  ;;  %v12096_v39 = vld [vmem:[%s25962_s0 + $0x8] sm:$0x3] }
0x1074   : > { %21763 = vmatpush3.bf16.msra.mxu1 %v21760_v35 }
0x1075   : > { %v21764_v46 = vpack.c.bf16 %v22778_v42, %v22777_v41  ;;  %v12095_v42 = vld [vmem:[%s25962_s0] sm:$0xff]  ;;  %s25966_s0 = smov 126  }
0x1076   : > { %v22781_v50 = vpop.permute.xlu1 %22780 }
0x1077   : > { %v22783_v14 = vunpack.i.h.bf16 %v22781_v50  ;;  %v22782_v49 = vunpack.i.l.bf16 %v22781_v50  ;;  %v22786_v37 = vpop.permute.xlu0 %22785  ;;  %21765 = vmatprep.subr.bf16.mxu1 %v21764_v46 }
0x1078   : > { %v22788_v7 = vunpack.i.h.bf16 %v22786_v37  ;;  %v22787_v32 = vunpack.i.l.bf16 %v22786_v37  ;;  %21767 = vmatpush3.bf16.msra.mxu1 %v21764_v46 }
0x1079   : > { %v21768_v16 = vpack.c.bf16 %v22783_v14, %v22782_v49  ;;  %v13909_v14 = vld [vmem:[%s25963_s1] sm:$0xff] }
0x107a   : > { %v22791_v55 = vpop.permute.xlu1 %22790  ;;  %v21772_v9 = vpack.c.bf16 %v22788_v7, %v22787_v32 }
0x107b   : > { %v22793_v44 = vunpack.i.h.bf16 %v22791_v55  ;;  %v22792_v38 = vunpack.i.l.bf16 %v22791_v55  ;;  %21769 = vmatprep.subr.bf16.mxu1 %v21768_v16  ;;  %v22796_v22 = vpop.permute.xlu0 %22795 }
0x107c   : > { %21771 = vmatpush3.bf16.msra.mxu1 %v21768_v16  ;;  %v22798_v60 = vunpack.i.h.bf16 %v22796_v22  ;;  %v22797_v31 = vunpack.i.l.bf16 %v22796_v22 }
0x107d   : > { %21773 = vmatprep.subr.bf16.mxu1 %v21772_v9  ;;  %v21776_v33 = vpack.c.bf16 %v22793_v44, %v22792_v38 }
0x107e   : > { %v22801_v47 = vpop.permute.xlu1 %22800  ;;  %v21780_v4 = vpack.c.bf16 %v22798_v60, %v22797_v31 }
0x107f   : > { %20535 = vmatmul.mubr.msk.f32.vlgmr.msra.gmra.mrb[220].mxu1 %vm3995_vm2, %v16902_v3  ;;  %v22803_v62 = vunpack.i.h.bf16 %v22801_v47  ;;  %v22802_v58 = vunpack.i.l.bf16 %v22801_v47  ;;  %v22806_v23 = vpop.permute.xlu0 %22805 }
0x1080   : > { %21775 = vmatpush3.bf16.msra.mxu1 %v21772_v9  ;;  %20553 = vmatprep.mubr.msk.f32.mxu1 %vm3995_vm2, %v16905_v10  ;;  %v22808_v34 = vunpack.i.h.bf16 %v22806_v23  ;;  %v22807_v6 = vunpack.i.l.bf16 %v22806_v23  ;;  %v13910_v23 = vld [vmem:[%s25963_s1 + $0x8] sm:$0xff] }
0x1081   : > { %21777 = vmatprep.subr.bf16.mxu1 %v21776_v33  ;;  %v21784_v56 = vpack.c.bf16 %v22803_v62, %v22802_v58 }
0x1082   : > { %v22811_v0 = vpop.permute.xlu1 %22810  ;;  %v21788_v18 = vpack.c.bf16 %v22808_v34, %v22807_v6  ;;  %v13912_v34 = vld [vmem:[%s25963_s1 + $0x18] sm:$0xff]  ;;  %v13913_v6 = vld [vmem:[%s25963_s1 + $0x20] sm:$0xff] }
0x1083   : > { %v22813_v45 = vunpack.i.h.bf16 %v22811_v0  ;;  %v22812_v11 = vunpack.i.l.bf16 %v22811_v0  ;;  %v22816_v48 = vpop.permute.xlu0 %22815  ;;  %v13914_v0 = vld [vmem:[%s25963_s1 + $0x28] sm:$0xff] }
0x1084   : > { %21779 = vmatpush3.bf16.msra.mxu1 %v21776_v33  ;;  %v22818_v51 = vunpack.i.h.bf16 %v22816_v48  ;;  %v22817_v63 = vunpack.i.l.bf16 %v22816_v48  ;;  %v13921_v48 = vld [vmem:[%s25963_s1 + $0x60] sm:$0xff] }
0x1085   : > { %21781 = vmatprep.subr.bf16.mxu1 %v21780_v4  ;;  %v21792_v20 = vpack.c.bf16 %v22813_v45, %v22812_v11  ;;  %v13918_v45 = vld [vmem:[%s25963_s1 + $0x48] sm:$0xff]  ;;  %v13919_v11 = vld [vmem:[%s25963_s1 + $0x50] sm:$0xff] }
0x1086   : > { %v22821_v52 = vpop.permute.xlu1 %22820  ;;  %v21796_v57 = vpack.c.bf16 %v22818_v51, %v22817_v63 }
0x1087   : > { %v22823_v17 = vunpack.i.h.bf16 %v22821_v52  ;;  %v22822_v24 = vunpack.i.l.bf16 %v22821_v52 }
0x1088   : > { %21783 = vmatpush3.bf16.msra.mxu1 %v21780_v4 }
0x1089   : > { %21785 = vmatprep.subr.bf16.mxu1 %v21784_v56  ;;  %v21800_v15 = vpack.c.bf16 %v22823_v17, %v22822_v24 }
0x108c   : > { %21787 = vmatpush3.bf16.msra.mxu1 %v21784_v56  ;;  %v13911_v56 = vld [vmem:[%s25963_s1 + $0x10] sm:$0xff] }
0x108d   : > { %21789 = vmatprep.subr.bf16.mxu1 %v21788_v18 }
0x108f   : > { %20554 = vmatmul.mubr.msk.f32.vlgmr.msra.gmra.mrb[220].mxu1 %vm3995_vm2, %v16906_v43  ;;  %v13922_v43 = vld [vmem:[%s25963_s1 + $0x68] sm:$0xff] }
0x1090   : > { %21791 = vmatpush3.bf16.msra.mxu1 %v21788_v18  ;;  %20572 = vmatprep.mubr.msk.f32.mxu1 %vm3995_vm2, %v16909_v40  ;;  %v13916_v18 = vld [vmem:[%s25963_s1 + $0x38] sm:$0xff] }
0x1091   : > { %21793 = vmatprep.subr.bf16.mxu1 %v21792_v20  ;;  %v13924_v40 = vld [vmem:[%s25963_s1 + $0x78] sm:$0xff] }
0x1094   : > { %21795 = vmatpush3.bf16.msra.mxu1 %v21792_v20  ;;  %v13868_v7 = vpop.permute.xlu0 %13867 }
0x1095   : > { %21797 = vmatprep.subr.bf16.mxu1 %v21796_v57 }
0x1097   : > { %v13873_v37 = vpop.permute.xlu1 %13872 }
0x1098   : > { %21799 = vmatpush3.bf16.msra.mxu1 %v21796_v57  ;;  %v13878_v10 = vpop.permute.xlu0 %13877 }
0x1099   : > { %21801 = vmatprep.subr.bf16.mxu1 %v21800_v15 }
0x109b   : > { %v13883_v38 = vpop.permute.xlu1 %13882 }
0x109c   : > { %21803 = vmatpush3.bf16.msra.mxu1 %v21800_v15 }
0x109d   : > { %20646 = vmatprep.subr.msk.mxu1 %vm13256_vm5, %v16959_v27 }
0x109f   : > { %20573 = vmatmul.mubr.msk.f32.vlgmr.msra.gmra.mrb[220].mxu1 %vm3995_vm2, %v16910_v59 }
0x10a0   : > { %20647 = vmatpush3.msk.msra.mxu1 %vm13256_vm5, %v16959_v27 }
0x10a1   : > { %20654 = vmatprep.subr.msk.mxu1 %vm13256_vm5, %v12930_v30 }
0x10df   : > { %v20612_v29 = vpop.f32.mrb[178].mxu0 }
0x10e0   : > { %v12907_v53 = vpop.f32.mrb[179].mxu0 }
0x10e3   : > { %v20615_v26 = vpop.f32.mrb[180].mxu0 }
0x10e4   : > { %v12917_v21 = vpop.f32.mrb[181].mxu0 }
0x10f7   : > { %v20642_v25 = vpop.f32.mrb[182].mxu0 }
0x10f8   : > { %v13218_v28 = vpop.f32.mrb[183].mxu0 }
0x10f9   : > { %20648 = vmatprep.mubr.msk.f32.mxu1 %vm13243_vm6, %v13218_v28  ;;  %v14335_v28 = vpop.permute.xlu1 %14334 }
0x10fa   : > { %20649 = vmatmul.mubr.msk.f32.vlgmr.msra.gmra.mrb[222].mxu1 %vm13243_vm6, %v20642_v25 }
0x10fb   : > { %v20645_v36 = vpop.f32.mrb[184].mxu0  ;;  %20655 = vmatpush3.msk.msra.mxu1 %vm13256_vm5, %v12930_v30 }
0x10fc   : > { %v13228_v1 = vpop.f32.mrb[185].mxu0  ;;  %20692 = vmatprep.subr.msk.mxu1 %vm13256_vm5, %v16994_v54 }
0x10fd   : > { %20651 = vmatprep.mubr.msk.f32.mxu1 %vm13243_vm6, %v13228_v1 }
0x10fe   : > { %20652 = vmatmul.mubr.msk.f32.gmra.mrb[224].mxu1 %vm13243_vm6, %v20645_v36  ;;  %v14345_v36 = vpop.permute.xlu1 %14344 }
0x10ff   : > { %20656 = vmatprep.mubr.msk.f32.mxu1 %vm13243_vm6, %v12907_v53 }
0x1102   : > { %20657 = vmatmul.mubr.msk.f32.vlgmr.msra.gmra.mrb[222].mxu1 %vm13243_vm6, %v20612_v29 }
0x1103   : > { %20659 = vmatprep.mubr.msk.f32.mxu1 %vm13243_vm6, %v12917_v21  ;;  %20693 = vmatpush3.msk.msra.mxu1 %vm13256_vm5, %v16994_v54  ;;  %v14330_v54 = vpop.permute.xlu0 %14329 }
0x1106   : > { %20660 = vmatmul.mubr.msk.f32.gmra.mrb[224].mxu1 %vm13243_vm6, %v20615_v26 }
0x1107   : > { %v14340_v1 = vpop.permute.xlu0 %14339 }
0x110f   : > { %v20688_v5 = vpop.f32.mrb[186].mxu0 }
0x1110   : > { %v13732_v13 = vpop.f32.mrb[187].mxu0 }
0x1111   : > { %20694 = vmatprep.mubr.msk.f32.mxu1 %vm13243_vm6, %v13732_v13  ;;  %v14350_v13 = vpop.permute.xlu0 %14349 }
0x1112   : > { %20695 = vmatmul.mubr.msk.f32.vlgmr.msra.gmra.mrb[222].mxu1 %vm13243_vm6, %v20688_v5  ;;  %v14355_v5 = vpop.permute.xlu1 %14354 }
0x1113   : > { %v20691_v19 = vpop.f32.mrb[188].mxu0 }
0x1114   : > { %v13742_v35 = vpop.f32.mrb[189].mxu0 }
0x1115   : > { %20697 = vmatprep.mubr.msk.f32.mxu1 %vm13243_vm6, %v13742_v35  ;;  %v14441_v35 = vld [vmem:[%s23311_s12] sm:$0xff] }
0x1116   : > { %20698 = vmatmul.mubr.msk.f32.gmra.mrb[224].mxu1 %vm13243_vm6, %v20691_v19  ;;  %20804 = vmatprep.mubr.f32.mxu0 %v14441_v35 }
0x1117   : > { %20708 = vmatprep.mubr.msk.f32.mxu1 %vm2341_vm1, %v13909_v14 }
0x1172   : > { %v20574_v41 = vpop.f32.mrb[220].mxu1 }
0x1173   : > { %v22176_v46 = vadd.f32 %v20574_v41, %v12096_v39  ;;  %v12509_v50 = vpop.f32.mrb[221].mxu1 }
0x1174   : > { %v22177_v49 = vadd.f32 %v12509_v50, %v12095_v42  ;;  %v14365_v50 = vpop.permute.xlu1 %14364 }
0x1175   : > { %12523 = vst.msk [vmem:[%s1022_s3 + $0x8] sm:$0x3] %vm12522_vm7, %v22176_v46 }
0x1176   : > { %12521 = vst.msk [vmem:[%s1022_s3] sm:$0xff] %vm12520_vm8, %v22177_v49  ;;  %s25964_s3 = sld [smem:[#allocation16_spill]] }
0x117c   : > { %v13893_v20 = vld [vmem:[%s25964_s3] sm:$0xff]  ;;  %v13894_v51 = vld [vmem:[%s25964_s3 + $0x8] sm:$0xff]  ;;  %v13895_v63 = vld [vmem:[%s25964_s3 + $0x10] sm:$0xff] }
0x117d   : > { %v13896_v52 = vld [vmem:[%s25964_s3 + $0x18] sm:$0xff]  ;;  %v13897_v57 = vld [vmem:[%s25964_s3 + $0x20] sm:$0xff]  ;;  %v13898_v17 = vld [vmem:[%s25964_s3 + $0x28] sm:$0xff] }
0x117e   : > { %v13899_v24 = vld [vmem:[%s25964_s3 + $0x30] sm:$0xff]  ;;  %v13900_v15 = vld [vmem:[%s25964_s3 + $0x38] sm:$0xff]  ;;  %v13901_v27 = vld [vmem:[%s25964_s3 + $0x40] sm:$0xff] }
0x117f   : > { %v13902_v59 = vld [vmem:[%s25964_s3 + $0x48] sm:$0xff]  ;;  %v13903_v30 = vld [vmem:[%s25964_s3 + $0x50] sm:$0xff]  ;;  %v13904_v29 = vld [vmem:[%s25964_s3 + $0x58] sm:$0xff] }
0x1180   : > { %v13905_v53 = vld [vmem:[%s25964_s3 + $0x60] sm:$0xff]  ;;  %v13906_v26 = vld [vmem:[%s25964_s3 + $0x68] sm:$0xff]  ;;  %v13907_v21 = vld [vmem:[%s25964_s3 + $0x70] sm:$0xff] }
0x1181   : > { %v13908_v25 = vld [vmem:[%s25964_s3 + $0x78] sm:$0xff] }
0x11e5   : > { %v20696_v32 = vpop.f32.mrb[222].mxu1 }
0x11e6   : > { %v13886_v16 = vadd.f32 %v20696_v32, %v13873_v37  ;;  %v13838_v55 = vpop.f32.mrb[223].mxu1  ;;  %v14360_v37 = vpop.permute.xlu0 %14359 }
0x11e7   : > { %v13885_v9 = vadd.f32 %v13868_v7, %v13838_v55 }
0x11e8   : > { %v13890_v44 = vmax.f32 %v13886_v16, 0.0 }
0x11e9   : > { %v13889_v22 = vmax.f32 %v13885_v9, 0.0  ;;  %v20699_v3 = vpop.f32.mrb[224].mxu1 }
0x11ea   : > { %v13888_v33 = vadd.f32 %v20699_v3, %v13883_v38  ;;  %v13848_v60 = vpop.f32.mrb[225].mxu1 }
0x11eb   : > { %v21848_v31 = vpack.c.bf16 %v13890_v44, %v13889_v22  ;;  %v13887_v47 = vadd.f32 %v13878_v10, %v13848_v60 }
0x11ec   : > { %v13892_v4 = vmax.f32 %v13888_v33, 0.0  ;;  %v14375_v33 = vpop.permute.xlu1 %14374 }
0x11ed   : > { %v13891_v62 = vmax.f32 %v13887_v47, 0.0  ;;  %21849 = vmatprep.subr.bf16.mxu1 %v21848_v31 }
0x11ee   : > { %21851 = vmatpush3.bf16.msra.mxu1 %v21848_v31 }
0x11ef   : > { %v21852_v58 = vpack.c.bf16 %v13892_v4, %v13891_v62  ;;  %v14370_v4 = vpop.permute.xlu0 %14369 }
0x11f1   : > { %21853 = vmatprep.subr.bf16.mxu1 %v21852_v58 }
0x11f2   : > { %21855 = vmatpush3.bf16.msra.mxu1 %v21852_v58 }
0x11f3   : > { %21857 = vmatprep.subr.bf16.mxu1 %v24432_v61 }
0x11f5   : > { %20709 = vmatmul.mubr.msk.f32.vlgmr.msra.gmra.mrb[226].mxu1 %vm2341_vm1, %v13910_v23 }
0x11f6   : > { %21859 = vmatpush3.bf16.msra.mxu1 %v24432_v61  ;;  %20711 = vmatprep.mubr.msk.f32.mxu1 %vm2341_vm1, %v13911_v56  ;;  %v13915_v61 = vld [vmem:[%s25963_s1 + $0x30] sm:$0xff] }
0x11f7   : > { %21861 = vmatprep.subr.bf16.mxu1 %v24438_v2 }
0x11f9   : > { %20712 = vmatmul.mubr.msk.f32.gmra.mrb[228].mxu1 %vm2341_vm1, %v13912_v34 }
0x11fa   : > { %21863 = vmatpush3.bf16.msra.mxu1 %v24438_v2  ;;  %20714 = vmatprep.mubr.msk.f32.mxu1 %vm2341_vm1, %v13913_v6  ;;  %v13917_v2 = vld [vmem:[%s25963_s1 + $0x40] sm:$0xff] }
0x11fb   : > { %21865 = vmatprep.subr.bf16.mxu1 %v24444_v8 }
0x11fd   : > { %20715 = vmatmul.mubr.msk.f32.gmra.mrb[230].mxu1 %vm2341_vm1, %v13914_v0 }
0x11fe   : > { %21867 = vmatpush3.bf16.msra.mxu1 %v24444_v8  ;;  %20717 = vmatprep.mubr.msk.f32.mxu1 %vm2341_vm1, %v13915_v61  ;;  %v13920_v8 = vld [vmem:[%s25963_s1 + $0x58] sm:$0xff] }
0x11ff   : > { %21869 = vmatprep.subr.bf16.mxu1 %v24450_v12 }
0x1201   : > { %20718 = vmatmul.mubr.msk.f32.gmra.mrb[232].mxu1 %vm2341_vm1, %v13916_v18 }
0x1202   : > { %21871 = vmatpush3.bf16.msra.mxu1 %v24450_v12  ;;  %20720 = vmatprep.mubr.msk.f32.mxu1 %vm2341_vm1, %v13917_v2  ;;  %v13923_v12 = vld [vmem:[%s25963_s1 + $0x70] sm:$0xff]  ;;  %v14385_v2 = vpop.permute.xlu1 %14384  ;;  %s23149_s1 = smov 124  }
0x1205   : > { %20721 = vmatmul.mubr.msk.f32.gmra.mrb[234].mxu1 %vm2341_vm1, %v13918_v45 }
0x1206   : > { %20723 = vmatprep.mubr.msk.f32.mxu1 %vm2341_vm1, %v13919_v11 }
0x1209   : > { %20724 = vmatmul.mubr.msk.f32.gmra.mrb[236].mxu1 %vm2341_vm1, %v13920_v8  ;;  %v14380_v8 = vpop.permute.xlu0 %14379 }
0x120a   : > { %20726 = vmatprep.mubr.msk.f32.mxu1 %vm2341_vm1, %v13921_v48 }
0x120d   : > { %20727 = vmatmul.mubr.msk.f32.gmra.mrb[238].mxu1 %vm2341_vm1, %v13922_v43 }
0x120e   : > { %20729 = vmatprep.mubr.msk.f32.mxu1 %vm2341_vm1, %v13923_v12 }
0x1211   : > { %20730 = vmatmul.mubr.msk.f32.gmra.mrb[240].mxu1 %vm2341_vm1, %v13924_v40 }
0x1212   : > { %20748 = vmatprep.mubr.msk.f32.mxu1 %vm3995_vm2, %v13893_v20 }
0x1215   : > { %20749 = vmatmul.mubr.msk.f32.vlgmr.msra.gmra.mrb[226].mxu1 %vm3995_vm2, %v13894_v51 }
0x1216   : > { %20751 = vmatprep.mubr.msk.f32.mxu1 %vm3995_vm2, %v13895_v63 }
0x1219   : > { %20752 = vmatmul.mubr.msk.f32.gmra.mrb[228].mxu1 %vm3995_vm2, %v13896_v52 }
0x121a   : > { %20754 = vmatprep.mubr.msk.f32.mxu1 %vm3995_vm2, %v13897_v57 }
0x121d   : > { %20755 = vmatmul.mubr.msk.f32.gmra.mrb[230].mxu1 %vm3995_vm2, %v13898_v17 }
0x121e   : > { %20757 = vmatprep.mubr.msk.f32.mxu1 %vm3995_vm2, %v13899_v24  ;;  %v14395_v24 = vpop.permute.xlu1 %14394 }
0x1221   : > { %20758 = vmatmul.mubr.msk.f32.gmra.mrb[232].mxu1 %vm3995_vm2, %v13900_v15 }
0x1222   : > { %20760 = vmatprep.mubr.msk.f32.mxu1 %vm3995_vm2, %v13901_v27 }
0x1225   : > { %20761 = vmatmul.mubr.msk.f32.gmra.mrb[234].mxu1 %vm3995_vm2, %v13902_v59 }
0x1226   : > { %20763 = vmatprep.mubr.msk.f32.mxu1 %vm3995_vm2, %v13903_v30  ;;  %v14390_v30 = vpop.permute.xlu0 %14389 }
0x1229   : > { %20764 = vmatmul.mubr.msk.f32.gmra.mrb[236].mxu1 %vm3995_vm2, %v13904_v29 }
0x122a   : > { %20766 = vmatprep.mubr.msk.f32.mxu1 %vm3995_vm2, %v13905_v53  ;;  %v14400_v35 = vpop.permute.xlu0 %14399 }
0x122d   : > { %20767 = vmatmul.mubr.msk.f32.gmra.mrb[238].mxu1 %vm3995_vm2, %v13906_v26 }
0x122e   : > { %20769 = vmatprep.mubr.msk.f32.mxu1 %vm3995_vm2, %v13907_v21 }
0x1231   : > { %20770 = vmatmul.mubr.msk.f32.gmra.mrb[240].mxu1 %vm3995_vm2, %v13908_v25 }
0x12e8   : > { %v20750_v19 = vpop.f32.mrb[226].mxu1 }
0x12e9   : > { %v14408_v39 = vadd.f32 %v20750_v19, %v14335_v28  ;;  %v14232_v42 = vpop.f32.mrb[227].mxu1 }
0x12ea   : > { %v14407_v41 = vadd.f32 %v14330_v54, %v14232_v42 }
0x12eb   : > { %v14424_v46 = vmax.f32 %v14408_v39, 0.0 }
0x12ec   : > { %v14423_v14 = vmax.f32 %v14407_v41, 0.0  ;;  %v20753_v49 = vpop.f32.mrb[228].mxu1 }
0x12ed   : > { %v14410_v7 = vadd.f32 %v20753_v49, %v14345_v36  ;;  %v14242_v32 = vpop.f32.mrb[229].mxu1 }
0x12ee   : > { %v14409_v16 = vadd.f32 %v14340_v1, %v14242_v32  ;;  %v25780_v55 = vpack.i.bf16 %v14424_v46, %v14423_v14  ;;  %v21872_v9 = vpack.c.bf16 %v14424_v46, %v14423_v14  ;;  %v14442_v32 = vld [vmem:[%s23311_s12 + $0x8] sm:$0x3] }
0x12ef   : > { %v14426_v44 = vmax.f32 %v14410_v7, 0.0 }
0x12f0   : > { %v14425_v38 = vmax.f32 %v14409_v16, 0.0  ;;  %22825 = vrot.lane.b32.xlu0 %v25780_v55, %s25965_s2  ;;  %v20756_v22 = vpop.f32.mrb[230].mxu1  ;;  %21873 = vmatprep.subr.bf16.mxu0 %v21872_v9  ;;  %v17032_v16 = vld [vmem:[%s23311_s12 + $0x10] sm:$0xff] }
0x12f1   : > { %v14412_v3 = vadd.f32 %v20756_v22, %v14355_v5  ;;  %v14252_v10 = vpop.f32.mrb[231].mxu1  ;;  %21875 = vmatpush3.bf16.msra.mxu0 %v21872_v9  ;;  %v14405_v5 = vpop.permute.xlu1 %14404 }
0x12f2   : > { %v14411_v60 = vadd.f32 %v14350_v13, %v14252_v10  ;;  %v25784_v31 = vpack.i.bf16 %v14426_v44, %v14425_v38  ;;  %v21876_v47 = vpack.c.bf16 %v14426_v44, %v14425_v38 }
0x12f3   : > { %v14428_v62 = vmax.f32 %v14412_v3, 0.0 }
0x12f4   : > { %v14427_v58 = vmax.f32 %v14411_v60, 0.0  ;;  %22830 = vrot.lane.b32.xlu1 %v25784_v31, %s25965_s2  ;;  %v20759_v23 = vpop.f32.mrb[232].mxu1  ;;  %21877 = vmatprep.subr.bf16.mxu0 %v21876_v47 }
0x12f5   : > { %v14414_v56 = vadd.f32 %v20759_v23, %v14365_v50  ;;  %v14262_v34 = vpop.f32.mrb[233].mxu1  ;;  %21879 = vmatpush3.bf16.msra.mxu0 %v21876_v47 }
0x12f6   : > { %v14413_v6 = vadd.f32 %v14360_v37, %v14262_v34  ;;  %v25788_v0 = vpack.i.bf16 %v14428_v62, %v14427_v58  ;;  %v21880_v61 = vpack.c.bf16 %v14428_v62, %v14427_v58 }
0x12f7   : > { %v14430_v18 = vmax.f32 %v14414_v56, 0.0 }
0x12f8   : > { %v14429_v45 = vmax.f32 %v14413_v6, 0.0  ;;  %22835 = vrot.lane.b32.xlu0 %v25788_v0, %s25965_s2  ;;  %v20762_v11 = vpop.f32.mrb[234].mxu1  ;;  %21881 = vmatprep.subr.bf16.mxu0 %v21880_v61 }
0x12f9   : > { %v14416_v48 = vadd.f32 %v20762_v11, %v14375_v33  ;;  %v14272_v43 = vpop.f32.mrb[235].mxu1  ;;  %21883 = vmatpush3.bf16.msra.mxu0 %v21880_v61 }
0x12fa   : > { %v14415_v12 = vadd.f32 %v14370_v4, %v14272_v43  ;;  %v25792_v40 = vpack.i.bf16 %v14430_v18, %v14429_v45  ;;  %v21884_v20 = vpack.c.bf16 %v14430_v18, %v14429_v45 }
0x12fb   : > { %v14432_v51 = vmax.f32 %v14416_v48, 0.0 }
0x12fc   : > { %v14431_v63 = vmax.f32 %v14415_v12, 0.0  ;;  %22840 = vrot.lane.b32.xlu1 %v25792_v40, %s25965_s2  ;;  %v20765_v52 = vpop.f32.mrb[236].mxu1  ;;  %21885 = vmatprep.subr.bf16.mxu0 %v21884_v20 }
0x12fd   : > { %v14418_v57 = vadd.f32 %v20765_v52, %v14385_v2  ;;  %v14282_v17 = vpop.f32.mrb[237].mxu1  ;;  %21887 = vmatpush3.bf16.msra.mxu0 %v21884_v20 }
0x12fe   : > { %v14417_v15 = vadd.f32 %v14380_v8, %v14282_v17  ;;  %v25796_v27 = vpack.i.bf16 %v14432_v51, %v14431_v63  ;;  %v21888_v59 = vpack.c.bf16 %v14432_v51, %v14431_v63 }
0x12ff   : > { %v14434_v29 = vmax.f32 %v14418_v57, 0.0 }
0x1300   : > { %v14433_v53 = vmax.f32 %v14417_v15, 0.0  ;;  %22845 = vrot.lane.b32.xlu0 %v25796_v27, %s25965_s2  ;;  %v20768_v26 = vpop.f32.mrb[238].mxu1  ;;  %21889 = vmatprep.subr.bf16.mxu0 %v21888_v59 }
0x1301   : > { %v14420_v21 = vadd.f32 %v20768_v26, %v14395_v24  ;;  %v14292_v25 = vpop.f32.mrb[239].mxu1  ;;  %21891 = vmatpush3.bf16.msra.mxu0 %v21888_v59 }
0x1302   : > { %v14419_v28 = vadd.f32 %v14390_v30, %v14292_v25  ;;  %v25800_v54 = vpack.i.bf16 %v14434_v29, %v14433_v53  ;;  %v21892_v36 = vpack.c.bf16 %v14434_v29, %v14433_v53  ;;  %v17033_v29 = vld [vmem:[%s23311_s12 + $0x18] sm:$0x3]  ;;  %v17034_v53 = vld [vmem:[%s23311_s12 + $0x20] sm:$0xff] }
0x1303   : > { %v14436_v1 = vmax.f32 %v14420_v21, 0.0 }
0x1304   : > { %v14435_v13 = vmax.f32 %v14419_v28, 0.0  ;;  %22850 = vrot.lane.b32.xlu1 %v25800_v54, %s25965_s2  ;;  %v20771_v19 = vpop.f32.mrb[240].mxu1  ;;  %21893 = vmatprep.subr.bf16.mxu0 %v21892_v36 }
0x1305   : > { %v14422_v39 = vadd.f32 %v20771_v19, %v14405_v5  ;;  %v14302_v42 = vpop.f32.mrb[241].mxu1  ;;  %21895 = vmatpush3.bf16.msra.mxu0 %v21892_v36 }
0x1306   : > { %v14421_v41 = vadd.f32 %v14400_v35, %v14302_v42  ;;  %v25804_v46 = vpack.i.bf16 %v14436_v1, %v14435_v13  ;;  %v21896_v50 = vpack.c.bf16 %v14436_v1, %v14435_v13 }
0x1307   : > { %v14438_v14 = vmax.f32 %v14422_v39, 0.0 }
0x1308   : > { %v14437_v49 = vmax.f32 %v14421_v41, 0.0  ;;  %22855 = vrot.lane.b32.xlu0 %v25804_v46, %s25965_s2  ;;  %21897 = vmatprep.subr.bf16.mxu0 %v21896_v50 }
0x1309   : > { %21899 = vmatpush3.bf16.msra.mxu0 %v21896_v50 }
0x130a   : > { %v25808_v37 = vpack.i.bf16 %v14438_v14, %v14437_v49  ;;  %v21900_v7 = vpack.c.bf16 %v14438_v14, %v14437_v49 }
0x130c   : > { %22865 = vrot.lane.b32.xlu0 %v25780_v55, %s25966_s0  ;;  %22860 = vrot.lane.b32.xlu1 %v25808_v37, %s25965_s2  ;;  %s25967_s2 = smov 125  }
0x130d   : > { %21901 = vmatprep.subr.bf16.mxu0 %v21900_v7 }
0x130e   : > { %21903 = vmatpush3.bf16.msra.mxu0 %v21900_v7 }
0x1310   : > { %22875 = vrot.lane.b32.xlu0 %v25788_v0, %s25966_s0  ;;  %22870 = vrot.lane.b32.xlu1 %v25784_v31, %s25966_s0 }
0x1311   : > { %20805 = vmatmul.mubr.f32.vlgmr.msra.gmra.mrb[190].mxu0 %v14442_v32 }
0x1312   : > { %20839 = vmatprep.mubr.f32.mxu0 %v17032_v16 }
0x1314   : > { %22885 = vrot.lane.b32.xlu0 %v25796_v27, %s25966_s0  ;;  %22880 = vrot.lane.b32.xlu1 %v25792_v40, %s25966_s0 }
0x1318   : > { %22895 = vrot.lane.b32.xlu0 %v25804_v46, %s25966_s0  ;;  %22890 = vrot.lane.b32.xlu1 %v25800_v54, %s25966_s0 }
0x131c   : > { %22905 = vrot.lane.b32.xlu0 %v25780_v55, %s25967_s2  ;;  %22900 = vrot.lane.b32.xlu1 %v25808_v37, %s25966_s0  ;;  %s23150_s0 = smov 123  }
0x1320   : > { %22915 = vrot.lane.b32.xlu0 %v25788_v0, %s25967_s2  ;;  %22910 = vrot.lane.b32.xlu1 %v25784_v31, %s25967_s2 }
0x1324   : > { %22925 = vrot.lane.b32.xlu0 %v25796_v27, %s25967_s2  ;;  %22920 = vrot.lane.b32.xlu1 %v25792_v40, %s25967_s2 }
0x1328   : > { %22935 = vrot.lane.b32.xlu0 %v25804_v46, %s25967_s2  ;;  %22930 = vrot.lane.b32.xlu1 %v25800_v54, %s25967_s2 }
0x132c   : > { %22945 = vrot.lane.b32.xlu0 %v25780_v55, %s23149_s1  ;;  %22940 = vrot.lane.b32.xlu1 %v25808_v37, %s25967_s2  ;;  %s23151_s2 = smov 122  }
0x1330   : > { %22955 = vrot.lane.b32.xlu0 %v25788_v0, %s23149_s1  ;;  %22950 = vrot.lane.b32.xlu1 %v25784_v31, %s23149_s1 }
0x1334   : > { %22965 = vrot.lane.b32.xlu0 %v25796_v27, %s23149_s1  ;;  %22960 = vrot.lane.b32.xlu1 %v25792_v40, %s23149_s1 }
0x1338   : > { %22975 = vrot.lane.b32.xlu0 %v25804_v46, %s23149_s1  ;;  %22970 = vrot.lane.b32.xlu1 %v25800_v54, %s23149_s1 }
0x133c   : > { %22985 = vrot.lane.b32.xlu0 %v25780_v55, %s23150_s0  ;;  %22980 = vrot.lane.b32.xlu1 %v25808_v37, %s23149_s1  ;;  %s23152_s1 = smov 121  }
0x1340   : > { %22995 = vrot.lane.b32.xlu0 %v25788_v0, %s23150_s0  ;;  %22990 = vrot.lane.b32.xlu1 %v25784_v31, %s23150_s0 }
0x1344   : > { %23005 = vrot.lane.b32.xlu0 %v25796_v27, %s23150_s0  ;;  %23000 = vrot.lane.b32.xlu1 %v25792_v40, %s23150_s0 }
0x1348   : > { %23015 = vrot.lane.b32.xlu0 %v25804_v46, %s23150_s0  ;;  %23010 = vrot.lane.b32.xlu1 %v25800_v54, %s23150_s0 }
0x134c   : > { %23025 = vrot.lane.b32.xlu0 %v25780_v55, %s23151_s2  ;;  %23020 = vrot.lane.b32.xlu1 %v25808_v37, %s23150_s0  ;;  %s25968_s0 = sshll.u32 %s25970_s10, 4 }
0x1350   : > { %23035 = vrot.lane.b32.xlu0 %v25788_v0, %s23151_s2  ;;  %23030 = vrot.lane.b32.xlu1 %v25784_v31, %s23151_s2 }
0x1354   : > { %23045 = vrot.lane.b32.xlu0 %v25796_v27, %s23151_s2  ;;  %23040 = vrot.lane.b32.xlu1 %v25792_v40, %s23151_s2 }
0x1358   : > { %23055 = vrot.lane.b32.xlu0 %v25804_v46, %s23151_s2  ;;  %23050 = vrot.lane.b32.xlu1 %v25800_v54, %s23151_s2 }
0x135c   : > { %23065 = vrot.lane.b32.xlu0 %v25780_v55, %s23152_s1  ;;  %23060 = vrot.lane.b32.xlu1 %v25808_v37, %s23151_s2  ;;  %s1027_s2 = scalar_lea.vmem %s23326_s30, %s25968_s0 }
0x1360   : > { %23075 = vrot.lane.b32.xlu0 %v25788_v0, %s23152_s1  ;;  %23070 = vrot.lane.b32.xlu1 %v25784_v31, %s23152_s1 }
0x1362   : > { %v22826_v9 = vpop.permute.xlu0 %22825 }
0x1363   : > { %v22828_v44 = vunpack.i.h.bf16 %v22826_v9  ;;  %v22827_v38 = vunpack.i.l.bf16 %v22826_v9 }
0x1364   : > { %23085 = vrot.lane.b32.xlu0 %v25796_v27, %s23152_s1  ;;  %23080 = vrot.lane.b32.xlu1 %v25792_v40, %s23152_s1 }
0x1365   : > { %v21904_v22 = vpack.c.bf16 %v22828_v44, %v22827_v38 }
0x1366   : > { %v22831_v3 = vpop.permute.xlu1 %22830 }
0x1367   : > { %v22833_v10 = vunpack.i.h.bf16 %v22831_v3  ;;  %v22832_v33 = vunpack.i.l.bf16 %v22831_v3  ;;  %21905 = vmatprep.subr.bf16.mxu0 %v21904_v22 }
0x1368   : > { %23095 = vrot.lane.b32.xlu0 %v25804_v46, %s23152_s1  ;;  %23090 = vrot.lane.b32.xlu1 %v25800_v54, %s23152_s1 }
0x1369   : > { %v21908_v55 = vpack.c.bf16 %v22833_v10, %v22832_v33  ;;  %21907 = vmatpush3.bf16.msra.mxu0 %v21904_v22 }
0x136a   : > { %v22836_v60 = vpop.permute.xlu0 %22835 }
0x136b   : > { %v22838_v31 = vunpack.i.h.bf16 %v22836_v60  ;;  %v22837_v47 = vunpack.i.l.bf16 %v22836_v60  ;;  %21909 = vmatprep.subr.bf16.mxu0 %v21908_v55 }
0x136c   : > { %23100 = vrot.lane.b32.xlu1 %v25808_v37, %s23152_s1 }
0x136d   : > { %v21912_v4 = vpack.c.bf16 %v22838_v31, %v22837_v47  ;;  %21911 = vmatpush3.bf16.msra.mxu0 %v21908_v55  ;;  %v17035_v47 = vld [vmem:[%s23311_s12 + $0x28] sm:$0x3] }
0x136e   : > { %v22841_v62 = vpop.permute.xlu1 %22840 }
0x136f   : > { %v22843_v58 = vunpack.i.h.bf16 %v22841_v62  ;;  %v22842_v23 = vunpack.i.l.bf16 %v22841_v62  ;;  %21913 = vmatprep.subr.bf16.mxu0 %v21912_v4 }
0x1371   : > { %v21916_v56 = vpack.c.bf16 %v22843_v58, %v22842_v23  ;;  %21915 = vmatpush3.bf16.msra.mxu0 %v21912_v4  ;;  %v17036_v4 = vld [vmem:[%s23311_s12 + $0x30] sm:$0xff] }
0x1372   : > { %v22846_v34 = vpop.permute.xlu0 %22845 }
0x1373   : > { %v22848_v6 = vunpack.i.h.bf16 %v22846_v34  ;;  %v22847_v0 = vunpack.i.l.bf16 %v22846_v34  ;;  %21917 = vmatprep.subr.bf16.mxu0 %v21916_v56 }
0x1375   : > { %v21920_v61 = vpack.c.bf16 %v22848_v6, %v22847_v0  ;;  %21919 = vmatpush3.bf16.msra.mxu0 %v21916_v56 }
0x1376   : > { %v22851_v18 = vpop.permute.xlu1 %22850 }
0x1377   : > { %v22853_v2 = vunpack.i.h.bf16 %v22851_v18  ;;  %v22852_v45 = vunpack.i.l.bf16 %v22851_v18  ;;  %21921 = vmatprep.subr.bf16.mxu0 %v21920_v61 }
0x1379   : > { %v21924_v11 = vpack.c.bf16 %v22853_v2, %v22852_v45  ;;  %21923 = vmatpush3.bf16.msra.mxu0 %v21920_v61 }
0x137a   : > { %v22856_v8 = vpop.permute.xlu0 %22855 }
0x137b   : > { %v22858_v48 = vunpack.i.h.bf16 %v22856_v8  ;;  %v22857_v43 = vunpack.i.l.bf16 %v22856_v8  ;;  %21925 = vmatprep.subr.bf16.mxu0 %v21924_v11 }
0x137d   : > { %v21928_v12 = vpack.c.bf16 %v22858_v48, %v22857_v43  ;;  %21927 = vmatpush3.bf16.msra.mxu0 %v21924_v11 }
0x137e   : > { %v22866_v40 = vpop.permute.xlu0 %22865  ;;  %v22861_v20 = vpop.permute.xlu1 %22860 }
0x137f   : > { %v22863_v51 = vunpack.i.h.bf16 %v22861_v20  ;;  %v22862_v63 = vunpack.i.l.bf16 %v22861_v20  ;;  %21929 = vmatprep.subr.bf16.mxu0 %v21928_v12  ;;  %v22868_v52 = vunpack.i.h.bf16 %v22866_v40  ;;  %v22867_v57 = vunpack.i.l.bf16 %v22866_v40 }
0x1381   : > { %v21932_v17 = vpack.c.bf16 %v22863_v51, %v22862_v63  ;;  %21931 = vmatpush3.bf16.msra.mxu0 %v21928_v12  ;;  %v21936_v15 = vpack.c.bf16 %v22868_v52, %v22867_v57 }
0x1382   : > { %v22871_v24 = vpop.permute.xlu1 %22870  ;;  %v22876_v30 = vpop.permute.xlu0 %22875 }
0x1383   : > { %21933 = vmatprep.subr.bf16.mxu0 %v21932_v17  ;;  %v22873_v27 = vunpack.i.h.bf16 %v22871_v24  ;;  %v22872_v59 = vunpack.i.l.bf16 %v22871_v24  ;;  %v22878_v26 = vunpack.i.h.bf16 %v22876_v30  ;;  %v22877_v21 = vunpack.i.l.bf16 %v22876_v30 }
0x1385   : > { %21935 = vmatpush3.bf16.msra.mxu0 %v21932_v17  ;;  %v21940_v25 = vpack.c.bf16 %v22873_v27, %v22872_v59  ;;  %v21944_v54 = vpack.c.bf16 %v22878_v26, %v22877_v21 }
0x1386   : > { %21937 = vmatprep.subr.bf16.mxu0 %v21936_v15  ;;  %v22881_v28 = vpop.permute.xlu1 %22880  ;;  %v22886_v5 = vpop.permute.xlu0 %22885 }
0x1387   : > { %v22883_v36 = vunpack.i.h.bf16 %v22881_v28  ;;  %v22882_v1 = vunpack.i.l.bf16 %v22881_v28  ;;  %v22888_v13 = vunpack.i.h.bf16 %v22886_v5  ;;  %v22887_v19 = vunpack.i.l.bf16 %v22886_v5  ;;  %v17038_v28 = vld [vmem:[%s23311_s12 + $0x40] sm:$0xff] }
0x1388   : > { %20840 = vmatmul.mubr.f32.vlgmr.msra.gmra.mrb[190].mxu0 %v17033_v29 }
0x1389   : > { %21939 = vmatpush3.bf16.msra.mxu0 %v21936_v15  ;;  %20874 = vmatprep.mubr.f32.mxu0 %v17034_v53  ;;  %v21948_v35 = vpack.c.bf16 %v22883_v36, %v22882_v1  ;;  %v21952_v42 = vpack.c.bf16 %v22888_v13, %v22887_v19 }
0x138a   : > { %21941 = vmatprep.subr.bf16.mxu0 %v21940_v25  ;;  %v22891_v39 = vpop.permute.xlu1 %22890  ;;  %v22896_v50 = vpop.permute.xlu0 %22895 }
0x138b   : > { %v22893_v41 = vunpack.i.h.bf16 %v22891_v39  ;;  %v22892_v46 = vunpack.i.l.bf16 %v22891_v39  ;;  %v22898_v14 = vunpack.i.h.bf16 %v22896_v50  ;;  %v22897_v49 = vunpack.i.l.bf16 %v22896_v50 }
0x138d   : > { %21943 = vmatpush3.bf16.msra.mxu0 %v21940_v25  ;;  %v21956_v37 = vpack.c.bf16 %v22893_v41, %v22892_v46  ;;  %v21960_v32 = vpack.c.bf16 %v22898_v14, %v22897_v49  ;;  %v17037_v25 = vld [vmem:[%s23311_s12 + $0x38] sm:$0x3] }
0x138e   : > { %21945 = vmatprep.subr.bf16.mxu0 %v21944_v54  ;;  %v22901_v7 = vpop.permute.xlu1 %22900  ;;  %v22906_v44 = vpop.permute.xlu0 %22905 }
0x138f   : > { %v22903_v16 = vunpack.i.h.bf16 %v22901_v7  ;;  %v22902_v9 = vunpack.i.l.bf16 %v22901_v7  ;;  %v22908_v38 = vunpack.i.h.bf16 %v22906_v44  ;;  %v22907_v22 = vunpack.i.l.bf16 %v22906_v44 }
0x1391   : > { %21947 = vmatpush3.bf16.msra.mxu0 %v21944_v54  ;;  %v21964_v3 = vpack.c.bf16 %v22903_v16, %v22902_v9  ;;  %v21968_v33 = vpack.c.bf16 %v22908_v38, %v22907_v22 }
0x1392   : > { %21949 = vmatprep.subr.bf16.mxu0 %v21948_v35  ;;  %v22911_v10 = vpop.permute.xlu1 %22910  ;;  %v22916_v31 = vpop.permute.xlu0 %22915 }
0x1393   : > { %v22913_v55 = vunpack.i.h.bf16 %v22911_v10  ;;  %v22912_v60 = vunpack.i.l.bf16 %v22911_v10  ;;  %v22918_v62 = vunpack.i.h.bf16 %v22916_v31  ;;  %v22917_v58 = vunpack.i.l.bf16 %v22916_v31 }
0x1395   : > { %21951 = vmatpush3.bf16.msra.mxu0 %v21948_v35  ;;  %v21972_v23 = vpack.c.bf16 %v22913_v55, %v22912_v60  ;;  %v21976_v34 = vpack.c.bf16 %v22918_v62, %v22917_v58 }
0x1396   : > { %21953 = vmatprep.subr.bf16.mxu0 %v21952_v42  ;;  %v22921_v56 = vpop.permute.xlu1 %22920  ;;  %v22926_v61 = vpop.permute.xlu0 %22925 }
0x1397   : > { %v22923_v6 = vunpack.i.h.bf16 %v22921_v56  ;;  %v22922_v0 = vunpack.i.l.bf16 %v22921_v56  ;;  %v22928_v18 = vunpack.i.h.bf16 %v22926_v61  ;;  %v22927_v2 = vunpack.i.l.bf16 %v22926_v61  ;;  %v17040_v56 = vld [vmem:[%s23311_s12 + $0x50] sm:$0xff] }
0x1399   : > { %21955 = vmatpush3.bf16.msra.mxu0 %v21952_v42  ;;  %v21980_v45 = vpack.c.bf16 %v22923_v6, %v22922_v0  ;;  %v21984_v8 = vpack.c.bf16 %v22928_v18, %v22927_v2 }
0x139a   : > { %21957 = vmatprep.subr.bf16.mxu0 %v21956_v37  ;;  %v22931_v11 = vpop.permute.xlu1 %22930  ;;  %v22936_v12 = vpop.permute.xlu0 %22935 }
0x139b   : > { %v22933_v48 = vunpack.i.h.bf16 %v22931_v11  ;;  %v22932_v43 = vunpack.i.l.bf16 %v22931_v11  ;;  %v22938_v40 = vunpack.i.h.bf16 %v22936_v12  ;;  %v22937_v20 = vunpack.i.l.bf16 %v22936_v12 }
0x139d   : > { %21959 = vmatpush3.bf16.msra.mxu0 %v21956_v37  ;;  %v21988_v51 = vpack.c.bf16 %v22933_v48, %v22932_v43  ;;  %v21992_v52 = vpack.c.bf16 %v22938_v40, %v22937_v20 }
0x139e   : > { %21961 = vmatprep.subr.bf16.mxu0 %v21960_v32  ;;  %v22941_v63 = vpop.permute.xlu1 %22940  ;;  %v22946_v24 = vpop.permute.xlu0 %22945 }
0x139f   : > { %v22943_v57 = vunpack.i.h.bf16 %v22941_v63  ;;  %v22942_v17 = vunpack.i.l.bf16 %v22941_v63  ;;  %v22948_v15 = vunpack.i.h.bf16 %v22946_v24  ;;  %v22947_v27 = vunpack.i.l.bf16 %v22946_v24 }
0x13a1   : > { %21963 = vmatpush3.bf16.msra.mxu0 %v21960_v32  ;;  %v21996_v59 = vpack.c.bf16 %v22943_v57, %v22942_v17  ;;  %v22000_v29 = vpack.c.bf16 %v22948_v15, %v22947_v27 }
0x13a2   : > { %21965 = vmatprep.subr.bf16.mxu0 %v21964_v3  ;;  %v22951_v30 = vpop.permute.xlu1 %22950  ;;  %v22956_v21 = vpop.permute.xlu0 %22955 }
0x13a3   : > { %v22953_v53 = vunpack.i.h.bf16 %v22951_v30  ;;  %v22952_v26 = vunpack.i.l.bf16 %v22951_v30  ;;  %v22958_v54 = vunpack.i.h.bf16 %v22956_v21  ;;  %v22957_v36 = vunpack.i.l.bf16 %v22956_v21 }
0x13a5   : > { %21967 = vmatpush3.bf16.msra.mxu0 %v21964_v3  ;;  %v22004_v1 = vpack.c.bf16 %v22953_v53, %v22952_v26  ;;  %v22008_v13 = vpack.c.bf16 %v22958_v54, %v22957_v36 }
0x13a6   : > { %21969 = vmatprep.subr.bf16.mxu0 %v21968_v33  ;;  %v22961_v5 = vpop.permute.xlu1 %22960  ;;  %v22966_v39 = vpop.permute.xlu0 %22965 }
0x13a7   : > { %v22963_v19 = vunpack.i.h.bf16 %v22961_v5  ;;  %v22962_v35 = vunpack.i.l.bf16 %v22961_v5  ;;  %v22968_v42 = vunpack.i.h.bf16 %v22966_v39  ;;  %v22967_v41 = vunpack.i.l.bf16 %v22966_v39  ;;  %v17042_v5 = vld [vmem:[%s23311_s12 + $0x60] sm:$0xff] }
0x13a8   : > { %20875 = vmatmul.mubr.f32.vlgmr.msra.gmra.mrb[190].mxu0 %v17035_v47 }
0x13a9   : > { %21971 = vmatpush3.bf16.msra.mxu0 %v21968_v33  ;;  %20909 = vmatprep.mubr.f32.mxu0 %v17036_v4  ;;  %v22012_v46 = vpack.c.bf16 %v22963_v19, %v22962_v35  ;;  %v22016_v14 = vpack.c.bf16 %v22968_v42, %v22967_v41 }
0x13aa   : > { %21973 = vmatprep.subr.bf16.mxu0 %v21972_v23  ;;  %v22971_v50 = vpop.permute.xlu1 %22970  ;;  %v22976_v7 = vpop.permute.xlu0 %22975 }
0x13ab   : > { %v22973_v49 = vunpack.i.h.bf16 %v22971_v50  ;;  %v22972_v37 = vunpack.i.l.bf16 %v22971_v50  ;;  %v22978_v32 = vunpack.i.h.bf16 %v22976_v7  ;;  %v22977_v16 = vunpack.i.l.bf16 %v22976_v7 }
0x13ad   : > { %21975 = vmatpush3.bf16.msra.mxu0 %v21972_v23  ;;  %v22020_v9 = vpack.c.bf16 %v22973_v49, %v22972_v37  ;;  %v22024_v38 = vpack.c.bf16 %v22978_v32, %v22977_v16  ;;  %v17039_v23 = vld [vmem:[%s23311_s12 + $0x48] sm:$0x3] }
0x13ae   : > { %21977 = vmatprep.subr.bf16.mxu0 %v21976_v34  ;;  %v22981_v44 = vpop.permute.xlu1 %22980  ;;  %v22986_v10 = vpop.permute.xlu0 %22985 }
0x13af   : > { %v22983_v22 = vunpack.i.h.bf16 %v22981_v44  ;;  %v22982_v3 = vunpack.i.l.bf16 %v22981_v44  ;;  %v22988_v33 = vunpack.i.h.bf16 %v22986_v10  ;;  %v22987_v55 = vunpack.i.l.bf16 %v22986_v10 }
0x13b1   : > { %21979 = vmatpush3.bf16.msra.mxu0 %v21976_v34  ;;  %v22028_v60 = vpack.c.bf16 %v22983_v22, %v22982_v3  ;;  %v22032_v47 = vpack.c.bf16 %v22988_v33, %v22987_v55 }
0x13b2   : > { %21981 = vmatprep.subr.bf16.mxu0 %v21980_v45  ;;  %v22991_v31 = vpop.permute.xlu1 %22990  ;;  %v22996_v58 = vpop.permute.xlu0 %22995 }
0x13b3   : > { %v22993_v4 = vunpack.i.h.bf16 %v22991_v31  ;;  %v22992_v62 = vunpack.i.l.bf16 %v22991_v31  ;;  %v22998_v34 = vunpack.i.h.bf16 %v22996_v58  ;;  %v22997_v6 = vunpack.i.l.bf16 %v22996_v58 }
0x13b5   : > { %21983 = vmatpush3.bf16.msra.mxu0 %v21980_v45  ;;  %v22036_v0 = vpack.c.bf16 %v22993_v4, %v22992_v62  ;;  %v22040_v18 = vpack.c.bf16 %v22998_v34, %v22997_v6 }
0x13b6   : > { %21985 = vmatprep.subr.bf16.mxu0 %v21984_v8  ;;  %v23001_v61 = vpop.permute.xlu1 %23000  ;;  %v23006_v11 = vpop.permute.xlu0 %23005 }
0x13b7   : > { %v23003_v2 = vunpack.i.h.bf16 %v23001_v61  ;;  %v23002_v45 = vunpack.i.l.bf16 %v23001_v61  ;;  %v23007_v48 = vunpack.i.l.bf16 %v23006_v11  ;;  %v17044_v61 = vld [vmem:[%s23311_s12 + $0x70] sm:$0xff] }
0x13b9   : > { %21987 = vmatpush3.bf16.msra.mxu0 %v21984_v8  ;;  %v23008_v8 = vunpack.i.h.bf16 %v23006_v11  ;;  %v22044_v43 = vpack.c.bf16 %v23003_v2, %v23002_v45 }
0x13ba   : > { %21989 = vmatprep.subr.bf16.mxu0 %v21988_v51  ;;  %v23011_v12 = vpop.permute.xlu1 %23010  ;;  %v23016_v63 = vpop.permute.xlu0 %23015 }
0x13bb   : > { %v22048_v40 = vpack.c.bf16 %v23008_v8, %v23007_v48  ;;  %v23013_v20 = vunpack.i.h.bf16 %v23011_v12  ;;  %v23017_v57 = vunpack.i.l.bf16 %v23016_v63 }
0x13bd   : > { %21991 = vmatpush3.bf16.msra.mxu0 %v21988_v51  ;;  %v23012_v51 = vunpack.i.l.bf16 %v23011_v12 }
0x13be   : > { %21993 = vmatprep.subr.bf16.mxu0 %v21992_v52  ;;  %v23021_v24 = vpop.permute.xlu1 %23020  ;;  %v23026_v30 = vpop.permute.xlu0 %23025 }
0x13bf   : > { %v22052_v17 = vpack.c.bf16 %v23013_v20, %v23012_v51  ;;  %v23023_v27 = vunpack.i.h.bf16 %v23021_v24  ;;  %v23027_v53 = vunpack.i.l.bf16 %v23026_v30 }
0x13c1   : > { %21995 = vmatpush3.bf16.msra.mxu0 %v21992_v52  ;;  %v23018_v52 = vunpack.i.h.bf16 %v23016_v63 }
0x13c2   : > { %21997 = vmatprep.subr.bf16.mxu0 %v21996_v59  ;;  %v23031_v21 = vpop.permute.xlu1 %23030  ;;  %v23036_v36 = vpop.permute.xlu0 %23035 }
0x13c3   : > { %v22056_v15 = vpack.c.bf16 %v23018_v52, %v23017_v57  ;;  %v23032_v54 = vunpack.i.l.bf16 %v23031_v21  ;;  %v23037_v19 = vunpack.i.l.bf16 %v23036_v36 }
0x13c5   : > { %21999 = vmatpush3.bf16.msra.mxu0 %v21996_v59  ;;  %v23022_v59 = vunpack.i.l.bf16 %v23021_v24 }
0x13c6   : > { %22001 = vmatprep.subr.bf16.mxu0 %v22000_v29  ;;  %v23041_v39 = vpop.permute.xlu1 %23040  ;;  %v23046_v50 = vpop.permute.xlu0 %23045 }
0x13c7   : > { %v22060_v26 = vpack.c.bf16 %v23023_v27, %v23022_v59  ;;  %v23043_v41 = vunpack.i.h.bf16 %v23041_v39  ;;  %v23047_v49 = vunpack.i.l.bf16 %v23046_v50 }
0x13c8   : > { %20910 = vmatmul.mubr.f32.vlgmr.msra.gmra.mrb[190].mxu0 %v17037_v25 }
0x13c9   : > { %22003 = vmatpush3.bf16.msra.mxu0 %v22000_v29  ;;  %20944 = vmatprep.mubr.f32.mxu0 %v17038_v28  ;;  %v23028_v29 = vunpack.i.h.bf16 %v23026_v30  ;;  %v23033_v28 = vunpack.i.h.bf16 %v23031_v21 }
0x13ca   : > { %22005 = vmatprep.subr.bf16.mxu0 %v22004_v1  ;;  %v23051_v7 = vpop.permute.xlu1 %23050  ;;  %v23056_v44 = vpop.permute.xlu0 %23055 }
0x13cb   : > { %v22064_v25 = vpack.c.bf16 %v23028_v29, %v23027_v53  ;;  %v22068_v35 = vpack.c.bf16 %v23033_v28, %v23032_v54  ;;  %v23053_v16 = vunpack.i.h.bf16 %v23051_v7  ;;  %v23057_v22 = vunpack.i.l.bf16 %v23056_v44  ;;  %v14440_v28 = vld [vmem:[%s23316_s19 + $0x8] sm:$0x3]  ;;  %v14439_v54 = vld [vmem:[%s23316_s19] sm:$0xff] }
0x13cd   : > { %22007 = vmatpush3.bf16.msra.mxu0 %v22004_v1  ;;  %v17041_v1 = vld [vmem:[%s23311_s12 + $0x58] sm:$0x3] }
0x13ce   : > { %22009 = vmatprep.subr.bf16.mxu0 %v22008_v13  ;;  %v23061_v10 = vpop.permute.xlu1 %23060  ;;  %v23066_v31 = vpop.permute.xlu0 %23065 }
0x13cf   : > { %v23063_v55 = vunpack.i.h.bf16 %v23061_v10  ;;  %v23067_v4 = vunpack.i.l.bf16 %v23066_v31 }
0x13d1   : > { %22011 = vmatpush3.bf16.msra.mxu0 %v22008_v13  ;;  %v23038_v13 = vunpack.i.h.bf16 %v23036_v36 }
0x13d2   : > { %22013 = vmatprep.subr.bf16.mxu0 %v22012_v46  ;;  %v23071_v58 = vpop.permute.xlu1 %23070  ;;  %v23076_v6 = vpop.permute.xlu0 %23075 }
0x13d3   : > { %v22072_v42 = vpack.c.bf16 %v23038_v13, %v23037_v19  ;;  %v23072_v34 = vunpack.i.l.bf16 %v23071_v58  ;;  %v23077_v2 = vunpack.i.l.bf16 %v23076_v6 }
0x13d5   : > { %22015 = vmatpush3.bf16.msra.mxu0 %v22012_v46  ;;  %v23042_v46 = vunpack.i.l.bf16 %v23041_v39 }
0x13d6   : > { %22017 = vmatprep.subr.bf16.mxu0 %v22016_v14  ;;  %v23081_v11 = vpop.permute.xlu1 %23080  ;;  %v23086_v12 = vpop.permute.xlu0 %23085 }
0x13d7   : > { %v22076_v37 = vpack.c.bf16 %v23043_v41, %v23042_v46  ;;  %v23083_v48 = vunpack.i.h.bf16 %v23081_v11  ;;  %v23087_v20 = vunpack.i.l.bf16 %v23086_v12 }
0x13d9   : > { %22019 = vmatpush3.bf16.msra.mxu0 %v22016_v14  ;;  %v23048_v14 = vunpack.i.h.bf16 %v23046_v50 }
0x13da   : > { %22021 = vmatprep.subr.bf16.mxu0 %v22020_v9  ;;  %v23091_v63 = vpop.permute.xlu1 %23090  ;;  %v23096_v24 = vpop.permute.xlu0 %23095 }
0x13db   : > { %v22080_v32 = vpack.c.bf16 %v23048_v14, %v23047_v49  ;;  %v23093_v57 = vunpack.i.h.bf16 %v23091_v63  ;;  %v23097_v27 = vunpack.i.l.bf16 %v23096_v24 }
0x13dd   : > { %22023 = vmatpush3.bf16.msra.mxu0 %v22020_v9  ;;  %v23052_v9 = vunpack.i.l.bf16 %v23051_v7 }
0x13de   : > { %22025 = vmatprep.subr.bf16.mxu0 %v22024_v38  ;;  %v23101_v30 = vpop.permute.xlu1 %23100 }
0x13df   : > { %v22084_v3 = vpack.c.bf16 %v23053_v16, %v23052_v9  ;;  %v23103_v53 = vunpack.i.h.bf16 %v23101_v30 }
0x13e1   : > { %22027 = vmatpush3.bf16.msra.mxu0 %v22024_v38  ;;  %v23058_v38 = vunpack.i.h.bf16 %v23056_v44 }
0x13e2   : > { %22029 = vmatprep.subr.bf16.mxu0 %v22028_v60 }
0x13e3   : > { %v22088_v33 = vpack.c.bf16 %v23058_v38, %v23057_v22 }
0x13e5   : > { %22031 = vmatpush3.bf16.msra.mxu0 %v22028_v60  ;;  %v23062_v60 = vunpack.i.l.bf16 %v23061_v10 }
0x13e6   : > { %22033 = vmatprep.subr.bf16.mxu0 %v22032_v47 }
0x13e7   : > { %v22092_v62 = vpack.c.bf16 %v23063_v55, %v23062_v60 }
0x13e8   : > { %20945 = vmatmul.mubr.f32.vlgmr.msra.gmra.mrb[190].mxu0 %v17039_v23 }
0x13e9   : > { %22035 = vmatpush3.bf16.msra.mxu0 %v22032_v47  ;;  %20979 = vmatprep.mubr.f32.mxu0 %v17040_v56  ;;  %v23068_v47 = vunpack.i.h.bf16 %v23066_v31  ;;  %v23073_v56 = vunpack.i.h.bf16 %v23071_v58 }
0x13ea   : > { %22037 = vmatprep.subr.bf16.mxu0 %v22036_v0 }
0x13eb   : > { %v22096_v23 = vpack.c.bf16 %v23068_v47, %v23067_v4  ;;  %v22100_v45 = vpack.c.bf16 %v23073_v56, %v23072_v34 }
0x13ed   : > { %22039 = vmatpush3.bf16.msra.mxu0 %v22036_v0  ;;  %v17043_v0 = vld [vmem:[%s23311_s12 + $0x68] sm:$0x3] }
0x13ee   : > { %22041 = vmatprep.subr.bf16.mxu0 %v22040_v18 }
0x13f1   : > { %22043 = vmatpush3.bf16.msra.mxu0 %v22040_v18  ;;  %v23078_v18 = vunpack.i.h.bf16 %v23076_v6 }
0x13f2   : > { %22045 = vmatprep.subr.bf16.mxu0 %v22044_v43 }
0x13f3   : > { %v22104_v8 = vpack.c.bf16 %v23078_v18, %v23077_v2 }
0x13f5   : > { %22047 = vmatpush3.bf16.msra.mxu0 %v22044_v43  ;;  %v23082_v43 = vunpack.i.l.bf16 %v23081_v11 }
0x13f6   : > { %22049 = vmatprep.subr.bf16.mxu0 %v22048_v40 }
0x13f7   : > { %v22108_v51 = vpack.c.bf16 %v23083_v48, %v23082_v43 }
0x13f9   : > { %22051 = vmatpush3.bf16.msra.mxu0 %v22048_v40  ;;  %v23088_v40 = vunpack.i.h.bf16 %v23086_v12 }
0x13fa   : > { %22053 = vmatprep.subr.bf16.mxu0 %v22052_v17 }
0x13fb   : > { %v22112_v52 = vpack.c.bf16 %v23088_v40, %v23087_v20 }
0x13fd   : > { %22055 = vmatpush3.bf16.msra.mxu0 %v22052_v17  ;;  %v23092_v17 = vunpack.i.l.bf16 %v23091_v63 }
0x13fe   : > { %22057 = vmatprep.subr.bf16.mxu0 %v22056_v15 }
0x13ff   : > { %v22116_v59 = vpack.c.bf16 %v23093_v57, %v23092_v17 }
0x1401   : > { %22059 = vmatpush3.bf16.msra.mxu0 %v22056_v15  ;;  %v23098_v15 = vunpack.i.h.bf16 %v23096_v24 }
0x1402   : > { %22061 = vmatprep.subr.bf16.mxu0 %v22060_v26 }
0x1403   : > { %v22120_v29 = vpack.c.bf16 %v23098_v15, %v23097_v27 }
0x1405   : > { %22063 = vmatpush3.bf16.msra.mxu0 %v22060_v26  ;;  %v23102_v26 = vunpack.i.l.bf16 %v23101_v30 }
0x1406   : > { %22065 = vmatprep.subr.bf16.mxu0 %v22064_v25 }
0x1407   : > { %v22124_v21 = vpack.c.bf16 %v23103_v53, %v23102_v26 }
0x1408   : > { %20980 = vmatmul.mubr.f32.vlgmr.msra.gmra.mrb[190].mxu0 %v17041_v1 }
0x1409   : > { %22067 = vmatpush3.bf16.msra.mxu0 %v22064_v25  ;;  %21014 = vmatprep.mubr.f32.mxu0 %v17042_v5  ;;  %v17045_v25 = vld [vmem:[%s23311_s12 + $0x78] sm:$0x3] }
0x140a   : > { %22069 = vmatprep.subr.bf16.mxu0 %v22068_v35 }
0x140d   : > { %22071 = vmatpush3.bf16.msra.mxu0 %v22068_v35 }
0x140e   : > { %22073 = vmatprep.subr.bf16.mxu0 %v22072_v42 }
0x1411   : > { %22075 = vmatpush3.bf16.msra.mxu0 %v22072_v42 }
0x1412   : > { %22077 = vmatprep.subr.bf16.mxu0 %v22076_v37 }
0x1415   : > { %22079 = vmatpush3.bf16.msra.mxu0 %v22076_v37 }
0x1416   : > { %22081 = vmatprep.subr.bf16.mxu0 %v22080_v32 }
0x1419   : > { %22083 = vmatpush3.bf16.msra.mxu0 %v22080_v32 }
0x141a   : > { %22085 = vmatprep.subr.bf16.mxu0 %v22084_v3 }
0x141d   : > { %22087 = vmatpush3.bf16.msra.mxu0 %v22084_v3 }
0x141e   : > { %22089 = vmatprep.subr.bf16.mxu0 %v22088_v33 }
0x1421   : > { %22091 = vmatpush3.bf16.msra.mxu0 %v22088_v33 }
0x1422   : > { %22093 = vmatprep.subr.bf16.mxu0 %v22092_v62 }
0x1425   : > { %22095 = vmatpush3.bf16.msra.mxu0 %v22092_v62 }
0x1426   : > { %22097 = vmatprep.subr.bf16.mxu0 %v22096_v23 }
0x1428   : > { %21015 = vmatmul.mubr.f32.vlgmr.msra.gmra.mrb[190].mxu0 %v17043_v0 }
0x1429   : > { %22099 = vmatpush3.bf16.msra.mxu0 %v22096_v23  ;;  %21049 = vmatprep.mubr.f32.mxu0 %v17044_v61 }
0x142a   : > { %22101 = vmatprep.subr.bf16.mxu0 %v22100_v45 }
0x142d   : > { %22103 = vmatpush3.bf16.msra.mxu0 %v22100_v45 }
0x142e   : > { %22105 = vmatprep.subr.bf16.mxu0 %v22104_v8 }
0x1431   : > { %22107 = vmatpush3.bf16.msra.mxu0 %v22104_v8 }
0x1432   : > { %22109 = vmatprep.subr.bf16.mxu0 %v22108_v51 }
0x1435   : > { %22111 = vmatpush3.bf16.msra.mxu0 %v22108_v51 }
0x1436   : > { %22113 = vmatprep.subr.bf16.mxu0 %v22112_v52 }
0x1439   : > { %22115 = vmatpush3.bf16.msra.mxu0 %v22112_v52 }
0x143a   : > { %22117 = vmatprep.subr.bf16.mxu0 %v22116_v59 }
0x143d   : > { %22119 = vmatpush3.bf16.msra.mxu0 %v22116_v59 }
0x143e   : > { %22121 = vmatprep.subr.bf16.mxu0 %v22120_v29 }
0x1441   : > { %22123 = vmatpush3.bf16.msra.mxu0 %v22120_v29 }
0x1442   : > { %22125 = vmatprep.subr.bf16.mxu0 %v22124_v21 }
0x1445   : > { %22127 = vmatpush3.bf16.msra.mxu0 %v22124_v21 }
0x1448   : > { %21050 = vmatmul.mubr.f32.vlgmr.msra.gmra.mrb[190].mxu0 %v17045_v25 }
0x151b   : > { %v21051_v36 = vpop.f32.mrb[190].mxu0 }
0x151c   : > { %v22178_v1 = vadd.f32 %v21051_v36, %v14440_v28  ;;  %v15421_v5 = vpop.f32.mrb[191].mxu0 }
0x151d   : > { %v22179_v13 = vadd.f32 %v15421_v5, %v14439_v54 }
0x151e   : > { %15433 = vst.msk [vmem:[%s1027_s2 + $0x8] sm:$0x3] %vm12522_vm7, %v22178_v1 }
0x151f   : > { %15432 = vst.msk [vmem:[%s1027_s2] sm:$0xff] %vm12520_vm8, %v22179_v13 }
0x1520 PF: > { %s78_s7 = sadd.s32 1, %s23110_s7  }
0x1521   : > { %p75_p4 = scmp.ge.s32.totalorder %s78_s7, 4  }
0x1523   :  { %77 = sbr.rel (!%p75_p4) target bundleno = 52 (0x34), region = 273 }

</bundles_post_ra>
